<compile_context>
chip_gen: v7x
topology: tpu7x:2x2x1
jax: 0.10.0
libtpu: 0.0.40
codegen_flags: <defaults>
</compile_context>

<pallas_src>
import math

import jax
import jax.numpy as jnp
from jax.experimental import pallas as pl
from jax.experimental.pallas import tpu as pltpu


def make_fbm_kernel(H, W):
    HW = H * W

    def fbm_kernel(x_ref,
                   rb_w1_ref, rb_b1_ref, rb_w2_ref, rb_b2_ref,
                   se_waT_ref, se_ba_ref, se_wb_ref, se_bb_ref,
                   o_ref):
        """One (batch*view) element per grid step.

        x_ref:     (1, C, HW)        lane-dense activation tile (HW multiple of 128)
        rb_w*_ref: (nb, C, 9*C)      conv weights packed as (C_out, ky*3*C + kx*C + ci)
        rb_b*_ref: (nb, C, 1)        conv biases
        se_waT_ref:(nb, C, Cg)       SE squeeze weights, transposed (C_in rows, Cg cols)
        se_ba_ref: (nb, 1, Cg)       SE squeeze bias (row)
        se_wb_ref: (nb, C, Cg)       SE excite weights (C_out rows, Cg cols)
        se_bb_ref: (nb, C, 1)        SE excite bias (column)
        o_ref:     (1, C, HW)        output tile
        """
        C = x_ref.shape[1]
        nb = rb_w1_ref.shape[0]
        x = x_ref[0].astype(jnp.float32)                      # (C, HW)

        # Flattened-pixel coordinates; computed once, shared by all 8 convs.
        p_idx = jax.lax.broadcasted_iota(jnp.int32, (C, HW), 1)
        w_idx = p_idx % W

        # Per-tap (lane-roll amount, boundary mask) for the 3x3 stencil.
        taps_meta = []
        for ky in range(3):
            dy = ky - 1
            for kx in range(3):
                dx = kx - 1
                # result[p] = x[p + dy*W + dx]  (wrap-around positions masked to 0)
                shift = (-(dy * W + dx)) % HW
                conds = []
                if dy < 0:
                    conds.append(p_idx >= (-dy) * W)          # h + dy >= 0
                if dy > 0:
                    conds.append(p_idx < (H - dy) * W)        # h + dy <  H
                if dx < 0:
                    conds.append(w_idx >= -dx)                # w + dx >= 0
                if dx > 0:
                    conds.append(w_idx < W - dx)              # w + dx <  W
                valid = None
                for cnd in conds:
                    valid = cnd if valid is None else (valid & cnd)
                taps_meta.append((shift, valid))

        def conv3x3(inp, w_mat, b_col):
            # Build the (9*C, HW) "im2col" block from XLU lane rolls + masks,
            # then one fused MXU matmul with K = 9*C.
            taps = []
            for shift, valid in taps_meta:
                t = pltpu.roll(inp, shift, 1) if shift else inp
                if valid is not None:
                    t = jnp.where(valid, t, 0.0)
                taps.append(t)
            stacked = jnp.concatenate(taps, axis=0)           # (9*C, HW)
            y = jnp.dot(w_mat, stacked, preferred_element_type=jnp.float32)
            return y + b_col                                  # (C, HW) + (C, 1)

        inv_hw = jnp.float32(1.0 / HW)
        fm = x
        for i in range(nb):
            # ---- RB: conv3x3 -> LeakyReLU(0.1) -> conv3x3 -> residual add ----
            y = conv3x3(fm, rb_w1_ref[i], rb_b1_ref[i])
            y = jnp.where(y > 0.0, y, 0.1 * y)
            z = conv3x3(y, rb_w2_ref[i], rb_b2_ref[i])
            fm = z + fm                                       # (C, HW)

            # ---- SELayer: channel attention ----
            pool_avg = jnp.sum(fm, axis=1, keepdims=True) * inv_hw   # (C, 1)
            pool_max = jnp.max(fm, axis=1, keepdims=True)            # (C, 1)
            add = pool_avg + pool_max                                # (C, 1)
            # squeeze 1x1 conv: hid[g] = sum_c waT[c,g]*add[c] + ba[g]
            hid = jnp.sum(se_waT_ref[i] * add, axis=0, keepdims=True) + se_ba_ref[i]
            hid = jnp.maximum(hid, 0.0)                              # (1, Cg)
            # excite 1x1 conv: att[c] = sum_g wb[c,g]*hid[g] + bb[c]
            att_lin = jnp.sum(se_wb_ref[i] * hid, axis=1, keepdims=True) + se_bb_ref[i]
            att = 1.0 / (1.0 + jnp.exp(-att_lin))                    # sigmoid, (C, 1)
            fm = fm * att

        o_ref[0] = fm.astype(o_ref.dtype)

    return fbm_kernel


@jax.jit
def fbm_forward(x_bnchw, rb_w1, rb_b1, rb_w2, rb_b2, se_wa, se_ba, se_wb, se_bb):
    """Matches the PyTorch FBM interface.

    x_bnchw: (b, n, C, H, W) activations (NCHW per view)
    rb_w*:   (nb, C, C, 3, 3)   OIHW conv weights, rb_b*: (nb, C)
    se_wa:   (nb, Cg, C, 1, 1)  1x1 conv OIHW,      se_ba: (nb, Cg)
    se_wb:   (nb, C, Cg, 1, 1)  1x1 conv OIHW,      se_bb: (nb, C)
    """
    b, n, C, H, W = x_bnchw.shape
    HW = H * W
    N = b * n
    nb = rb_w1.shape[0]
    Cg = se_wa.shape[1]

    # Activations: pure reshape only (contiguity-preserving, no transpose).
    x_flat = x_bnchw.reshape(N, C, HW)

    # Weights: tiny one-time pre-pack (in a real model this happens at init).
    w1m = jnp.transpose(rb_w1, (0, 1, 3, 4, 2)).reshape(nb, C, 9 * C)
    w2m = jnp.transpose(rb_w2, (0, 1, 3, 4, 2)).reshape(nb, C, 9 * C)
    b1c = rb_b1.reshape(nb, C, 1)
    b2c = rb_b2.reshape(nb, C, 1)
    waT = jnp.transpose(se_wa.reshape(nb, Cg, C), (0, 2, 1))   # (nb, C, Cg)
    bar = se_ba.reshape(nb, 1, Cg)
    wbm = se_wb.reshape(nb, C, Cg)
    bbc = se_bb.reshape(nb, C, 1)

    out = pl.pallas_call(
        make_fbm_kernel(H, W),
        out_shape=jax.ShapeDtypeStruct((N, C, HW), x_bnchw.dtype),
        grid=(N,),
        in_specs=[
            pl.BlockSpec((1, C, HW), lambda i: (i, 0, 0)),
            pl.BlockSpec((nb, C, 9 * C), lambda i: (0, 0, 0)),
            pl.BlockSpec((nb, C, 1), lambda i: (0, 0, 0)),
            pl.BlockSpec((nb, C, 9 * C), lambda i: (0, 0, 0)),
            pl.BlockSpec((nb, C, 1), lambda i: (0, 0, 0)),
            pl.BlockSpec((nb, C, Cg), lambda i: (0, 0, 0)),
            pl.BlockSpec((nb, 1, Cg), lambda i: (0, 0, 0)),
            pl.BlockSpec((nb, C, Cg), lambda i: (0, 0, 0)),
            pl.BlockSpec((nb, C, 1), lambda i: (0, 0, 0)),
        ],
        out_specs=pl.BlockSpec((1, C, HW), lambda i: (i, 0, 0)),
        compiler_params=pltpu.CompilerParams(
            dimension_semantics=("parallel",)
        ),
    )(x_flat, w1m, b1c, w2m, b2c, waT, bar, wbm, bbc)
    return out.reshape(b, n, C, H, W)


def ref_fbm(x, rb_w1, rb_b1, rb_w2, rb_b2, se_wa, se_ba, se_wb, se_bb):
    """Pure-JAX reference (lax conv) of FBM: 4x (RB -> SELayer)."""
    b, n, C, H, W = x.shape
    nb = rb_w1.shape[0]
    Cg = se_wa.shape[1]
    fm = x.reshape(b * n, C, H, W)
    dn = ("NCHW", "OIHW", "NCHW")
    for i in range(nb):
        y = jax.lax.conv_general_dilated(fm, rb_w1[i], (1, 1), "SAME",
                                         dimension_numbers=dn)
        y = y + rb_b1[i].reshape(1, -1, 1, 1)
        y = jnp.where(y > 0.0, y, 0.1 * y)
        z = jax.lax.conv_general_dilated(y, rb_w2[i], (1, 1), "SAME",
                                         dimension_numbers=dn)
        z = z + rb_b2[i].reshape(1, -1, 1, 1)
        fm = z + fm
        # SELayer
        pool_avg = jnp.mean(fm, axis=(2, 3), keepdims=True)
        pool_max = jnp.max(fm, axis=(2, 3), keepdims=True)
        add = pool_avg + pool_max                                   # (BN, C, 1, 1)
        hid = jnp.einsum('oc,bchw->bohw', se_wa[i].reshape(Cg, C), add)
        hid = hid + se_ba[i].reshape(1, -1, 1, 1)
        hid = jnp.maximum(hid, 0.0)
        att = jnp.einsum('oc,bchw->bohw', se_wb[i].reshape(C, Cg), hid)
        att = att + se_bb[i].reshape(1, -1, 1, 1)
        att = jax.nn.sigmoid(att)
        fm = fm * att
    return fm.reshape(b, n, C, H, W)


if __name__ == "__main__":
    # Small FBM instance: b=2 batches, n=4 views, channel=32, 16x16 spatial.
    b, n, C, H, W = 2, 4, 32, 16, 16
    n_blocks, g = 4, 16
    Cg = C // g

    key = jax.random.PRNGKey(0)
    keys = jax.random.split(key, 9)

    # Deterministic PyTorch-style uniform init.
    bound3 = 1.0 / math.sqrt(9 * C)
    rb_w1 = jax.random.uniform(keys[0], (n_blocks, C, C, 3, 3), jnp.float32, -bound3, bound3)
    rb_b1 = jax.random.uniform(keys[1], (n_blocks, C), jnp.float32, -bound3, bound3)
    rb_w2 = jax.random.uniform(keys[2], (n_blocks, C, C, 3, 3), jnp.float32, -bound3, bound3)
    rb_b2 = jax.random.uniform(keys[3], (n_blocks, C), jnp.float32, -bound3, bound3)
    bound1a = 1.0 / math.sqrt(C)
    se_wa = jax.random.uniform(keys[4], (n_blocks, Cg, C, 1, 1), jnp.float32, -bound1a, bound1a)
    se_ba = jax.random.uniform(keys[5], (n_blocks, Cg), jnp.float32, -bound1a, bound1a)
    bound1b = 1.0 / math.sqrt(Cg)
    se_wb = jax.random.uniform(keys[6], (n_blocks, C, Cg, 1, 1), jnp.float32, -bound1b, bound1b)
    se_bb = jax.random.uniform(keys[7], (n_blocks, C), jnp.float32, -bound1b, bound1b)

    # Module input in PyTorch convention: (b, n, c, h, w).
    x = jax.random.normal(keys[8], (b, n, C, H, W), jnp.float32)

    out = fbm_forward(x, rb_w1, rb_b1, rb_w2, rb_b2, se_wa, se_ba, se_wb, se_bb)
    out = jax.block_until_ready(out)

    ref = ref_fbm(x, rb_w1, rb_b1, rb_w2, rb_b2, se_wa, se_ba, se_wb, se_bb)
    assert out.shape == x.shape
    max_err = jnp.max(jnp.abs(out - ref))
    assert jnp.allclose(out, ref, atol=5e-3, rtol=5e-3), (
        f"mismatch vs reference (max abs err {max_err})"
    )

    print("KERNEL_OK")
</pallas_src>

<mosaic_0001>
module attributes {stable_mosaic.version = 11 : i64} {
  func.func @fbm_kernel(%arg0: i32, %arg1: memref<1x32x256xf32, #tpu.memory_space<vmem>>, %arg2: memref<4x32x288xf32, #tpu.memory_space<vmem>>, %arg3: memref<4x32x1xf32, #tpu.memory_space<vmem>>, %arg4: memref<4x32x288xf32, #tpu.memory_space<vmem>>, %arg5: memref<4x32x1xf32, #tpu.memory_space<vmem>>, %arg6: memref<4x32x2xf32, #tpu.memory_space<vmem>>, %arg7: memref<4x1x2xf32, #tpu.memory_space<vmem>>, %arg8: memref<4x32x2xf32, #tpu.memory_space<vmem>>, %arg9: memref<4x32x1xf32, #tpu.memory_space<vmem>>, %arg10: memref<1x32x256xf32, #tpu.memory_space<vmem>>) attributes {dimension_semantics = [#tpu.dimension_semantics<parallel>], iteration_bounds = array<i64: 8>, scalar_prefetch = 0 : i64, scratch_operands = 0 : i64, tpu.core_type = #tpu.core_type<tc>, window_params = [{transform_indices = @transform_0, window_bounds = array<i64: 1, 32, 256>}, {pipeline_mode = #tpu.pipeline_mode<synchronous>, transform_indices = @transform_1, window_bounds = array<i64: 4, 32, 288>}, {pipeline_mode = #tpu.pipeline_mode<synchronous>, transform_indices = @transform_2, window_bounds = array<i64: 4, 32, 1>}, {pipeline_mode = #tpu.pipeline_mode<synchronous>, transform_indices = @transform_3, window_bounds = array<i64: 4, 32, 288>}, {pipeline_mode = #tpu.pipeline_mode<synchronous>, transform_indices = @transform_4, window_bounds = array<i64: 4, 32, 1>}, {pipeline_mode = #tpu.pipeline_mode<synchronous>, transform_indices = @transform_5, window_bounds = array<i64: 4, 32, 2>}, {pipeline_mode = #tpu.pipeline_mode<synchronous>, transform_indices = @transform_6, window_bounds = array<i64: 4, 1, 2>}, {pipeline_mode = #tpu.pipeline_mode<synchronous>, transform_indices = @transform_7, window_bounds = array<i64: 4, 32, 2>}, {pipeline_mode = #tpu.pipeline_mode<synchronous>, transform_indices = @transform_8, window_bounds = array<i64: 4, 32, 1>}, {transform_indices = @transform_9, window_bounds = array<i64: 1, 32, 256>}]} {
    %c0 = arith.constant 0 : index
    %c0_0 = arith.constant 0 : index
    %c0_1 = arith.constant 0 : index
    %0 = vector.load %arg1[%c0, %c0_0, %c0_1] : memref<1x32x256xf32, #tpu.memory_space<vmem>>, vector<1x32x256xf32>
    %1 = vector.shape_cast %0 : vector<1x32x256xf32> to vector<32x256xf32>
    %2 = tpu.iota {dimensions = array<i32: 1>} : vector<32x256xi32>
    %c16_i32 = arith.constant 16 : i32
    %c0_i32 = arith.constant 0 : i32
    %3 = arith.cmpi eq, %c16_i32, %c0_i32 : i32
    %c1_i32 = arith.constant 1 : i32
    %4 = arith.select %3, %c1_i32, %c16_i32 : i32
    %5 = vector.broadcast %4 : i32 to vector<32x256xi32>
    %6 = arith.remsi %2, %5 : vector<32x256xi32>
    %c0_i32_2 = arith.constant 0 : i32
    %7 = vector.broadcast %c0_i32_2 : i32 to vector<32x256xi32>
    %8 = arith.cmpi ne, %6, %7 : vector<32x256xi32>
    %c0_i32_3 = arith.constant 0 : i32
    %9 = vector.broadcast %c0_i32_3 : i32 to vector<32x256xi32>
    %10 = arith.cmpi slt, %6, %9 : vector<32x256xi32>
    %c0_i32_4 = arith.constant 0 : i32
    %11 = arith.cmpi slt, %4, %c0_i32_4 : i32
    %12 = vector.broadcast %11 : i1 to vector<32x256xi1>
    %13 = vector.broadcast %12 : vector<32x256xi1> to vector<32x256xi1>
    %14 = arith.xori %10, %13 : vector<32x256xi1>
    %15 = arith.andi %14, %8 : vector<32x256xi1>
    %16 = vector.broadcast %4 : i32 to vector<32x256xi32>
    %17 = arith.addi %6, %16 : vector<32x256xi32>
    %18 = arith.select %15, %17, %6 : vector<32x256xi1>, vector<32x256xi32>
    %c16_i32_5 = arith.constant 16 : i32
    %19 = vector.broadcast %c16_i32_5 : i32 to vector<32x256xi32>
    %20 = arith.cmpi sge, %2, %19 : vector<32x256xi32>
    %c1_i32_6 = arith.constant 1 : i32
    %21 = vector.broadcast %c1_i32_6 : i32 to vector<32x256xi32>
    %22 = arith.cmpi sge, %18, %21 : vector<32x256xi32>
    %23 = arith.andi %20, %22 : vector<32x256xi1>
    %c16_i32_7 = arith.constant 16 : i32
    %24 = vector.broadcast %c16_i32_7 : i32 to vector<32x256xi32>
    %25 = arith.cmpi sge, %2, %24 : vector<32x256xi32>
    %c16_i32_8 = arith.constant 16 : i32
    %26 = vector.broadcast %c16_i32_8 : i32 to vector<32x256xi32>
    %27 = arith.cmpi sge, %2, %26 : vector<32x256xi32>
    %c15_i32 = arith.constant 15 : i32
    %28 = vector.broadcast %c15_i32 : i32 to vector<32x256xi32>
    %29 = arith.cmpi slt, %18, %28 : vector<32x256xi32>
    %30 = arith.andi %27, %29 : vector<32x256xi1>
    %c1_i32_9 = arith.constant 1 : i32
    %31 = vector.broadcast %c1_i32_9 : i32 to vector<32x256xi32>
    %32 = arith.cmpi sge, %18, %31 : vector<32x256xi32>
    %c15_i32_10 = arith.constant 15 : i32
    %33 = vector.broadcast %c15_i32_10 : i32 to vector<32x256xi32>
    %34 = arith.cmpi slt, %18, %33 : vector<32x256xi32>
    %c240_i32 = arith.constant 240 : i32
    %35 = vector.broadcast %c240_i32 : i32 to vector<32x256xi32>
    %36 = arith.cmpi slt, %2, %35 : vector<32x256xi32>
    %c1_i32_11 = arith.constant 1 : i32
    %37 = vector.broadcast %c1_i32_11 : i32 to vector<32x256xi32>
    %38 = arith.cmpi sge, %18, %37 : vector<32x256xi32>
    %39 = arith.andi %36, %38 : vector<32x256xi1>
    %c240_i32_12 = arith.constant 240 : i32
    %40 = vector.broadcast %c240_i32_12 : i32 to vector<32x256xi32>
    %41 = arith.cmpi slt, %2, %40 : vector<32x256xi32>
    %c240_i32_13 = arith.constant 240 : i32
    %42 = vector.broadcast %c240_i32_13 : i32 to vector<32x256xi32>
    %43 = arith.cmpi slt, %2, %42 : vector<32x256xi32>
    %c15_i32_14 = arith.constant 15 : i32
    %44 = vector.broadcast %c15_i32_14 : i32 to vector<32x256xi32>
    %45 = arith.cmpi slt, %18, %44 : vector<32x256xi32>
    %46 = arith.andi %43, %45 : vector<32x256xi1>
    %c0_15 = arith.constant 0 : index
    %c0_16 = arith.constant 0 : index
    %c0_17 = arith.constant 0 : index
    %47 = vector.load %arg2[%c0_15, %c0_16, %c0_17] : memref<4x32x288xf32, #tpu.memory_space<vmem>>, vector<1x32x288xf32>
    %48 = vector.shape_cast %47 : vector<1x32x288xf32> to vector<32x288xf32>
    %c0_18 = arith.constant 0 : index
    %c0_19 = arith.constant 0 : index
    %c0_20 = arith.constant 0 : index
    %49 = vector.load %arg3[%c0_18, %c0_19, %c0_20] : memref<4x32x1xf32, #tpu.memory_space<vmem>>, vector<1x32x1xf32>
    %50 = vector.shape_cast %49 : vector<1x32x1xf32> to vector<32x1xf32>
    %c17_i32 = arith.constant 17 : i32
    %51 = tpu.dynamic_rotate %1 by %c17_i32 dim 1 : vector<32x256xf32>, i32 -> vector<32x256xf32>
    %cst = arith.constant 0.000000e+00 : f32
    %52 = vector.broadcast %cst : f32 to vector<32x256xf32>
    %53 = arith.select %23, %51, %52 : vector<32x256xi1>, vector<32x256xf32>
    %c16_i32_21 = arith.constant 16 : i32
    %54 = tpu.dynamic_rotate %1 by %c16_i32_21 dim 1 : vector<32x256xf32>, i32 -> vector<32x256xf32>
    %cst_22 = arith.constant 0.000000e+00 : f32
    %55 = vector.broadcast %cst_22 : f32 to vector<32x256xf32>
    %56 = arith.select %25, %54, %55 : vector<32x256xi1>, vector<32x256xf32>
    %c15_i32_23 = arith.constant 15 : i32
    %57 = tpu.dynamic_rotate %1 by %c15_i32_23 dim 1 : vector<32x256xf32>, i32 -> vector<32x256xf32>
    %cst_24 = arith.constant 0.000000e+00 : f32
    %58 = vector.broadcast %cst_24 : f32 to vector<32x256xf32>
    %59 = arith.select %30, %57, %58 : vector<32x256xi1>, vector<32x256xf32>
    %c1_i32_25 = arith.constant 1 : i32
    %60 = tpu.dynamic_rotate %1 by %c1_i32_25 dim 1 : vector<32x256xf32>, i32 -> vector<32x256xf32>
    %cst_26 = arith.constant 0.000000e+00 : f32
    %61 = vector.broadcast %cst_26 : f32 to vector<32x256xf32>
    %62 = arith.select %32, %60, %61 : vector<32x256xi1>, vector<32x256xf32>
    %c255_i32 = arith.constant 255 : i32
    %63 = tpu.dynamic_rotate %1 by %c255_i32 dim 1 : vector<32x256xf32>, i32 -> vector<32x256xf32>
    %cst_27 = arith.constant 0.000000e+00 : f32
    %64 = vector.broadcast %cst_27 : f32 to vector<32x256xf32>
    %65 = arith.select %34, %63, %64 : vector<32x256xi1>, vector<32x256xf32>
    %c241_i32 = arith.constant 241 : i32
    %66 = tpu.dynamic_rotate %1 by %c241_i32 dim 1 : vector<32x256xf32>, i32 -> vector<32x256xf32>
    %cst_28 = arith.constant 0.000000e+00 : f32
    %67 = vector.broadcast %cst_28 : f32 to vector<32x256xf32>
    %68 = arith.select %39, %66, %67 : vector<32x256xi1>, vector<32x256xf32>
    %c240_i32_29 = arith.constant 240 : i32
    %69 = tpu.dynamic_rotate %1 by %c240_i32_29 dim 1 : vector<32x256xf32>, i32 -> vector<32x256xf32>
    %cst_30 = arith.constant 0.000000e+00 : f32
    %70 = vector.broadcast %cst_30 : f32 to vector<32x256xf32>
    %71 = arith.select %41, %69, %70 : vector<32x256xi1>, vector<32x256xf32>
    %c239_i32 = arith.constant 239 : i32
    %72 = tpu.dynamic_rotate %1 by %c239_i32 dim 1 : vector<32x256xf32>, i32 -> vector<32x256xf32>
    %cst_31 = arith.constant 0.000000e+00 : f32
    %73 = vector.broadcast %cst_31 : f32 to vector<32x256xf32>
    %74 = arith.select %46, %72, %73 : vector<32x256xi1>, vector<32x256xf32>
    %75 = tpu.concatenate %53, %56, %59, %62, %1, %65, %68, %71, %74 in 0 : vector<32x256xf32>, vector<32x256xf32>, vector<32x256xf32>, vector<32x256xf32>, vector<32x256xf32>, vector<32x256xf32>, vector<32x256xf32>, vector<32x256xf32>, vector<32x256xf32> -> vector<288x256xf32>
    %cst_32 = arith.constant dense<0.000000e+00> : vector<32x256xf32>
    %76 = tpu.matmul %48, %75, %cst_32 {dimension_numbers = #tpu.dot_dimension_numbers<[1], [0], [0], [1], [0, 0, 1, 1], [], []>} : vector<32x288xf32>, vector<288x256xf32>, vector<32x256xf32> -> vector<32x256xf32>
    %77 = vector.broadcast %50 : vector<32x1xf32> to vector<32x256xf32>
    %78 = arith.addf %76, %77 : vector<32x256xf32>
    %cst_33 = arith.constant 0.000000e+00 : f32
    %79 = vector.broadcast %cst_33 : f32 to vector<32x256xf32>
    %80 = arith.cmpf ogt, %78, %79 : vector<32x256xf32>
    %cst_34 = arith.constant 1.000000e-01 : f32
    %81 = vector.broadcast %cst_34 : f32 to vector<32x256xf32>
    %82 = arith.mulf %81, %78 : vector<32x256xf32>
    %83 = arith.select %80, %78, %82 : vector<32x256xi1>, vector<32x256xf32>
    %c0_35 = arith.constant 0 : index
    %c0_36 = arith.constant 0 : index
    %c0_37 = arith.constant 0 : index
    %84 = vector.load %arg4[%c0_35, %c0_36, %c0_37] : memref<4x32x288xf32, #tpu.memory_space<vmem>>, vector<1x32x288xf32>
    %85 = vector.shape_cast %84 : vector<1x32x288xf32> to vector<32x288xf32>
    %c0_38 = arith.constant 0 : index
    %c0_39 = arith.constant 0 : index
    %c0_40 = arith.constant 0 : index
    %86 = vector.load %arg5[%c0_38, %c0_39, %c0_40] : memref<4x32x1xf32, #tpu.memory_space<vmem>>, vector<1x32x1xf32>
    %87 = vector.shape_cast %86 : vector<1x32x1xf32> to vector<32x1xf32>
    %c17_i32_41 = arith.constant 17 : i32
    %88 = tpu.dynamic_rotate %83 by %c17_i32_41 dim 1 : vector<32x256xf32>, i32 -> vector<32x256xf32>
    %cst_42 = arith.constant 0.000000e+00 : f32
    %89 = vector.broadcast %cst_42 : f32 to vector<32x256xf32>
    %90 = arith.select %23, %88, %89 : vector<32x256xi1>, vector<32x256xf32>
    %c16_i32_43 = arith.constant 16 : i32
    %91 = tpu.dynamic_rotate %83 by %c16_i32_43 dim 1 : vector<32x256xf32>, i32 -> vector<32x256xf32>
    %cst_44 = arith.constant 0.000000e+00 : f32
    %92 = vector.broadcast %cst_44 : f32 to vector<32x256xf32>
    %93 = arith.select %25, %91, %92 : vector<32x256xi1>, vector<32x256xf32>
    %c15_i32_45 = arith.constant 15 : i32
    %94 = tpu.dynamic_rotate %83 by %c15_i32_45 dim 1 : vector<32x256xf32>, i32 -> vector<32x256xf32>
    %cst_46 = arith.constant 0.000000e+00 : f32
    %95 = vector.broadcast %cst_46 : f32 to vector<32x256xf32>
    %96 = arith.select %30, %94, %95 : vector<32x256xi1>, vector<32x256xf32>
    %c1_i32_47 = arith.constant 1 : i32
    %97 = tpu.dynamic_rotate %83 by %c1_i32_47 dim 1 : vector<32x256xf32>, i32 -> vector<32x256xf32>
    %cst_48 = arith.constant 0.000000e+00 : f32
    %98 = vector.broadcast %cst_48 : f32 to vector<32x256xf32>
    %99 = arith.select %32, %97, %98 : vector<32x256xi1>, vector<32x256xf32>
    %c255_i32_49 = arith.constant 255 : i32
    %100 = tpu.dynamic_rotate %83 by %c255_i32_49 dim 1 : vector<32x256xf32>, i32 -> vector<32x256xf32>
    %cst_50 = arith.constant 0.000000e+00 : f32
    %101 = vector.broadcast %cst_50 : f32 to vector<32x256xf32>
    %102 = arith.select %34, %100, %101 : vector<32x256xi1>, vector<32x256xf32>
    %c241_i32_51 = arith.constant 241 : i32
    %103 = tpu.dynamic_rotate %83 by %c241_i32_51 dim 1 : vector<32x256xf32>, i32 -> vector<32x256xf32>
    %cst_52 = arith.constant 0.000000e+00 : f32
    %104 = vector.broadcast %cst_52 : f32 to vector<32x256xf32>
    %105 = arith.select %39, %103, %104 : vector<32x256xi1>, vector<32x256xf32>
    %c240_i32_53 = arith.constant 240 : i32
    %106 = tpu.dynamic_rotate %83 by %c240_i32_53 dim 1 : vector<32x256xf32>, i32 -> vector<32x256xf32>
    %cst_54 = arith.constant 0.000000e+00 : f32
    %107 = vector.broadcast %cst_54 : f32 to vector<32x256xf32>
    %108 = arith.select %41, %106, %107 : vector<32x256xi1>, vector<32x256xf32>
    %c239_i32_55 = arith.constant 239 : i32
    %109 = tpu.dynamic_rotate %83 by %c239_i32_55 dim 1 : vector<32x256xf32>, i32 -> vector<32x256xf32>
    %cst_56 = arith.constant 0.000000e+00 : f32
    %110 = vector.broadcast %cst_56 : f32 to vector<32x256xf32>
    %111 = arith.select %46, %109, %110 : vector<32x256xi1>, vector<32x256xf32>
    %112 = tpu.concatenate %90, %93, %96, %99, %83, %102, %105, %108, %111 in 0 : vector<32x256xf32>, vector<32x256xf32>, vector<32x256xf32>, vector<32x256xf32>, vector<32x256xf32>, vector<32x256xf32>, vector<32x256xf32>, vector<32x256xf32>, vector<32x256xf32> -> vector<288x256xf32>
    %cst_57 = arith.constant dense<0.000000e+00> : vector<32x256xf32>
    %113 = tpu.matmul %85, %112, %cst_57 {dimension_numbers = #tpu.dot_dimension_numbers<[1], [0], [0], [1], [0, 0, 1, 1], [], []>} : vector<32x288xf32>, vector<288x256xf32>, vector<32x256xf32> -> vector<32x256xf32>
    %114 = vector.broadcast %87 : vector<32x1xf32> to vector<32x256xf32>
    %115 = arith.addf %113, %114 : vector<32x256xf32>
    %116 = arith.addf %115, %1 : vector<32x256xf32>
    %cst_58 = arith.constant dense<0.000000e+00> : vector<32xf32>
    %117 = vector.multi_reduction <add>, %116, %cst_58 [1] : vector<32x256xf32> to vector<32xf32>
    %118 = vector.shape_cast %117 : vector<32xf32> to vector<32x1xf32>
    %cst_59 = arith.constant 3.906250e-03 : f32
    %119 = vector.broadcast %cst_59 : f32 to vector<32x1xf32>
    %120 = arith.mulf %118, %119 : vector<32x1xf32>
    %cst_60 = arith.constant dense<0xFF800000> : vector<32xf32>
    %121 = vector.multi_reduction <maximumf>, %116, %cst_60 [1] : vector<32x256xf32> to vector<32xf32>
    %122 = vector.shape_cast %121 : vector<32xf32> to vector<32x1xf32>
    %123 = arith.addf %120, %122 : vector<32x1xf32>
    %c0_61 = arith.constant 0 : index
    %c0_62 = arith.constant 0 : index
    %c0_63 = arith.constant 0 : index
    %124 = vector.load %arg6[%c0_61, %c0_62, %c0_63] : memref<4x32x2xf32, #tpu.memory_space<vmem>>, vector<1x32x2xf32>
    %125 = vector.shape_cast %124 : vector<1x32x2xf32> to vector<32x2xf32>
    %126 = vector.broadcast %123 : vector<32x1xf32> to vector<32x2xf32>
    %127 = arith.mulf %125, %126 : vector<32x2xf32>
    %cst_64 = arith.constant dense<0.000000e+00> : vector<2xf32>
    %128 = vector.multi_reduction <add>, %127, %cst_64 [0] : vector<32x2xf32> to vector<2xf32>
    %129 = vector.shape_cast %128 : vector<2xf32> to vector<1x2xf32>
    %c0_65 = arith.constant 0 : index
    %c0_66 = arith.constant 0 : index
    %c0_67 = arith.constant 0 : index
    %130 = vector.load %arg7[%c0_65, %c0_66, %c0_67] : memref<4x1x2xf32, #tpu.memory_space<vmem>>, vector<1x1x2xf32>
    %131 = vector.shape_cast %130 : vector<1x1x2xf32> to vector<1x2xf32>
    %132 = arith.addf %129, %131 : vector<1x2xf32>
    %cst_68 = arith.constant 0.000000e+00 : f32
    %133 = vector.broadcast %cst_68 : f32 to vector<1x2xf32>
    %134 = arith.maximumf %132, %133 : vector<1x2xf32>
    %c0_69 = arith.constant 0 : index
    %c0_70 = arith.constant 0 : index
    %c0_71 = arith.constant 0 : index
    %135 = vector.load %arg8[%c0_69, %c0_70, %c0_71] : memref<4x32x2xf32, #tpu.memory_space<vmem>>, vector<1x32x2xf32>
    %136 = vector.shape_cast %135 : vector<1x32x2xf32> to vector<32x2xf32>
    %137 = vector.broadcast %134 : vector<1x2xf32> to vector<32x2xf32>
    %138 = arith.mulf %136, %137 : vector<32x2xf32>
    %cst_72 = arith.constant dense<0.000000e+00> : vector<32xf32>
    %139 = vector.multi_reduction <add>, %138, %cst_72 [1] : vector<32x2xf32> to vector<32xf32>
    %140 = vector.shape_cast %139 : vector<32xf32> to vector<32x1xf32>
    %c0_73 = arith.constant 0 : index
    %c0_74 = arith.constant 0 : index
    %c0_75 = arith.constant 0 : index
    %141 = vector.load %arg9[%c0_73, %c0_74, %c0_75] : memref<4x32x1xf32, #tpu.memory_space<vmem>>, vector<1x32x1xf32>
    %142 = vector.shape_cast %141 : vector<1x32x1xf32> to vector<32x1xf32>
    %143 = arith.addf %140, %142 : vector<32x1xf32>
    %cst_76 = arith.constant 0.000000e+00 : f32
    %144 = vector.broadcast %cst_76 : f32 to vector<32x1xf32>
    %145 = arith.subf %144, %143 : vector<32x1xf32>
    %146 = math.exp %145 : vector<32x1xf32>
    %cst_77 = arith.constant 1.000000e+00 : f32
    %147 = vector.broadcast %cst_77 : f32 to vector<32x1xf32>
    %148 = arith.addf %147, %146 : vector<32x1xf32>
    %cst_78 = arith.constant 1.000000e+00 : f32
    %149 = vector.broadcast %cst_78 : f32 to vector<32x1xf32>
    %150 = arith.divf %149, %148 : vector<32x1xf32>
    %151 = vector.broadcast %150 : vector<32x1xf32> to vector<32x256xf32>
    %152 = arith.mulf %116, %151 : vector<32x256xf32>
    %c1 = arith.constant 1 : index
    %c0_79 = arith.constant 0 : index
    %c0_80 = arith.constant 0 : index
    %153 = vector.load %arg2[%c1, %c0_79, %c0_80] : memref<4x32x288xf32, #tpu.memory_space<vmem>>, vector<1x32x288xf32>
    %154 = vector.shape_cast %153 : vector<1x32x288xf32> to vector<32x288xf32>
    %c1_81 = arith.constant 1 : index
    %c0_82 = arith.constant 0 : index
    %c0_83 = arith.constant 0 : index
    %155 = vector.load %arg3[%c1_81, %c0_82, %c0_83] : memref<4x32x1xf32, #tpu.memory_space<vmem>>, vector<1x32x1xf32>
    %156 = vector.shape_cast %155 : vector<1x32x1xf32> to vector<32x1xf32>
    %c17_i32_84 = arith.constant 17 : i32
    %157 = tpu.dynamic_rotate %152 by %c17_i32_84 dim 1 : vector<32x256xf32>, i32 -> vector<32x256xf32>
    %cst_85 = arith.constant 0.000000e+00 : f32
    %158 = vector.broadcast %cst_85 : f32 to vector<32x256xf32>
    %159 = arith.select %23, %157, %158 : vector<32x256xi1>, vector<32x256xf32>
    %c16_i32_86 = arith.constant 16 : i32
    %160 = tpu.dynamic_rotate %152 by %c16_i32_86 dim 1 : vector<32x256xf32>, i32 -> vector<32x256xf32>
    %cst_87 = arith.constant 0.000000e+00 : f32
    %161 = vector.broadcast %cst_87 : f32 to vector<32x256xf32>
    %162 = arith.select %25, %160, %161 : vector<32x256xi1>, vector<32x256xf32>
    %c15_i32_88 = arith.constant 15 : i32
    %163 = tpu.dynamic_rotate %152 by %c15_i32_88 dim 1 : vector<32x256xf32>, i32 -> vector<32x256xf32>
    %cst_89 = arith.constant 0.000000e+00 : f32
    %164 = vector.broadcast %cst_89 : f32 to vector<32x256xf32>
    %165 = arith.select %30, %163, %164 : vector<32x256xi1>, vector<32x256xf32>
    %c1_i32_90 = arith.constant 1 : i32
    %166 = tpu.dynamic_rotate %152 by %c1_i32_90 dim 1 : vector<32x256xf32>, i32 -> vector<32x256xf32>
    %cst_91 = arith.constant 0.000000e+00 : f32
    %167 = vector.broadcast %cst_91 : f32 to vector<32x256xf32>
    %168 = arith.select %32, %166, %167 : vector<32x256xi1>, vector<32x256xf32>
    %c255_i32_92 = arith.constant 255 : i32
    %169 = tpu.dynamic_rotate %152 by %c255_i32_92 dim 1 : vector<32x256xf32>, i32 -> vector<32x256xf32>
    %cst_93 = arith.constant 0.000000e+00 : f32
    %170 = vector.broadcast %cst_93 : f32 to vector<32x256xf32>
    %171 = arith.select %34, %169, %170 : vector<32x256xi1>, vector<32x256xf32>
    %c241_i32_94 = arith.constant 241 : i32
    %172 = tpu.dynamic_rotate %152 by %c241_i32_94 dim 1 : vector<32x256xf32>, i32 -> vector<32x256xf32>
    %cst_95 = arith.constant 0.000000e+00 : f32
    %173 = vector.broadcast %cst_95 : f32 to vector<32x256xf32>
    %174 = arith.select %39, %172, %173 : vector<32x256xi1>, vector<32x256xf32>
    %c240_i32_96 = arith.constant 240 : i32
    %175 = tpu.dynamic_rotate %152 by %c240_i32_96 dim 1 : vector<32x256xf32>, i32 -> vector<32x256xf32>
    %cst_97 = arith.constant 0.000000e+00 : f32
    %176 = vector.broadcast %cst_97 : f32 to vector<32x256xf32>
    %177 = arith.select %41, %175, %176 : vector<32x256xi1>, vector<32x256xf32>
    %c239_i32_98 = arith.constant 239 : i32
    %178 = tpu.dynamic_rotate %152 by %c239_i32_98 dim 1 : vector<32x256xf32>, i32 -> vector<32x256xf32>
    %cst_99 = arith.constant 0.000000e+00 : f32
    %179 = vector.broadcast %cst_99 : f32 to vector<32x256xf32>
    %180 = arith.select %46, %178, %179 : vector<32x256xi1>, vector<32x256xf32>
    %181 = tpu.concatenate %159, %162, %165, %168, %152, %171, %174, %177, %180 in 0 : vector<32x256xf32>, vector<32x256xf32>, vector<32x256xf32>, vector<32x256xf32>, vector<32x256xf32>, vector<32x256xf32>, vector<32x256xf32>, vector<32x256xf32>, vector<32x256xf32> -> vector<288x256xf32>
    %cst_100 = arith.constant dense<0.000000e+00> : vector<32x256xf32>
    %182 = tpu.matmul %154, %181, %cst_100 {dimension_numbers = #tpu.dot_dimension_numbers<[1], [0], [0], [1], [0, 0, 1, 1], [], []>} : vector<32x288xf32>, vector<288x256xf32>, vector<32x256xf32> -> vector<32x256xf32>
    %183 = vector.broadcast %156 : vector<32x1xf32> to vector<32x256xf32>
    %184 = arith.addf %182, %183 : vector<32x256xf32>
    %cst_101 = arith.constant 0.000000e+00 : f32
    %185 = vector.broadcast %cst_101 : f32 to vector<32x256xf32>
    %186 = arith.cmpf ogt, %184, %185 : vector<32x256xf32>
    %cst_102 = arith.constant 1.000000e-01 : f32
    %187 = vector.broadcast %cst_102 : f32 to vector<32x256xf32>
    %188 = arith.mulf %187, %184 : vector<32x256xf32>
    %189 = arith.select %186, %184, %188 : vector<32x256xi1>, vector<32x256xf32>
    %c1_103 = arith.constant 1 : index
    %c0_104 = arith.constant 0 : index
    %c0_105 = arith.constant 0 : index
    %190 = vector.load %arg4[%c1_103, %c0_104, %c0_105] : memref<4x32x288xf32, #tpu.memory_space<vmem>>, vector<1x32x288xf32>
    %191 = vector.shape_cast %190 : vector<1x32x288xf32> to vector<32x288xf32>
    %c1_106 = arith.constant 1 : index
    %c0_107 = arith.constant 0 : index
    %c0_108 = arith.constant 0 : index
    %192 = vector.load %arg5[%c1_106, %c0_107, %c0_108] : memref<4x32x1xf32, #tpu.memory_space<vmem>>, vector<1x32x1xf32>
    %193 = vector.shape_cast %192 : vector<1x32x1xf32> to vector<32x1xf32>
    %c17_i32_109 = arith.constant 17 : i32
    %194 = tpu.dynamic_rotate %189 by %c17_i32_109 dim 1 : vector<32x256xf32>, i32 -> vector<32x256xf32>
    %cst_110 = arith.constant 0.000000e+00 : f32
    %195 = vector.broadcast %cst_110 : f32 to vector<32x256xf32>
    %196 = arith.select %23, %194, %195 : vector<32x256xi1>, vector<32x256xf32>
    %c16_i32_111 = arith.constant 16 : i32
    %197 = tpu.dynamic_rotate %189 by %c16_i32_111 dim 1 : vector<32x256xf32>, i32 -> vector<32x256xf32>
    %cst_112 = arith.constant 0.000000e+00 : f32
    %198 = vector.broadcast %cst_112 : f32 to vector<32x256xf32>
    %199 = arith.select %25, %197, %198 : vector<32x256xi1>, vector<32x256xf32>
    %c15_i32_113 = arith.constant 15 : i32
    %200 = tpu.dynamic_rotate %189 by %c15_i32_113 dim 1 : vector<32x256xf32>, i32 -> vector<32x256xf32>
    %cst_114 = arith.constant 0.000000e+00 : f32
    %201 = vector.broadcast %cst_114 : f32 to vector<32x256xf32>
    %202 = arith.select %30, %200, %201 : vector<32x256xi1>, vector<32x256xf32>
    %c1_i32_115 = arith.constant 1 : i32
    %203 = tpu.dynamic_rotate %189 by %c1_i32_115 dim 1 : vector<32x256xf32>, i32 -> vector<32x256xf32>
    %cst_116 = arith.constant 0.000000e+00 : f32
    %204 = vector.broadcast %cst_116 : f32 to vector<32x256xf32>
    %205 = arith.select %32, %203, %204 : vector<32x256xi1>, vector<32x256xf32>
    %c255_i32_117 = arith.constant 255 : i32
    %206 = tpu.dynamic_rotate %189 by %c255_i32_117 dim 1 : vector<32x256xf32>, i32 -> vector<32x256xf32>
    %cst_118 = arith.constant 0.000000e+00 : f32
    %207 = vector.broadcast %cst_118 : f32 to vector<32x256xf32>
    %208 = arith.select %34, %206, %207 : vector<32x256xi1>, vector<32x256xf32>
    %c241_i32_119 = arith.constant 241 : i32
    %209 = tpu.dynamic_rotate %189 by %c241_i32_119 dim 1 : vector<32x256xf32>, i32 -> vector<32x256xf32>
    %cst_120 = arith.constant 0.000000e+00 : f32
    %210 = vector.broadcast %cst_120 : f32 to vector<32x256xf32>
    %211 = arith.select %39, %209, %210 : vector<32x256xi1>, vector<32x256xf32>
    %c240_i32_121 = arith.constant 240 : i32
    %212 = tpu.dynamic_rotate %189 by %c240_i32_121 dim 1 : vector<32x256xf32>, i32 -> vector<32x256xf32>
    %cst_122 = arith.constant 0.000000e+00 : f32
    %213 = vector.broadcast %cst_122 : f32 to vector<32x256xf32>
    %214 = arith.select %41, %212, %213 : vector<32x256xi1>, vector<32x256xf32>
    %c239_i32_123 = arith.constant 239 : i32
    %215 = tpu.dynamic_rotate %189 by %c239_i32_123 dim 1 : vector<32x256xf32>, i32 -> vector<32x256xf32>
    %cst_124 = arith.constant 0.000000e+00 : f32
    %216 = vector.broadcast %cst_124 : f32 to vector<32x256xf32>
    %217 = arith.select %46, %215, %216 : vector<32x256xi1>, vector<32x256xf32>
    %218 = tpu.concatenate %196, %199, %202, %205, %189, %208, %211, %214, %217 in 0 : vector<32x256xf32>, vector<32x256xf32>, vector<32x256xf32>, vector<32x256xf32>, vector<32x256xf32>, vector<32x256xf32>, vector<32x256xf32>, vector<32x256xf32>, vector<32x256xf32> -> vector<288x256xf32>
    %cst_125 = arith.constant dense<0.000000e+00> : vector<32x256xf32>
    %219 = tpu.matmul %191, %218, %cst_125 {dimension_numbers = #tpu.dot_dimension_numbers<[1], [0], [0], [1], [0, 0, 1, 1], [], []>} : vector<32x288xf32>, vector<288x256xf32>, vector<32x256xf32> -> vector<32x256xf32>
    %220 = vector.broadcast %193 : vector<32x1xf32> to vector<32x256xf32>
    %221 = arith.addf %219, %220 : vector<32x256xf32>
    %222 = arith.addf %221, %152 : vector<32x256xf32>
    %cst_126 = arith.constant dense<0.000000e+00> : vector<32xf32>
    %223 = vector.multi_reduction <add>, %222, %cst_126 [1] : vector<32x256xf32> to vector<32xf32>
    %224 = vector.shape_cast %223 : vector<32xf32> to vector<32x1xf32>
    %cst_127 = arith.constant 3.906250e-03 : f32
    %225 = vector.broadcast %cst_127 : f32 to vector<32x1xf32>
    %226 = arith.mulf %224, %225 : vector<32x1xf32>
    %cst_128 = arith.constant dense<0xFF800000> : vector<32xf32>
    %227 = vector.multi_reduction <maximumf>, %222, %cst_128 [1] : vector<32x256xf32> to vector<32xf32>
    %228 = vector.shape_cast %227 : vector<32xf32> to vector<32x1xf32>
    %229 = arith.addf %226, %228 : vector<32x1xf32>
    %c1_129 = arith.constant 1 : index
    %c0_130 = arith.constant 0 : index
    %c0_131 = arith.constant 0 : index
    %230 = vector.load %arg6[%c1_129, %c0_130, %c0_131] : memref<4x32x2xf32, #tpu.memory_space<vmem>>, vector<1x32x2xf32>
    %231 = vector.shape_cast %230 : vector<1x32x2xf32> to vector<32x2xf32>
    %232 = vector.broadcast %229 : vector<32x1xf32> to vector<32x2xf32>
    %233 = arith.mulf %231, %232 : vector<32x2xf32>
    %cst_132 = arith.constant dense<0.000000e+00> : vector<2xf32>
    %234 = vector.multi_reduction <add>, %233, %cst_132 [0] : vector<32x2xf32> to vector<2xf32>
    %235 = vector.shape_cast %234 : vector<2xf32> to vector<1x2xf32>
    %c1_133 = arith.constant 1 : index
    %c0_134 = arith.constant 0 : index
    %c0_135 = arith.constant 0 : index
    %236 = vector.load %arg7[%c1_133, %c0_134, %c0_135] : memref<4x1x2xf32, #tpu.memory_space<vmem>>, vector<1x1x2xf32>
    %237 = vector.shape_cast %236 : vector<1x1x2xf32> to vector<1x2xf32>
    %238 = arith.addf %235, %237 : vector<1x2xf32>
    %cst_136 = arith.constant 0.000000e+00 : f32
    %239 = vector.broadcast %cst_136 : f32 to vector<1x2xf32>
    %240 = arith.maximumf %238, %239 : vector<1x2xf32>
    %c1_137 = arith.constant 1 : index
    %c0_138 = arith.constant 0 : index
    %c0_139 = arith.constant 0 : index
    %241 = vector.load %arg8[%c1_137, %c0_138, %c0_139] : memref<4x32x2xf32, #tpu.memory_space<vmem>>, vector<1x32x2xf32>
    %242 = vector.shape_cast %241 : vector<1x32x2xf32> to vector<32x2xf32>
    %243 = vector.broadcast %240 : vector<1x2xf32> to vector<32x2xf32>
    %244 = arith.mulf %242, %243 : vector<32x2xf32>
    %cst_140 = arith.constant dense<0.000000e+00> : vector<32xf32>
    %245 = vector.multi_reduction <add>, %244, %cst_140 [1] : vector<32x2xf32> to vector<32xf32>
    %246 = vector.shape_cast %245 : vector<32xf32> to vector<32x1xf32>
    %c1_141 = arith.constant 1 : index
    %c0_142 = arith.constant 0 : index
    %c0_143 = arith.constant 0 : index
    %247 = vector.load %arg9[%c1_141, %c0_142, %c0_143] : memref<4x32x1xf32, #tpu.memory_space<vmem>>, vector<1x32x1xf32>
    %248 = vector.shape_cast %247 : vector<1x32x1xf32> to vector<32x1xf32>
    %249 = arith.addf %246, %248 : vector<32x1xf32>
    %cst_144 = arith.constant 0.000000e+00 : f32
    %250 = vector.broadcast %cst_144 : f32 to vector<32x1xf32>
    %251 = arith.subf %250, %249 : vector<32x1xf32>
    %252 = math.exp %251 : vector<32x1xf32>
    %cst_145 = arith.constant 1.000000e+00 : f32
    %253 = vector.broadcast %cst_145 : f32 to vector<32x1xf32>
    %254 = arith.addf %253, %252 : vector<32x1xf32>
    %cst_146 = arith.constant 1.000000e+00 : f32
    %255 = vector.broadcast %cst_146 : f32 to vector<32x1xf32>
    %256 = arith.divf %255, %254 : vector<32x1xf32>
    %257 = vector.broadcast %256 : vector<32x1xf32> to vector<32x256xf32>
    %258 = arith.mulf %222, %257 : vector<32x256xf32>
    %c2 = arith.constant 2 : index
    %c0_147 = arith.constant 0 : index
    %c0_148 = arith.constant 0 : index
    %259 = vector.load %arg2[%c2, %c0_147, %c0_148] : memref<4x32x288xf32, #tpu.memory_space<vmem>>, vector<1x32x288xf32>
    %260 = vector.shape_cast %259 : vector<1x32x288xf32> to vector<32x288xf32>
    %c2_149 = arith.constant 2 : index
    %c0_150 = arith.constant 0 : index
    %c0_151 = arith.constant 0 : index
    %261 = vector.load %arg3[%c2_149, %c0_150, %c0_151] : memref<4x32x1xf32, #tpu.memory_space<vmem>>, vector<1x32x1xf32>
    %262 = vector.shape_cast %261 : vector<1x32x1xf32> to vector<32x1xf32>
    %c17_i32_152 = arith.constant 17 : i32
    %263 = tpu.dynamic_rotate %258 by %c17_i32_152 dim 1 : vector<32x256xf32>, i32 -> vector<32x256xf32>
    %cst_153 = arith.constant 0.000000e+00 : f32
    %264 = vector.broadcast %cst_153 : f32 to vector<32x256xf32>
    %265 = arith.select %23, %263, %264 : vector<32x256xi1>, vector<32x256xf32>
    %c16_i32_154 = arith.constant 16 : i32
    %266 = tpu.dynamic_rotate %258 by %c16_i32_154 dim 1 : vector<32x256xf32>, i32 -> vector<32x256xf32>
    %cst_155 = arith.constant 0.000000e+00 : f32
    %267 = vector.broadcast %cst_155 : f32 to vector<32x256xf32>
    %268 = arith.select %25, %266, %267 : vector<32x256xi1>, vector<32x256xf32>
    %c15_i32_156 = arith.constant 15 : i32
    %269 = tpu.dynamic_rotate %258 by %c15_i32_156 dim 1 : vector<32x256xf32>, i32 -> vector<32x256xf32>
    %cst_157 = arith.constant 0.000000e+00 : f32
    %270 = vector.broadcast %cst_157 : f32 to vector<32x256xf32>
    %271 = arith.select %30, %269, %270 : vector<32x256xi1>, vector<32x256xf32>
    %c1_i32_158 = arith.constant 1 : i32
    %272 = tpu.dynamic_rotate %258 by %c1_i32_158 dim 1 : vector<32x256xf32>, i32 -> vector<32x256xf32>
    %cst_159 = arith.constant 0.000000e+00 : f32
    %273 = vector.broadcast %cst_159 : f32 to vector<32x256xf32>
    %274 = arith.select %32, %272, %273 : vector<32x256xi1>, vector<32x256xf32>
    %c255_i32_160 = arith.constant 255 : i32
    %275 = tpu.dynamic_rotate %258 by %c255_i32_160 dim 1 : vector<32x256xf32>, i32 -> vector<32x256xf32>
    %cst_161 = arith.constant 0.000000e+00 : f32
    %276 = vector.broadcast %cst_161 : f32 to vector<32x256xf32>
    %277 = arith.select %34, %275, %276 : vector<32x256xi1>, vector<32x256xf32>
    %c241_i32_162 = arith.constant 241 : i32
    %278 = tpu.dynamic_rotate %258 by %c241_i32_162 dim 1 : vector<32x256xf32>, i32 -> vector<32x256xf32>
    %cst_163 = arith.constant 0.000000e+00 : f32
    %279 = vector.broadcast %cst_163 : f32 to vector<32x256xf32>
    %280 = arith.select %39, %278, %279 : vector<32x256xi1>, vector<32x256xf32>
    %c240_i32_164 = arith.constant 240 : i32
    %281 = tpu.dynamic_rotate %258 by %c240_i32_164 dim 1 : vector<32x256xf32>, i32 -> vector<32x256xf32>
    %cst_165 = arith.constant 0.000000e+00 : f32
    %282 = vector.broadcast %cst_165 : f32 to vector<32x256xf32>
    %283 = arith.select %41, %281, %282 : vector<32x256xi1>, vector<32x256xf32>
    %c239_i32_166 = arith.constant 239 : i32
    %284 = tpu.dynamic_rotate %258 by %c239_i32_166 dim 1 : vector<32x256xf32>, i32 -> vector<32x256xf32>
    %cst_167 = arith.constant 0.000000e+00 : f32
    %285 = vector.broadcast %cst_167 : f32 to vector<32x256xf32>
    %286 = arith.select %46, %284, %285 : vector<32x256xi1>, vector<32x256xf32>
    %287 = tpu.concatenate %265, %268, %271, %274, %258, %277, %280, %283, %286 in 0 : vector<32x256xf32>, vector<32x256xf32>, vector<32x256xf32>, vector<32x256xf32>, vector<32x256xf32>, vector<32x256xf32>, vector<32x256xf32>, vector<32x256xf32>, vector<32x256xf32> -> vector<288x256xf32>
    %cst_168 = arith.constant dense<0.000000e+00> : vector<32x256xf32>
    %288 = tpu.matmul %260, %287, %cst_168 {dimension_numbers = #tpu.dot_dimension_numbers<[1], [0], [0], [1], [0, 0, 1, 1], [], []>} : vector<32x288xf32>, vector<288x256xf32>, vector<32x256xf32> -> vector<32x256xf32>
    %289 = vector.broadcast %262 : vector<32x1xf32> to vector<32x256xf32>
    %290 = arith.addf %288, %289 : vector<32x256xf32>
    %cst_169 = arith.constant 0.000000e+00 : f32
    %291 = vector.broadcast %cst_169 : f32 to vector<32x256xf32>
    %292 = arith.cmpf ogt, %290, %291 : vector<32x256xf32>
    %cst_170 = arith.constant 1.000000e-01 : f32
    %293 = vector.broadcast %cst_170 : f32 to vector<32x256xf32>
    %294 = arith.mulf %293, %290 : vector<32x256xf32>
    %295 = arith.select %292, %290, %294 : vector<32x256xi1>, vector<32x256xf32>
    %c2_171 = arith.constant 2 : index
    %c0_172 = arith.constant 0 : index
    %c0_173 = arith.constant 0 : index
    %296 = vector.load %arg4[%c2_171, %c0_172, %c0_173] : memref<4x32x288xf32, #tpu.memory_space<vmem>>, vector<1x32x288xf32>
    %297 = vector.shape_cast %296 : vector<1x32x288xf32> to vector<32x288xf32>
    %c2_174 = arith.constant 2 : index
    %c0_175 = arith.constant 0 : index
    %c0_176 = arith.constant 0 : index
    %298 = vector.load %arg5[%c2_174, %c0_175, %c0_176] : memref<4x32x1xf32, #tpu.memory_space<vmem>>, vector<1x32x1xf32>
    %299 = vector.shape_cast %298 : vector<1x32x1xf32> to vector<32x1xf32>
    %c17_i32_177 = arith.constant 17 : i32
    %300 = tpu.dynamic_rotate %295 by %c17_i32_177 dim 1 : vector<32x256xf32>, i32 -> vector<32x256xf32>
    %cst_178 = arith.constant 0.000000e+00 : f32
    %301 = vector.broadcast %cst_178 : f32 to vector<32x256xf32>
    %302 = arith.select %23, %300, %301 : vector<32x256xi1>, vector<32x256xf32>
    %c16_i32_179 = arith.constant 16 : i32
    %303 = tpu.dynamic_rotate %295 by %c16_i32_179 dim 1 : vector<32x256xf32>, i32 -> vector<32x256xf32>
    %cst_180 = arith.constant 0.000000e+00 : f32
    %304 = vector.broadcast %cst_180 : f32 to vector<32x256xf32>
    %305 = arith.select %25, %303, %304 : vector<32x256xi1>, vector<32x256xf32>
    %c15_i32_181 = arith.constant 15 : i32
    %306 = tpu.dynamic_rotate %295 by %c15_i32_181 dim 1 : vector<32x256xf32>, i32 -> vector<32x256xf32>
    %cst_182 = arith.constant 0.000000e+00 : f32
    %307 = vector.broadcast %cst_182 : f32 to vector<32x256xf32>
    %308 = arith.select %30, %306, %307 : vector<32x256xi1>, vector<32x256xf32>
    %c1_i32_183 = arith.constant 1 : i32
    %309 = tpu.dynamic_rotate %295 by %c1_i32_183 dim 1 : vector<32x256xf32>, i32 -> vector<32x256xf32>
    %cst_184 = arith.constant 0.000000e+00 : f32
    %310 = vector.broadcast %cst_184 : f32 to vector<32x256xf32>
    %311 = arith.select %32, %309, %310 : vector<32x256xi1>, vector<32x256xf32>
    %c255_i32_185 = arith.constant 255 : i32
    %312 = tpu.dynamic_rotate %295 by %c255_i32_185 dim 1 : vector<32x256xf32>, i32 -> vector<32x256xf32>
    %cst_186 = arith.constant 0.000000e+00 : f32
    %313 = vector.broadcast %cst_186 : f32 to vector<32x256xf32>
    %314 = arith.select %34, %312, %313 : vector<32x256xi1>, vector<32x256xf32>
    %c241_i32_187 = arith.constant 241 : i32
    %315 = tpu.dynamic_rotate %295 by %c241_i32_187 dim 1 : vector<32x256xf32>, i32 -> vector<32x256xf32>
    %cst_188 = arith.constant 0.000000e+00 : f32
    %316 = vector.broadcast %cst_188 : f32 to vector<32x256xf32>
    %317 = arith.select %39, %315, %316 : vector<32x256xi1>, vector<32x256xf32>
    %c240_i32_189 = arith.constant 240 : i32
    %318 = tpu.dynamic_rotate %295 by %c240_i32_189 dim 1 : vector<32x256xf32>, i32 -> vector<32x256xf32>
    %cst_190 = arith.constant 0.000000e+00 : f32
    %319 = vector.broadcast %cst_190 : f32 to vector<32x256xf32>
    %320 = arith.select %41, %318, %319 : vector<32x256xi1>, vector<32x256xf32>
    %c239_i32_191 = arith.constant 239 : i32
    %321 = tpu.dynamic_rotate %295 by %c239_i32_191 dim 1 : vector<32x256xf32>, i32 -> vector<32x256xf32>
    %cst_192 = arith.constant 0.000000e+00 : f32
    %322 = vector.broadcast %cst_192 : f32 to vector<32x256xf32>
    %323 = arith.select %46, %321, %322 : vector<32x256xi1>, vector<32x256xf32>
    %324 = tpu.concatenate %302, %305, %308, %311, %295, %314, %317, %320, %323 in 0 : vector<32x256xf32>, vector<32x256xf32>, vector<32x256xf32>, vector<32x256xf32>, vector<32x256xf32>, vector<32x256xf32>, vector<32x256xf32>, vector<32x256xf32>, vector<32x256xf32> -> vector<288x256xf32>
    %cst_193 = arith.constant dense<0.000000e+00> : vector<32x256xf32>
    %325 = tpu.matmul %297, %324, %cst_193 {dimension_numbers = #tpu.dot_dimension_numbers<[1], [0], [0], [1], [0, 0, 1, 1], [], []>} : vector<32x288xf32>, vector<288x256xf32>, vector<32x256xf32> -> vector<32x256xf32>
    %326 = vector.broadcast %299 : vector<32x1xf32> to vector<32x256xf32>
    %327 = arith.addf %325, %326 : vector<32x256xf32>
    %328 = arith.addf %327, %258 : vector<32x256xf32>
    %cst_194 = arith.constant dense<0.000000e+00> : vector<32xf32>
    %329 = vector.multi_reduction <add>, %328, %cst_194 [1] : vector<32x256xf32> to vector<32xf32>
    %330 = vector.shape_cast %329 : vector<32xf32> to vector<32x1xf32>
    %cst_195 = arith.constant 3.906250e-03 : f32
    %331 = vector.broadcast %cst_195 : f32 to vector<32x1xf32>
    %332 = arith.mulf %330, %331 : vector<32x1xf32>
    %cst_196 = arith.constant dense<0xFF800000> : vector<32xf32>
    %333 = vector.multi_reduction <maximumf>, %328, %cst_196 [1] : vector<32x256xf32> to vector<32xf32>
    %334 = vector.shape_cast %333 : vector<32xf32> to vector<32x1xf32>
    %335 = arith.addf %332, %334 : vector<32x1xf32>
    %c2_197 = arith.constant 2 : index
    %c0_198 = arith.constant 0 : index
    %c0_199 = arith.constant 0 : index
    %336 = vector.load %arg6[%c2_197, %c0_198, %c0_199] : memref<4x32x2xf32, #tpu.memory_space<vmem>>, vector<1x32x2xf32>
    %337 = vector.shape_cast %336 : vector<1x32x2xf32> to vector<32x2xf32>
    %338 = vector.broadcast %335 : vector<32x1xf32> to vector<32x2xf32>
    %339 = arith.mulf %337, %338 : vector<32x2xf32>
    %cst_200 = arith.constant dense<0.000000e+00> : vector<2xf32>
    %340 = vector.multi_reduction <add>, %339, %cst_200 [0] : vector<32x2xf32> to vector<2xf32>
    %341 = vector.shape_cast %340 : vector<2xf32> to vector<1x2xf32>
    %c2_201 = arith.constant 2 : index
    %c0_202 = arith.constant 0 : index
    %c0_203 = arith.constant 0 : index
    %342 = vector.load %arg7[%c2_201, %c0_202, %c0_203] : memref<4x1x2xf32, #tpu.memory_space<vmem>>, vector<1x1x2xf32>
    %343 = vector.shape_cast %342 : vector<1x1x2xf32> to vector<1x2xf32>
    %344 = arith.addf %341, %343 : vector<1x2xf32>
    %cst_204 = arith.constant 0.000000e+00 : f32
    %345 = vector.broadcast %cst_204 : f32 to vector<1x2xf32>
    %346 = arith.maximumf %344, %345 : vector<1x2xf32>
    %c2_205 = arith.constant 2 : index
    %c0_206 = arith.constant 0 : index
    %c0_207 = arith.constant 0 : index
    %347 = vector.load %arg8[%c2_205, %c0_206, %c0_207] : memref<4x32x2xf32, #tpu.memory_space<vmem>>, vector<1x32x2xf32>
    %348 = vector.shape_cast %347 : vector<1x32x2xf32> to vector<32x2xf32>
    %349 = vector.broadcast %346 : vector<1x2xf32> to vector<32x2xf32>
    %350 = arith.mulf %348, %349 : vector<32x2xf32>
    %cst_208 = arith.constant dense<0.000000e+00> : vector<32xf32>
    %351 = vector.multi_reduction <add>, %350, %cst_208 [1] : vector<32x2xf32> to vector<32xf32>
    %352 = vector.shape_cast %351 : vector<32xf32> to vector<32x1xf32>
    %c2_209 = arith.constant 2 : index
    %c0_210 = arith.constant 0 : index
    %c0_211 = arith.constant 0 : index
    %353 = vector.load %arg9[%c2_209, %c0_210, %c0_211] : memref<4x32x1xf32, #tpu.memory_space<vmem>>, vector<1x32x1xf32>
    %354 = vector.shape_cast %353 : vector<1x32x1xf32> to vector<32x1xf32>
    %355 = arith.addf %352, %354 : vector<32x1xf32>
    %cst_212 = arith.constant 0.000000e+00 : f32
    %356 = vector.broadcast %cst_212 : f32 to vector<32x1xf32>
    %357 = arith.subf %356, %355 : vector<32x1xf32>
    %358 = math.exp %357 : vector<32x1xf32>
    %cst_213 = arith.constant 1.000000e+00 : f32
    %359 = vector.broadcast %cst_213 : f32 to vector<32x1xf32>
    %360 = arith.addf %359, %358 : vector<32x1xf32>
    %cst_214 = arith.constant 1.000000e+00 : f32
    %361 = vector.broadcast %cst_214 : f32 to vector<32x1xf32>
    %362 = arith.divf %361, %360 : vector<32x1xf32>
    %363 = vector.broadcast %362 : vector<32x1xf32> to vector<32x256xf32>
    %364 = arith.mulf %328, %363 : vector<32x256xf32>
    %c3 = arith.constant 3 : index
    %c0_215 = arith.constant 0 : index
    %c0_216 = arith.constant 0 : index
    %365 = vector.load %arg2[%c3, %c0_215, %c0_216] : memref<4x32x288xf32, #tpu.memory_space<vmem>>, vector<1x32x288xf32>
    %366 = vector.shape_cast %365 : vector<1x32x288xf32> to vector<32x288xf32>
    %c3_217 = arith.constant 3 : index
    %c0_218 = arith.constant 0 : index
    %c0_219 = arith.constant 0 : index
    %367 = vector.load %arg3[%c3_217, %c0_218, %c0_219] : memref<4x32x1xf32, #tpu.memory_space<vmem>>, vector<1x32x1xf32>
    %368 = vector.shape_cast %367 : vector<1x32x1xf32> to vector<32x1xf32>
    %c17_i32_220 = arith.constant 17 : i32
    %369 = tpu.dynamic_rotate %364 by %c17_i32_220 dim 1 : vector<32x256xf32>, i32 -> vector<32x256xf32>
    %cst_221 = arith.constant 0.000000e+00 : f32
    %370 = vector.broadcast %cst_221 : f32 to vector<32x256xf32>
    %371 = arith.select %23, %369, %370 : vector<32x256xi1>, vector<32x256xf32>
    %c16_i32_222 = arith.constant 16 : i32
    %372 = tpu.dynamic_rotate %364 by %c16_i32_222 dim 1 : vector<32x256xf32>, i32 -> vector<32x256xf32>
    %cst_223 = arith.constant 0.000000e+00 : f32
    %373 = vector.broadcast %cst_223 : f32 to vector<32x256xf32>
    %374 = arith.select %25, %372, %373 : vector<32x256xi1>, vector<32x256xf32>
    %c15_i32_224 = arith.constant 15 : i32
    %375 = tpu.dynamic_rotate %364 by %c15_i32_224 dim 1 : vector<32x256xf32>, i32 -> vector<32x256xf32>
    %cst_225 = arith.constant 0.000000e+00 : f32
    %376 = vector.broadcast %cst_225 : f32 to vector<32x256xf32>
    %377 = arith.select %30, %375, %376 : vector<32x256xi1>, vector<32x256xf32>
    %c1_i32_226 = arith.constant 1 : i32
    %378 = tpu.dynamic_rotate %364 by %c1_i32_226 dim 1 : vector<32x256xf32>, i32 -> vector<32x256xf32>
    %cst_227 = arith.constant 0.000000e+00 : f32
    %379 = vector.broadcast %cst_227 : f32 to vector<32x256xf32>
    %380 = arith.select %32, %378, %379 : vector<32x256xi1>, vector<32x256xf32>
    %c255_i32_228 = arith.constant 255 : i32
    %381 = tpu.dynamic_rotate %364 by %c255_i32_228 dim 1 : vector<32x256xf32>, i32 -> vector<32x256xf32>
    %cst_229 = arith.constant 0.000000e+00 : f32
    %382 = vector.broadcast %cst_229 : f32 to vector<32x256xf32>
    %383 = arith.select %34, %381, %382 : vector<32x256xi1>, vector<32x256xf32>
    %c241_i32_230 = arith.constant 241 : i32
    %384 = tpu.dynamic_rotate %364 by %c241_i32_230 dim 1 : vector<32x256xf32>, i32 -> vector<32x256xf32>
    %cst_231 = arith.constant 0.000000e+00 : f32
    %385 = vector.broadcast %cst_231 : f32 to vector<32x256xf32>
    %386 = arith.select %39, %384, %385 : vector<32x256xi1>, vector<32x256xf32>
    %c240_i32_232 = arith.constant 240 : i32
    %387 = tpu.dynamic_rotate %364 by %c240_i32_232 dim 1 : vector<32x256xf32>, i32 -> vector<32x256xf32>
    %cst_233 = arith.constant 0.000000e+00 : f32
    %388 = vector.broadcast %cst_233 : f32 to vector<32x256xf32>
    %389 = arith.select %41, %387, %388 : vector<32x256xi1>, vector<32x256xf32>
    %c239_i32_234 = arith.constant 239 : i32
    %390 = tpu.dynamic_rotate %364 by %c239_i32_234 dim 1 : vector<32x256xf32>, i32 -> vector<32x256xf32>
    %cst_235 = arith.constant 0.000000e+00 : f32
    %391 = vector.broadcast %cst_235 : f32 to vector<32x256xf32>
    %392 = arith.select %46, %390, %391 : vector<32x256xi1>, vector<32x256xf32>
    %393 = tpu.concatenate %371, %374, %377, %380, %364, %383, %386, %389, %392 in 0 : vector<32x256xf32>, vector<32x256xf32>, vector<32x256xf32>, vector<32x256xf32>, vector<32x256xf32>, vector<32x256xf32>, vector<32x256xf32>, vector<32x256xf32>, vector<32x256xf32> -> vector<288x256xf32>
    %cst_236 = arith.constant dense<0.000000e+00> : vector<32x256xf32>
    %394 = tpu.matmul %366, %393, %cst_236 {dimension_numbers = #tpu.dot_dimension_numbers<[1], [0], [0], [1], [0, 0, 1, 1], [], []>} : vector<32x288xf32>, vector<288x256xf32>, vector<32x256xf32> -> vector<32x256xf32>
    %395 = vector.broadcast %368 : vector<32x1xf32> to vector<32x256xf32>
    %396 = arith.addf %394, %395 : vector<32x256xf32>
    %cst_237 = arith.constant 0.000000e+00 : f32
    %397 = vector.broadcast %cst_237 : f32 to vector<32x256xf32>
    %398 = arith.cmpf ogt, %396, %397 : vector<32x256xf32>
    %cst_238 = arith.constant 1.000000e-01 : f32
    %399 = vector.broadcast %cst_238 : f32 to vector<32x256xf32>
    %400 = arith.mulf %399, %396 : vector<32x256xf32>
    %401 = arith.select %398, %396, %400 : vector<32x256xi1>, vector<32x256xf32>
    %c3_239 = arith.constant 3 : index
    %c0_240 = arith.constant 0 : index
    %c0_241 = arith.constant 0 : index
    %402 = vector.load %arg4[%c3_239, %c0_240, %c0_241] : memref<4x32x288xf32, #tpu.memory_space<vmem>>, vector<1x32x288xf32>
    %403 = vector.shape_cast %402 : vector<1x32x288xf32> to vector<32x288xf32>
    %c3_242 = arith.constant 3 : index
    %c0_243 = arith.constant 0 : index
    %c0_244 = arith.constant 0 : index
    %404 = vector.load %arg5[%c3_242, %c0_243, %c0_244] : memref<4x32x1xf32, #tpu.memory_space<vmem>>, vector<1x32x1xf32>
    %405 = vector.shape_cast %404 : vector<1x32x1xf32> to vector<32x1xf32>
    %c17_i32_245 = arith.constant 17 : i32
    %406 = tpu.dynamic_rotate %401 by %c17_i32_245 dim 1 : vector<32x256xf32>, i32 -> vector<32x256xf32>
    %cst_246 = arith.constant 0.000000e+00 : f32
    %407 = vector.broadcast %cst_246 : f32 to vector<32x256xf32>
    %408 = arith.select %23, %406, %407 : vector<32x256xi1>, vector<32x256xf32>
    %c16_i32_247 = arith.constant 16 : i32
    %409 = tpu.dynamic_rotate %401 by %c16_i32_247 dim 1 : vector<32x256xf32>, i32 -> vector<32x256xf32>
    %cst_248 = arith.constant 0.000000e+00 : f32
    %410 = vector.broadcast %cst_248 : f32 to vector<32x256xf32>
    %411 = arith.select %25, %409, %410 : vector<32x256xi1>, vector<32x256xf32>
    %c15_i32_249 = arith.constant 15 : i32
    %412 = tpu.dynamic_rotate %401 by %c15_i32_249 dim 1 : vector<32x256xf32>, i32 -> vector<32x256xf32>
    %cst_250 = arith.constant 0.000000e+00 : f32
    %413 = vector.broadcast %cst_250 : f32 to vector<32x256xf32>
    %414 = arith.select %30, %412, %413 : vector<32x256xi1>, vector<32x256xf32>
    %c1_i32_251 = arith.constant 1 : i32
    %415 = tpu.dynamic_rotate %401 by %c1_i32_251 dim 1 : vector<32x256xf32>, i32 -> vector<32x256xf32>
    %cst_252 = arith.constant 0.000000e+00 : f32
    %416 = vector.broadcast %cst_252 : f32 to vector<32x256xf32>
    %417 = arith.select %32, %415, %416 : vector<32x256xi1>, vector<32x256xf32>
    %c255_i32_253 = arith.constant 255 : i32
    %418 = tpu.dynamic_rotate %401 by %c255_i32_253 dim 1 : vector<32x256xf32>, i32 -> vector<32x256xf32>
    %cst_254 = arith.constant 0.000000e+00 : f32
    %419 = vector.broadcast %cst_254 : f32 to vector<32x256xf32>
    %420 = arith.select %34, %418, %419 : vector<32x256xi1>, vector<32x256xf32>
    %c241_i32_255 = arith.constant 241 : i32
    %421 = tpu.dynamic_rotate %401 by %c241_i32_255 dim 1 : vector<32x256xf32>, i32 -> vector<32x256xf32>
    %cst_256 = arith.constant 0.000000e+00 : f32
    %422 = vector.broadcast %cst_256 : f32 to vector<32x256xf32>
    %423 = arith.select %39, %421, %422 : vector<32x256xi1>, vector<32x256xf32>
    %c240_i32_257 = arith.constant 240 : i32
    %424 = tpu.dynamic_rotate %401 by %c240_i32_257 dim 1 : vector<32x256xf32>, i32 -> vector<32x256xf32>
    %cst_258 = arith.constant 0.000000e+00 : f32
    %425 = vector.broadcast %cst_258 : f32 to vector<32x256xf32>
    %426 = arith.select %41, %424, %425 : vector<32x256xi1>, vector<32x256xf32>
    %c239_i32_259 = arith.constant 239 : i32
    %427 = tpu.dynamic_rotate %401 by %c239_i32_259 dim 1 : vector<32x256xf32>, i32 -> vector<32x256xf32>
    %cst_260 = arith.constant 0.000000e+00 : f32
    %428 = vector.broadcast %cst_260 : f32 to vector<32x256xf32>
    %429 = arith.select %46, %427, %428 : vector<32x256xi1>, vector<32x256xf32>
    %430 = tpu.concatenate %408, %411, %414, %417, %401, %420, %423, %426, %429 in 0 : vector<32x256xf32>, vector<32x256xf32>, vector<32x256xf32>, vector<32x256xf32>, vector<32x256xf32>, vector<32x256xf32>, vector<32x256xf32>, vector<32x256xf32>, vector<32x256xf32> -> vector<288x256xf32>
    %cst_261 = arith.constant dense<0.000000e+00> : vector<32x256xf32>
    %431 = tpu.matmul %403, %430, %cst_261 {dimension_numbers = #tpu.dot_dimension_numbers<[1], [0], [0], [1], [0, 0, 1, 1], [], []>} : vector<32x288xf32>, vector<288x256xf32>, vector<32x256xf32> -> vector<32x256xf32>
    %432 = vector.broadcast %405 : vector<32x1xf32> to vector<32x256xf32>
    %433 = arith.addf %431, %432 : vector<32x256xf32>
    %434 = arith.addf %433, %364 : vector<32x256xf32>
    %cst_262 = arith.constant dense<0.000000e+00> : vector<32xf32>
    %435 = vector.multi_reduction <add>, %434, %cst_262 [1] : vector<32x256xf32> to vector<32xf32>
    %436 = vector.shape_cast %435 : vector<32xf32> to vector<32x1xf32>
    %cst_263 = arith.constant 3.906250e-03 : f32
    %437 = vector.broadcast %cst_263 : f32 to vector<32x1xf32>
    %438 = arith.mulf %436, %437 : vector<32x1xf32>
    %cst_264 = arith.constant dense<0xFF800000> : vector<32xf32>
    %439 = vector.multi_reduction <maximumf>, %434, %cst_264 [1] : vector<32x256xf32> to vector<32xf32>
    %440 = vector.shape_cast %439 : vector<32xf32> to vector<32x1xf32>
    %441 = arith.addf %438, %440 : vector<32x1xf32>
    %c3_265 = arith.constant 3 : index
    %c0_266 = arith.constant 0 : index
    %c0_267 = arith.constant 0 : index
    %442 = vector.load %arg6[%c3_265, %c0_266, %c0_267] : memref<4x32x2xf32, #tpu.memory_space<vmem>>, vector<1x32x2xf32>
    %443 = vector.shape_cast %442 : vector<1x32x2xf32> to vector<32x2xf32>
    %444 = vector.broadcast %441 : vector<32x1xf32> to vector<32x2xf32>
    %445 = arith.mulf %443, %444 : vector<32x2xf32>
    %cst_268 = arith.constant dense<0.000000e+00> : vector<2xf32>
    %446 = vector.multi_reduction <add>, %445, %cst_268 [0] : vector<32x2xf32> to vector<2xf32>
    %447 = vector.shape_cast %446 : vector<2xf32> to vector<1x2xf32>
    %c3_269 = arith.constant 3 : index
    %c0_270 = arith.constant 0 : index
    %c0_271 = arith.constant 0 : index
    %448 = vector.load %arg7[%c3_269, %c0_270, %c0_271] : memref<4x1x2xf32, #tpu.memory_space<vmem>>, vector<1x1x2xf32>
    %449 = vector.shape_cast %448 : vector<1x1x2xf32> to vector<1x2xf32>
    %450 = arith.addf %447, %449 : vector<1x2xf32>
    %cst_272 = arith.constant 0.000000e+00 : f32
    %451 = vector.broadcast %cst_272 : f32 to vector<1x2xf32>
    %452 = arith.maximumf %450, %451 : vector<1x2xf32>
    %c3_273 = arith.constant 3 : index
    %c0_274 = arith.constant 0 : index
    %c0_275 = arith.constant 0 : index
    %453 = vector.load %arg8[%c3_273, %c0_274, %c0_275] : memref<4x32x2xf32, #tpu.memory_space<vmem>>, vector<1x32x2xf32>
    %454 = vector.shape_cast %453 : vector<1x32x2xf32> to vector<32x2xf32>
    %455 = vector.broadcast %452 : vector<1x2xf32> to vector<32x2xf32>
    %456 = arith.mulf %454, %455 : vector<32x2xf32>
    %cst_276 = arith.constant dense<0.000000e+00> : vector<32xf32>
    %457 = vector.multi_reduction <add>, %456, %cst_276 [1] : vector<32x2xf32> to vector<32xf32>
    %458 = vector.shape_cast %457 : vector<32xf32> to vector<32x1xf32>
    %c3_277 = arith.constant 3 : index
    %c0_278 = arith.constant 0 : index
    %c0_279 = arith.constant 0 : index
    %459 = vector.load %arg9[%c3_277, %c0_278, %c0_279] : memref<4x32x1xf32, #tpu.memory_space<vmem>>, vector<1x32x1xf32>
    %460 = vector.shape_cast %459 : vector<1x32x1xf32> to vector<32x1xf32>
    %461 = arith.addf %458, %460 : vector<32x1xf32>
    %cst_280 = arith.constant 0.000000e+00 : f32
    %462 = vector.broadcast %cst_280 : f32 to vector<32x1xf32>
    %463 = arith.subf %462, %461 : vector<32x1xf32>
    %464 = math.exp %463 : vector<32x1xf32>
    %cst_281 = arith.constant 1.000000e+00 : f32
    %465 = vector.broadcast %cst_281 : f32 to vector<32x1xf32>
    %466 = arith.addf %465, %464 : vector<32x1xf32>
    %cst_282 = arith.constant 1.000000e+00 : f32
    %467 = vector.broadcast %cst_282 : f32 to vector<32x1xf32>
    %468 = arith.divf %467, %466 : vector<32x1xf32>
    %469 = vector.broadcast %468 : vector<32x1xf32> to vector<32x256xf32>
    %470 = arith.mulf %434, %469 : vector<32x256xf32>
    %c0_283 = arith.constant 0 : index
    %c0_284 = arith.constant 0 : index
    %c0_285 = arith.constant 0 : index
    %471 = vector.load %arg10[%c0_283, %c0_284, %c0_285] : memref<1x32x256xf32, #tpu.memory_space<vmem>>, vector<1x32x256xf32>
    %472 = vector.shape_cast %471 : vector<1x32x256xf32> to vector<32x256xf32>
    %473 = vector.shape_cast %470 : vector<32x256xf32> to vector<1x32x256xf32>
    tpu.vector_store %arg10[%c0_283, %c0_284, %c0_285], %473 {strides = array<i32>} : memref<1x32x256xf32, #tpu.memory_space<vmem>>, vector<1x32x256xf32>,
    return
  }
  func.func @transform_0(%arg0: i32) -> (i32, i32, i32) {
    %c0_i32 = arith.constant 0 : i32
    %c0_i32_0 = arith.constant 0 : i32
    %c0_i32_1 = arith.constant 0 : i32
    return %arg0, %c0_i32, %c0_i32_0 : i32, i32, i32
  }
  func.func @transform_1(%arg0: i32) -> (i32, i32, i32) {
    %c0_i32 = arith.constant 0 : i32
    %c0_i32_0 = arith.constant 0 : i32
    %c0_i32_1 = arith.constant 0 : i32
    %c0_i32_2 = arith.constant 0 : i32
    return %c0_i32, %c0_i32_0, %c0_i32_1 : i32, i32, i32
  }
  func.func @transform_2(%arg0: i32) -> (i32, i32, i32) {
    %c0_i32 = arith.constant 0 : i32
    %c0_i32_0 = arith.constant 0 : i32
    %c0_i32_1 = arith.constant 0 : i32
    %c0_i32_2 = arith.constant 0 : i32
    return %c0_i32, %c0_i32_0, %c0_i32_1 : i32, i32, i32
  }
  func.func @transform_3(%arg0: i32) -> (i32, i32, i32) {
    %c0_i32 = arith.constant 0 : i32
    %c0_i32_0 = arith.constant 0 : i32
    %c0_i32_1 = arith.constant 0 : i32
    %c0_i32_2 = arith.constant 0 : i32
    return %c0_i32, %c0_i32_0, %c0_i32_1 : i32, i32, i32
  }
  func.func @transform_4(%arg0: i32) -> (i32, i32, i32) {
    %c0_i32 = arith.constant 0 : i32
    %c0_i32_0 = arith.constant 0 : i32
    %c0_i32_1 = arith.constant 0 : i32
    %c0_i32_2 = arith.constant 0 : i32
    return %c0_i32, %c0_i32_0, %c0_i32_1 : i32, i32, i32
  }
  func.func @transform_5(%arg0: i32) -> (i32, i32, i32) {
    %c0_i32 = arith.constant 0 : i32
    %c0_i32_0 = arith.constant 0 : i32
    %c0_i32_1 = arith.constant 0 : i32
    %c0_i32_2 = arith.constant 0 : i32
    return %c0_i32, %c0_i32_0, %c0_i32_1 : i32, i32, i32
  }
  func.func @transform_6(%arg0: i32) -> (i32, i32, i32) {
    %c0_i32 = arith.constant 0 : i32
    %c0_i32_0 = arith.constant 0 : i32
    %c0_i32_1 = arith.constant 0 : i32
    %c0_i32_2 = arith.constant 0 : i32
    return %c0_i32, %c0_i32_0, %c0_i32_1 : i32, i32, i32
  }
  func.func @transform_7(%arg0: i32) -> (i32, i32, i32) {
    %c0_i32 = arith.constant 0 : i32
    %c0_i32_0 = arith.constant 0 : i32
    %c0_i32_1 = arith.constant 0 : i32
    %c0_i32_2 = arith.constant 0 : i32
    return %c0_i32, %c0_i32_0, %c0_i32_1 : i32, i32, i32
  }
  func.func @transform_8(%arg0: i32) -> (i32, i32, i32) {
    %c0_i32 = arith.constant 0 : i32
    %c0_i32_0 = arith.constant 0 : i32
    %c0_i32_1 = arith.constant 0 : i32
    %c0_i32_2 = arith.constant 0 : i32
    return %c0_i32, %c0_i32_0, %c0_i32_1 : i32, i32, i32
  }
  func.func @transform_9(%arg0: i32) -> (i32, i32, i32) {
    %c0_i32 = arith.constant 0 : i32
    %c0_i32_0 = arith.constant 0 : i32
    %c0_i32_1 = arith.constant 0 : i32
    return %arg0, %c0_i32, %c0_i32_0 : i32, i32, i32
  }
}

</mosaic_0001>

<bundles_post_ra>
// kernel: fbm_forward.1
= control target key start
LH: loop header
LB: loop body
LE: loop exit
PB: predicated region body
PF: predicated region fallthrough
CT: control target
= control target key end

     0   :  { %s8021_s30 = smov 0   ;;  %s11045_s0 = inlined_call_operand.vmem [shape: f32[8,32,256], index: 0, kind: input, shape index: {}]   ;;  %s11046_s1 = inlined_call_operand.vmem [shape: f32[4,32,288], index: 1, kind: input, shape index: {}]   ;;  %s11047_s2 = inlined_call_operand.vmem [shape: f32[4,32,1], index: 2, kind: input, shape index: {}]   ;;  %s11048_s3 = inlined_call_operand.vmem [shape: f32[4,32,288], index: 3, kind: input, shape index: {}]   ;;  %s11049_s4 = inlined_call_operand.vmem [shape: f32[4,32,1], index: 4, kind: input, shape index: {}]   ;;  %s11050_s5 = inlined_call_operand.vmem [shape: f32[4,32,2], index: 5, kind: input, shape index: {}]   ;;  %s11051_s6 = inlined_call_operand.vmem [shape: f32[4,1,2], index: 6, kind: input, shape index: {}]   ;;  %s11052_s7 = inlined_call_operand.vmem [shape: f32[4,32,2], index: 7, kind: input, shape index: {}]   ;;  %s11053_s8 = inlined_call_operand.vmem [shape: f32[4,32,1], index: 8, kind: input, shape index: {}]   ;;  %s11054_s9 = inlined_call_operand.vmem [shape: f32[8,32,256], index: 9, kind: output, shape index: {}]  }
   0x1 LB: > { %s5025_s10 = sadd.s32 4294967295, %s7959_s30   ;;  %p5029_p0 = scmp.ge.s32.totalorder %s7959_s30, 1  ;;  %s7959_s30 = sphi %s8021_s30, %s19_s30  }
   0x2   : > { %p287_p1 = scmp.lt.s32.totalorder %s7959_s30, 9 }
   0x4   : > { %p288_p2 = pnand %p5029_p0, %p287_p1 }
   0x5   : > { %p323_p3 = scmp.lt.s32.totalorder (!%p288_p2), %s5025_s10, 7  ;;  %s7961_s15 = smov (!%p288_p2), 17   ;;  %v385_v12 = vld [vmem:[%s11046_s1 + $0x8] sm:$0xff] (!%p288_p2)  ;;  %v396_v13 = vld [vmem:[%s11047_s2] sm:$0xff] (!%p288_p2)  ;;  %v7969_v15 = vmov (!%p288_p2), 0   ;;  %v398_v16 = vld [vmem:[%s11047_s2 + $0x10] sm:$0xff] (!%p288_p2)  ;;  %v341_v18 = vlaneseq (!%p288_p2) }
   0x6   : > { %291 = sbr.rel (%p288_p2) target bundleno = 5392 (0x1510), region = 56  ;;  %s7962_s16 = smov (!%p288_p2), 16   ;;  %761 = vmatprep.mubr.f32.mxu0 (!%p288_p2), %v385_v12  ;;  %v397_v14 = vld [vmem:[%s11047_s2 + $0x8] sm:$0xff] (!%p288_p2)  ;;  %6759 = vset.pattern.permute.xlu0 (!%p288_p2), %v7969_v15  ;;  %v399_v17 = vld [vmem:[%s11047_s2 + $0x18] sm:$0xff] (!%p288_p2) }
   0x7   : > { %s7963_s17 = smov (!%p288_p2), 15   ;;  %s7964_s18 = smov (!%p288_p2), 1   ;;  %6760 = vset.pattern.permute.xlu1 (!%p288_p2), %v7969_v15  ;;  %v8119_v19 = vand.u32 (!%p288_p2), 127, %v341_v18 }
   0x8   : > { %s7965_s19 = smov (!%p288_p2), 127   ;;  %s7966_s20 = smov (!%p288_p2), 113  }
   0x9   : > { %s7967_s21 = smov (!%p288_p2), 112   ;;  %s7968_s22 = smov (!%p288_p2), 111   ;;  %v8122_v20 = vadd.s32 (!%p288_p2), 128, %v8119_v19  ;;  %v348_v21 = vand.u32 (!%p288_p2), 15, %v8119_v19  ;;  %vm368_vm0 = vcmp.ge.s32.totalorder (!%p288_p2), %v8119_v19, 16  ;;  %vm416_vm2 = vcmp.lt.s32.totalorder (!%p288_p2), %v8119_v19, 17 }
   0xa   : > { %vm11061_vm5 = vcmp.lt.s32.totalorder (!%p288_p2), %v8119_v19, 16  ;;  %vm11058_vm8 = vcmp.lt.s32.totalorder (!%p288_p2), %v8119_v19, 15  ;;  %vm8200_vm9 = vmpackc.low (!%p288_p2), %vm368_vm0, %vm368_vm0  ;;  %vm11055_vm14 = vcmp.lt.s32.totalorder (!%p288_p2), %v8119_v19, 1 }
   0xb   : > { %v355_v24 = vand.u32 (!%p288_p2), 15, %v8122_v20  ;;  %vm8129_vm1 = vcmp.ge.s32.totalorder (!%p288_p2), %v348_v21, 1  ;;  %vm8212_vm11 = vcmp.lt.s32.totalorder (!%p288_p2), %v348_v21, 15 }
   0xc   : > { %vm372_vm4 = vmand (!%p288_p2), %vm368_vm0, %vm8129_vm1 }
   0xd   : > { %s11513_s10 = smov (!%p323_p3, %s5025_s10), 7  ;;  %vm8136_vm3 = vcmp.ge.s32.totalorder %v355_v24, 1  ;;  %vm8164_vm7 = vmpackc.low %vm372_vm4, %vm372_vm4  ;;  %vm8206_vm10 = vcmp.lt.s32.totalorder %v355_v24, 15  ;;  %vm11057_vm4 = vcmp.lt.s32.totalorder %v8119_v19, 113 }
   0xe   : > { %s5651_s11 = sshll.u32 %s11513_s10, 6  ;;  %vm8156_vm6 = vmpackc.low %vm8136_vm3, %vm8136_vm3 }
   0xf   : > { %s8037_s14 = scalar_lea.vmem %s11045_s0, %s5651_s11  ;;  %vm8229_vm12 = vmpackc.low %vm8206_vm10, %vm8206_vm10 }
  0x10   : > { %v8040_v0 = vld [vmem:[%s8037_s14 + $0x20] sm:$0xff]  ;;  %v8043_v1 = vld [vmem:[%s8037_s14 + $0x30] sm:$0xff]  ;;  %v8054_v5 = vld [vmem:[%s8037_s14 + $0x28] sm:$0xff] }
  0x11   : > { %v8046_v2 = vld [vmem:[%s8037_s14] sm:$0xff]  ;;  %v6609_v3 = vpack.i.bf16 %v8043_v1, %v8040_v0  ;;  %v8051_v4 = vld [vmem:[%s8037_s14 + $0x10] sm:$0xff]  ;;  %v8057_v6 = vld [vmem:[%s8037_s14 + $0x38] sm:$0xff] }
  0x12   : > { %v6599_v7 = vpack.i.bf16 %v8051_v4, %v8046_v2  ;;  %v8062_v8 = vld [vmem:[%s8037_s14 + $0x8] sm:$0xff]  ;;  %v8065_v9 = vld [vmem:[%s8037_s14 + $0x18] sm:$0xff]  ;;  %v6614_v10 = vpack.i.bf16 %v8057_v6, %v8054_v5  ;;  %vm376_vm13 = vmand %vm368_vm0, %vm8212_vm11 }
  0x13   : > { %6610 = vrot.lane.b32.xlu1 %v6609_v3, %s7961_s15  ;;  %v6604_v11 = vpack.i.bf16 %v8065_v9, %v8062_v8  ;;  %vm8250_vm15 = vmpackc.low %vm376_vm13, %vm376_vm13  ;;  %vm379_vm13 = vcmp.lt.s32.totalorder %v8122_v20, 240 }
  0x14   : > { %6600 = vrot.lane.b32.xlu0 %v6599_v7, %s7961_s15  ;;  %vm8275_vm0 = vmpackc.low %vm8129_vm1, %vm8129_vm1  ;;  %vm11056_vm1 = vcmp.lt.s32.totalorder %v8119_v19, 127 }
  0x17   : > { %6615 = vrot.lane.b32.xlu1 %v6614_v10, %s7961_s15 }
  0x18   : > { %6605 = vrot.lane.b32.xlu0 %v6604_v11, %s7961_s15 }
  0x1b   : > { %6625 = vrot.lane.b32.xlu1 %v6604_v11, %s7962_s16 }
  0x1c   : > { %6620 = vrot.lane.b32.xlu0 %v6599_v7, %s7962_s16 }
  0x1f   : > { %6635 = vrot.lane.b32.xlu1 %v6614_v10, %s7962_s16 }
  0x20   : > { %6630 = vrot.lane.b32.xlu0 %v6609_v3, %s7962_s16 }
  0x23   : > { %6645 = vrot.lane.b32.xlu1 %v6604_v11, %s7963_s17 }
  0x24   : > { %6640 = vrot.lane.b32.xlu0 %v6599_v7, %s7963_s17 }
  0x27   : > { %6655 = vrot.lane.b32.xlu1 %v6614_v10, %s7963_s17 }
  0x28   : > { %6650 = vrot.lane.b32.xlu0 %v6609_v3, %s7963_s17 }
  0x2b   : > { %6665 = vrot.lane.b32.xlu1 %v6604_v11, %s7964_s18 }
  0x2c   : > { %6660 = vrot.lane.b32.xlu0 %v6599_v7, %s7964_s18 }
  0x2f   : > { %6675 = vrot.lane.b32.xlu1 %v6614_v10, %s7964_s18 }
  0x30   : > { %6670 = vrot.lane.b32.xlu0 %v6609_v3, %s7964_s18 }
  0x33   : > { %6685 = vrot.lane.b32.xlu1 %v6604_v11, %s7965_s19 }
  0x34   : > { %6680 = vrot.lane.b32.xlu0 %v6599_v7, %s7965_s19 }
  0x37   : > { %6695 = vrot.lane.b32.xlu1 %v6614_v10, %s7965_s19 }
  0x38   : > { %6690 = vrot.lane.b32.xlu0 %v6609_v3, %s7965_s19 }
  0x3b   : > { %6705 = vrot.lane.b32.xlu1 %v6604_v11, %s7966_s20 }
  0x3c   : > { %6700 = vrot.lane.b32.xlu0 %v6599_v7, %s7966_s20 }
  0x3f   : > { %6715 = vrot.lane.b32.xlu1 %v6614_v10, %s7966_s20 }
  0x40   : > { %6710 = vrot.lane.b32.xlu0 %v6609_v3, %s7966_s20 }
  0x43   : > { %6725 = vrot.lane.b32.xlu1 %v6604_v11, %s7967_s21 }
  0x44   : > { %6720 = vrot.lane.b32.xlu0 %v6599_v7, %s7967_s21 }
  0x47   : > { %6735 = vrot.lane.b32.xlu1 %v6614_v10, %s7967_s21 }
  0x48   : > { %6730 = vrot.lane.b32.xlu0 %v6609_v3, %s7967_s21 }
  0x4b   : > { %6745 = vrot.lane.b32.xlu1 %v6604_v11, %s7968_s22 }
  0x4c   : > { %6740 = vrot.lane.b32.xlu0 %v6599_v7, %s7968_s22 }
  0x4f   : > { %6755 = vrot.lane.b32.xlu1 %v6614_v10, %s7968_s22 }
  0x50   : > { %6750 = vrot.lane.b32.xlu0 %v6609_v3, %s7968_s22 }
  0x53   : > { %671 = vperm.xlu1 %6760, %v397_v14  }
  0x54   : > { %666 = vperm.xlu0 %6759, %v396_v13  }
  0x57   : > { %676 = vperm.xlu1 %6760, %v398_v16  }
  0x58   : > { %681 = vperm.xlu0 %6759, %v399_v17  }
  0x85   : > { %v6611_v22 = vpop.permute.xlu1 %6610 }
  0x86   : > { %v6601_v23 = vpop.permute.xlu0 %6600  ;;  %v6613_v25 = vunpack.i.h.bf16 %v6611_v22  ;;  %v6612_v26 = vunpack.i.l.bf16 %v6611_v22 }
  0x87   : > { %v6603_v33 = vunpack.i.h.bf16 %v6601_v23  ;;  %v6602_v34 = vunpack.i.l.bf16 %v6601_v23 }
  0x89   : > { %v6616_v28 = vpop.permute.xlu1 %6615 }
  0x8a   : > { %v6618_v29 = vunpack.i.h.bf16 %v6616_v28  ;;  %v6617_v30 = vunpack.i.l.bf16 %v6616_v28  ;;  %v6606_v31 = vpop.permute.xlu0 %6605 }
  0x8b   : > { %v6608_v35 = vunpack.i.h.bf16 %v6606_v31  ;;  %v6607_v36 = vunpack.i.l.bf16 %v6606_v31 }
  0x8c   : > { %v419_v37 = vsel %vm416_vm2, %v6612_v26, %v6617_v30  ;;  %v420_v38 = vsel %vm416_vm2, %v6613_v25, %v6618_v29  ;;  %v423_v53 = vsel %vm416_vm2, %v6617_v30, %v6612_v26  ;;  %v424_v54 = vsel %vm416_vm2, %v6618_v29, %v6613_v25 }
  0x8d   : > { %v417_v39 = vsel %vm416_vm2, %v6602_v34, %v6607_v36  ;;  %v418_v40 = vsel %vm416_vm2, %v6603_v33, %v6608_v35  ;;  %v421_v42 = vsel %vm416_vm2, %v6607_v36, %v6602_v34  ;;  %v422_v43 = vsel %vm416_vm2, %v6608_v35, %v6603_v33  ;;  %v6626_v44 = vpop.permute.xlu1 %6625 }
  0x8e   : > { %v5653_v45 = vpack.c.bf16 %v418_v40, %v417_v39  ;;  %v5656_v46 = vpack.c.bf16 %v422_v43, %v421_v42  ;;  %v6628_v48 = vunpack.i.h.bf16 %v6626_v44  ;;  %v6627_v49 = vunpack.i.l.bf16 %v6626_v44  ;;  %v6621_v50 = vpop.permute.xlu0 %6620 }
  0x8f   : > { %v6623_v51 = vunpack.i.h.bf16 %v6621_v50  ;;  %v6622_v52 = vunpack.i.l.bf16 %v6621_v50  ;;  %v5659_v55 = vpack.c.bf16 %v420_v38, %v419_v37  ;;  %v5662_v7 = vpack.c.bf16 %v424_v54, %v423_v53 }
  0x90   : > { %5655 = vmatprep.subr.msk.bf16.mxu0 %vm8156_vm6, %v5653_v45 }
  0x91   : > { %5658 = vmatpush1.bf16.msk.msra.mxu0 %vm8164_vm7, %v5656_v46  ;;  %v455_v56 = vsel %vm11061_vm5, %v6628_v48, %v6623_v51  ;;  %v6636_v57 = vpop.permute.xlu1 %6635  ;;  %v450_v58 = vsel %vm11061_vm5, %v6622_v52, %v6627_v49  ;;  %v451_v59 = vsel %vm11061_vm5, %v6623_v51, %v6628_v48  ;;  %v454_v60 = vsel %vm11061_vm5, %v6627_v49, %v6622_v52 }
  0x92   : > { %5661 = vmatprep.subr.msk.bf16.mxu0 %vm8156_vm6, %v5659_v55  ;;  %v6638_v61 = vunpack.i.h.bf16 %v6636_v57  ;;  %v6637_v62 = vunpack.i.l.bf16 %v6636_v57  ;;  %v6631_v63 = vpop.permute.xlu0 %6630  ;;  %v5665_v3 = vpack.c.bf16 %v451_v59, %v450_v58  ;;  %v5667_v13 = vpack.c.bf16 %v455_v56, %v454_v60 }
  0x93   : > { %v6633_v10 = vunpack.i.h.bf16 %v6631_v63  ;;  %v6632_v11 = vunpack.i.l.bf16 %v6631_v63 }
  0x95   : > { %5664 = vmatpush1.bf16.msk.msra.mxu0 %vm8164_vm7, %v5662_v7  ;;  %v457_v12 = vsel %vm11061_vm5, %v6638_v61, %v6633_v10  ;;  %v6646_v14 = vpop.permute.xlu1 %6645  ;;  %v452_v15 = vsel %vm11061_vm5, %v6632_v11, %v6637_v62  ;;  %v453_v16 = vsel %vm11061_vm5, %v6633_v10, %v6638_v61  ;;  %v456_v17 = vsel %vm11061_vm5, %v6637_v62, %v6632_v11 }
  0x96   : > { %5666 = vmatprep.subr.bf16.mxu0 %v5665_v3  ;;  %v6648_v23 = vunpack.i.h.bf16 %v6646_v14  ;;  %v6647_v25 = vunpack.i.l.bf16 %v6646_v14  ;;  %v6641_v26 = vpop.permute.xlu0 %6640  ;;  %v5670_v28 = vpack.c.bf16 %v453_v16, %v452_v15  ;;  %v5672_v36 = vpack.c.bf16 %v457_v12, %v456_v17 }
  0x97   : > { %v6643_v29 = vunpack.i.h.bf16 %v6641_v26  ;;  %v6642_v30 = vunpack.i.l.bf16 %v6641_v26 }
  0x99   : > { %5669 = vmatpush1.bf16.msk.msra.mxu0 %vm8200_vm9, %v5667_v13  ;;  %v484_v34 = vsel %vm11058_vm8, %v6643_v29, %v6648_v23  ;;  %v488_v35 = vsel %vm11058_vm8, %v6648_v23, %v6643_v29  ;;  %v483_v24 = vsel %vm11058_vm8, %v6642_v30, %v6647_v25  ;;  %v6656_v37 = vpop.permute.xlu1 %6655  ;;  %v487_v21 = vsel %vm11058_vm8, %v6647_v25, %v6642_v30 }
  0x9a   : > { %5671 = vmatprep.subr.bf16.mxu0 %v5670_v28  ;;  %v6658_v38 = vunpack.i.h.bf16 %v6656_v37  ;;  %v6657_v39 = vunpack.i.l.bf16 %v6656_v37  ;;  %v6651_v40 = vpop.permute.xlu0 %6650  ;;  %v5675_v42 = vpack.c.bf16 %v484_v34, %v483_v24  ;;  %v5678_v50 = vpack.c.bf16 %v488_v35, %v487_v21 }
  0x9b   : > { %v6653_v44 = vunpack.i.h.bf16 %v6651_v40  ;;  %v6652_v45 = vunpack.i.l.bf16 %v6651_v40  ;;  %v5699_v35 = vpack.c.bf16 %v8065_v9, %v8062_v8  ;;  %v5701_v40 = vpack.c.bf16 %v8051_v4, %v8046_v2 }
  0x9d   : > { %5674 = vmatpush1.bf16.msk.msra.mxu0 %vm8200_vm9, %v5672_v36  ;;  %v486_v46 = vsel %vm11058_vm8, %v6653_v44, %v6658_v38  ;;  %v490_v48 = vsel %vm11058_vm8, %v6658_v38, %v6653_v44  ;;  %v485_v49 = vsel %vm11058_vm8, %v6652_v45, %v6657_v39  ;;  %v6666_v51 = vpop.permute.xlu1 %6665  ;;  %v489_v52 = vsel %vm11058_vm8, %v6657_v39, %v6652_v45  ;;  %vm383_vm8 = vmand %vm379_vm13, %vm8206_vm10 }
  0x9e   : > { %5677 = vmatprep.subr.msk.bf16.mxu0 %vm8229_vm12, %v5675_v42  ;;  %v6668_v54 = vunpack.i.h.bf16 %v6666_v51  ;;  %v6667_v55 = vunpack.i.l.bf16 %v6666_v51  ;;  %v6661_v56 = vpop.permute.xlu0 %6660  ;;  %v5681_v57 = vpack.c.bf16 %v486_v46, %v485_v49  ;;  %v5684_v63 = vpack.c.bf16 %v490_v48, %v489_v52 }
  0x9f   : > { %v6663_v58 = vunpack.i.h.bf16 %v6661_v56  ;;  %v6662_v59 = vunpack.i.l.bf16 %v6661_v56  ;;  %v5703_v44 = vpack.c.bf16 %v8057_v6, %v8054_v5  ;;  %v5705_v51 = vpack.c.bf16 %v8043_v1, %v8040_v0 }
  0xa1   : > { %5680 = vmatpush1.bf16.msk.msra.mxu0 %vm8250_vm15, %v5678_v50  ;;  %v517_v60 = vsel %vm11055_vm14, %v6663_v58, %v6668_v54  ;;  %v521_v61 = vsel %vm11055_vm14, %v6668_v54, %v6663_v58  ;;  %v516_v62 = vsel %vm11055_vm14, %v6662_v59, %v6667_v55  ;;  %v6676_v3 = vpop.permute.xlu1 %6675  ;;  %v520_v7 = vsel %vm11055_vm14, %v6667_v55, %v6662_v59 }
  0xa2   : > { %5683 = vmatprep.subr.msk.bf16.mxu0 %vm8229_vm12, %v5681_v57  ;;  %v6678_v10 = vunpack.i.h.bf16 %v6676_v3  ;;  %v6677_v11 = vunpack.i.l.bf16 %v6676_v3  ;;  %v6671_v12 = vpop.permute.xlu0 %6670  ;;  %v5687_v13 = vpack.c.bf16 %v517_v60, %v516_v62  ;;  %v5690_v23 = vpack.c.bf16 %v521_v61, %v520_v7  ;;  %v5562_v61 = vld [vmem:[%s11048_s3 + $0x130] sm:$0xff] }
  0xa3   : > { %v6673_v14 = vunpack.i.h.bf16 %v6671_v12  ;;  %v6672_v15 = vunpack.i.l.bf16 %v6671_v12 }
  0xa5   : > { %5686 = vmatpush1.bf16.msk.msra.mxu0 %vm8250_vm15, %v5684_v63  ;;  %v519_v16 = vsel %vm11055_vm14, %v6673_v14, %v6678_v10  ;;  %v518_v17 = vsel %vm11055_vm14, %v6672_v15, %v6677_v11  ;;  %v6686_v25 = vpop.permute.xlu1 %6685  ;;  %v523_v28 = vsel %vm11055_vm14, %v6678_v10, %v6673_v14  ;;  %v522_v29 = vsel %vm11055_vm14, %v6677_v11, %v6672_v15  ;;  %vm8319_vm14 = vmpackc.low %vm8212_vm11, %vm8212_vm11  ;;  %v5569_v14 = vld [vmem:[%s11048_s3 + $0x168] sm:$0xff] }
  0xa6   : > { %5689 = vmatprep.subr.msk.bf16.mxu0 %vm8156_vm6, %v5687_v13  ;;  %v5693_v30 = vpack.c.bf16 %v519_v16, %v518_v17  ;;  %v6681_v34 = vpop.permute.xlu0 %6680  ;;  %v5696_v27 = vpack.c.bf16 %v523_v28, %v522_v29  ;;  %v6688_v36 = vunpack.i.h.bf16 %v6686_v25  ;;  %v6687_v37 = vunpack.i.l.bf16 %v6686_v25  ;;  %vm8335_vm11 = vmand %vm379_vm13, %vm8136_vm3 }
  0xa7   : > { %v6683_v21 = vunpack.i.h.bf16 %v6681_v34  ;;  %v6682_v38 = vunpack.i.l.bf16 %v6681_v34  ;;  %vm11059_vm3 = vcmp.lt.s32.totalorder %v8119_v19, 112 }
  0xa9   : > { %5692 = vmatpush1.bf16.msk.msra.mxu0 %vm8275_vm0, %v5690_v23  ;;  %v6696_v24 = vpop.permute.xlu1 %6695  ;;  %v554_v8 = vsel %vm11056_vm1, %v6688_v36, %v6683_v21  ;;  %v553_v9 = vsel %vm11056_vm1, %v6687_v37, %v6682_v38  ;;  %v550_v2 = vsel %vm11056_vm1, %v6683_v21, %v6688_v36  ;;  %v549_v4 = vsel %vm11056_vm1, %v6682_v38, %v6687_v37 }
  0xaa   : > { %5695 = vmatprep.subr.msk.bf16.mxu0 %vm8156_vm6, %v5693_v30  ;;  %v6691_v39 = vpop.permute.xlu0 %6690  ;;  %v6698_v46 = vunpack.i.h.bf16 %v6696_v24  ;;  %v6697_v48 = vunpack.i.l.bf16 %v6696_v24  ;;  %v5707_v52 = vpack.c.bf16 %v554_v8, %v553_v9  ;;  %v5710_v1 = vpack.c.bf16 %v550_v2, %v549_v4 }
  0xab   : > { %v6693_v49 = vunpack.i.h.bf16 %v6691_v39  ;;  %v6692_v50 = vunpack.i.l.bf16 %v6691_v39 }
  0xad   : > { %5698 = vmatpush1.bf16.msk.msra.mxu0 %vm8275_vm0, %v5696_v27  ;;  %v6706_v42 = vpop.permute.xlu1 %6705  ;;  %v556_v58 = vsel %vm11056_vm1, %v6698_v46, %v6693_v49  ;;  %v555_v59 = vsel %vm11056_vm1, %v6697_v48, %v6692_v50  ;;  %v552_v0 = vsel %vm11056_vm1, %v6693_v49, %v6698_v46  ;;  %v551_v62 = vsel %vm11056_vm1, %v6692_v50, %v6697_v48  ;;  %vm8355_vm1 = vmpackc.low %vm8335_vm11, %vm8335_vm11 }
  0xae   : > { %5700 = vmatprep.subr.bf16.mxu0 %v5699_v35  ;;  %v6701_v45 = vpop.permute.xlu0 %6700  ;;  %v6708_v55 = vunpack.i.h.bf16 %v6706_v42  ;;  %v6707_v5 = vunpack.i.l.bf16 %v6706_v42  ;;  %v5713_v7 = vpack.c.bf16 %v556_v58, %v555_v59  ;;  %v5716_v17 = vpack.c.bf16 %v552_v0, %v551_v62 }
  0xaf   : > { %v6703_v6 = vunpack.i.h.bf16 %v6701_v45  ;;  %v6702_v56 = vunpack.i.l.bf16 %v6701_v45  ;;  %vm11060_vm11 = vcmp.lt.s32.totalorder %v8119_v19, 111 }
  0xb1   : > { %5702 = vmatpush1.bf16.msra.mxu0 %v5701_v40  ;;  %v6716_v54 = vpop.permute.xlu1 %6715  ;;  %v587_v63 = vsel %vm11057_vm4, %v6708_v55, %v6703_v6  ;;  %v586_v3 = vsel %vm11057_vm4, %v6707_v5, %v6702_v56  ;;  %v583_v15 = vsel %vm11057_vm4, %v6703_v6, %v6708_v55  ;;  %v582_v16 = vsel %vm11057_vm4, %v6702_v56, %v6707_v5  ;;  %v5560_v6 = vld [vmem:[%s11048_s3 + $0x120] sm:$0xff] }
  0xb2   : > { %5704 = vmatprep.subr.bf16.mxu0 %v5703_v44  ;;  %v6711_v57 = vpop.permute.xlu0 %6710  ;;  %v6718_v33 = vunpack.i.h.bf16 %v6716_v54  ;;  %v6717_v11 = vunpack.i.l.bf16 %v6716_v54  ;;  %v5719_v23 = vpack.c.bf16 %v587_v63, %v586_v3  ;;  %v5722_v37 = vpack.c.bf16 %v583_v15, %v582_v16  ;;  %v384_v16 = vld [vmem:[%s11046_s1] sm:$0xff] }
  0xb3   : > { %v6713_v12 = vunpack.i.h.bf16 %v6711_v57  ;;  %v6712_v13 = vunpack.i.l.bf16 %v6711_v57 }
  0xb5   : > { %5706 = vmatpush1.bf16.msra.mxu0 %v5705_v51  ;;  %v6726_v60 = vpop.permute.xlu1 %6725  ;;  %v589_v27 = vsel %vm11057_vm4, %v6718_v33, %v6713_v12  ;;  %v588_v35 = vsel %vm11057_vm4, %v6717_v11, %v6712_v13  ;;  %v585_v36 = vsel %vm11057_vm4, %v6713_v12, %v6718_v33  ;;  %v584_v21 = vsel %vm11057_vm4, %v6712_v13, %v6717_v11  ;;  %vm8387_vm4 = vmpackc.low %vm379_vm13, %vm379_vm13 }
  0xb6   : > { %5709 = vmatprep.subr.msk.bf16.mxu0 %vm8229_vm12, %v5707_v52  ;;  %v6721_v10 = vpop.permute.xlu0 %6720  ;;  %v6728_v32 = vunpack.i.h.bf16 %v6726_v60  ;;  %v6727_v25 = vunpack.i.l.bf16 %v6726_v60  ;;  %v5725_v40 = vpack.c.bf16 %v589_v27, %v588_v35  ;;  %v5728_v48 = vpack.c.bf16 %v585_v36, %v584_v21  ;;  %v394_v27 = vld [vmem:[%s11046_s1 + $0x50] sm:$0xff]  ;;  %v393_v35 = vld [vmem:[%s11046_s1 + $0x48] sm:$0xff] }
  0xb7   : > { %v6723_v28 = vunpack.i.h.bf16 %v6721_v10  ;;  %v6722_v29 = vunpack.i.l.bf16 %v6721_v10  ;;  %v7970_v36 = vmov 0.0   ;;  %v389_v21 = vld [vmem:[%s11046_s1 + $0x28] sm:$0xff] }
  0xb9   : > { %5712 = vmatpush1.bf16.msk.msra.mxu0 %vm8319_vm14, %v5710_v1  ;;  %v6736_v30 = vpop.permute.xlu1 %6735  ;;  %v620_v38 = vsel %vm11059_vm3, %v6728_v32, %v6723_v28  ;;  %v619_v39 = vsel %vm11059_vm3, %v6727_v25, %v6722_v29  ;;  %v615_v50 = vsel %vm11059_vm3, %v6722_v29, %v6727_v25  ;;  %v616_v2 = vsel %vm11059_vm3, %v6723_v28, %v6728_v32  ;;  %v388_v32 = vld [vmem:[%s11046_s1 + $0x20] sm:$0xff]  ;;  %v387_v29 = vld [vmem:[%s11046_s1 + $0x18] sm:$0xff] }
  0xba   : > { %5715 = vmatprep.subr.msk.bf16.mxu0 %vm8229_vm12, %v5713_v7  ;;  %v6731_v34 = vpop.permute.xlu0 %6730  ;;  %v6738_v9 = vunpack.i.h.bf16 %v6736_v30  ;;  %v6737_v44 = vunpack.i.l.bf16 %v6736_v30  ;;  %v5731_v49 = vpack.c.bf16 %v620_v38, %v619_v39  ;;  %v5734_v58 = vpack.c.bf16 %v616_v2, %v615_v50  ;;  %v391_v30 = vld [vmem:[%s11046_s1 + $0x38] sm:$0xff]  ;;  %v392_v38 = vld [vmem:[%s11046_s1 + $0x40] sm:$0xff] }
  0xbb   : > { %v6733_v45 = vunpack.i.h.bf16 %v6731_v34  ;;  %v6732_v46 = vunpack.i.l.bf16 %v6731_v34  ;;  %v390_v34 = vld [vmem:[%s11046_s1 + $0x30] sm:$0xff]  ;;  %v395_v39 = vld [vmem:[%s11046_s1 + $0x58] sm:$0xff] }
  0xbd   : > { %5718 = vmatpush1.bf16.msk.msra.mxu0 %vm8319_vm14, %v5716_v17  ;;  %v6746_v42 = vpop.permute.xlu1 %6745  ;;  %v622_v55 = vsel %vm11059_vm3, %v6738_v9, %v6733_v45  ;;  %v621_v5 = vsel %vm11059_vm3, %v6737_v44, %v6732_v46  ;;  %v617_v59 = vsel %vm11059_vm3, %v6732_v46, %v6737_v44  ;;  %v618_v62 = vsel %vm11059_vm3, %v6733_v45, %v6738_v9  ;;  %vm8413_vm3 = vmpackc.low %vm383_vm8, %vm383_vm8 }
  0xbe   : > { %5721 = vmatprep.subr.msk.bf16.mxu0 %vm8355_vm1, %v5719_v23  ;;  %v6741_v8 = vpop.permute.xlu0 %6740  ;;  %v6748_v4 = vunpack.i.h.bf16 %v6746_v42  ;;  %v6747_v51 = vunpack.i.l.bf16 %v6746_v42  ;;  %v5736_v60 = vpack.c.bf16 %v622_v55, %v621_v5  ;;  %v5739_v33 = vpack.c.bf16 %v618_v62, %v617_v59 }
  0xbf   : > { %v6743_v52 = vunpack.i.h.bf16 %v6741_v8  ;;  %v6742_v54 = vunpack.i.l.bf16 %v6741_v8  ;;  %vm11062_vm8 = vcmask 261120  }
  0xc1   : > { %5724 = vmatpush1.bf16.msk.msra.mxu0 %vm8275_vm0, %v5722_v37  ;;  %v6756_v56 = vpop.permute.xlu1 %6755  ;;  %v653_v0 = vsel %vm11060_vm11, %v6748_v4, %v6743_v52  ;;  %v652_v1 = vsel %vm11060_vm11, %v6747_v51, %v6742_v54  ;;  %v649_v11 = vsel %vm11060_vm11, %v6743_v52, %v6748_v4  ;;  %v648_v12 = vsel %vm11060_vm11, %v6742_v54, %v6747_v51  ;;  %v386_v37 = vld [vmem:[%s11046_s1 + $0x10] sm:$0xff] }
  0xc2   : > { %5727 = vmatprep.subr.msk.bf16.mxu0 %vm8355_vm1, %v5725_v40  ;;  %v6751_v57 = vpop.permute.xlu0 %6750  ;;  %v6758_v63 = vunpack.i.h.bf16 %v6756_v56  ;;  %v6757_v3 = vunpack.i.l.bf16 %v6756_v56  ;;  %v5741_v13 = vpack.c.bf16 %v653_v0, %v652_v1  ;;  %v5744_v15 = vpack.c.bf16 %v649_v11, %v648_v12 }
  0xc3   : > { %v6753_v7 = vunpack.i.h.bf16 %v6751_v57  ;;  %v6752_v10 = vunpack.i.l.bf16 %v6751_v57 }
  0xc5   : > { %5730 = vmatpush1.bf16.msk.msra.mxu0 %vm8275_vm0, %v5728_v48  ;;  %v655_v20 = vsel %vm11060_vm11, %v6758_v63, %v6753_v7  ;;  %v654_v31 = vsel %vm11060_vm11, %v6757_v3, %v6752_v10  ;;  %v651_v17 = vsel %vm11060_vm11, %v6753_v7, %v6758_v63  ;;  %v650_v23 = vsel %vm11060_vm11, %v6752_v10, %v6757_v3 }
  0xc6   : > { %5733 = vmatprep.subr.msk.bf16.mxu0 %vm8387_vm4, %v5731_v49  ;;  %v5747_v25 = vpack.c.bf16 %v655_v20, %v654_v31  ;;  %v5750_v28 = vpack.c.bf16 %v651_v17, %v650_v23 }
  0xc9   : > { %5735 = vmatpush1.bf16.msra.mxu0 %v5734_v58 }
  0xca   : > { %5738 = vmatprep.subr.msk.bf16.mxu0 %vm8387_vm4, %v5736_v60 }
  0xcd   : > { %5740 = vmatpush1.bf16.msra.mxu0 %v5739_v33 }
  0xce   : > { %5743 = vmatprep.subr.msk.bf16.mxu0 %vm8413_vm3, %v5741_v13 }
  0xd0   : > { %762 = vmatmul.mubr.f32.vlgmr.msra.gmra.mrb[0].mxu0 %v384_v16 }
  0xd1   : > { %5746 = vmatpush1.bf16.msk.msra.mxu0 %vm8319_vm14, %v5744_v15  ;;  %767 = vmatprep.mubr.f32.mxu0 %v388_v32 }
  0xd2   : > { %5749 = vmatprep.subr.msk.bf16.mxu0 %vm8413_vm3, %v5747_v25  ;;  %v672_v8 = vpop.permute.xlu1 %671 }
  0xd3   : > { %v667_v40 = vpop.permute.xlu0 %666 }
  0xd4   : > { %768 = vmatmul.mubr.f32.gmra.mrb[2].mxu0 %v387_v29 }
  0xd5   : > { %773 = vmatprep.mubr.f32.mxu0 %v391_v30  ;;  %5752 = vmatpush1.bf16.msk.msra.mxu0 %vm8319_vm14, %v5750_v28 }
  0xd6   : > { %v677_v51 = vpop.permute.xlu1 %676 }
  0xd7   : > { %v682_v3 = vpop.permute.xlu0 %681 }
  0xd8   : > { %774 = vmatmul.mubr.f32.gmra.mrb[4].mxu0 %v390_v34  ;;  %v900_v34 = vld [vmem:[%s11048_s3 + $0x8] sm:$0xff] }
  0xd9   : > { %779 = vmatprep.mubr.f32.mxu0 %v394_v27  ;;  %1267 = vmatprep.mubr.f32.mxu1 %v900_v34  ;;  %v911_v27 = vld [vmem:[%s11049_s4] sm:$0xff] }
  0xdc   : > { %780 = vmatmul.mubr.f32.gmra.mrb[6].mxu0 %v393_v35  ;;  %v912_v35 = vld [vmem:[%s11049_s4 + $0x8] sm:$0xff] }
  0xdd   : > { %850 = vmatprep.mubr.f32.mxu0 %v7970_v36 }
  0xe0   : > { %5090 = vmatmul.mubr.msk.f32.vlgmr.msra.gmra.mrb[0].mxu0 %vm11062_vm8, %v386_v37  ;;  %v913_v37 = vld [vmem:[%s11049_s4 + $0x10] sm:$0xff] }
  0xe1   : > { %856 = vmatprep.mubr.f32.mxu0 %v7970_v36 }
  0xe4   : > { %5091 = vmatmul.mubr.msk.f32.gmra.mrb[2].mxu0 %vm11062_vm8, %v389_v21  ;;  %v914_v21 = vld [vmem:[%s11049_s4 + $0x18] sm:$0xff] }
  0xe5   : > { %862 = vmatprep.mubr.f32.mxu0 %v7970_v36 }
  0xe8   : > { %5092 = vmatmul.mubr.msk.f32.gmra.mrb[4].mxu0 %vm11062_vm8, %v392_v38 }
  0xe9   : > { %868 = vmatprep.mubr.f32.mxu0 %v7970_v36 }
  0xec   : > { %5093 = vmatmul.mubr.msk.f32.gmra.mrb[6].mxu0 %vm11062_vm8, %v395_v39 }
 0x1b3   : > { %v852_v42 = vpop.f32.mrb[0].mxu0 }
 0x1b4   : > { %v6453_v9 = vadd.f32 %v852_v42, %v667_v40  ;;  %v854_v44 = vpop.f32.mrb[1].mxu0 }
 0x1b5   : > { %v6454_v45 = vadd.f32 %v854_v44, %v667_v40 }
 0x1b6   : > { %v883_v48 = vmul.f32 0.1, %v6453_v9  ;;  %vm875_vm10 = vcmp.gt.f32.partialorder %v6453_v9, 0.0 }
 0x1b7   : > { %v858_v46 = vpop.f32.mrb[2].mxu0  ;;  %v884_v49 = vmul.f32 0.1, %v6454_v45  ;;  %vm876_vm13 = vcmp.gt.f32.partialorder %v6454_v45, 0.0 }
 0x1b8   : > { %v6455_v50 = vadd.f32 %v858_v46, %v672_v8  ;;  %v860_v2 = vpop.f32.mrb[3].mxu0  ;;  %v8474_v5 = vsel %vm875_vm10, %v6453_v9, %v883_v48 }
 0x1b9   : > { %v6456_v4 = vadd.f32 %v860_v2, %v672_v8  ;;  %v8476_v56 = vsel %vm876_vm13, %v6454_v45, %v884_v49 }
 0x1ba   : > { %vm877_vm11 = vcmp.gt.f32.partialorder %v6455_v50, 0.0  ;;  %v885_v52 = vmul.f32 0.1, %v6455_v50 }
 0x1bb   : > { %vm878_vm5 = vcmp.gt.f32.partialorder %v6456_v4, 0.0  ;;  %v886_v54 = vmul.f32 0.1, %v6456_v4  ;;  %v864_v55 = vpop.f32.mrb[4].mxu0 }
 0x1bc   : > { %v8478_v57 = vsel %vm877_vm11, %v6455_v50, %v885_v52  ;;  %v6457_v58 = vadd.f32 %v864_v55, %v677_v51  ;;  %v866_v59 = vpop.f32.mrb[5].mxu0 }
 0x1bd   : > { %v8480_v0 = vsel %vm878_vm5, %v6456_v4, %v886_v54  ;;  %v6458_v1 = vadd.f32 %v866_v59, %v677_v51  ;;  %v6761_v60 = vpack.i.bf16 %v8478_v57, %v8474_v5  ;;  %v5801_v28 = vpack.c.bf16 %v8478_v57, %v8474_v5 }
 0x1be   : > { %vm879_vm8 = vcmp.gt.f32.partialorder %v6457_v58, 0.0  ;;  %v887_v62 = vmul.f32 0.1, %v6457_v58  ;;  %v6766_v63 = vpack.i.bf16 %v8480_v0, %v8476_v56  ;;  %v5799_v17 = vpack.c.bf16 %v8480_v0, %v8476_v56 }
 0x1bf   : > { %vm880_vm10 = vcmp.gt.f32.partialorder %v6458_v1, 0.0  ;;  %v888_v7 = vmul.f32 0.1, %v6458_v1  ;;  %v870_v10 = vpop.f32.mrb[6].mxu0  ;;  %6762 = vrot.lane.b32.xlu1 %v6761_v60, %s7961_s15 }
 0x1c0   : > { %v8487_v33 = vsel %vm879_vm8, %v6457_v58, %v887_v62  ;;  %v6459_v11 = vadd.f32 %v870_v10, %v682_v3  ;;  %v872_v12 = vpop.f32.mrb[7].mxu0  ;;  %6767 = vrot.lane.b32.xlu0 %v6766_v63, %s7961_s15  ;;  %vm11094_vm8 = vcmp.lt.s32.totalorder %v8119_v19, 16 }
 0x1c1   : > { %v8490_v13 = vsel %vm880_vm10, %v6458_v1, %v888_v7  ;;  %v6460_v20 = vadd.f32 %v872_v12, %v682_v3  ;;  %vm11095_vm13 = vmmov %vm11094_vm8 }
 0x1c2   : > { %vm881_vm5 = vcmp.gt.f32.partialorder %v6459_v11, 0.0  ;;  %v889_v31 = vmul.f32 0.1, %v6459_v11  ;;  %vm11096_vm10 = vmmov %vm11094_vm8 }
 0x1c3   : > { %vm882_vm11 = vcmp.gt.f32.partialorder %v6460_v20, 0.0  ;;  %v890_v15 = vmul.f32 0.1, %v6460_v20 }
 0x1c4   : > { %v8492_v16 = vsel %vm881_vm5, %v6459_v11, %v889_v31  ;;  %vm11097_vm5 = vmmov %vm11094_vm8 }
 0x1c5   : > { %v8496_v23 = vsel %vm882_vm11, %v6460_v20, %v890_v15  ;;  %v6771_v32 = vpack.i.bf16 %v8492_v16, %v8487_v33  ;;  %v5805_v30 = vpack.c.bf16 %v8492_v16, %v8487_v33  ;;  %vm11098_vm11 = vmmov %vm11097_vm5 }
 0x1c6   : > { %v6781_v25 = vpack.i.bf16 %v8496_v23, %v8490_v13  ;;  %v5803_v29 = vpack.c.bf16 %v8496_v23, %v8490_v13 }
 0x1c7   : > { %6772 = vrot.lane.b32.xlu1 %v6771_v32, %s7961_s15 }
 0x1c8   : > { %6782 = vrot.lane.b32.xlu0 %v6781_v25, %s7961_s15 }
 0x1cb   : > { %6777 = vrot.lane.b32.xlu1 %v6761_v60, %s7962_s16 }
 0x1cc   : > { %6787 = vrot.lane.b32.xlu0 %v6766_v63, %s7962_s16 }
 0x1cf   : > { %6792 = vrot.lane.b32.xlu1 %v6771_v32, %s7962_s16 }
 0x1d0   : > { %6802 = vrot.lane.b32.xlu0 %v6781_v25, %s7962_s16 }
 0x1d3   : > { %6797 = vrot.lane.b32.xlu1 %v6761_v60, %s7963_s17 }
 0x1d4   : > { %6807 = vrot.lane.b32.xlu0 %v6766_v63, %s7963_s17 }
 0x1d7   : > { %6812 = vrot.lane.b32.xlu1 %v6771_v32, %s7963_s17 }
 0x1d8   : > { %6822 = vrot.lane.b32.xlu0 %v6781_v25, %s7963_s17 }
 0x1db   : > { %6817 = vrot.lane.b32.xlu1 %v6761_v60, %s7964_s18 }
 0x1dc   : > { %6827 = vrot.lane.b32.xlu0 %v6766_v63, %s7964_s18 }
 0x1df   : > { %6832 = vrot.lane.b32.xlu1 %v6771_v32, %s7964_s18 }
 0x1e0   : > { %6837 = vrot.lane.b32.xlu0 %v6781_v25, %s7964_s18 }
 0x1e3   : > { %6842 = vrot.lane.b32.xlu1 %v6761_v60, %s7965_s19 }
 0x1e4   : > { %6847 = vrot.lane.b32.xlu0 %v6766_v63, %s7965_s19 }
 0x1e7   : > { %6852 = vrot.lane.b32.xlu1 %v6771_v32, %s7965_s19 }
 0x1e8   : > { %6862 = vrot.lane.b32.xlu0 %v6781_v25, %s7965_s19 }
 0x1eb   : > { %6857 = vrot.lane.b32.xlu1 %v6761_v60, %s7966_s20 }
 0x1ec   : > { %6867 = vrot.lane.b32.xlu0 %v6766_v63, %s7966_s20 }
 0x1ef   : > { %6872 = vrot.lane.b32.xlu1 %v6771_v32, %s7966_s20 }
 0x1f0   : > { %6882 = vrot.lane.b32.xlu0 %v6781_v25, %s7966_s20 }
 0x1f3   : > { %6877 = vrot.lane.b32.xlu1 %v6761_v60, %s7967_s21 }
 0x1f4   : > { %6887 = vrot.lane.b32.xlu0 %v6766_v63, %s7967_s21 }
 0x1f7   : > { %6892 = vrot.lane.b32.xlu1 %v6771_v32, %s7967_s21 }
 0x1f8   : > { %6897 = vrot.lane.b32.xlu0 %v6781_v25, %s7967_s21 }
 0x1fb   : > { %6902 = vrot.lane.b32.xlu1 %v6761_v60, %s7968_s22 }
 0x1fc   : > { %6907 = vrot.lane.b32.xlu0 %v6766_v63, %s7968_s22 }
 0x1ff   : > { %6912 = vrot.lane.b32.xlu1 %v6771_v32, %s7968_s22 }
 0x200   : > { %6917 = vrot.lane.b32.xlu0 %v6781_v25, %s7968_s22 }
 0x203   : > { %1173 = vperm.xlu1 %6760, %v911_v27  }
 0x204   : > { %1178 = vperm.xlu0 %6759, %v912_v35  }
 0x207   : > { %1183 = vperm.xlu1 %6760, %v913_v37  }
 0x208   : > { %1188 = vperm.xlu0 %6759, %v914_v21  }
 0x231   : > { %v6763_v38 = vpop.permute.xlu1 %6762 }
 0x232   : > { %v6765_v39 = vunpack.i.h.bf16 %v6763_v38  ;;  %v6764_v40 = vunpack.i.l.bf16 %v6763_v38  ;;  %v6768_v42 = vpop.permute.xlu0 %6767 }
 0x233   : > { %v6770_v8 = vunpack.i.h.bf16 %v6768_v42  ;;  %v6769_v9 = vunpack.i.l.bf16 %v6768_v42 }
 0x235   : > { %v931_v44 = vsel %vm416_vm2, %v6764_v40, %v6769_v9  ;;  %v932_v45 = vsel %vm416_vm2, %v6765_v39, %v6770_v8  ;;  %v935_v46 = vsel %vm416_vm2, %v6769_v9, %v6764_v40  ;;  %v936_v48 = vsel %vm416_vm2, %v6770_v8, %v6765_v39 }
 0x236   : > { %v5753_v49 = vpack.c.bf16 %v932_v45, %v931_v44  ;;  %v5756_v50 = vpack.c.bf16 %v936_v48, %v935_v46 }
 0x238   : > { %5755 = vmatprep.subr.msk.bf16.mxu1 %vm8156_vm6, %v5753_v49 }
 0x239   : > { %v6773_v2 = vpop.permute.xlu1 %6772  ;;  %5758 = vmatpush1.bf16.msk.msra.mxu1 %vm8164_vm7, %v5756_v50 }
 0x23a   : > { %v6775_v4 = vunpack.i.h.bf16 %v6773_v2  ;;  %v6774_v51 = vunpack.i.l.bf16 %v6773_v2  ;;  %v6783_v52 = vpop.permute.xlu0 %6782 }
 0x23b   : > { %v6785_v54 = vunpack.i.h.bf16 %v6783_v52  ;;  %v6784_v55 = vunpack.i.l.bf16 %v6783_v52 }
 0x23d   : > { %v933_v58 = vsel %vm416_vm2, %v6774_v51, %v6784_v55  ;;  %v934_v59 = vsel %vm416_vm2, %v6775_v4, %v6785_v54  ;;  %v937_v1 = vsel %vm416_vm2, %v6784_v55, %v6774_v51  ;;  %v938_v60 = vsel %vm416_vm2, %v6785_v54, %v6775_v4  ;;  %v6778_v62 = vpop.permute.xlu1 %6777 }
 0x23e   : > { %v6780_v63 = vunpack.i.h.bf16 %v6778_v62  ;;  %v6779_v3 = vunpack.i.l.bf16 %v6778_v62  ;;  %v6788_v7 = vpop.permute.xlu0 %6787  ;;  %v5759_v10 = vpack.c.bf16 %v934_v59, %v933_v58  ;;  %v5762_v11 = vpack.c.bf16 %v938_v60, %v937_v1 }
 0x23f   : > { %v6790_v12 = vunpack.i.h.bf16 %v6788_v7  ;;  %v6789_v20 = vunpack.i.l.bf16 %v6788_v7 }
 0x240   : > { %5761 = vmatprep.subr.msk.bf16.mxu1 %vm8156_vm6, %v5759_v10 }
 0x241   : > { %v967_v31 = vsel %vm11094_vm8, %v6789_v20, %v6779_v3  ;;  %v968_v15 = vsel %vm11095_vm13, %v6790_v12, %v6780_v63  ;;  %v6793_v32 = vpop.permute.xlu1 %6792  ;;  %5764 = vmatpush1.bf16.msk.msra.mxu1 %vm8164_vm7, %v5762_v11  ;;  %v963_v25 = vsel %vm11096_vm10, %v6779_v3, %v6789_v20  ;;  %v964_v34 = vsel %vm11097_vm5, %v6780_v63, %v6790_v12  ;;  %vm11099_vm8 = vmmov %vm11097_vm5 }
 0x242   : > { %v6795_v27 = vunpack.i.h.bf16 %v6793_v32  ;;  %v6794_v35 = vunpack.i.l.bf16 %v6793_v32  ;;  %v6803_v37 = vpop.permute.xlu0 %6802  ;;  %v5765_v21 = vpack.c.bf16 %v964_v34, %v963_v25  ;;  %v5767_v38 = vpack.c.bf16 %v968_v15, %v967_v31  ;;  %vm11100_vm13 = vmmov %vm11097_vm5 }
 0x243   : > { %v6805_v39 = vunpack.i.h.bf16 %v6803_v37  ;;  %v6804_v40 = vunpack.i.l.bf16 %v6803_v37  ;;  %vm11101_vm10 = vmmov %vm11097_vm5  ;;  %vm11102_vm5 = vcmp.lt.s32.totalorder %v8119_v19, 15 }
 0x244   : > { %5766 = vmatprep.subr.bf16.mxu1 %v5765_v21 }
 0x245   : > { %v969_v42 = vsel %vm11098_vm11, %v6804_v40, %v6794_v35  ;;  %v970_v8 = vsel %vm11099_vm8, %v6805_v39, %v6795_v27  ;;  %v6798_v9 = vpop.permute.xlu1 %6797  ;;  %5769 = vmatpush1.bf16.msk.msra.mxu1 %vm8200_vm9, %v5767_v38  ;;  %v965_v44 = vsel %vm11100_vm13, %v6794_v35, %v6804_v40  ;;  %v966_v45 = vsel %vm11101_vm10, %v6795_v27, %v6805_v39  ;;  %vm11103_vm11 = vmmov %vm11102_vm5 }
 0x246   : > { %v6800_v46 = vunpack.i.h.bf16 %v6798_v9  ;;  %v6799_v48 = vunpack.i.l.bf16 %v6798_v9  ;;  %v6808_v49 = vpop.permute.xlu0 %6807  ;;  %v5770_v50 = vpack.c.bf16 %v966_v45, %v965_v44  ;;  %v5772_v2 = vpack.c.bf16 %v970_v8, %v969_v42  ;;  %vm11104_vm8 = vmmov %vm11102_vm5 }
 0x247   : > { %v6810_v4 = vunpack.i.h.bf16 %v6808_v49  ;;  %v6809_v51 = vunpack.i.l.bf16 %v6808_v49  ;;  %vm11105_vm13 = vmmov %vm11102_vm5 }
 0x248   : > { %5771 = vmatprep.subr.bf16.mxu1 %v5770_v50  ;;  %vm11106_vm10 = vmmov %vm11102_vm5 }
 0x249   : > { %v995_v52 = vsel %vm11102_vm5, %v6799_v48, %v6809_v51  ;;  %v996_v54 = vsel %vm11103_vm11, %v6800_v46, %v6810_v4  ;;  %v999_v55 = vsel %vm11104_vm8, %v6809_v51, %v6799_v48  ;;  %v1000_v58 = vsel %vm11105_vm13, %v6810_v4, %v6800_v46  ;;  %v6813_v59 = vpop.permute.xlu1 %6812  ;;  %5774 = vmatpush1.bf16.msk.msra.mxu1 %vm8200_vm9, %v5772_v2  ;;  %vm11107_vm11 = vmmov %vm11102_vm5 }
 0x24a   : > { %v6815_v1 = vunpack.i.h.bf16 %v6813_v59  ;;  %v6814_v60 = vunpack.i.l.bf16 %v6813_v59  ;;  %v6823_v62 = vpop.permute.xlu0 %6822  ;;  %v5775_v63 = vpack.c.bf16 %v996_v54, %v995_v52  ;;  %v5778_v3 = vpack.c.bf16 %v1000_v58, %v999_v55  ;;  %vm11108_vm8 = vmmov %vm11102_vm5 }
 0x24b   : > { %v6825_v7 = vunpack.i.h.bf16 %v6823_v62  ;;  %v6824_v10 = vunpack.i.l.bf16 %v6823_v62  ;;  %vm11109_vm13 = vcmp.lt.s32.totalorder %v8119_v19, 1 }
 0x24c   : > { %5777 = vmatprep.subr.msk.bf16.mxu1 %vm8229_vm12, %v5775_v63 }
 0x24d   : > { %v997_v11 = vsel %vm11106_vm10, %v6814_v60, %v6824_v10  ;;  %v998_v12 = vsel %vm11102_vm5, %v6815_v1, %v6825_v7  ;;  %v1001_v20 = vsel %vm11107_vm11, %v6824_v10, %v6814_v60  ;;  %v1002_v31 = vsel %vm11108_vm8, %v6825_v7, %v6815_v1  ;;  %v6818_v15 = vpop.permute.xlu1 %6817  ;;  %5780 = vmatpush1.bf16.msk.msra.mxu1 %vm8250_vm15, %v5778_v3  ;;  %vm11110_vm10 = vmmov %vm11109_vm13 }
 0x24e   : > { %v6820_v32 = vunpack.i.h.bf16 %v6818_v15  ;;  %v6819_v25 = vunpack.i.l.bf16 %v6818_v15  ;;  %v6828_v34 = vpop.permute.xlu0 %6827  ;;  %v5781_v27 = vpack.c.bf16 %v998_v12, %v997_v11  ;;  %v5784_v35 = vpack.c.bf16 %v1002_v31, %v1001_v20  ;;  %vm11111_vm5 = vmmov %vm11110_vm10 }
 0x24f   : > { %v6830_v37 = vunpack.i.h.bf16 %v6828_v34  ;;  %v6829_v21 = vunpack.i.l.bf16 %v6828_v34  ;;  %vm11112_vm11 = vmmov %vm11111_vm5 }
 0x250   : > { %5783 = vmatprep.subr.msk.bf16.mxu1 %vm8229_vm12, %v5781_v27  ;;  %vm11113_vm8 = vmmov %vm11111_vm5 }
 0x251   : > { %v1027_v38 = vsel %vm11109_vm13, %v6819_v25, %v6829_v21  ;;  %v1028_v39 = vsel %vm11110_vm10, %v6820_v32, %v6830_v37  ;;  %v1031_v40 = vsel %vm11111_vm5, %v6829_v21, %v6819_v25  ;;  %v1032_v42 = vsel %vm11112_vm11, %v6830_v37, %v6820_v32  ;;  %v6833_v8 = vpop.permute.xlu1 %6832  ;;  %5786 = vmatpush1.bf16.msk.msra.mxu1 %vm8250_vm15, %v5784_v35  ;;  %vm11114_vm13 = vmmov %vm11111_vm5 }
 0x252   : > { %v6835_v9 = vunpack.i.h.bf16 %v6833_v8  ;;  %v6834_v44 = vunpack.i.l.bf16 %v6833_v8  ;;  %v6838_v45 = vpop.permute.xlu0 %6837  ;;  %v5787_v46 = vpack.c.bf16 %v1028_v39, %v1027_v38  ;;  %v5790_v48 = vpack.c.bf16 %v1032_v42, %v1031_v40  ;;  %vm11115_vm10 = vmmov %vm11111_vm5 }
 0x253   : > { %v6840_v49 = vunpack.i.h.bf16 %v6838_v45  ;;  %v6839_v50 = vunpack.i.l.bf16 %v6838_v45  ;;  %vm11116_vm11 = vcmp.lt.s32.totalorder %v8119_v19, 127 }
 0x254   : > { %5789 = vmatprep.subr.msk.bf16.mxu1 %vm8156_vm6, %v5787_v46 }
 0x255   : > { %v1029_v2 = vsel %vm11113_vm8, %v6834_v44, %v6839_v50  ;;  %v1030_v4 = vsel %vm11114_vm13, %v6835_v9, %v6840_v49  ;;  %v1033_v51 = vsel %vm11115_vm10, %v6839_v50, %v6834_v44  ;;  %v1034_v52 = vsel %vm11111_vm5, %v6840_v49, %v6835_v9  ;;  %v6843_v54 = vpop.permute.xlu1 %6842  ;;  %5792 = vmatpush1.bf16.msk.msra.mxu1 %vm8275_vm0, %v5790_v48  ;;  %vm11117_vm8 = vmmov %vm11116_vm11 }
 0x256   : > { %v6848_v55 = vpop.permute.xlu0 %6847  ;;  %v5793_v58 = vpack.c.bf16 %v1030_v4, %v1029_v2  ;;  %v5796_v59 = vpack.c.bf16 %v1034_v52, %v1033_v51  ;;  %v6845_v1 = vunpack.i.h.bf16 %v6843_v54  ;;  %v6844_v60 = vunpack.i.l.bf16 %v6843_v54  ;;  %vm11118_vm13 = vmmov %vm11117_vm8 }
 0x257   : > { %v6850_v62 = vunpack.i.h.bf16 %v6848_v55  ;;  %v6849_v63 = vunpack.i.l.bf16 %v6848_v55  ;;  %vm11119_vm10 = vmmov %vm11117_vm8 }
 0x258   : > { %5795 = vmatprep.subr.msk.bf16.mxu1 %vm8156_vm6, %v5793_v58  ;;  %vm11120_vm5 = vmmov %vm11117_vm8 }
 0x259   : > { %v6853_v3 = vpop.permute.xlu1 %6852  ;;  %5798 = vmatpush1.bf16.msk.msra.mxu1 %vm8275_vm0, %v5796_v59  ;;  %v1063_v10 = vsel %vm11116_vm11, %v6849_v63, %v6844_v60  ;;  %v1064_v11 = vsel %vm11117_vm8, %v6850_v62, %v6845_v1  ;;  %v1059_v56 = vsel %vm11118_vm13, %v6844_v60, %v6849_v63  ;;  %v1060_v0 = vsel %vm11119_vm10, %v6845_v1, %v6850_v62  ;;  %vm11121_vm11 = vmmov %vm11120_vm5 }
 0x25a   : > { %v6863_v7 = vpop.permute.xlu0 %6862  ;;  %5800 = vmatprep.subr.bf16.mxu1 %v5799_v17  ;;  %v6855_v12 = vunpack.i.h.bf16 %v6853_v3  ;;  %v6854_v20 = vunpack.i.l.bf16 %v6853_v3  ;;  %v5807_v17 = vpack.c.bf16 %v1064_v11, %v1063_v10  ;;  %vm11122_vm8 = vmmov %vm11120_vm5  ;;  %vm11124_vm10 = vcmp.lt.s32.totalorder %v8119_v19, 113 }
 0x25b   : > { %v6865_v31 = vunpack.i.h.bf16 %v6863_v7  ;;  %v6864_v15 = vunpack.i.l.bf16 %v6863_v7  ;;  %vm11123_vm13 = vmmov %vm11120_vm5 }
 0x25d   : > { %v6858_v32 = vpop.permute.xlu1 %6857  ;;  %5802 = vmatpush1.bf16.msra.mxu1 %v5801_v28  ;;  %v1065_v5 = vsel %vm11120_vm5, %v6864_v15, %v6854_v20  ;;  %v1066_v57 = vsel %vm11121_vm11, %v6865_v31, %v6855_v12  ;;  %v1061_v23 = vsel %vm11122_vm8, %v6854_v20, %v6864_v15  ;;  %v1062_v21 = vsel %vm11123_vm13, %v6855_v12, %v6865_v31  ;;  %vm11125_vm5 = vmmov %vm11124_vm10 }
 0x25e   : > { %v6868_v25 = vpop.permute.xlu0 %6867  ;;  %5804 = vmatprep.subr.bf16.mxu1 %v5803_v29  ;;  %v6860_v34 = vunpack.i.h.bf16 %v6858_v32  ;;  %v6859_v27 = vunpack.i.l.bf16 %v6858_v32  ;;  %v5810_v29 = vpack.c.bf16 %v1060_v0, %v1059_v56  ;;  %v5813_v40 = vpack.c.bf16 %v1066_v57, %v1065_v5  ;;  %vm11126_vm11 = vmmov %vm11125_vm5 }
 0x25f   : > { %v6870_v35 = vunpack.i.h.bf16 %v6868_v25  ;;  %v6869_v37 = vunpack.i.l.bf16 %v6868_v25  ;;  %vm11127_vm8 = vmmov %vm11125_vm5  ;;  %v5816_v46 = vpack.c.bf16 %v1062_v21, %v1061_v23 }
 0x260   : > { %vm11128_vm13 = vmmov %vm11125_vm5 }
 0x261   : > { %v6873_v28 = vpop.permute.xlu1 %6872  ;;  %5806 = vmatpush1.bf16.msra.mxu1 %v5805_v30  ;;  %v1095_v38 = vsel %vm11124_vm10, %v6869_v37, %v6859_v27  ;;  %v1096_v39 = vsel %vm11125_vm5, %v6870_v35, %v6860_v34  ;;  %v1091_v44 = vsel %vm11126_vm11, %v6859_v27, %v6869_v37  ;;  %v1092_v45 = vsel %vm11127_vm8, %v6860_v34, %v6870_v35  ;;  %vm11129_vm10 = vmmov %vm11125_vm5 }
 0x262   : > { %v6883_v13 = vpop.permute.xlu0 %6882  ;;  %5809 = vmatprep.subr.msk.bf16.mxu1 %vm8229_vm12, %v5807_v17  ;;  %v6875_v33 = vunpack.i.h.bf16 %v6873_v28  ;;  %v6874_v16 = vunpack.i.l.bf16 %v6873_v28  ;;  %v5819_v48 = vpack.c.bf16 %v1096_v39, %v1095_v38  ;;  %v5822_v59 = vpack.c.bf16 %v1092_v45, %v1091_v44  ;;  %vm11130_vm11 = vmmov %vm11125_vm5  ;;  %v899_v45 = vld [vmem:[%s11048_s3] sm:$0xff] }
 0x263   : > { %v6885_v30 = vunpack.i.h.bf16 %v6883_v13  ;;  %v6884_v42 = vunpack.i.l.bf16 %v6883_v13  ;;  %vm11131_vm8 = vcmp.lt.s32.totalorder %v8119_v19, 112 }
 0x265   : > { %v6878_v8 = vpop.permute.xlu1 %6877  ;;  %5812 = vmatpush1.bf16.msk.msra.mxu1 %vm8319_vm14, %v5810_v29  ;;  %v1097_v51 = vsel %vm11128_vm13, %v6884_v42, %v6874_v16  ;;  %v1098_v52 = vsel %vm11129_vm10, %v6885_v30, %v6875_v33  ;;  %v1093_v58 = vsel %vm11125_vm5, %v6874_v16, %v6884_v42  ;;  %v1094_v1 = vsel %vm11130_vm11, %v6875_v33, %v6885_v30  ;;  %vm11132_vm13 = vmmov %vm11131_vm8 }
 0x266   : > { %v6888_v9 = vpop.permute.xlu0 %6887  ;;  %5815 = vmatprep.subr.msk.bf16.mxu1 %vm8229_vm12, %v5813_v40  ;;  %v6880_v49 = vunpack.i.h.bf16 %v6878_v8  ;;  %v6879_v50 = vunpack.i.l.bf16 %v6878_v8  ;;  %v5825_v63 = vpack.c.bf16 %v1098_v52, %v1097_v51  ;;  %v5828_v31 = vpack.c.bf16 %v1094_v1, %v1093_v58  ;;  %vm11133_vm10 = vmmov %vm11131_vm8  ;;  %v906_v51 = vld [vmem:[%s11048_s3 + $0x38] sm:$0xff]  ;;  %v908_v58 = vld [vmem:[%s11048_s3 + $0x48] sm:$0xff] }
 0x267   : > { %v6890_v2 = vunpack.i.h.bf16 %v6888_v9  ;;  %v6889_v4 = vunpack.i.l.bf16 %v6888_v9  ;;  %vm11134_vm5 = vmmov %vm11131_vm8  ;;  %v904_v1 = vld [vmem:[%s11048_s3 + $0x28] sm:$0xff] }
 0x268   : > { %vm11135_vm11 = vmmov %vm11134_vm5 }
 0x269   : > { %v6893_v54 = vpop.permute.xlu1 %6892  ;;  %5818 = vmatpush1.bf16.msk.msra.mxu1 %vm8319_vm14, %v5816_v46  ;;  %v1127_v60 = vsel %vm11131_vm8, %v6889_v4, %v6879_v50  ;;  %v1128_v62 = vsel %vm11132_vm13, %v6890_v2, %v6880_v49  ;;  %v1123_v32 = vsel %vm11133_vm10, %v6879_v50, %v6889_v4  ;;  %v1124_v25 = vsel %vm11134_vm5, %v6880_v49, %v6890_v2  ;;  %vm11136_vm8 = vmmov %vm11134_vm5  ;;  %v903_v46 = vld [vmem:[%s11048_s3 + $0x20] sm:$0xff]  ;;  %v902_v4 = vld [vmem:[%s11048_s3 + $0x18] sm:$0xff] }
 0x26a   : > { %v6898_v55 = vpop.permute.xlu0 %6897  ;;  %5821 = vmatprep.subr.msk.bf16.mxu1 %vm8355_vm1, %v5819_v48  ;;  %v6895_v3 = vunpack.i.h.bf16 %v6893_v54  ;;  %v6894_v7 = vunpack.i.l.bf16 %v6893_v54  ;;  %v5831_v15 = vpack.c.bf16 %v1128_v62, %v1127_v60  ;;  %v5834_v57 = vpack.c.bf16 %v1124_v25, %v1123_v32  ;;  %vm11137_vm13 = vmmov %vm11134_vm5  ;;  %v905_v54 = vld [vmem:[%s11048_s3 + $0x30] sm:$0xff]  ;;  %v907_v60 = vld [vmem:[%s11048_s3 + $0x40] sm:$0xff] }
 0x26b   : > { %v6900_v10 = vunpack.i.h.bf16 %v6898_v55  ;;  %v6899_v11 = vunpack.i.l.bf16 %v6898_v55  ;;  %vm11138_vm10 = vcmp.lt.s32.totalorder %v8119_v19, 111  ;;  %v909_v55 = vld [vmem:[%s11048_s3 + $0x50] sm:$0xff]  ;;  %v910_v62 = vld [vmem:[%s11048_s3 + $0x58] sm:$0xff] }
 0x26c   : > { %vm11139_vm5 = vmmov %vm11138_vm10 }
 0x26d   : > { %v6903_v12 = vpop.permute.xlu1 %6902  ;;  %5824 = vmatpush1.bf16.msk.msra.mxu1 %vm8275_vm0, %v5822_v59  ;;  %v1129_v27 = vsel %vm11135_vm11, %v6899_v11, %v6894_v7  ;;  %v1130_v35 = vsel %vm11136_vm8, %v6900_v10, %v6895_v3  ;;  %v1125_v28 = vsel %vm11137_vm13, %v6894_v7, %v6899_v11  ;;  %vm11140_vm11 = vmmov %vm11136_vm8  ;;  %v901_v59 = vld [vmem:[%s11048_s3 + $0x10] sm:$0xff] }
 0x26e   : > { %v6908_v20 = vpop.permute.xlu0 %6907  ;;  %5827 = vmatprep.subr.msk.bf16.mxu1 %vm8355_vm1, %v5825_v63  ;;  %v6905_v56 = vunpack.i.h.bf16 %v6903_v12  ;;  %v6904_v0 = vunpack.i.l.bf16 %v6903_v12  ;;  %v5836_v29 = vpack.c.bf16 %v1130_v35, %v1129_v27  ;;  %v1126_v21 = vsel %vm11140_vm11, %v6895_v3, %v6900_v10  ;;  %vm11141_vm8 = vmmov %vm11139_vm5  ;;  %v7945_v12 = vld [vmem:[%s8037_s14] sm:$0xff]  ;;  %v7947_v27 = vld [vmem:[%s8037_s14 + $0x10] sm:$0xff] }
 0x26f   : > { %v6910_v17 = vunpack.i.h.bf16 %v6908_v20  ;;  %v6909_v34 = vunpack.i.l.bf16 %v6908_v20  ;;  %v5839_v16 = vpack.c.bf16 %v1126_v21, %v1125_v28  ;;  %vm11142_vm13 = vmmov %vm11139_vm5 }
 0x270   : > { %vm11144_vm11 = vmmov %vm11139_vm5 }
 0x271   : > { %5830 = vmatpush1.bf16.msk.msra.mxu1 %vm8275_vm0, %v5828_v31  ;;  %v6913_v37 = vpop.permute.xlu1 %6912  ;;  %v1159_v13 = vsel %vm11138_vm10, %v6909_v34, %v6904_v0  ;;  %v1160_v23 = vsel %vm11139_vm5, %v6910_v17, %v6905_v56  ;;  %v1155_v30 = vsel %vm11141_vm8, %v6904_v0, %v6909_v34  ;;  %v1156_v42 = vsel %vm11142_vm13, %v6905_v56, %v6910_v17  ;;  %vm11143_vm10 = vmmov %vm11139_vm5 }
 0x272   : > { %v6918_v5 = vpop.permute.xlu0 %6917  ;;  %5833 = vmatprep.subr.msk.bf16.mxu1 %vm8387_vm4, %v5831_v15  ;;  %v6915_v38 = vunpack.i.h.bf16 %v6913_v37  ;;  %v6914_v39 = vunpack.i.l.bf16 %v6913_v37  ;;  %v5841_v8 = vpack.c.bf16 %v1160_v23, %v1159_v13  ;;  %v5844_v48 = vpack.c.bf16 %v1156_v42, %v1155_v30  ;;  %vm11145_vm8 = vmmov %vm11139_vm5  ;;  %v7946_v15 = vld [vmem:[%s8037_s14 + $0x8] sm:$0xff]  ;;  %v7948_v37 = vld [vmem:[%s8037_s14 + $0x18] sm:$0xff] }
 0x273   : > { %v6920_v40 = vunpack.i.h.bf16 %v6918_v5  ;;  %v6919_v33 = vunpack.i.l.bf16 %v6918_v5  ;;  %vm11146_vm13 = vcmask 261120   ;;  %v7949_v30 = vld [vmem:[%s8037_s14 + $0x20] sm:$0xff] }
 0x275   : > { %5835 = vmatpush1.bf16.msra.mxu1 %v5834_v57  ;;  %v1161_v9 = vsel %vm11143_vm10, %v6919_v33, %v6914_v39  ;;  %v1162_v44 = vsel %vm11139_vm5, %v6920_v40, %v6915_v38  ;;  %v1157_v49 = vsel %vm11144_vm11, %v6914_v39, %v6919_v33  ;;  %v1158_v50 = vsel %vm11145_vm8, %v6915_v38, %v6920_v40  ;;  %vm11147_vm10 = vmmov %vm11146_vm13 }
 0x276   : > { %5838 = vmatprep.subr.msk.bf16.mxu1 %vm8387_vm4, %v5836_v29  ;;  %v5847_v2 = vpack.c.bf16 %v1162_v44, %v1161_v9  ;;  %v5850_v52 = vpack.c.bf16 %v1158_v50, %v1157_v49  ;;  %vm11148_vm5 = vmmov %vm11147_vm10  ;;  %v7952_v49 = vld [vmem:[%s8037_s14 + $0x38] sm:$0xff]  ;;  %vm11063_vm8 = vcmask 15360  }
 0x277   : > { %vm11149_vm11 = vmmov %vm11148_vm5 }
 0x279   : > { %5840 = vmatpush1.bf16.msra.mxu1 %v5839_v16 }
 0x27a   : > { %5843 = vmatprep.subr.msk.bf16.mxu1 %vm8413_vm3, %v5841_v8  ;;  %v7950_v8 = vld [vmem:[%s8037_s14 + $0x28] sm:$0xff] }
 0x27c   : > { %1268 = vmatmul.mubr.f32.vlgmr.msra.gmra.mrb[0].mxu1 %v899_v45 }
 0x27d   : > { %5846 = vmatpush1.bf16.msk.msra.mxu1 %vm8319_vm14, %v5844_v48  ;;  %1273 = vmatprep.mubr.f32.mxu1 %v903_v46  ;;  %v7951_v46 = vld [vmem:[%s8037_s14 + $0x30] sm:$0xff] }
 0x27e   : > { %5849 = vmatprep.subr.msk.bf16.mxu1 %vm8413_vm3, %v5847_v2 }
 0x280   : > { %1274 = vmatmul.mubr.f32.gmra.mrb[2].mxu1 %v902_v4 }
 0x281   : > { %5852 = vmatpush1.bf16.msk.msra.mxu1 %vm8319_vm14, %v5850_v52  ;;  %1279 = vmatprep.mubr.f32.mxu1 %v906_v51 }
 0x282   : > { %v1174_v63 = vpop.permute.xlu1 %1173 }
 0x283   : > { %v1179_v31 = vpop.permute.xlu0 %1178 }
 0x284   : > { %1280 = vmatmul.mubr.f32.gmra.mrb[4].mxu1 %v905_v54 }
 0x285   : > { %1285 = vmatprep.mubr.f32.mxu1 %v909_v55 }
 0x286   : > { %v1184_v28 = vpop.permute.xlu1 %1183 }
 0x287   : > { %v1189_v39 = vpop.permute.xlu0 %1188 }
 0x288   : > { %1286 = vmatmul.mubr.f32.gmra.mrb[6].mxu1 %v908_v58 }
 0x289   : > { %1356 = vmatprep.mubr.f32.mxu1 %v7970_v36 }
 0x28c   : > { %5150 = vmatmul.mubr.msk.f32.vlgmr.msra.gmra.mrb[0].mxu1 %vm11146_vm13, %v901_v59  ;;  %vm11150_vm13 = vcmp.lt.s32.totalorder %v8119_v19, 16 }
 0x28d   : > { %1362 = vmatprep.mubr.f32.mxu1 %v7970_v36 }
 0x290   : > { %5151 = vmatmul.mubr.msk.f32.gmra.mrb[2].mxu1 %vm11147_vm10, %v904_v1  ;;  %vm11151_vm10 = vmmov %vm11150_vm13 }
 0x291   : > { %1368 = vmatprep.mubr.f32.mxu1 %v7970_v36 }
 0x294   : > { %5152 = vmatmul.mubr.msk.f32.gmra.mrb[4].mxu1 %vm11148_vm5, %v907_v60  ;;  %vm11152_vm5 = vmmov %vm11151_vm10 }
 0x295   : > { %1374 = vmatprep.mubr.f32.mxu1 %v7970_v36 }
 0x298   : > { %5153 = vmatmul.mubr.msk.f32.gmra.mrb[6].mxu1 %vm11149_vm11, %v910_v62  ;;  %vm11153_vm11 = vmmov %vm11152_vm5 }
 0x35f   : > { %v1358_v3 = vpop.f32.mrb[0].mxu1 }
 0x360   : > { %v6461_v7 = vadd.f32 %v1358_v3, %v1174_v63  ;;  %v1360_v10 = vpop.f32.mrb[1].mxu1 }
 0x361   : > { %v6462_v11 = vadd.f32 %v1360_v10, %v1174_v63  ;;  %v1422_v63 = vld [vmem:[%s11050_s5 + $0x8] sm:$0xff] }
 0x362   : > { %v8791_v20 = vadd.f32 %v7945_v12, %v6461_v7  ;;  %v1421_v7 = vld [vmem:[%s11050_s5] sm:$0xff] }
 0x363   : > { %v8794_v32 = vadd.f32 %v7946_v15, %v6462_v11  ;;  %v1364_v25 = vpop.f32.mrb[2].mxu1 }
 0x364   : > { %v6463_v56 = vadd.f32 %v1364_v25, %v1179_v31  ;;  %v1366_v0 = vpop.f32.mrb[3].mxu1 }
 0x365   : > { %v6464_v17 = vadd.f32 %v1366_v0, %v1179_v31  ;;  %v1389_v34 = vadd.f32 %v8794_v32, %v8791_v20  ;;  %v1405_v38 = vmax.f32 %v8791_v20, %v8794_v32 }
 0x366   : > { %v8799_v35 = vadd.f32 %v7947_v27, %v6463_v56  ;;  %v1423_v56 = vld [vmem:[%s11050_s5 + $0x10] sm:$0xff] }
 0x367   : > { %v8802_v5 = vadd.f32 %v7948_v37, %v6464_v17  ;;  %v1370_v57 = vpop.f32.mrb[4].mxu1  ;;  %1390 = vadd.xlane.f32.xlu1 %v1389_v34  ;;  %v1424_v17 = vld [vmem:[%s11050_s5 + $0x18] sm:$0xff] }
 0x368   : > { %v1372_v13 = vpop.f32.mrb[5].mxu1  ;;  %v6465_v23 = vadd.f32 %v1370_v57, %v1184_v28 }
 0x369   : > { %v6466_v29 = vadd.f32 %v1372_v13, %v1184_v28  ;;  %v1392_v21 = vadd.f32 %v8802_v5, %v8799_v35  ;;  %v1408_v45 = vmax.f32 %v8799_v35, %v8802_v5 }
 0x36a   : > { %v8809_v42 = vadd.f32 %v7949_v30, %v6465_v23 }
 0x36b   : > { %v1376_v40 = vpop.f32.mrb[6].mxu1  ;;  %1393 = vadd.xlane.f32.xlu0 %v1392_v21  ;;  %1406 = vmax.xlane.f32.xlu1 %v1405_v38  ;;  %v8812_v9 = vadd.f32 %v7950_v8, %v6466_v29 }
 0x36c   : > { %v6467_v33 = vadd.f32 %v1376_v40, %v1189_v39  ;;  %v1378_v16 = vpop.f32.mrb[7].mxu1 }
 0x36d   : > { %v6468_v44 = vadd.f32 %v1378_v16, %v1189_v39  ;;  %v1395_v2 = vadd.f32 %v8812_v9, %v8809_v42  ;;  %v1411_v51 = vmax.f32 %v8809_v42, %v8812_v9 }
 0x36e   : > { %v8817_v48 = vadd.f32 %v7951_v46, %v6467_v33  ;;  %v1443_v46 = vld [vmem:[%s11051_s6] sm:$0x1] }
 0x36f   : > { %v8820_v50 = vadd.f32 %v7952_v49, %v6468_v44  ;;  %1409 = vmax.xlane.f32.xlu0 %v1408_v45  ;;  %v1451_v45 = vshrl.u32 %v341_v18, 7  ;;  %v1449_v18 = vld [vmem:[%s11052_s7 + $0x18] sm:$0xff] }
 0x371   : > { %v1398_v4 = vadd.f32 %v8820_v50, %v8817_v48  ;;  %v1414_v52 = vmax.f32 %v8817_v48, %v8820_v50 }
 0x373   : > { %1396 = vadd.xlane.f32.xlu0 %v1395_v2  ;;  %1399 = vadd.xlane.f32.xlu1 %v1398_v4  ;;  %v8850_v4 = vsub.s32 0, %v1451_v45 }
 0x377   : > { %1412 = vmax.xlane.f32.xlu0 %v1411_v51  ;;  %1415 = vmax.xlane.f32.xlu1 %v1414_v52  ;;  %v1447_v52 = vld [vmem:[%s11052_s7 + $0x8] sm:$0xff] }
 0x3f4   : > { %v1391_v54 = vpop.xlane.xlu1 %1390 }
 0x3f5   : > { %v1401_v60 = vmul.f32 0.00390625, %v1391_v54  ;;  %v1446_v54 = vld [vmem:[%s11052_s7] sm:$0xff] }
 0x3f8   : > { %v1394_v55 = vpop.xlane.xlu0 %1393  ;;  %v1407_v59 = vpop.xlane.xlu1 %1406 }
 0x3f9   : > { %v1402_v58 = vmul.f32 0.00390625, %v1394_v55  ;;  %v1417_v3 = vadd.f32 %v1407_v59, %v1401_v60 }
 0x3fb   : > { %v1425_v31 = vmul.f32 %v1421_v7, %v1417_v3 }
 0x3fc   : > { %v1410_v1 = vpop.xlane.xlu0 %1409 }
 0x3fd   : > { %v1418_v62 = vadd.f32 %v1410_v1, %v1402_v58  ;;  %v1430_v28 = vsel %vm11063_vm8, %v1425_v31, 0.0  ;;  %v1448_v58 = vld [vmem:[%s11052_s7 + $0x10] sm:$0xff] }
 0x3ff   : > { %v1426_v12 = vmul.f32 %v1422_v63, %v1418_v62 }
 0x400   : > { %v1397_v10 = vpop.xlane.xlu0 %1396  ;;  %v1400_v11 = vpop.xlane.xlu1 %1399 }
 0x401   : > { %v1403_v15 = vmul.f32 0.00390625, %v1397_v10  ;;  %v1404_v25 = vmul.f32 0.00390625, %v1400_v11  ;;  %v1431_v27 = vsel %vm11063_vm8, %v1426_v12, 0.0  ;;  %v1471_v11 = vld [vmem:[%s11053_s8 + $0x8] sm:$0xff]  ;;  %v1470_v12 = vld [vmem:[%s11053_s8] sm:$0xff] }
 0x402   : > { %v1432_v29 = vadd.f32 %v1431_v27, %v1430_v28 }
 0x404   : > { %v1413_v0 = vpop.xlane.xlu0 %1412  ;;  %v1416_v34 = vpop.xlane.xlu1 %1415 }
 0x405   : > { %v1419_v37 = vadd.f32 %v1413_v0, %v1403_v15  ;;  %v1420_v57 = vadd.f32 %v1416_v34, %v1404_v25  ;;  %v1473_v0 = vld [vmem:[%s11053_s8 + $0x18] sm:$0xff] }
 0x407   : > { %v1427_v13 = vmul.f32 %v1423_v56, %v1419_v37  ;;  %v1428_v23 = vmul.f32 %v1424_v17, %v1420_v57  ;;  %v1472_v17 = vld [vmem:[%s11053_s8 + $0x10] sm:$0xff] }
 0x409   : > { %v1433_v21 = vsel %vm11063_vm8, %v1427_v13, 0.0  ;;  %v1435_v39 = vsel %vm11063_vm8, %v1428_v23, 0.0 }
 0x40a   : > { %v1434_v38 = vadd.f32 %v1433_v21, %v1432_v29 }
 0x40c   : > { %v1436_v40 = vadd.f32 %v1435_v39, %v1434_v38 }
 0x40e   : > { %v1437_v33 = vrot.slane %v1436_v40, 4 }
 0x410   : > { %v1438_v16 = vadd.f32 %v1437_v33, %v1436_v40 }
 0x412   : > { %v1439_v30 = vrot.slane %v1438_v16, 2 }
 0x414   : > { %v1440_v8 = vadd.f32 %v1439_v30, %v1438_v16 }
 0x416   : > { %v1441_v44 = vrot.slane %v1440_v8, 1 }
 0x418   : > { %v1442_v49 = vadd.f32 %v1441_v44, %v1440_v8 }
 0x41a   : > { %v1444_v2 = vadd.f32 %v1443_v46, %v1442_v49 }
 0x41c   : > { %v1445_v51 = vmax.f32 %v1444_v2, 0.0 }
 0x41e   : > { %v1453_v55 = vrot.slane %v1445_v51, %v8850_v4 }
 0x420   : > { %v1455_v59 = vmul.f32 %v1453_v55, %v1447_v52  ;;  %v1454_v1 = vmul.f32 %v1453_v55, %v1446_v54  ;;  %v1457_v63 = vmul.f32 %v1453_v55, %v1449_v18  ;;  %v1456_v3 = vmul.f32 %v1453_v55, %v1448_v58 }
 0x422   : > { %v1461_v60 = vsel %vm11063_vm8, %v1455_v59, 0.0  ;;  %v1458_v62 = vsel %vm11063_vm8, %v1454_v1, 0.0  ;;  %v1467_v7 = vsel %vm11063_vm8, %v1457_v63, 0.0  ;;  %v1464_v10 = vsel %vm11063_vm8, %v1456_v3, 0.0 }
 0x423   : > { %1462 = vadd.xlane.f32.xlu1 %v1461_v60  ;;  %1459 = vadd.xlane.f32.xlu0 %v1458_v62 }
 0x427   : > { %1468 = vadd.xlane.f32.xlu1 %v1467_v7  ;;  %1465 = vadd.xlane.f32.xlu0 %v1464_v10 }
 0x4b0   : > { %v1463_v31 = vpop.xlane.xlu1 %1462  ;;  %v1460_v15 = vpop.xlane.xlu0 %1459 }
 0x4b1   : > { %v1475_v25 = vadd.f32 %v1471_v11, %v1463_v31  ;;  %v1474_v56 = vadd.f32 %v1470_v12, %v1460_v15  ;;  %v5169_v11 = vld [vmem:[%s11047_s2 + $0x38] sm:$0xff]  ;;  %v5168_v12 = vld [vmem:[%s11047_s2 + $0x30] sm:$0xff] }
 0x4b3   : > { %v1479_v34 = vsub.f32 0.0, %v1475_v25  ;;  %v1478_v27 = vsub.f32 0.0, %v1474_v56 }
 0x4b4   : > { %v1469_v37 = vpop.xlane.xlu1 %1468  ;;  %v1466_v57 = vpop.xlane.xlu0 %1465 }
 0x4b5   : > { %v1484_v28 = vmul.f32 1.442695, %v1479_v34  ;;  %v1482_v13 = vmul.f32 1.442695, %v1478_v27  ;;  %v1477_v23 = vadd.f32 %v1473_v0, %v1469_v37  ;;  %v1476_v29 = vadd.f32 %v1472_v17, %v1466_v57 }
 0x4b7   : > { %7881 = vpow2.f32 %v1484_v28  ;;  %v1481_v21 = vsub.f32 0.0, %v1477_v23  ;;  %v1480_v38 = vsub.f32 0.0, %v1476_v29 }
 0x4b8   : > { %7883 = vpow2.f32 %v1482_v13 }
 0x4b9   : > { %v1488_v39 = vmul.f32 1.442695, %v1481_v21  ;;  %v1486_v40 = vmul.f32 1.442695, %v1480_v38 }
 0x4bb   : > { %7885 = vpow2.f32 %v1488_v39 }
 0x4bc   : > { %7887 = vpow2.f32 %v1486_v40 }
 0x4c1   : > { %v7882_v33 = vpop.eup %7881 }
 0x4c2   : > { %v7884_v16 = vpop.eup %7883  ;;  %v1491_v30 = vadd.f32 1.0, %v7882_v33 }
 0x4c3   : > { %v1490_v8 = vadd.f32 1.0, %v7884_v16 }
 0x4c4   : > { %7889 = vrcp.f32 %v1491_v30 }
 0x4c5   : > { %v7886_v44 = vpop.eup %7885  ;;  %7891 = vrcp.f32 %v1490_v8 }
 0x4c6   : > { %v7888_v45 = vpop.eup %7887  ;;  %v1493_v46 = vadd.f32 1.0, %v7886_v44 }
 0x4c7   : > { %v1492_v49 = vadd.f32 1.0, %v7888_v45 }
 0x4c8   : > { %7893 = vrcp.f32 %v1493_v46 }
 0x4c9   : > { %7895 = vrcp.f32 %v1492_v49 }
 0x4ce   : > { %v7890_v2 = vpop.eup %7889 }
 0x4cf   : > { %v7892_v51 = vpop.eup %7891  ;;  %1509 = vperm.xlu1 %6760, %v7890_v2  }
 0x4d0   : > { %1504 = vperm.xlu0 %6759, %v7892_v51  }
 0x4d2   : > { %v7894_v52 = vpop.eup %7893 }
 0x4d3   : > { %v7896_v54 = vpop.eup %7895 }
 0x4d4   : > { %1519 = vperm.xlu0 %6759, %v7894_v52   ;;  %1514 = vperm.xlu1 %6760, %v7896_v54  }
 0x54e   : > { %v1510_v55 = vpop.permute.xlu1 %1509 }
 0x54f   : > { %v8882_v18 = vmul.f32 %v1510_v55, %v8799_v35  ;;  %v8885_v58 = vmul.f32 %v1510_v55, %v8802_v5  ;;  %v1505_v59 = vpop.permute.xlu0 %1504 }
 0x550   : > { %v8888_v1 = vmul.f32 %v1505_v59, %v8791_v20  ;;  %v8891_v60 = vmul.f32 %v1505_v59, %v8794_v32 }
 0x552   : > { %v6926_v62 = vpack.i.bf16 %v8885_v58, %v8891_v60  ;;  %v6921_v63 = vpack.i.bf16 %v8882_v18, %v8888_v1 }
 0x553   : > { %v1515_v3 = vpop.permute.xlu1 %1514  ;;  %v1520_v7 = vpop.permute.xlu0 %1519 }
 0x554   : > { %v8898_v35 = vmul.f32 %v1515_v3, %v8809_v42  ;;  %v8901_v5 = vmul.f32 %v1515_v3, %v8812_v9  ;;  %v8904_v20 = vmul.f32 %v1520_v7, %v8817_v48  ;;  %v8907_v32 = vmul.f32 %v1520_v7, %v8820_v50  ;;  %6927 = vrot.lane.b32.xlu0 %v6926_v62, %s7961_s15  ;;  %v5155_v9 = vld [vmem:[%s11046_s1 + $0x68] sm:$0xff]  ;;  %v5166_v50 = vld [vmem:[%s11047_s2 + $0x20] sm:$0xff] }
 0x555   : > { %6922 = vrot.lane.b32.xlu1 %v6921_v63, %s7961_s15  ;;  %1900 = vmatprep.mubr.f32.mxu0 %v5155_v9  ;;  %v5167_v48 = vld [vmem:[%s11047_s2 + $0x28] sm:$0xff] }
 0x556   : > { %v6936_v10 = vpack.i.bf16 %v8907_v32, %v8901_v5  ;;  %v6931_v42 = vpack.i.bf16 %v8904_v20, %v8898_v35 }
 0x558   : > { %6937 = vrot.lane.b32.xlu0 %v6936_v10, %s7961_s15 }
 0x559   : > { %6932 = vrot.lane.b32.xlu1 %v6931_v42, %s7961_s15 }
 0x55c   : > { %6947 = vrot.lane.b32.xlu0 %v6926_v62, %s7962_s16 }
 0x55d   : > { %6942 = vrot.lane.b32.xlu1 %v6921_v63, %s7962_s16 }
 0x560   : > { %6957 = vrot.lane.b32.xlu0 %v6936_v10, %s7962_s16 }
 0x561   : > { %6952 = vrot.lane.b32.xlu1 %v6931_v42, %s7962_s16 }
 0x564   : > { %6967 = vrot.lane.b32.xlu0 %v6926_v62, %s7963_s17 }
 0x565   : > { %6962 = vrot.lane.b32.xlu1 %v6921_v63, %s7963_s17 }
 0x568   : > { %6977 = vrot.lane.b32.xlu0 %v6936_v10, %s7963_s17 }
 0x569   : > { %6972 = vrot.lane.b32.xlu1 %v6931_v42, %s7963_s17 }
 0x56c   : > { %6987 = vrot.lane.b32.xlu0 %v6926_v62, %s7964_s18 }
 0x56d   : > { %6982 = vrot.lane.b32.xlu1 %v6921_v63, %s7964_s18 }
 0x570   : > { %6997 = vrot.lane.b32.xlu0 %v6936_v10, %s7964_s18 }
 0x571   : > { %6992 = vrot.lane.b32.xlu1 %v6931_v42, %s7964_s18 }
 0x574   : > { %7007 = vrot.lane.b32.xlu0 %v6926_v62, %s7965_s19 }
 0x575   : > { %7002 = vrot.lane.b32.xlu1 %v6921_v63, %s7965_s19 }
 0x578   : > { %7017 = vrot.lane.b32.xlu0 %v6936_v10, %s7965_s19 }
 0x579   : > { %7012 = vrot.lane.b32.xlu1 %v6931_v42, %s7965_s19 }
 0x57c   : > { %7027 = vrot.lane.b32.xlu0 %v6926_v62, %s7966_s20 }
 0x57d   : > { %7022 = vrot.lane.b32.xlu1 %v6921_v63, %s7966_s20 }
 0x580   : > { %7037 = vrot.lane.b32.xlu0 %v6936_v10, %s7966_s20 }
 0x581   : > { %7032 = vrot.lane.b32.xlu1 %v6931_v42, %s7966_s20 }
 0x584   : > { %7047 = vrot.lane.b32.xlu0 %v6926_v62, %s7967_s21 }
 0x585   : > { %7042 = vrot.lane.b32.xlu1 %v6921_v63, %s7967_s21 }
 0x588   : > { %7057 = vrot.lane.b32.xlu0 %v6936_v10, %s7967_s21 }
 0x589   : > { %7052 = vrot.lane.b32.xlu1 %v6931_v42, %s7967_s21 }
 0x58c   : > { %7067 = vrot.lane.b32.xlu0 %v6926_v62, %s7968_s22 }
 0x58d   : > { %7062 = vrot.lane.b32.xlu1 %v6921_v63, %s7968_s22 }
 0x590   : > { %7077 = vrot.lane.b32.xlu0 %v6936_v10, %s7968_s22 }
 0x591   : > { %7072 = vrot.lane.b32.xlu1 %v6931_v42, %s7968_s22 }
 0x594   : > { %1811 = vperm.xlu0 %6759, %v5167_v48  }
 0x595   : > { %1806 = vperm.xlu1 %6760, %v5166_v50  }
 0x598   : > { %1821 = vperm.xlu0 %6759, %v5169_v11  }
 0x599   : > { %1816 = vperm.xlu1 %6760, %v5168_v12  }
 0x5c6   : > { %v6928_v31 = vpop.permute.xlu0 %6927 }
 0x5c7   : > { %v6923_v15 = vpop.permute.xlu1 %6922  ;;  %v6930_v25 = vunpack.i.h.bf16 %v6928_v31  ;;  %v6929_v56 = vunpack.i.l.bf16 %v6928_v31 }
 0x5c8   : > { %v6925_v0 = vunpack.i.h.bf16 %v6923_v15  ;;  %v6924_v17 = vunpack.i.l.bf16 %v6923_v15 }
 0x5ca   : > { %v1565_v34 = vsel %vm416_vm2, %v6925_v0, %v6930_v25  ;;  %v1569_v27 = vsel %vm416_vm2, %v6930_v25, %v6925_v0  ;;  %v1564_v37 = vsel %vm416_vm2, %v6924_v17, %v6929_v56  ;;  %v1568_v57 = vsel %vm416_vm2, %v6929_v56, %v6924_v17  ;;  %v6938_v28 = vpop.permute.xlu0 %6937 }
 0x5cb   : > { %v5856_v13 = vpack.c.bf16 %v1569_v27, %v1568_v57  ;;  %v6933_v23 = vpop.permute.xlu1 %6932  ;;  %v6940_v29 = vunpack.i.h.bf16 %v6938_v28  ;;  %v6939_v21 = vunpack.i.l.bf16 %v6938_v28  ;;  %v5853_v38 = vpack.c.bf16 %v1565_v34, %v1564_v37 }
 0x5cc   : > { %v6935_v39 = vunpack.i.h.bf16 %v6933_v23  ;;  %v6934_v40 = vunpack.i.l.bf16 %v6933_v23 }
 0x5cd   : > { %5855 = vmatprep.subr.msk.bf16.mxu0 %vm8156_vm6, %v5853_v38 }
 0x5ce   : > { %v1567_v33 = vsel %vm416_vm2, %v6935_v39, %v6940_v29  ;;  %v1571_v16 = vsel %vm416_vm2, %v6940_v29, %v6935_v39  ;;  %v1566_v30 = vsel %vm416_vm2, %v6934_v40, %v6939_v21  ;;  %v1570_v8 = vsel %vm416_vm2, %v6939_v21, %v6934_v40  ;;  %5858 = vmatpush1.bf16.msk.msra.mxu0 %vm8164_vm7, %v5856_v13  ;;  %v6948_v44 = vpop.permute.xlu0 %6947 }
 0x5cf   : > { %v5862_v45 = vpack.c.bf16 %v1571_v16, %v1570_v8  ;;  %v6943_v46 = vpop.permute.xlu1 %6942  ;;  %v6950_v49 = vunpack.i.h.bf16 %v6948_v44  ;;  %v6949_v2 = vunpack.i.l.bf16 %v6948_v44  ;;  %v5859_v51 = vpack.c.bf16 %v1567_v33, %v1566_v30 }
 0x5d0   : > { %v6945_v52 = vunpack.i.h.bf16 %v6943_v46  ;;  %v6944_v54 = vunpack.i.l.bf16 %v6943_v46 }
 0x5d1   : > { %5861 = vmatprep.subr.msk.bf16.mxu0 %vm8156_vm6, %v5859_v51 }
 0x5d2   : > { %v1601_v55 = vsel %vm11150_vm13, %v6950_v49, %v6945_v52  ;;  %v1600_v59 = vsel %vm11151_vm10, %v6949_v2, %v6944_v54  ;;  %5864 = vmatpush1.bf16.msk.msra.mxu0 %vm8164_vm7, %v5862_v45  ;;  %v6958_v62 = vpop.permute.xlu0 %6957  ;;  %v1596_v63 = vsel %vm11152_vm5, %v6944_v54, %v6949_v2  ;;  %v1597_v3 = vsel %vm11153_vm11, %v6945_v52, %v6950_v49  ;;  %vm11154_vm13 = vmmov %vm11152_vm5 }
 0x5d3   : > { %v5867_v7 = vpack.c.bf16 %v1601_v55, %v1600_v59  ;;  %v6953_v10 = vpop.permute.xlu1 %6952  ;;  %v6960_v42 = vunpack.i.h.bf16 %v6958_v62  ;;  %v6959_v9 = vunpack.i.l.bf16 %v6958_v62  ;;  %v5865_v48 = vpack.c.bf16 %v1597_v3, %v1596_v63  ;;  %vm11155_vm10 = vmmov %vm11152_vm5 }
 0x5d4   : > { %v6955_v50 = vunpack.i.h.bf16 %v6953_v10  ;;  %v6954_v11 = vunpack.i.l.bf16 %v6953_v10  ;;  %vm11156_vm11 = vmmov %vm11152_vm5 }
 0x5d5   : > { %5866 = vmatprep.subr.bf16.mxu0 %v5865_v48 }
 0x5d6   : > { %v1603_v12 = vsel %vm11154_vm13, %v6960_v42, %v6955_v50  ;;  %v1602_v31 = vsel %vm11155_vm10, %v6959_v9, %v6954_v11  ;;  %5869 = vmatpush1.bf16.msk.msra.mxu0 %vm8200_vm9, %v5867_v7  ;;  %v6968_v15 = vpop.permute.xlu0 %6967  ;;  %v1598_v25 = vsel %vm11152_vm5, %v6954_v11, %v6959_v9  ;;  %v1599_v56 = vsel %vm11156_vm11, %v6955_v50, %v6960_v42 }
 0x5d7   : > { %v5872_v0 = vpack.c.bf16 %v1603_v12, %v1602_v31  ;;  %v6963_v17 = vpop.permute.xlu1 %6962  ;;  %v6970_v34 = vunpack.i.h.bf16 %v6968_v15  ;;  %v6969_v27 = vunpack.i.l.bf16 %v6968_v15  ;;  %v5870_v37 = vpack.c.bf16 %v1599_v56, %v1598_v25 }
 0x5d8   : > { %v6965_v57 = vunpack.i.h.bf16 %v6963_v17  ;;  %v6964_v28 = vunpack.i.l.bf16 %v6963_v17  ;;  %vm11157_vm13 = vcmp.lt.s32.totalorder %v8119_v19, 15 }
 0x5d9   : > { %5871 = vmatprep.subr.bf16.mxu0 %v5870_v37  ;;  %vm11158_vm10 = vmmov %vm11157_vm13 }
 0x5da   : > { %v1629_v13 = vsel %vm11157_vm13, %v6965_v57, %v6970_v34  ;;  %v1633_v23 = vsel %vm11158_vm10, %v6970_v34, %v6965_v57  ;;  %vm11159_vm8 = vmmov %vm11158_vm10  ;;  %5874 = vmatpush1.bf16.msk.msra.mxu0 %vm8200_vm9, %v5872_v0  ;;  %v6978_v38 = vpop.permute.xlu0 %6977 }
 0x5db   : > { %v1628_v29 = vsel %vm11159_vm8, %v6964_v28, %v6969_v27  ;;  %vm11160_vm5 = vmmov %vm11159_vm8  ;;  %v6973_v40 = vpop.permute.xlu1 %6972  ;;  %v6980_v33 = vunpack.i.h.bf16 %v6978_v38  ;;  %v6979_v16 = vunpack.i.l.bf16 %v6978_v38 }
 0x5dc   : > { %v1632_v21 = vsel %vm11160_vm5, %v6969_v27, %v6964_v28  ;;  %v5875_v30 = vpack.c.bf16 %v1629_v13, %v1628_v29  ;;  %v6975_v8 = vunpack.i.h.bf16 %v6973_v40  ;;  %v6974_v44 = vunpack.i.l.bf16 %v6973_v40  ;;  %vm11161_vm11 = vmmov %vm11160_vm5 }
 0x5dd   : > { %v5878_v39 = vpack.c.bf16 %v1633_v23, %v1632_v21  ;;  %vm11162_vm8 = vmmov %vm11160_vm5  ;;  %v5899_v23 = vpack.c.bf16 %v8885_v58, %v8891_v60 }
 0x5de   : > { %5877 = vmatprep.subr.msk.bf16.mxu0 %vm8229_vm12, %v5875_v30  ;;  %v1631_v45 = vsel %vm11161_vm11, %v6975_v8, %v6980_v33  ;;  %v1635_v46 = vsel %vm11162_vm8, %v6980_v33, %v6975_v8  ;;  %vm11163_vm13 = vmmov %vm11160_vm5  ;;  %v6988_v51 = vpop.permute.xlu0 %6987 }
 0x5df   : > { %v1630_v49 = vsel %vm11163_vm13, %v6974_v44, %v6979_v16  ;;  %vm11164_vm10 = vmmov %vm11160_vm5  ;;  %5880 = vmatpush1.bf16.msk.msra.mxu0 %vm8250_vm15, %v5878_v39  ;;  %v6983_v54 = vpop.permute.xlu1 %6982  ;;  %v6990_v55 = vunpack.i.h.bf16 %v6988_v51  ;;  %v6989_v59 = vunpack.i.l.bf16 %v6988_v51  ;;  %vm11165_vm5 = vcmp.lt.s32.totalorder %v8119_v19, 1 }
 0x5e0   : > { %v1634_v2 = vsel %vm11164_vm10, %v6979_v16, %v6974_v44  ;;  %v5881_v62 = vpack.c.bf16 %v1631_v45, %v1630_v49  ;;  %v6985_v63 = vunpack.i.h.bf16 %v6983_v54  ;;  %v6984_v3 = vunpack.i.l.bf16 %v6983_v54  ;;  %vm11166_vm11 = vmmov %vm11165_vm5 }
 0x5e1   : > { %v5884_v52 = vpack.c.bf16 %v1635_v46, %v1634_v2  ;;  %vm11167_vm8 = vmmov %vm11165_vm5  ;;  %v5901_v16 = vpack.c.bf16 %v8882_v18, %v8888_v1  ;;  %v5903_v44 = vpack.c.bf16 %v8907_v32, %v8901_v5 }
 0x5e2   : > { %5883 = vmatprep.subr.msk.bf16.mxu0 %vm8229_vm12, %v5881_v62  ;;  %v1661_v7 = vsel %vm11165_vm5, %v6985_v63, %v6990_v55  ;;  %v1665_v10 = vsel %vm11166_vm11, %v6990_v55, %v6985_v63  ;;  %v1660_v42 = vsel %vm11167_vm8, %v6984_v3, %v6989_v59  ;;  %vm11168_vm13 = vmmov %vm11165_vm5  ;;  %v6998_v48 = vpop.permute.xlu0 %6997 }
 0x5e3   : > { %v1664_v9 = vsel %vm11168_vm13, %v6989_v59, %v6984_v3  ;;  %5886 = vmatpush1.bf16.msk.msra.mxu0 %vm8250_vm15, %v5884_v52  ;;  %v6993_v11 = vpop.permute.xlu1 %6992  ;;  %v7000_v12 = vunpack.i.h.bf16 %v6998_v48  ;;  %v6999_v31 = vunpack.i.l.bf16 %v6998_v48  ;;  %v5887_v15 = vpack.c.bf16 %v1661_v7, %v1660_v42  ;;  %vm11169_vm10 = vmmov %vm11165_vm5 }
 0x5e4   : > { %v5890_v50 = vpack.c.bf16 %v1665_v10, %v1664_v9  ;;  %v6995_v25 = vunpack.i.h.bf16 %v6993_v11  ;;  %v6994_v56 = vunpack.i.l.bf16 %v6993_v11  ;;  %vm11170_vm11 = vmmov %vm11165_vm5  ;;  %vm11172_vm13 = vcmp.lt.s32.totalorder %v8119_v19, 127 }
 0x5e5   : > { %5889 = vmatprep.subr.msk.bf16.mxu0 %vm8156_vm6, %v5887_v15  ;;  %vm11171_vm8 = vmmov %vm11165_vm5  ;;  %v5905_v59 = vpack.c.bf16 %v8904_v20, %v8898_v35 }
 0x5e6   : > { %v1663_v0 = vsel %vm11169_vm10, %v6995_v25, %v7000_v12  ;;  %v1667_v17 = vsel %vm11165_vm5, %v7000_v12, %v6995_v25  ;;  %v1662_v34 = vsel %vm11170_vm11, %v6994_v56, %v6999_v31  ;;  %v1666_v27 = vsel %vm11171_vm8, %v6999_v31, %v6994_v56  ;;  %v7008_v37 = vpop.permute.xlu0 %7007  ;;  %vm11173_vm10 = vmmov %vm11172_vm13 }
 0x5e7   : > { %5892 = vmatpush1.bf16.msk.msra.mxu0 %vm8275_vm0, %v5890_v50  ;;  %v5896_v57 = vpack.c.bf16 %v1667_v17, %v1666_v27  ;;  %v7003_v28 = vpop.permute.xlu1 %7002  ;;  %v5893_v13 = vpack.c.bf16 %v1663_v0, %v1662_v34  ;;  %v7010_v38 = vunpack.i.h.bf16 %v7008_v37  ;;  %v7009_v39 = vunpack.i.l.bf16 %v7008_v37  ;;  %vm11174_vm5 = vmmov %vm11173_vm10 }
 0x5e8   : > { %v7005_v29 = vunpack.i.h.bf16 %v7003_v28  ;;  %v7004_v21 = vunpack.i.l.bf16 %v7003_v28  ;;  %vm11175_vm11 = vmmov %vm11174_vm5 }
 0x5e9   : > { %5895 = vmatprep.subr.msk.bf16.mxu0 %vm8156_vm6, %v5893_v13  ;;  %vm11176_vm8 = vmmov %vm11174_vm5 }
 0x5ea   : > { %v7018_v40 = vpop.permute.xlu0 %7017  ;;  %v1697_v30 = vsel %vm11172_vm13, %v7010_v38, %v7005_v29  ;;  %v1696_v8 = vsel %vm11173_vm10, %v7009_v39, %v7004_v21  ;;  %v1693_v54 = vsel %vm11174_vm5, %v7005_v29, %v7010_v38  ;;  %v1692_v55 = vsel %vm11175_vm11, %v7004_v21, %v7009_v39  ;;  %vm11177_vm13 = vmmov %vm11174_vm5 }
 0x5eb   : > { %5898 = vmatpush1.bf16.msk.msra.mxu0 %vm8275_vm0, %v5896_v57  ;;  %v7013_v33 = vpop.permute.xlu1 %7012  ;;  %v7020_v49 = vunpack.i.h.bf16 %v7018_v40  ;;  %v7019_v2 = vunpack.i.l.bf16 %v7018_v40  ;;  %v5907_v62 = vpack.c.bf16 %v1697_v30, %v1696_v8  ;;  %v5910_v11 = vpack.c.bf16 %v1693_v54, %v1692_v55  ;;  %vm11178_vm10 = vmmov %vm11174_vm5 }
 0x5ec   : > { %5900 = vmatprep.subr.bf16.mxu0 %v5899_v23  ;;  %v7015_v45 = vunpack.i.h.bf16 %v7013_v33  ;;  %v7014_v46 = vunpack.i.l.bf16 %v7013_v33  ;;  %vm11179_vm11 = vcmp.lt.s32.totalorder %v8119_v19, 113 }
 0x5ee   : > { %v7028_v51 = vpop.permute.xlu0 %7027  ;;  %v1699_v42 = vsel %vm11176_vm8, %v7020_v49, %v7015_v45  ;;  %v1698_v9 = vsel %vm11177_vm13, %v7019_v2, %v7014_v46  ;;  %v1695_v12 = vsel %vm11178_vm10, %v7015_v45, %v7020_v49  ;;  %v1694_v31 = vsel %vm11174_vm5, %v7014_v46, %v7019_v2  ;;  %vm11180_vm8 = vmmov %vm11179_vm11 }
 0x5ef   : > { %5902 = vmatpush1.bf16.msra.mxu0 %v5901_v16  ;;  %v7023_v52 = vpop.permute.xlu1 %7022  ;;  %v7030_v7 = vunpack.i.h.bf16 %v7028_v51  ;;  %v7029_v10 = vunpack.i.l.bf16 %v7028_v51  ;;  %v5913_v56 = vpack.c.bf16 %v1699_v42, %v1698_v9  ;;  %v5916_v28 = vpack.c.bf16 %v1695_v12, %v1694_v31  ;;  %vm11181_vm13 = vmmov %vm11180_vm8 }
 0x5f0   : > { %5904 = vmatprep.subr.bf16.mxu0 %v5903_v44  ;;  %v7025_v63 = vunpack.i.h.bf16 %v7023_v52  ;;  %v7024_v3 = vunpack.i.l.bf16 %v7023_v52  ;;  %vm11182_vm10 = vmmov %vm11180_vm8 }
 0x5f1   : > { %vm11183_vm5 = vmmov %vm11180_vm8 }
 0x5f2   : > { %v7038_v48 = vpop.permute.xlu0 %7037  ;;  %v1729_v15 = vsel %vm11179_vm11, %v7030_v7, %v7025_v63  ;;  %v1728_v25 = vsel %vm11180_vm8, %v7029_v10, %v7024_v3  ;;  %v1725_v13 = vsel %vm11181_vm13, %v7025_v63, %v7030_v7  ;;  %v1724_v23 = vsel %vm11182_vm10, %v7024_v3, %v7029_v10  ;;  %vm11184_vm11 = vmmov %vm11183_vm5 }
 0x5f3   : > { %5906 = vmatpush1.bf16.msra.mxu0 %v5905_v59  ;;  %v7033_v50 = vpop.permute.xlu1 %7032  ;;  %v7040_v34 = vunpack.i.h.bf16 %v7038_v48  ;;  %v7039_v27 = vunpack.i.l.bf16 %v7038_v48  ;;  %v5919_v29 = vpack.c.bf16 %v1729_v15, %v1728_v25  ;;  %v5922_v44 = vpack.c.bf16 %v1725_v13, %v1724_v23  ;;  %vm11185_vm8 = vmmov %vm11183_vm5 }
 0x5f4   : > { %5909 = vmatprep.subr.msk.bf16.mxu0 %vm8229_vm12, %v5907_v62  ;;  %v7035_v0 = vunpack.i.h.bf16 %v7033_v50  ;;  %v7034_v17 = vunpack.i.l.bf16 %v7033_v50  ;;  %vm11186_vm13 = vmmov %vm11183_vm5  ;;  %vm11187_vm10 = vcmp.lt.s32.totalorder %v8119_v19, 112 }
 0x5f6   : > { %v7048_v37 = vpop.permute.xlu0 %7047  ;;  %v1731_v33 = vsel %vm11183_vm5, %v7040_v34, %v7035_v0  ;;  %v1730_v16 = vsel %vm11184_vm11, %v7039_v27, %v7034_v17  ;;  %v1727_v45 = vsel %vm11185_vm8, %v7035_v0, %v7040_v34  ;;  %v1726_v46 = vsel %vm11186_vm13, %v7034_v17, %v7039_v27  ;;  %vm11188_vm5 = vmmov %vm11187_vm10 }
 0x5f7   : > { %5912 = vmatpush1.bf16.msk.msra.mxu0 %vm8319_vm14, %v5910_v11  ;;  %v7043_v57 = vpop.permute.xlu1 %7042  ;;  %v7050_v39 = vunpack.i.h.bf16 %v7048_v37  ;;  %v7049_v40 = vunpack.i.l.bf16 %v7048_v37  ;;  %v5925_v51 = vpack.c.bf16 %v1731_v33, %v1730_v16  ;;  %v5928_v3 = vpack.c.bf16 %v1727_v45, %v1726_v46  ;;  %vm11189_vm11 = vmmov %vm11188_vm5  ;;  %v5154_v16 = vld [vmem:[%s11046_s1 + $0x60] sm:$0xff] }
 0x5f8   : > { %5915 = vmatprep.subr.msk.bf16.mxu0 %vm8229_vm12, %v5913_v56  ;;  %v7045_v21 = vunpack.i.h.bf16 %v7043_v57  ;;  %v7044_v38 = vunpack.i.l.bf16 %v7043_v57  ;;  %vm11190_vm8 = vmmov %vm11188_vm5 }
 0x5f9   : > { %vm11191_vm13 = vmmov %vm11188_vm5 }
 0x5fa   : > { %v7058_v30 = vpop.permute.xlu0 %7057  ;;  %v1761_v49 = vsel %vm11187_vm10, %v7050_v39, %v7045_v21  ;;  %v1760_v2 = vsel %vm11188_vm5, %v7049_v40, %v7044_v38  ;;  %v1757_v7 = vsel %vm11189_vm11, %v7045_v21, %v7050_v39  ;;  %v1756_v10 = vsel %vm11190_vm8, %v7044_v38, %v7049_v40  ;;  %vm11192_vm10 = vmmov %vm11188_vm5 }
 0x5fb   : > { %5918 = vmatpush1.bf16.msk.msra.mxu0 %vm8319_vm14, %v5916_v28  ;;  %v7053_v8 = vpop.permute.xlu1 %7052  ;;  %v7060_v55 = vunpack.i.h.bf16 %v7058_v30  ;;  %v7059_v59 = vunpack.i.l.bf16 %v7058_v30  ;;  %v5931_v42 = vpack.c.bf16 %v1761_v49, %v1760_v2  ;;  %v5934_v0 = vpack.c.bf16 %v1757_v7, %v1756_v10  ;;  %vm11193_vm11 = vmmov %vm11188_vm5  ;;  %v5158_v30 = vld [vmem:[%s11046_s1 + $0x80] sm:$0xff]  ;;  %v5157_v49 = vld [vmem:[%s11046_s1 + $0x78] sm:$0xff] }
 0x5fc   : > { %5921 = vmatprep.subr.msk.bf16.mxu0 %vm8355_vm1, %v5919_v29  ;;  %v7055_v52 = vunpack.i.h.bf16 %v7053_v8  ;;  %v7054_v54 = vunpack.i.l.bf16 %v7053_v8  ;;  %vm11194_vm8 = vcmp.lt.s32.totalorder %v8119_v19, 111  ;;  %v5161_v2 = vld [vmem:[%s11046_s1 + $0x98] sm:$0xff] }
 0x5fe   : > { %v7068_v62 = vpop.permute.xlu0 %7067  ;;  %v1763_v12 = vsel %vm11191_vm13, %v7060_v55, %v7055_v52  ;;  %v1762_v31 = vsel %vm11192_vm10, %v7059_v59, %v7054_v54  ;;  %v1759_v56 = vsel %vm11188_vm5, %v7055_v52, %v7060_v55  ;;  %v1758_v17 = vsel %vm11193_vm11, %v7054_v54, %v7059_v59  ;;  %vm11195_vm13 = vmmov %vm11194_vm8  ;;  %v5160_v52 = vld [vmem:[%s11046_s1 + $0x90] sm:$0xff]  ;;  %v5163_v55 = vld [vmem:[%s11046_s1 + $0xa8] sm:$0xff] }
 0x5ff   : > { %5924 = vmatpush1.bf16.msk.msra.mxu0 %vm8275_vm0, %v5922_v44  ;;  %v7063_v63 = vpop.permute.xlu1 %7062  ;;  %v7070_v50 = vunpack.i.h.bf16 %v7068_v62  ;;  %v7069_v11 = vunpack.i.l.bf16 %v7068_v62  ;;  %v5936_v37 = vpack.c.bf16 %v1763_v12, %v1762_v31  ;;  %v5939_v29 = vpack.c.bf16 %v1759_v56, %v1758_v17  ;;  %vm11196_vm10 = vmmov %vm11194_vm8  ;;  %v5164_v54 = vld [vmem:[%s11046_s1 + $0xb0] sm:$0xff]  ;;  %v5159_v62 = vld [vmem:[%s11046_s1 + $0x88] sm:$0xff] }
 0x600   : > { %5927 = vmatprep.subr.msk.bf16.mxu0 %vm8355_vm1, %v5925_v51  ;;  %v7065_v9 = vunpack.i.h.bf16 %v7063_v63  ;;  %v7064_v48 = vunpack.i.l.bf16 %v7063_v63  ;;  %vm11197_vm5 = vmmov %vm11194_vm8  ;;  %v5156_v59 = vld [vmem:[%s11046_s1 + $0x70] sm:$0xff]  ;;  %v5162_v63 = vld [vmem:[%s11046_s1 + $0xa0] sm:$0xff] }
 0x601   : > { %vm11198_vm11 = vmmov %vm11197_vm5 }
 0x602   : > { %v7078_v25 = vpop.permute.xlu0 %7077  ;;  %v1793_v34 = vsel %vm11194_vm8, %v7070_v50, %v7065_v9  ;;  %v1792_v27 = vsel %vm11195_vm13, %v7069_v11, %v7064_v48  ;;  %v1789_v21 = vsel %vm11196_vm10, %v7065_v9, %v7070_v50  ;;  %v1788_v38 = vsel %vm11197_vm5, %v7064_v48, %v7069_v11  ;;  %vm11199_vm8 = vmmov %vm11197_vm5 }
 0x603   : > { %5930 = vmatpush1.bf16.msk.msra.mxu0 %vm8275_vm0, %v5928_v3  ;;  %v7073_v15 = vpop.permute.xlu1 %7072  ;;  %v7080_v13 = vunpack.i.h.bf16 %v7078_v25  ;;  %v7079_v23 = vunpack.i.l.bf16 %v7078_v25  ;;  %v5941_v39 = vpack.c.bf16 %v1793_v34, %v1792_v27  ;;  %v5944_v8 = vpack.c.bf16 %v1789_v21, %v1788_v38  ;;  %vm11200_vm13 = vmmov %vm11197_vm5  ;;  %v5165_v3 = vld [vmem:[%s11046_s1 + $0xb8] sm:$0xff] }
 0x604   : > { %5933 = vmatprep.subr.msk.bf16.mxu0 %vm8387_vm4, %v5931_v42  ;;  %v7075_v57 = vunpack.i.h.bf16 %v7073_v15  ;;  %v7074_v28 = vunpack.i.l.bf16 %v7073_v15  ;;  %vm11201_vm10 = vmmov %vm11197_vm5  ;;  %vm11202_vm5 = vcmask 261120  }
 0x606   : > { %v1795_v40 = vsel %vm11198_vm11, %v7080_v13, %v7075_v57  ;;  %v1794_v33 = vsel %vm11199_vm8, %v7079_v23, %v7074_v28  ;;  %v1791_v44 = vsel %vm11200_vm13, %v7075_v57, %v7080_v13  ;;  %v1790_v45 = vsel %vm11201_vm10, %v7074_v28, %v7079_v23  ;;  %vm11203_vm11 = vmmov %vm11202_vm5 }
 0x607   : > { %5935 = vmatpush1.bf16.msra.mxu0 %v5934_v0  ;;  %v5947_v46 = vpack.c.bf16 %v1795_v40, %v1794_v33  ;;  %v5950_v51 = vpack.c.bf16 %v1791_v44, %v1790_v45  ;;  %vm11204_vm8 = vmmov %vm11202_vm5 }
 0x608   : > { %5938 = vmatprep.subr.msk.bf16.mxu0 %vm8387_vm4, %v5936_v37  ;;  %vm11205_vm13 = vmmov %vm11202_vm5 }
 0x60b   : > { %5940 = vmatpush1.bf16.msra.mxu0 %v5939_v29 }
 0x60c   : > { %5943 = vmatprep.subr.msk.bf16.mxu0 %vm8413_vm3, %v5941_v39 }
 0x60e   : > { %1901 = vmatmul.mubr.f32.vlgmr.msra.gmra.mrb[8].mxu0 %v5154_v16 }
 0x60f   : > { %5946 = vmatpush1.bf16.msk.msra.mxu0 %vm8319_vm14, %v5944_v8  ;;  %1906 = vmatprep.mubr.f32.mxu0 %v5158_v30 }
 0x610   : > { %5949 = vmatprep.subr.msk.bf16.mxu0 %vm8413_vm3, %v5947_v46 }
 0x612   : > { %1907 = vmatmul.mubr.f32.gmra.mrb[10].mxu0 %v5157_v49 }
 0x613   : > { %5952 = vmatpush1.bf16.msk.msra.mxu0 %vm8319_vm14, %v5950_v51  ;;  %1912 = vmatprep.mubr.f32.mxu0 %v5161_v2  ;;  %v1812_v50 = vpop.permute.xlu0 %1811 }
 0x614   : > { %v1807_v7 = vpop.permute.xlu1 %1806 }
 0x616   : > { %1913 = vmatmul.mubr.f32.gmra.mrb[12].mxu0 %v5160_v52 }
 0x617   : > { %1918 = vmatprep.mubr.f32.mxu0 %v5164_v54  ;;  %v1822_v33 = vpop.permute.xlu0 %1821 }
 0x618   : > { %v1817_v17 = vpop.permute.xlu1 %1816 }
 0x61a   : > { %1919 = vmatmul.mubr.f32.gmra.mrb[14].mxu0 %v5163_v55 }
 0x61b   : > { %1989 = vmatprep.mubr.f32.mxu0 %v7970_v36 }
 0x61e   : > { %5226 = vmatmul.mubr.msk.f32.vlgmr.msra.gmra.mrb[8].mxu0 %vm11202_vm5, %v5156_v59 }
 0x61f   : > { %1995 = vmatprep.mubr.f32.mxu0 %v7970_v36 }
 0x622   : > { %5227 = vmatmul.mubr.msk.f32.gmra.mrb[10].mxu0 %vm11203_vm11, %v5159_v62 }
 0x623   : > { %2001 = vmatprep.mubr.f32.mxu0 %v7970_v36 }
 0x626   : > { %5228 = vmatmul.mubr.msk.f32.gmra.mrb[12].mxu0 %vm11204_vm8, %v5162_v63 }
 0x627   : > { %2007 = vmatprep.mubr.f32.mxu0 %v7970_v36 }
 0x62a   : > { %5229 = vmatmul.mubr.msk.f32.gmra.mrb[14].mxu0 %vm11205_vm13, %v5165_v3 }
 0x6f1   : > { %v1991_v10 = vpop.f32.mrb[8].mxu0 }
 0x6f2   : > { %v6469_v42 = vadd.f32 %v1991_v10, %v1807_v7  ;;  %v1993_v9 = vpop.f32.mrb[9].mxu0  ;;  %v5231_v10 = vld [vmem:[%s11048_s3 + $0x68] sm:$0xff] }
 0x6f3   : > { %v6470_v48 = vadd.f32 %v1993_v9, %v1807_v7  ;;  %2408 = vmatprep.mubr.f32.mxu1 %v5231_v10  ;;  %v5243_v9 = vld [vmem:[%s11049_s4 + $0x28] sm:$0xff] }
 0x6f4   : > { %v2022_v12 = vmul.f32 0.1, %v6469_v42  ;;  %vm2014_vm10 = vcmp.gt.f32.partialorder %v6469_v42, 0.0 }
 0x6f5   : > { %v1997_v11 = vpop.f32.mrb[10].mxu0  ;;  %v2023_v31 = vmul.f32 0.1, %v6470_v48  ;;  %vm2015_vm5 = vcmp.gt.f32.partialorder %v6470_v48, 0.0 }
 0x6f6   : > { %v6471_v15 = vadd.f32 %v1997_v11, %v1812_v50  ;;  %v1999_v25 = vpop.f32.mrb[11].mxu0  ;;  %v9193_v37 = vsel %vm2014_vm10, %v6469_v42, %v2022_v12  ;;  %v5242_v42 = vld [vmem:[%s11049_s4 + $0x20] sm:$0xff] }
 0x6f7   : > { %v6472_v56 = vadd.f32 %v1999_v25, %v1812_v50  ;;  %v9195_v57 = vsel %vm2015_vm5, %v6470_v48, %v2023_v31  ;;  %v5244_v48 = vld [vmem:[%s11049_s4 + $0x30] sm:$0xff]  ;;  %v5245_v50 = vld [vmem:[%s11049_s4 + $0x38] sm:$0xff] }
 0x6f8   : > { %vm2016_vm11 = vcmp.gt.f32.partialorder %v6471_v15, 0.0  ;;  %v2024_v0 = vmul.f32 0.1, %v6471_v15 }
 0x6f9   : > { %vm2017_vm8 = vcmp.gt.f32.partialorder %v6472_v56, 0.0  ;;  %v2025_v34 = vmul.f32 0.1, %v6472_v56  ;;  %v2003_v27 = vpop.f32.mrb[12].mxu0 }
 0x6fa   : > { %v9197_v28 = vsel %vm2016_vm11, %v6471_v15, %v2024_v0  ;;  %v6473_v13 = vadd.f32 %v2003_v27, %v1817_v17  ;;  %v2005_v23 = vpop.f32.mrb[13].mxu0 }
 0x6fb   : > { %v9199_v29 = vsel %vm2017_vm8, %v6472_v56, %v2025_v34  ;;  %v6474_v21 = vadd.f32 %v2005_v23, %v1817_v17  ;;  %v7081_v38 = vpack.i.bf16 %v9197_v28, %v9193_v37  ;;  %v6001_v63 = vpack.c.bf16 %v9197_v28, %v9193_v37 }
 0x6fc   : > { %vm2018_vm13 = vcmp.gt.f32.partialorder %v6473_v13, 0.0  ;;  %v2026_v39 = vmul.f32 0.1, %v6473_v13  ;;  %v7086_v40 = vpack.i.bf16 %v9199_v29, %v9195_v57  ;;  %v5999_v54 = vpack.c.bf16 %v9199_v29, %v9195_v57 }
 0x6fd   : > { %vm2019_vm10 = vcmp.gt.f32.partialorder %v6474_v21, 0.0  ;;  %v2027_v16 = vmul.f32 0.1, %v6474_v21  ;;  %v2009_v30 = vpop.f32.mrb[14].mxu0  ;;  %7082 = vrot.lane.b32.xlu1 %v7081_v38, %s7961_s15  ;;  %vm11206_vm8 = vcmp.lt.s32.totalorder %v8119_v19, 16 }
 0x6fe   : > { %v9206_v8 = vsel %vm2018_vm13, %v6473_v13, %v2026_v39  ;;  %v6475_v44 = vadd.f32 %v2009_v30, %v1822_v33  ;;  %v2011_v45 = vpop.f32.mrb[15].mxu0  ;;  %7087 = vrot.lane.b32.xlu0 %v7086_v40, %s7961_s15  ;;  %vm11207_vm13 = vmmov %vm11206_vm8 }
 0x6ff   : > { %v9209_v46 = vsel %vm2019_vm10, %v6474_v21, %v2027_v16  ;;  %v6476_v49 = vadd.f32 %v2011_v45, %v1822_v33  ;;  %vm11208_vm10 = vmmov %vm11206_vm8 }
 0x700   : > { %vm2020_vm5 = vcmp.gt.f32.partialorder %v6475_v44, 0.0  ;;  %v2028_v2 = vmul.f32 0.1, %v6475_v44 }
 0x701   : > { %vm2021_vm11 = vcmp.gt.f32.partialorder %v6476_v49, 0.0  ;;  %v2029_v51 = vmul.f32 0.1, %v6476_v49 }
 0x702   : > { %v9211_v52 = vsel %vm2020_vm5, %v6475_v44, %v2028_v2  ;;  %vm11209_vm5 = vmmov %vm11206_vm8 }
 0x703   : > { %v9215_v55 = vsel %vm2021_vm11, %v6476_v49, %v2029_v51  ;;  %v7091_v59 = vpack.i.bf16 %v9211_v52, %v9206_v8  ;;  %v6005_v7 = vpack.c.bf16 %v9211_v52, %v9206_v8  ;;  %vm11210_vm11 = vmmov %vm11209_vm5 }
 0x704   : > { %v7101_v62 = vpack.i.bf16 %v9215_v55, %v9209_v46  ;;  %v6003_v3 = vpack.c.bf16 %v9215_v55, %v9209_v46 }
 0x705   : > { %7092 = vrot.lane.b32.xlu1 %v7091_v59, %s7961_s15 }
 0x706   : > { %7102 = vrot.lane.b32.xlu0 %v7101_v62, %s7961_s15 }
 0x709   : > { %7097 = vrot.lane.b32.xlu1 %v7081_v38, %s7962_s16 }
 0x70a   : > { %7107 = vrot.lane.b32.xlu0 %v7086_v40, %s7962_s16 }
 0x70d   : > { %7112 = vrot.lane.b32.xlu1 %v7091_v59, %s7962_s16 }
 0x70e   : > { %7122 = vrot.lane.b32.xlu0 %v7101_v62, %s7962_s16 }
 0x711   : > { %7117 = vrot.lane.b32.xlu1 %v7081_v38, %s7963_s17 }
 0x712   : > { %7127 = vrot.lane.b32.xlu0 %v7086_v40, %s7963_s17 }
 0x715   : > { %7132 = vrot.lane.b32.xlu1 %v7091_v59, %s7963_s17 }
 0x716   : > { %7142 = vrot.lane.b32.xlu0 %v7101_v62, %s7963_s17 }
 0x719   : > { %7137 = vrot.lane.b32.xlu1 %v7081_v38, %s7964_s18 }
 0x71a   : > { %7147 = vrot.lane.b32.xlu0 %v7086_v40, %s7964_s18 }
 0x71d   : > { %7152 = vrot.lane.b32.xlu1 %v7091_v59, %s7964_s18 }
 0x71e   : > { %7157 = vrot.lane.b32.xlu0 %v7101_v62, %s7964_s18 }
 0x721   : > { %7162 = vrot.lane.b32.xlu1 %v7081_v38, %s7965_s19 }
 0x722   : > { %7167 = vrot.lane.b32.xlu0 %v7086_v40, %s7965_s19 }
 0x725   : > { %7172 = vrot.lane.b32.xlu1 %v7091_v59, %s7965_s19 }
 0x726   : > { %7182 = vrot.lane.b32.xlu0 %v7101_v62, %s7965_s19 }
 0x729   : > { %7177 = vrot.lane.b32.xlu1 %v7081_v38, %s7966_s20 }
 0x72a   : > { %7187 = vrot.lane.b32.xlu0 %v7086_v40, %s7966_s20 }
 0x72d   : > { %7192 = vrot.lane.b32.xlu1 %v7091_v59, %s7966_s20 }
 0x72e   : > { %7202 = vrot.lane.b32.xlu0 %v7101_v62, %s7966_s20 }
 0x731   : > { %7197 = vrot.lane.b32.xlu1 %v7081_v38, %s7967_s21 }
 0x732   : > { %7207 = vrot.lane.b32.xlu0 %v7086_v40, %s7967_s21 }
 0x735   : > { %7212 = vrot.lane.b32.xlu1 %v7091_v59, %s7967_s21 }
 0x736   : > { %7217 = vrot.lane.b32.xlu0 %v7101_v62, %s7967_s21 }
 0x739   : > { %7222 = vrot.lane.b32.xlu1 %v7081_v38, %s7968_s22 }
 0x73a   : > { %7227 = vrot.lane.b32.xlu0 %v7086_v40, %s7968_s22 }
 0x73d   : > { %7232 = vrot.lane.b32.xlu1 %v7091_v59, %s7968_s22 }
 0x73e   : > { %7237 = vrot.lane.b32.xlu0 %v7101_v62, %s7968_s22 }
 0x741   : > { %2314 = vperm.xlu1 %6760, %v5242_v42  }
 0x742   : > { %2319 = vperm.xlu0 %6759, %v5243_v9  }
 0x745   : > { %2324 = vperm.xlu1 %6760, %v5244_v48  }
 0x746   : > { %2329 = vperm.xlu0 %6759, %v5245_v50  }
 0x76f   : > { %v7083_v11 = vpop.permute.xlu1 %7082 }
 0x770   : > { %v7085_v12 = vunpack.i.h.bf16 %v7083_v11  ;;  %v7084_v31 = vunpack.i.l.bf16 %v7083_v11  ;;  %v7088_v15 = vpop.permute.xlu0 %7087 }
 0x771   : > { %v7090_v25 = vunpack.i.h.bf16 %v7088_v15  ;;  %v7089_v56 = vunpack.i.l.bf16 %v7088_v15 }
 0x773   : > { %v2072_v0 = vsel %vm416_vm2, %v7084_v31, %v7089_v56  ;;  %v2073_v17 = vsel %vm416_vm2, %v7085_v12, %v7090_v25  ;;  %v2076_v34 = vsel %vm416_vm2, %v7089_v56, %v7084_v31  ;;  %v2077_v27 = vsel %vm416_vm2, %v7090_v25, %v7085_v12 }
 0x774   : > { %v5956_v13 = vpack.c.bf16 %v2077_v27, %v2076_v34  ;;  %v5953_v23 = vpack.c.bf16 %v2073_v17, %v2072_v0 }
 0x776   : > { %5955 = vmatprep.subr.msk.bf16.mxu1 %vm8156_vm6, %v5953_v23 }
 0x777   : > { %v7093_v21 = vpop.permute.xlu1 %7092  ;;  %5958 = vmatpush1.bf16.msk.msra.mxu1 %vm8164_vm7, %v5956_v13 }
 0x778   : > { %v7095_v38 = vunpack.i.h.bf16 %v7093_v21  ;;  %v7094_v39 = vunpack.i.l.bf16 %v7093_v21  ;;  %v7103_v40 = vpop.permute.xlu0 %7102 }
 0x779   : > { %v7105_v33 = vunpack.i.h.bf16 %v7103_v40  ;;  %v7104_v16 = vunpack.i.l.bf16 %v7103_v40 }
 0x77b   : > { %v2074_v30 = vsel %vm416_vm2, %v7094_v39, %v7104_v16  ;;  %v2075_v44 = vsel %vm416_vm2, %v7095_v38, %v7105_v33  ;;  %v2078_v45 = vsel %vm416_vm2, %v7104_v16, %v7094_v39  ;;  %v2079_v49 = vsel %vm416_vm2, %v7105_v33, %v7095_v38  ;;  %v7098_v2 = vpop.permute.xlu1 %7097 }
 0x77c   : > { %v5962_v51 = vpack.c.bf16 %v2079_v49, %v2078_v45  ;;  %v7100_v59 = vunpack.i.h.bf16 %v7098_v2  ;;  %v7099_v62 = vunpack.i.l.bf16 %v7098_v2  ;;  %v7108_v10 = vpop.permute.xlu0 %7107  ;;  %v5959_v42 = vpack.c.bf16 %v2075_v44, %v2074_v30 }
 0x77d   : > { %v7110_v9 = vunpack.i.h.bf16 %v7108_v10  ;;  %v7109_v48 = vunpack.i.l.bf16 %v7108_v10 }
 0x77e   : > { %5961 = vmatprep.subr.msk.bf16.mxu1 %vm8156_vm6, %v5959_v42 }
 0x77f   : > { %v2108_v50 = vsel %vm11206_vm8, %v7109_v48, %v7099_v62  ;;  %v2109_v11 = vsel %vm11207_vm13, %v7110_v9, %v7100_v59  ;;  %v7113_v12 = vpop.permute.xlu1 %7112  ;;  %5964 = vmatpush1.bf16.msk.msra.mxu1 %vm8164_vm7, %v5962_v51  ;;  %v2104_v31 = vsel %vm11208_vm10, %v7099_v62, %v7109_v48  ;;  %v2105_v15 = vsel %vm11209_vm5, %v7100_v59, %v7110_v9  ;;  %vm11211_vm8 = vmmov %vm11209_vm5 }
 0x780   : > { %v5967_v25 = vpack.c.bf16 %v2109_v11, %v2108_v50  ;;  %v7115_v56 = vunpack.i.h.bf16 %v7113_v12  ;;  %v7114_v0 = vunpack.i.l.bf16 %v7113_v12  ;;  %v7123_v17 = vpop.permute.xlu0 %7122  ;;  %v5965_v34 = vpack.c.bf16 %v2105_v15, %v2104_v31  ;;  %vm11212_vm13 = vmmov %vm11209_vm5 }
 0x781   : > { %v7125_v27 = vunpack.i.h.bf16 %v7123_v17  ;;  %v7124_v13 = vunpack.i.l.bf16 %v7123_v17  ;;  %vm11213_vm10 = vmmov %vm11209_vm5  ;;  %vm11214_vm5 = vcmp.lt.s32.totalorder %v8119_v19, 15 }
 0x782   : > { %5966 = vmatprep.subr.bf16.mxu1 %v5965_v34 }
 0x783   : > { %v2110_v23 = vsel %vm11210_vm11, %v7124_v13, %v7114_v0  ;;  %v2111_v21 = vsel %vm11211_vm8, %v7125_v27, %v7115_v56  ;;  %v7118_v38 = vpop.permute.xlu1 %7117  ;;  %5969 = vmatpush1.bf16.msk.msra.mxu1 %vm8200_vm9, %v5967_v25  ;;  %v2106_v39 = vsel %vm11212_vm13, %v7114_v0, %v7124_v13  ;;  %v2107_v40 = vsel %vm11213_vm10, %v7115_v56, %v7125_v27  ;;  %vm11215_vm11 = vmmov %vm11214_vm5 }
 0x784   : > { %v5972_v33 = vpack.c.bf16 %v2111_v21, %v2110_v23  ;;  %v7120_v16 = vunpack.i.h.bf16 %v7118_v38  ;;  %v7119_v30 = vunpack.i.l.bf16 %v7118_v38  ;;  %v7128_v44 = vpop.permute.xlu0 %7127  ;;  %v5970_v45 = vpack.c.bf16 %v2107_v40, %v2106_v39  ;;  %vm11216_vm8 = vmmov %vm11214_vm5 }
 0x785   : > { %v7130_v49 = vunpack.i.h.bf16 %v7128_v44  ;;  %v7129_v2 = vunpack.i.l.bf16 %v7128_v44  ;;  %vm11217_vm13 = vmmov %vm11214_vm5 }
 0x786   : > { %5971 = vmatprep.subr.bf16.mxu1 %v5970_v45  ;;  %vm11218_vm10 = vmmov %vm11214_vm5 }
 0x787   : > { %v2136_v51 = vsel %vm11214_vm5, %v7119_v30, %v7129_v2  ;;  %v2137_v59 = vsel %vm11215_vm11, %v7120_v16, %v7130_v49  ;;  %v2140_v62 = vsel %vm11216_vm8, %v7129_v2, %v7119_v30  ;;  %v2141_v10 = vsel %vm11217_vm13, %v7130_v49, %v7120_v16  ;;  %v7133_v42 = vpop.permute.xlu1 %7132  ;;  %5974 = vmatpush1.bf16.msk.msra.mxu1 %vm8200_vm9, %v5972_v33  ;;  %vm11219_vm11 = vmmov %vm11214_vm5 }
 0x788   : > { %v5978_v9 = vpack.c.bf16 %v2141_v10, %v2140_v62  ;;  %v7135_v48 = vunpack.i.h.bf16 %v7133_v42  ;;  %v7134_v50 = vunpack.i.l.bf16 %v7133_v42  ;;  %v7143_v11 = vpop.permute.xlu0 %7142  ;;  %v5975_v12 = vpack.c.bf16 %v2137_v59, %v2136_v51  ;;  %vm11220_vm8 = vmmov %vm11214_vm5 }
 0x789   : > { %v7145_v31 = vunpack.i.h.bf16 %v7143_v11  ;;  %v7144_v15 = vunpack.i.l.bf16 %v7143_v11  ;;  %vm11221_vm13 = vcmp.lt.s32.totalorder %v8119_v19, 1 }
 0x78a   : > { %5977 = vmatprep.subr.msk.bf16.mxu1 %vm8229_vm12, %v5975_v12 }
 0x78b   : > { %v2138_v25 = vsel %vm11218_vm10, %v7134_v50, %v7144_v15  ;;  %v2139_v56 = vsel %vm11214_vm5, %v7135_v48, %v7145_v31  ;;  %v2142_v0 = vsel %vm11219_vm11, %v7144_v15, %v7134_v50  ;;  %v2143_v17 = vsel %vm11220_vm8, %v7145_v31, %v7135_v48  ;;  %v7138_v34 = vpop.permute.xlu1 %7137  ;;  %5980 = vmatpush1.bf16.msk.msra.mxu1 %vm8250_vm15, %v5978_v9  ;;  %vm11222_vm10 = vmmov %vm11221_vm13 }
 0x78c   : > { %v5984_v27 = vpack.c.bf16 %v2143_v17, %v2142_v0  ;;  %v7140_v13 = vunpack.i.h.bf16 %v7138_v34  ;;  %v7139_v23 = vunpack.i.l.bf16 %v7138_v34  ;;  %v7148_v21 = vpop.permute.xlu0 %7147  ;;  %v5981_v38 = vpack.c.bf16 %v2139_v56, %v2138_v25  ;;  %vm11223_vm5 = vmmov %vm11222_vm10 }
 0x78d   : > { %v7150_v39 = vunpack.i.h.bf16 %v7148_v21  ;;  %v7149_v40 = vunpack.i.l.bf16 %v7148_v21  ;;  %vm11224_vm11 = vmmov %vm11223_vm5 }
 0x78e   : > { %5983 = vmatprep.subr.msk.bf16.mxu1 %vm8229_vm12, %v5981_v38  ;;  %vm11225_vm8 = vmmov %vm11223_vm5 }
 0x78f   : > { %v2168_v33 = vsel %vm11221_vm13, %v7139_v23, %v7149_v40  ;;  %v2169_v16 = vsel %vm11222_vm10, %v7140_v13, %v7150_v39  ;;  %v2172_v30 = vsel %vm11223_vm5, %v7149_v40, %v7139_v23  ;;  %v2173_v44 = vsel %vm11224_vm11, %v7150_v39, %v7140_v13  ;;  %v7153_v45 = vpop.permute.xlu1 %7152  ;;  %5986 = vmatpush1.bf16.msk.msra.mxu1 %vm8250_vm15, %v5984_v27  ;;  %vm11226_vm13 = vmmov %vm11223_vm5 }
 0x790   : > { %v5990_v49 = vpack.c.bf16 %v2173_v44, %v2172_v30  ;;  %v7155_v2 = vunpack.i.h.bf16 %v7153_v45  ;;  %v7154_v51 = vunpack.i.l.bf16 %v7153_v45  ;;  %v7158_v59 = vpop.permute.xlu0 %7157  ;;  %v5987_v62 = vpack.c.bf16 %v2169_v16, %v2168_v33  ;;  %vm11227_vm10 = vmmov %vm11223_vm5 }
 0x791   : > { %v7160_v10 = vunpack.i.h.bf16 %v7158_v59  ;;  %v7159_v42 = vunpack.i.l.bf16 %v7158_v59  ;;  %vm11228_vm11 = vcmp.lt.s32.totalorder %v8119_v19, 127 }
 0x792   : > { %5989 = vmatprep.subr.msk.bf16.mxu1 %vm8156_vm6, %v5987_v62 }
 0x793   : > { %v2170_v9 = vsel %vm11225_vm8, %v7154_v51, %v7159_v42  ;;  %v2171_v48 = vsel %vm11226_vm13, %v7155_v2, %v7160_v10  ;;  %v2174_v50 = vsel %vm11227_vm10, %v7159_v42, %v7154_v51  ;;  %v2175_v11 = vsel %vm11223_vm5, %v7160_v10, %v7155_v2  ;;  %v7163_v12 = vpop.permute.xlu1 %7162  ;;  %5992 = vmatpush1.bf16.msk.msra.mxu1 %vm8275_vm0, %v5990_v49  ;;  %vm11229_vm8 = vmmov %vm11228_vm11 }
 0x794   : > { %v5996_v31 = vpack.c.bf16 %v2175_v11, %v2174_v50  ;;  %v7168_v15 = vpop.permute.xlu0 %7167  ;;  %v5993_v25 = vpack.c.bf16 %v2171_v48, %v2170_v9  ;;  %v7165_v56 = vunpack.i.h.bf16 %v7163_v12  ;;  %v7164_v0 = vunpack.i.l.bf16 %v7163_v12  ;;  %vm11230_vm13 = vmmov %vm11229_vm8 }
 0x795   : > { %v7170_v17 = vunpack.i.h.bf16 %v7168_v15  ;;  %v7169_v34 = vunpack.i.l.bf16 %v7168_v15  ;;  %vm11231_vm10 = vmmov %vm11229_vm8 }
 0x796   : > { %5995 = vmatprep.subr.msk.bf16.mxu1 %vm8156_vm6, %v5993_v25  ;;  %vm11232_vm5 = vmmov %vm11229_vm8 }
 0x797   : > { %v7173_v27 = vpop.permute.xlu1 %7172  ;;  %5998 = vmatpush1.bf16.msk.msra.mxu1 %vm8275_vm0, %v5996_v31  ;;  %v2204_v23 = vsel %vm11228_vm11, %v7169_v34, %v7164_v0  ;;  %v2205_v21 = vsel %vm11229_vm8, %v7170_v17, %v7165_v56  ;;  %v2200_v57 = vsel %vm11230_vm13, %v7164_v0, %v7169_v34  ;;  %v2201_v29 = vsel %vm11231_vm10, %v7165_v56, %v7170_v17  ;;  %vm11233_vm11 = vmmov %vm11232_vm5 }
 0x798   : > { %v7183_v13 = vpop.permute.xlu0 %7182  ;;  %6000 = vmatprep.subr.bf16.mxu1 %v5999_v54  ;;  %v7175_v38 = vunpack.i.h.bf16 %v7173_v27  ;;  %v7174_v39 = vunpack.i.l.bf16 %v7173_v27  ;;  %v6007_v54 = vpack.c.bf16 %v2205_v21, %v2204_v23  ;;  %v6010_v55 = vpack.c.bf16 %v2201_v29, %v2200_v57  ;;  %vm11234_vm8 = vmmov %vm11232_vm5 }
 0x799   : > { %v7185_v40 = vunpack.i.h.bf16 %v7183_v13  ;;  %v7184_v33 = vunpack.i.l.bf16 %v7183_v13  ;;  %vm11235_vm13 = vmmov %vm11232_vm5  ;;  %vm11236_vm10 = vcmp.lt.s32.totalorder %v8119_v19, 113 }
 0x79b   : > { %v7178_v16 = vpop.permute.xlu1 %7177  ;;  %6002 = vmatpush1.bf16.msra.mxu1 %v6001_v63  ;;  %v2206_v37 = vsel %vm11232_vm5, %v7184_v33, %v7174_v39  ;;  %v2207_v28 = vsel %vm11233_vm11, %v7185_v40, %v7175_v38  ;;  %v2203_v51 = vsel %vm11235_vm13, %v7175_v38, %v7185_v40  ;;  %vm11237_vm5 = vmmov %vm11236_vm10 }
 0x79c   : > { %v7188_v30 = vpop.permute.xlu0 %7187  ;;  %6004 = vmatprep.subr.bf16.mxu1 %v6003_v3  ;;  %v7180_v44 = vunpack.i.h.bf16 %v7178_v16  ;;  %v7179_v45 = vunpack.i.l.bf16 %v7178_v16  ;;  %v2202_v3 = vsel %vm11234_vm8, %v7174_v39, %v7184_v33  ;;  %v6013_v10 = vpack.c.bf16 %v2207_v28, %v2206_v37  ;;  %vm11238_vm11 = vmmov %vm11237_vm5 }
 0x79d   : > { %v7190_v49 = vunpack.i.h.bf16 %v7188_v30  ;;  %v7189_v2 = vunpack.i.l.bf16 %v7188_v30  ;;  %v6016_v50 = vpack.c.bf16 %v2203_v51, %v2202_v3  ;;  %vm11239_vm8 = vmmov %vm11237_vm5 }
 0x79e   : > { %vm11240_vm13 = vmmov %vm11237_vm5 }
 0x79f   : > { %v7193_v63 = vpop.permute.xlu1 %7192  ;;  %6006 = vmatpush1.bf16.msra.mxu1 %v6005_v7  ;;  %v2236_v59 = vsel %vm11236_vm10, %v7189_v2, %v7179_v45  ;;  %v2237_v62 = vsel %vm11237_vm5, %v7190_v49, %v7180_v44  ;;  %v2232_v11 = vsel %vm11238_vm11, %v7179_v45, %v7189_v2  ;;  %v2233_v12 = vsel %vm11239_vm8, %v7180_v44, %v7190_v49  ;;  %vm11241_vm10 = vmmov %vm11237_vm5 }
 0x7a0   : > { %v7203_v46 = vpop.permute.xlu0 %7202  ;;  %6009 = vmatprep.subr.msk.bf16.mxu1 %vm8229_vm12, %v6007_v54  ;;  %v7195_v8 = vunpack.i.h.bf16 %v7193_v63  ;;  %v7194_v52 = vunpack.i.l.bf16 %v7193_v63  ;;  %v6019_v31 = vpack.c.bf16 %v2237_v62, %v2236_v59  ;;  %v6022_v23 = vpack.c.bf16 %v2233_v12, %v2232_v11  ;;  %vm11242_vm11 = vmmov %vm11237_vm5 }
 0x7a1   : > { %v7205_v7 = vunpack.i.h.bf16 %v7203_v46  ;;  %v7204_v42 = vunpack.i.l.bf16 %v7203_v46  ;;  %vm11243_vm8 = vcmp.lt.s32.totalorder %v8119_v19, 112 }
 0x7a3   : > { %v7198_v9 = vpop.permute.xlu1 %7197  ;;  %6012 = vmatpush1.bf16.msk.msra.mxu1 %vm8319_vm14, %v6010_v55  ;;  %v2238_v17 = vsel %vm11240_vm13, %v7204_v42, %v7194_v52  ;;  %v2239_v34 = vsel %vm11241_vm10, %v7205_v7, %v7195_v8  ;;  %v2234_v21 = vsel %vm11237_vm5, %v7194_v52, %v7204_v42  ;;  %v2235_v38 = vsel %vm11242_vm11, %v7195_v8, %v7205_v7  ;;  %vm11244_vm13 = vmmov %vm11243_vm8 }
 0x7a4   : > { %v7208_v48 = vpop.permute.xlu0 %7207  ;;  %6015 = vmatprep.subr.msk.bf16.mxu1 %vm8229_vm12, %v6013_v10  ;;  %v7200_v15 = vunpack.i.h.bf16 %v7198_v9  ;;  %v7199_v25 = vunpack.i.l.bf16 %v7198_v9  ;;  %v6025_v33 = vpack.c.bf16 %v2239_v34, %v2238_v17  ;;  %v6028_v45 = vpack.c.bf16 %v2235_v38, %v2234_v21  ;;  %vm11245_vm10 = vmmov %vm11243_vm8  ;;  %v5230_v34 = vld [vmem:[%s11048_s3 + $0x60] sm:$0xff] }
 0x7a5   : > { %v7210_v56 = vunpack.i.h.bf16 %v7208_v48  ;;  %v7209_v0 = vunpack.i.l.bf16 %v7208_v48  ;;  %vm11246_vm5 = vmmov %vm11243_vm8 }
 0x7a6   : > { %vm11247_vm11 = vmmov %vm11246_vm5 }
 0x7a7   : > { %v7213_v27 = vpop.permute.xlu1 %7212  ;;  %6018 = vmatpush1.bf16.msk.msra.mxu1 %vm8319_vm14, %v6016_v50  ;;  %v2268_v39 = vsel %vm11243_vm8, %v7209_v0, %v7199_v25  ;;  %v2269_v40 = vsel %vm11244_vm13, %v7210_v56, %v7200_v15  ;;  %v2264_v49 = vsel %vm11245_vm10, %v7199_v25, %v7209_v0  ;;  %v2265_v2 = vsel %vm11246_vm5, %v7200_v15, %v7210_v56  ;;  %vm11248_vm8 = vmmov %vm11246_vm5 }
 0x7a8   : > { %v7218_v13 = vpop.permute.xlu0 %7217  ;;  %6021 = vmatprep.subr.msk.bf16.mxu1 %vm8355_vm1, %v6019_v31  ;;  %v7215_v16 = vunpack.i.h.bf16 %v7213_v27  ;;  %v7214_v30 = vunpack.i.l.bf16 %v7213_v27  ;;  %v6031_v37 = vpack.c.bf16 %v2269_v40, %v2268_v39  ;;  %vm11249_vm13 = vmmov %vm11246_vm5  ;;  %v6034_v8 = vpack.c.bf16 %v2265_v2, %v2264_v49  ;;  %v5234_v27 = vld [vmem:[%s11048_s3 + $0x80] sm:$0xff]  ;;  %v5233_v39 = vld [vmem:[%s11048_s3 + $0x78] sm:$0xff] }
 0x7a9   : > { %v7220_v57 = vunpack.i.h.bf16 %v7218_v13  ;;  %v7219_v29 = vunpack.i.l.bf16 %v7218_v13  ;;  %vm11250_vm10 = vmmov %vm11246_vm5  ;;  %vm11251_vm5 = vcmp.lt.s32.totalorder %v8119_v19, 111  ;;  %v5237_v40 = vld [vmem:[%s11048_s3 + $0x98] sm:$0xff] }
 0x7ab   : > { %v7223_v54 = vpop.permute.xlu1 %7222  ;;  %6024 = vmatpush1.bf16.msk.msra.mxu1 %vm8275_vm0, %v6022_v23  ;;  %v2270_v3 = vsel %vm11247_vm11, %v7219_v29, %v7214_v30  ;;  %v2271_v51 = vsel %vm11248_vm8, %v7220_v57, %v7215_v16  ;;  %v2266_v10 = vsel %vm11249_vm13, %v7214_v30, %v7219_v29  ;;  %v2267_v52 = vsel %vm11250_vm10, %v7215_v16, %v7220_v57  ;;  %vm11252_vm11 = vmmov %vm11251_vm5  ;;  %v5236_v16 = vld [vmem:[%s11048_s3 + $0x90] sm:$0xff]  ;;  %v5239_v57 = vld [vmem:[%s11048_s3 + $0xa8] sm:$0xff] }
 0x7ac   : > { %v7228_v44 = vpop.permute.xlu0 %7227  ;;  %6027 = vmatprep.subr.msk.bf16.mxu1 %vm8355_vm1, %v6025_v33  ;;  %v7225_v28 = vunpack.i.h.bf16 %v7223_v54  ;;  %v7224_v63 = vunpack.i.l.bf16 %v7223_v54  ;;  %v6036_v9 = vpack.c.bf16 %v2271_v51, %v2270_v3  ;;  %v6039_v31 = vpack.c.bf16 %v2267_v52, %v2266_v10  ;;  %vm11253_vm8 = vmmov %vm11251_vm5  ;;  %v5240_v30 = vld [vmem:[%s11048_s3 + $0xb0] sm:$0xff]  ;;  %v5235_v54 = vld [vmem:[%s11048_s3 + $0x88] sm:$0xff] }
 0x7ad   : > { %v7230_v46 = vunpack.i.h.bf16 %v7228_v44  ;;  %v7229_v55 = vunpack.i.l.bf16 %v7228_v44  ;;  %vm11254_vm13 = vmmov %vm11251_vm5  ;;  %v5232_v29 = vld [vmem:[%s11048_s3 + $0x70] sm:$0xff]  ;;  %v5238_v44 = vld [vmem:[%s11048_s3 + $0xa0] sm:$0xff] }
 0x7ae   : > { %vm11255_vm10 = vmmov %vm11251_vm5 }
 0x7af   : > { %6030 = vmatpush1.bf16.msk.msra.mxu1 %vm8275_vm0, %v6028_v45  ;;  %v7233_v59 = vpop.permute.xlu1 %7232  ;;  %v2300_v7 = vsel %vm11251_vm5, %v7229_v55, %v7224_v63  ;;  %v2301_v42 = vsel %vm11252_vm11, %v7230_v46, %v7225_v28  ;;  %v2296_v15 = vsel %vm11253_vm8, %v7224_v63, %v7229_v55  ;;  %v2297_v25 = vsel %vm11254_vm13, %v7225_v28, %v7230_v46  ;;  %vm11256_vm11 = vmmov %vm11251_vm5  ;;  %v5241_v45 = vld [vmem:[%s11048_s3 + $0xb8] sm:$0xff] }
 0x7b0   : > { %v7238_v62 = vpop.permute.xlu0 %7237  ;;  %6033 = vmatprep.subr.msk.bf16.mxu1 %vm8387_vm4, %v6031_v37  ;;  %v7235_v48 = vunpack.i.h.bf16 %v7233_v59  ;;  %v7234_v50 = vunpack.i.l.bf16 %v7233_v59  ;;  %v6041_v56 = vpack.c.bf16 %v2301_v42, %v2300_v7  ;;  %v6044_v13 = vpack.c.bf16 %v2297_v25, %v2296_v15  ;;  %vm11257_vm8 = vmmov %vm11251_vm5 }
 0x7b1   : > { %v7240_v11 = vunpack.i.h.bf16 %v7238_v62  ;;  %v7239_v12 = vunpack.i.l.bf16 %v7238_v62  ;;  %vm11258_vm13 = vcmask 261120  }
 0x7b3   : > { %6035 = vmatpush1.bf16.msra.mxu1 %v6034_v8  ;;  %v2302_v0 = vsel %vm11255_vm10, %v7239_v12, %v7234_v50  ;;  %v2303_v17 = vsel %vm11251_vm5, %v7240_v11, %v7235_v48  ;;  %v2298_v23 = vsel %vm11256_vm11, %v7234_v50, %v7239_v12  ;;  %v2299_v21 = vsel %vm11257_vm8, %v7235_v48, %v7240_v11  ;;  %vm11259_vm10 = vmmov %vm11258_vm13 }
 0x7b4   : > { %6038 = vmatprep.subr.msk.bf16.mxu1 %vm8387_vm4, %v6036_v9  ;;  %v6047_v38 = vpack.c.bf16 %v2303_v17, %v2302_v0  ;;  %v6050_v33 = vpack.c.bf16 %v2299_v21, %v2298_v23  ;;  %vm11260_vm5 = vmmov %vm11259_vm10  ;;  %vm11262_vm8 = vcmask 15360  }
 0x7b5   : > { %vm11261_vm11 = vmmov %vm11260_vm5 }
 0x7b7   : > { %6040 = vmatpush1.bf16.msra.mxu1 %v6039_v31 }
 0x7b8   : > { %6043 = vmatprep.subr.msk.bf16.mxu1 %vm8413_vm3, %v6041_v56 }
 0x7ba   : > { %2409 = vmatmul.mubr.f32.vlgmr.msra.gmra.mrb[8].mxu1 %v5230_v34 }
 0x7bb   : > { %6046 = vmatpush1.bf16.msk.msra.mxu1 %vm8319_vm14, %v6044_v13  ;;  %2414 = vmatprep.mubr.f32.mxu1 %v5234_v27 }
 0x7bc   : > { %6049 = vmatprep.subr.msk.bf16.mxu1 %vm8413_vm3, %v6047_v38 }
 0x7be   : > { %2415 = vmatmul.mubr.f32.gmra.mrb[10].mxu1 %v5233_v39 }
 0x7bf   : > { %6052 = vmatpush1.bf16.msk.msra.mxu1 %vm8319_vm14, %v6050_v33  ;;  %2420 = vmatprep.mubr.f32.mxu1 %v5237_v40  ;;  %v5307_v33 = vld [vmem:[%s11050_s5 + $0x28] sm:$0xff] }
 0x7c0   : > { %v2315_v49 = vpop.permute.xlu1 %2314 }
 0x7c1   : > { %v2320_v55 = vpop.permute.xlu0 %2319 }
 0x7c2   : > { %2421 = vmatmul.mubr.f32.gmra.mrb[12].mxu1 %v5236_v16 }
 0x7c3   : > { %2426 = vmatprep.mubr.f32.mxu1 %v5240_v30  ;;  %v5306_v30 = vld [vmem:[%s11050_s5 + $0x20] sm:$0xff] }
 0x7c5   : > { %v2330_v12 = vpop.permute.xlu0 %2329 }
 0x7c6   : > { %2427 = vmatmul.mubr.f32.gmra.mrb[14].mxu1 %v5239_v57 }
 0x7c7   : > { %2497 = vmatprep.mubr.f32.mxu1 %v7970_v36 }
 0x7ca   : > { %5302 = vmatmul.mubr.msk.f32.vlgmr.msra.gmra.mrb[8].mxu1 %vm11258_vm13, %v5232_v29  ;;  %vm11263_vm13 = vmmov %vm11262_vm8 }
 0x7cb   : > { %2503 = vmatprep.mubr.f32.mxu1 %v7970_v36 }
 0x7ce   : > { %5303 = vmatmul.mubr.msk.f32.gmra.mrb[10].mxu1 %vm11259_vm10, %v5235_v54  ;;  %vm11264_vm10 = vmmov %vm11262_vm8 }
 0x7cf   : > { %2509 = vmatprep.mubr.f32.mxu1 %v7970_v36 }
 0x7d2   : > { %5304 = vmatmul.mubr.msk.f32.gmra.mrb[12].mxu1 %vm11260_vm5, %v5238_v44  ;;  %vm11265_vm5 = vmmov %vm11262_vm8 }
 0x7d3   : > { %2515 = vmatprep.mubr.f32.mxu1 %v7970_v36 }
 0x7d6   : > { %5305 = vmatmul.mubr.msk.f32.gmra.mrb[14].mxu1 %vm11261_vm11, %v5241_v45  ;;  %vm11266_vm11 = vmmov %vm11265_vm5 }
 0x89d   : > { %v2499_v2 = vpop.f32.mrb[8].mxu1 }
 0x89e   : > { %v6477_v37 = vadd.f32 %v2499_v2, %v2315_v49  ;;  %v2501_v28 = vpop.f32.mrb[9].mxu1  ;;  %v5308_v2 = vld [vmem:[%s11050_s5 + $0x30] sm:$0xff] }
 0x89f   : > { %v6478_v63 = vadd.f32 %v2501_v28, %v2315_v49  ;;  %v5309_v28 = vld [vmem:[%s11050_s5 + $0x38] sm:$0xff] }
 0x8a0   : > { %v9510_v46 = vadd.f32 %v6477_v37, %v8888_v1  ;;  %v2325_v1 = vpop.permute.xlu1 %2324 }
 0x8a1   : > { %v9513_v3 = vadd.f32 %v6478_v63, %v8891_v60  ;;  %v2505_v51 = vpop.f32.mrb[10].mxu1 }
 0x8a2   : > { %v6479_v59 = vadd.f32 %v2505_v51, %v2320_v55  ;;  %v2507_v62 = vpop.f32.mrb[11].mxu1 }
 0x8a3   : > { %v6480_v10 = vadd.f32 %v2507_v62, %v2320_v55  ;;  %v2530_v8 = vadd.f32 %v9513_v3, %v9510_v46  ;;  %v2546_v11 = vmax.f32 %v9510_v46, %v9513_v3 }
 0x8a4   : > { %v9518_v52 = vadd.f32 %v6479_v59, %v8882_v18 }
 0x8a5   : > { %v9521_v7 = vadd.f32 %v6480_v10, %v8885_v58  ;;  %v2511_v42 = vpop.f32.mrb[12].mxu1  ;;  %2531 = vadd.xlane.f32.xlu1 %v2530_v8 }
 0x8a6   : > { %v2513_v9 = vpop.f32.mrb[13].mxu1  ;;  %v6481_v48 = vadd.f32 %v2511_v42, %v2325_v1 }
 0x8a7   : > { %v6482_v60 = vadd.f32 %v2513_v9, %v2325_v1  ;;  %v2533_v50 = vadd.f32 %v9521_v7, %v9518_v52  ;;  %v2549_v0 = vmax.f32 %v9518_v52, %v9521_v7 }
 0x8a8   : > { %v9528_v58 = vadd.f32 %v6481_v48, %v8898_v35 }
 0x8a9   : > { %v2517_v31 = vpop.f32.mrb[14].mxu1  ;;  %2534 = vadd.xlane.f32.xlu0 %v2533_v50  ;;  %2547 = vmax.xlane.f32.xlu1 %v2546_v11  ;;  %v9531_v25 = vadd.f32 %v6482_v60, %v8901_v5 }
 0x8aa   : > { %v6483_v18 = vadd.f32 %v2517_v31, %v2330_v12  ;;  %v2519_v15 = vpop.f32.mrb[15].mxu1 }
 0x8ab   : > { %v6484_v56 = vadd.f32 %v2519_v15, %v2330_v12  ;;  %v2536_v27 = vadd.f32 %v9531_v25, %v9528_v58  ;;  %v2552_v5 = vmax.f32 %v9528_v58, %v9531_v25  ;;  %v5310_v15 = vld [vmem:[%s11051_s6 + $0x1] sm:$0x1] }
 0x8ac   : > { %v9536_v17 = vadd.f32 %v6483_v18, %v8904_v20 }
 0x8ad   : > { %v9539_v34 = vadd.f32 %v6484_v56, %v8907_v32  ;;  %2550 = vmax.xlane.f32.xlu0 %v2549_v0 }
 0x8af   : > { %v2539_v35 = vadd.f32 %v9539_v34, %v9536_v17  ;;  %v2555_v13 = vmax.f32 %v9536_v17, %v9539_v34 }
 0x8b1   : > { %2537 = vadd.xlane.f32.xlu0 %v2536_v27  ;;  %2540 = vadd.xlane.f32.xlu1 %v2539_v35  ;;  %v5312_v35 = vld [vmem:[%s11052_s7 + $0x28] sm:$0xff] }
 0x8b5   : > { %2553 = vmax.xlane.f32.xlu0 %v2552_v5  ;;  %2556 = vmax.xlane.f32.xlu1 %v2555_v13  ;;  %v5311_v5 = vld [vmem:[%s11052_s7 + $0x20] sm:$0xff] }
 0x932   : > { %v2532_v20 = vpop.xlane.xlu1 %2531 }
 0x933   : > { %v2542_v39 = vmul.f32 0.00390625, %v2532_v20  ;;  %v5314_v20 = vld [vmem:[%s11052_s7 + $0x38] sm:$0xff] }
 0x936   : > { %v2535_v32 = vpop.xlane.xlu0 %2534  ;;  %v2548_v21 = vpop.xlane.xlu1 %2547 }
 0x937   : > { %v2543_v23 = vmul.f32 0.00390625, %v2535_v32  ;;  %v2558_v16 = vadd.f32 %v2548_v21, %v2542_v39  ;;  %v5313_v32 = vld [vmem:[%s11052_s7 + $0x30] sm:$0xff] }
 0x939   : > { %v2567_v44 = vmul.f32 %v5306_v30, %v2558_v16 }
 0x93a   : > { %v2551_v38 = vpop.xlane.xlu0 %2550 }
 0x93b   : > { %v2559_v40 = vadd.f32 %v2551_v38, %v2543_v23  ;;  %v2571_v62 = vsel %vm11263_vm13, %v2567_v44, 0.0  ;;  %vm11268_vm13 = vmmov %vm11265_vm5 }
 0x93d   : > { %v2568_v54 = vmul.f32 %v5307_v33, %v2559_v40 }
 0x93e   : > { %v2538_v57 = vpop.xlane.xlu0 %2537  ;;  %v2541_v29 = vpop.xlane.xlu1 %2540 }
 0x93f   : > { %v2544_v45 = vmul.f32 0.00390625, %v2538_v57  ;;  %v2545_v49 = vmul.f32 0.00390625, %v2541_v29  ;;  %v2572_v55 = vsel %vm11262_vm8, %v2568_v54, 0.0  ;;  %vm11267_vm8 = vmmov %vm11265_vm5  ;;  %v5316_v57 = vld [vmem:[%s11053_s8 + $0x28] sm:$0xff]  ;;  %v5315_v29 = vld [vmem:[%s11053_s8 + $0x20] sm:$0xff] }
 0x940   : > { %v2573_v42 = vadd.f32 %v2572_v55, %v2571_v62 }
 0x942   : > { %v2554_v37 = vpop.xlane.xlu0 %2553  ;;  %v2557_v63 = vpop.xlane.xlu1 %2556 }
 0x943   : > { %v2560_v51 = vadd.f32 %v2554_v37, %v2544_v45  ;;  %v2561_v59 = vadd.f32 %v2557_v63, %v2545_v49  ;;  %v5317_v37 = vld [vmem:[%s11053_s8 + $0x30] sm:$0xff] }
 0x945   : > { %v2569_v10 = vmul.f32 %v5308_v2, %v2560_v51  ;;  %v2570_v8 = vmul.f32 %v5309_v28, %v2561_v59  ;;  %v5318_v2 = vld [vmem:[%s11053_s8 + $0x38] sm:$0xff] }
 0x947   : > { %v2574_v1 = vsel %vm11264_vm10, %v2569_v10, 0.0  ;;  %v2576_v48 = vsel %vm11265_vm5, %v2570_v8, 0.0  ;;  %vm11269_vm10 = vmmov %vm11265_vm5  ;;  %vm11270_vm5 = vcmp.lt.s32.totalorder %v8119_v19, 16 }
 0x948   : > { %v2575_v9 = vadd.f32 %v2574_v1, %v2573_v42 }
 0x94a   : > { %v2577_v60 = vadd.f32 %v2576_v48, %v2575_v9 }
 0x94c   : > { %v2578_v50 = vrot.slane %v2577_v60, 4 }
 0x94e   : > { %v2579_v11 = vadd.f32 %v2578_v50, %v2577_v60 }
 0x950   : > { %v2580_v12 = vrot.slane %v2579_v11, 2 }
 0x952   : > { %v2581_v31 = vadd.f32 %v2580_v12, %v2579_v11 }
 0x954   : > { %v2582_v18 = vrot.slane %v2581_v31, 1 }
 0x956   : > { %v2583_v56 = vadd.f32 %v2582_v18, %v2581_v31 }
 0x958   : > { %v2586_v0 = vadd.f32 %v5310_v15, %v2583_v56 }
 0x95a   : > { %v2587_v27 = vmax.f32 %v2586_v0, 0.0 }
 0x95c   : > { %v2596_v13 = vrot.slane %v2587_v27, %v8850_v4 }
 0x95e   : > { %v2598_v23 = vmul.f32 %v5312_v35, %v2596_v13  ;;  %v2597_v21 = vmul.f32 %v5311_v5, %v2596_v13  ;;  %v2600_v40 = vmul.f32 %v5314_v20, %v2596_v13  ;;  %v2599_v33 = vmul.f32 %v5313_v32, %v2596_v13 }
 0x960   : > { %v2604_v38 = vsel %vm11266_vm11, %v2598_v23, 0.0  ;;  %v2601_v39 = vsel %vm11267_vm8, %v2597_v21, 0.0  ;;  %v2610_v16 = vsel %vm11268_vm13, %v2600_v40, 0.0  ;;  %v2607_v30 = vsel %vm11269_vm10, %v2599_v33, 0.0  ;;  %vm11271_vm11 = vmmov %vm11270_vm5 }
 0x961   : > { %2605 = vadd.xlane.f32.xlu1 %v2604_v38  ;;  %2602 = vadd.xlane.f32.xlu0 %v2601_v39  ;;  %vm11272_vm8 = vmmov %vm11270_vm5 }
 0x962   : > { %vm11273_vm13 = vmmov %vm11270_vm5 }
 0x963   : > { %vm11274_vm10 = vmmov %vm11270_vm5 }
 0x965   : > { %2611 = vadd.xlane.f32.xlu1 %v2610_v16  ;;  %2608 = vadd.xlane.f32.xlu0 %v2607_v30 }
 0x9ee   : > { %v2606_v54 = vpop.xlane.xlu1 %2605  ;;  %v2603_v44 = vpop.xlane.xlu0 %2602 }
 0x9ef   : > { %v2619_v45 = vadd.f32 %v5316_v57, %v2606_v54  ;;  %v2618_v49 = vadd.f32 %v5315_v29, %v2603_v44  ;;  %v5334_v57 = vld [vmem:[%s11047_s2 + $0x58] sm:$0xff]  ;;  %v5333_v29 = vld [vmem:[%s11047_s2 + $0x50] sm:$0xff] }
 0x9f1   : > { %v2623_v28 = vsub.f32 0.0, %v2619_v45  ;;  %v2622_v63 = vsub.f32 0.0, %v2618_v49 }
 0x9f2   : > { %v2612_v55 = vpop.xlane.xlu1 %2611  ;;  %v2609_v51 = vpop.xlane.xlu0 %2608 }
 0x9f3   : > { %v2628_v59 = vmul.f32 1.442695, %v2623_v28  ;;  %v2626_v62 = vmul.f32 1.442695, %v2622_v63  ;;  %v2621_v10 = vadd.f32 %v5318_v2, %v2612_v55  ;;  %v2620_v8 = vadd.f32 %v5317_v37, %v2609_v51 }
 0x9f5   : > { %7897 = vpow2.f32 %v2628_v59  ;;  %v2625_v42 = vsub.f32 0.0, %v2621_v10  ;;  %v2624_v1 = vsub.f32 0.0, %v2620_v8 }
 0x9f6   : > { %7899 = vpow2.f32 %v2626_v62 }
 0x9f7   : > { %v2632_v9 = vmul.f32 1.442695, %v2625_v42  ;;  %v2630_v48 = vmul.f32 1.442695, %v2624_v1 }
 0x9f9   : > { %7901 = vpow2.f32 %v2632_v9 }
 0x9fa   : > { %7903 = vpow2.f32 %v2630_v48 }
 0x9ff   : > { %v7898_v60 = vpop.eup %7897 }
 0xa00   : > { %v7900_v50 = vpop.eup %7899  ;;  %v2635_v11 = vadd.f32 1.0, %v7898_v60 }
 0xa01   : > { %v2634_v12 = vadd.f32 1.0, %v7900_v50 }
 0xa02   : > { %7905 = vrcp.f32 %v2635_v11 }
 0xa03   : > { %v7902_v31 = vpop.eup %7901  ;;  %7907 = vrcp.f32 %v2634_v12 }
 0xa04   : > { %v7904_v18 = vpop.eup %7903  ;;  %v2637_v15 = vadd.f32 1.0, %v7902_v31 }
 0xa05   : > { %v2636_v56 = vadd.f32 1.0, %v7904_v18 }
 0xa06   : > { %7909 = vrcp.f32 %v2637_v15 }
 0xa07   : > { %7911 = vrcp.f32 %v2636_v56 }
 0xa0c   : > { %v7906_v0 = vpop.eup %7905 }
 0xa0d   : > { %v7908_v27 = vpop.eup %7907  ;;  %2653 = vperm.xlu1 %6760, %v7906_v0  }
 0xa0e   : > { %2648 = vperm.xlu0 %6759, %v7908_v27  }
 0xa10   : > { %v7910_v35 = vpop.eup %7909 }
 0xa11   : > { %v7912_v5 = vpop.eup %7911 }
 0xa12   : > { %2663 = vperm.xlu0 %6759, %v7910_v35   ;;  %2658 = vperm.xlu1 %6760, %v7912_v5  }
 0xa8c   : > { %v2654_v13 = vpop.permute.xlu1 %2653 }
 0xa8d   : > { %v9598_v20 = vmul.f32 %v2654_v13, %v9518_v52  ;;  %v9601_v32 = vmul.f32 %v2654_v13, %v9521_v7  ;;  %v2649_v23 = vpop.permute.xlu0 %2648 }
 0xa8e   : > { %v9604_v21 = vmul.f32 %v2649_v23, %v9510_v46  ;;  %v9607_v38 = vmul.f32 %v2649_v23, %v9513_v3 }
 0xa90   : > { %v7246_v39 = vpack.i.bf16 %v9601_v32, %v9607_v38  ;;  %v7241_v40 = vpack.i.bf16 %v9598_v20, %v9604_v21 }
 0xa91   : > { %v2659_v33 = vpop.permute.xlu1 %2658  ;;  %v2664_v16 = vpop.permute.xlu0 %2663 }
 0xa92   : > { %v9614_v52 = vmul.f32 %v2659_v33, %v9528_v58  ;;  %v9617_v7 = vmul.f32 %v2659_v33, %v9531_v25  ;;  %v9620_v46 = vmul.f32 %v2664_v16, %v9536_v17  ;;  %v9623_v3 = vmul.f32 %v2664_v16, %v9539_v34  ;;  %7247 = vrot.lane.b32.xlu0 %v7246_v39, %s7961_s15  ;;  %v5320_v25 = vld [vmem:[%s11046_s1 + $0xc8] sm:$0xff]  ;;  %v5331_v34 = vld [vmem:[%s11047_s2 + $0x40] sm:$0xff] }
 0xa93   : > { %7242 = vrot.lane.b32.xlu1 %v7241_v40, %s7961_s15  ;;  %3044 = vmatprep.mubr.f32.mxu0 %v5320_v25  ;;  %v5332_v17 = vld [vmem:[%s11047_s2 + $0x48] sm:$0xff] }
 0xa94   : > { %v7256_v30 = vpack.i.bf16 %v9623_v3, %v9617_v7  ;;  %v7251_v58 = vpack.i.bf16 %v9620_v46, %v9614_v52 }
 0xa96   : > { %7257 = vrot.lane.b32.xlu0 %v7256_v30, %s7961_s15 }
 0xa97   : > { %7252 = vrot.lane.b32.xlu1 %v7251_v58, %s7961_s15 }
 0xa9a   : > { %7267 = vrot.lane.b32.xlu0 %v7246_v39, %s7962_s16 }
 0xa9b   : > { %7262 = vrot.lane.b32.xlu1 %v7241_v40, %s7962_s16 }
 0xa9e   : > { %7277 = vrot.lane.b32.xlu0 %v7256_v30, %s7962_s16 }
 0xa9f   : > { %7272 = vrot.lane.b32.xlu1 %v7251_v58, %s7962_s16 }
 0xaa2   : > { %7287 = vrot.lane.b32.xlu0 %v7246_v39, %s7963_s17 }
 0xaa3   : > { %7282 = vrot.lane.b32.xlu1 %v7241_v40, %s7963_s17 }
 0xaa6   : > { %7297 = vrot.lane.b32.xlu0 %v7256_v30, %s7963_s17 }
 0xaa7   : > { %7292 = vrot.lane.b32.xlu1 %v7251_v58, %s7963_s17 }
 0xaaa   : > { %7307 = vrot.lane.b32.xlu0 %v7246_v39, %s7964_s18 }
 0xaab   : > { %7302 = vrot.lane.b32.xlu1 %v7241_v40, %s7964_s18 }
 0xaae   : > { %7317 = vrot.lane.b32.xlu0 %v7256_v30, %s7964_s18 }
 0xaaf   : > { %7312 = vrot.lane.b32.xlu1 %v7251_v58, %s7964_s18 }
 0xab2   : > { %7327 = vrot.lane.b32.xlu0 %v7246_v39, %s7965_s19 }
 0xab3   : > { %7322 = vrot.lane.b32.xlu1 %v7241_v40, %s7965_s19 }
 0xab6   : > { %7337 = vrot.lane.b32.xlu0 %v7256_v30, %s7965_s19 }
 0xab7   : > { %7332 = vrot.lane.b32.xlu1 %v7251_v58, %s7965_s19 }
 0xaba   : > { %7347 = vrot.lane.b32.xlu0 %v7246_v39, %s7966_s20 }
 0xabb   : > { %7342 = vrot.lane.b32.xlu1 %v7241_v40, %s7966_s20 }
 0xabe   : > { %7357 = vrot.lane.b32.xlu0 %v7256_v30, %s7966_s20 }
 0xabf   : > { %7352 = vrot.lane.b32.xlu1 %v7251_v58, %s7966_s20 }
 0xac2   : > { %7367 = vrot.lane.b32.xlu0 %v7246_v39, %s7967_s21 }
 0xac3   : > { %7362 = vrot.lane.b32.xlu1 %v7241_v40, %s7967_s21 }
 0xac6   : > { %7377 = vrot.lane.b32.xlu0 %v7256_v30, %s7967_s21 }
 0xac7   : > { %7372 = vrot.lane.b32.xlu1 %v7251_v58, %s7967_s21 }
 0xaca   : > { %7387 = vrot.lane.b32.xlu0 %v7246_v39, %s7968_s22 }
 0xacb   : > { %7382 = vrot.lane.b32.xlu1 %v7241_v40, %s7968_s22 }
 0xace   : > { %7397 = vrot.lane.b32.xlu0 %v7256_v30, %s7968_s22 }
 0xacf   : > { %7392 = vrot.lane.b32.xlu1 %v7251_v58, %s7968_s22 }
 0xad2   : > { %2955 = vperm.xlu0 %6759, %v5332_v17  }
 0xad3   : > { %2950 = vperm.xlu1 %6760, %v5331_v34  }
 0xad6   : > { %2965 = vperm.xlu0 %6759, %v5334_v57  }
 0xad7   : > { %2960 = vperm.xlu1 %6760, %v5333_v29  }
 0xb04   : > { %v7248_v54 = vpop.permute.xlu0 %7247 }
 0xb05   : > { %v7243_v44 = vpop.permute.xlu1 %7242  ;;  %v7250_v45 = vunpack.i.h.bf16 %v7248_v54  ;;  %v7249_v49 = vunpack.i.l.bf16 %v7248_v54 }
 0xb06   : > { %v7245_v2 = vunpack.i.h.bf16 %v7243_v44  ;;  %v7244_v37 = vunpack.i.l.bf16 %v7243_v44 }
 0xb08   : > { %v2709_v28 = vsel %vm416_vm2, %v7245_v2, %v7250_v45  ;;  %v2713_v63 = vsel %vm416_vm2, %v7250_v45, %v7245_v2  ;;  %v2708_v55 = vsel %vm416_vm2, %v7244_v37, %v7249_v49  ;;  %v2712_v51 = vsel %vm416_vm2, %v7249_v49, %v7244_v37  ;;  %v7258_v59 = vpop.permute.xlu0 %7257 }
 0xb09   : > { %v6056_v62 = vpack.c.bf16 %v2713_v63, %v2712_v51  ;;  %v7253_v10 = vpop.permute.xlu1 %7252  ;;  %v7260_v8 = vunpack.i.h.bf16 %v7258_v59  ;;  %v7259_v42 = vunpack.i.l.bf16 %v7258_v59  ;;  %v6053_v1 = vpack.c.bf16 %v2709_v28, %v2708_v55 }
 0xb0a   : > { %v7255_v9 = vunpack.i.h.bf16 %v7253_v10  ;;  %v7254_v48 = vunpack.i.l.bf16 %v7253_v10 }
 0xb0b   : > { %6055 = vmatprep.subr.msk.bf16.mxu0 %vm8156_vm6, %v6053_v1 }
 0xb0c   : > { %v2711_v60 = vsel %vm416_vm2, %v7255_v9, %v7260_v8  ;;  %v2715_v50 = vsel %vm416_vm2, %v7260_v8, %v7255_v9  ;;  %v2710_v11 = vsel %vm416_vm2, %v7254_v48, %v7259_v42  ;;  %v2714_v12 = vsel %vm416_vm2, %v7259_v42, %v7254_v48  ;;  %6058 = vmatpush1.bf16.msk.msra.mxu0 %vm8164_vm7, %v6056_v62  ;;  %v7268_v31 = vpop.permute.xlu0 %7267 }
 0xb0d   : > { %v6062_v18 = vpack.c.bf16 %v2715_v50, %v2714_v12  ;;  %v7263_v15 = vpop.permute.xlu1 %7262  ;;  %v7270_v56 = vunpack.i.h.bf16 %v7268_v31  ;;  %v7269_v0 = vunpack.i.l.bf16 %v7268_v31  ;;  %v6059_v27 = vpack.c.bf16 %v2711_v60, %v2710_v11 }
 0xb0e   : > { %v7265_v35 = vunpack.i.h.bf16 %v7263_v15  ;;  %v7264_v5 = vunpack.i.l.bf16 %v7263_v15 }
 0xb0f   : > { %6061 = vmatprep.subr.msk.bf16.mxu0 %vm8156_vm6, %v6059_v27 }
 0xb10   : > { %v2745_v13 = vsel %vm11270_vm5, %v7270_v56, %v7265_v35  ;;  %v2744_v23 = vsel %vm11271_vm11, %v7269_v0, %v7264_v5  ;;  %6064 = vmatpush1.bf16.msk.msra.mxu0 %vm8164_vm7, %v6062_v18  ;;  %v7278_v39 = vpop.permute.xlu0 %7277  ;;  %v2740_v40 = vsel %vm11272_vm8, %v7264_v5, %v7269_v0  ;;  %v2741_v33 = vsel %vm11273_vm13, %v7265_v35, %v7270_v56  ;;  %vm11275_vm11 = vmmov %vm11270_vm5 }
 0xb11   : > { %v6067_v16 = vpack.c.bf16 %v2745_v13, %v2744_v23  ;;  %v7273_v30 = vpop.permute.xlu1 %7272  ;;  %v7280_v58 = vunpack.i.h.bf16 %v7278_v39  ;;  %v7279_v25 = vunpack.i.l.bf16 %v7278_v39  ;;  %v6065_v17 = vpack.c.bf16 %v2741_v33, %v2740_v40  ;;  %vm11276_vm8 = vmmov %vm11270_vm5 }
 0xb12   : > { %v7275_v34 = vunpack.i.h.bf16 %v7273_v30  ;;  %v7274_v57 = vunpack.i.l.bf16 %v7273_v30  ;;  %vm11277_vm13 = vcmp.lt.s32.totalorder %v8119_v19, 15 }
 0xb13   : > { %6066 = vmatprep.subr.bf16.mxu0 %v6065_v17 }
 0xb14   : > { %v2747_v29 = vsel %vm11274_vm10, %v7280_v58, %v7275_v34  ;;  %v2746_v54 = vsel %vm11270_vm5, %v7279_v25, %v7274_v57  ;;  %6069 = vmatpush1.bf16.msk.msra.mxu0 %vm8200_vm9, %v6067_v16  ;;  %v7288_v44 = vpop.permute.xlu0 %7287  ;;  %v2742_v45 = vsel %vm11275_vm11, %v7274_v57, %v7279_v25  ;;  %v2743_v49 = vsel %vm11276_vm8, %v7275_v34, %v7280_v58  ;;  %vm11278_vm10 = vmmov %vm11277_vm13 }
 0xb15   : > { %v6072_v2 = vpack.c.bf16 %v2747_v29, %v2746_v54  ;;  %v7283_v37 = vpop.permute.xlu1 %7282  ;;  %v7290_v28 = vunpack.i.h.bf16 %v7288_v44  ;;  %v7289_v63 = vunpack.i.l.bf16 %v7288_v44  ;;  %v6070_v55 = vpack.c.bf16 %v2743_v49, %v2742_v45  ;;  %vm11279_vm5 = vmmov %vm11278_vm10 }
 0xb16   : > { %v7285_v51 = vunpack.i.h.bf16 %v7283_v37  ;;  %v7284_v59 = vunpack.i.l.bf16 %v7283_v37  ;;  %vm11280_vm11 = vmmov %vm11279_vm5 }
 0xb17   : > { %6071 = vmatprep.subr.bf16.mxu0 %v6070_v55  ;;  %vm11281_vm8 = vmmov %vm11279_vm5 }
 0xb18   : > { %v2773_v62 = vsel %vm11277_vm13, %v7285_v51, %v7290_v28  ;;  %v2777_v10 = vsel %vm11278_vm10, %v7290_v28, %v7285_v51  ;;  %v2772_v8 = vsel %vm11279_vm5, %v7284_v59, %v7289_v63  ;;  %v2776_v42 = vsel %vm11280_vm11, %v7289_v63, %v7284_v59  ;;  %6074 = vmatpush1.bf16.msk.msra.mxu0 %vm8200_vm9, %v6072_v2  ;;  %v7298_v1 = vpop.permute.xlu0 %7297  ;;  %vm11282_vm13 = vmmov %vm11279_vm5 }
 0xb19   : > { %v6078_v9 = vpack.c.bf16 %v2777_v10, %v2776_v42  ;;  %v7293_v48 = vpop.permute.xlu1 %7292  ;;  %v7300_v60 = vunpack.i.h.bf16 %v7298_v1  ;;  %v7299_v50 = vunpack.i.l.bf16 %v7298_v1  ;;  %v6075_v11 = vpack.c.bf16 %v2773_v62, %v2772_v8  ;;  %vm11283_vm10 = vmmov %vm11279_vm5 }
 0xb1a   : > { %v7295_v12 = vunpack.i.h.bf16 %v7293_v48  ;;  %v7294_v31 = vunpack.i.l.bf16 %v7293_v48  ;;  %vm11284_vm11 = vcmp.lt.s32.totalorder %v8119_v19, 1  ;;  %v6099_v10 = vpack.c.bf16 %v9601_v32, %v9607_v38 }
 0xb1b   : > { %6077 = vmatprep.subr.msk.bf16.mxu0 %vm8229_vm12, %v6075_v11 }
 0xb1c   : > { %v2775_v18 = vsel %vm11281_vm8, %v7295_v12, %v7300_v60  ;;  %v2779_v15 = vsel %vm11282_vm13, %v7300_v60, %v7295_v12  ;;  %v2774_v56 = vsel %vm11283_vm10, %v7294_v31, %v7299_v50  ;;  %v2778_v0 = vsel %vm11279_vm5, %v7299_v50, %v7294_v31  ;;  %6080 = vmatpush1.bf16.msk.msra.mxu0 %vm8250_vm15, %v6078_v9  ;;  %v7308_v27 = vpop.permute.xlu0 %7307  ;;  %vm11285_vm8 = vmmov %vm11284_vm11 }
 0xb1d   : > { %v6084_v35 = vpack.c.bf16 %v2779_v15, %v2778_v0  ;;  %v7303_v5 = vpop.permute.xlu1 %7302  ;;  %v7310_v13 = vunpack.i.h.bf16 %v7308_v27  ;;  %v7309_v23 = vunpack.i.l.bf16 %v7308_v27  ;;  %v6081_v39 = vpack.c.bf16 %v2775_v18, %v2774_v56  ;;  %vm11286_vm13 = vmmov %vm11285_vm8 }
 0xb1e   : > { %v7305_v40 = vunpack.i.h.bf16 %v7303_v5  ;;  %v7304_v33 = vunpack.i.l.bf16 %v7303_v5  ;;  %vm11287_vm10 = vmmov %vm11285_vm8  ;;  %v6101_v50 = vpack.c.bf16 %v9598_v20, %v9604_v21  ;;  %v6103_v31 = vpack.c.bf16 %v9623_v3, %v9617_v7 }
 0xb1f   : > { %6083 = vmatprep.subr.msk.bf16.mxu0 %vm8229_vm12, %v6081_v39  ;;  %vm11288_vm5 = vmmov %vm11285_vm8 }
 0xb20   : > { %v2805_v16 = vsel %vm11284_vm11, %v7305_v40, %v7310_v13  ;;  %v2809_v30 = vsel %vm11285_vm8, %v7310_v13, %v7305_v40  ;;  %v2804_v58 = vsel %vm11286_vm13, %v7304_v33, %v7309_v23  ;;  %v2808_v25 = vsel %vm11287_vm10, %v7309_v23, %v7304_v33  ;;  %6086 = vmatpush1.bf16.msk.msra.mxu0 %vm8250_vm15, %v6084_v35  ;;  %v7318_v17 = vpop.permute.xlu0 %7317  ;;  %vm11289_vm11 = vmmov %vm11288_vm5 }
 0xb21   : > { %v6090_v34 = vpack.c.bf16 %v2809_v30, %v2808_v25  ;;  %v7313_v57 = vpop.permute.xlu1 %7312  ;;  %v7320_v29 = vunpack.i.h.bf16 %v7318_v17  ;;  %v7319_v54 = vunpack.i.l.bf16 %v7318_v17  ;;  %v6087_v44 = vpack.c.bf16 %v2805_v16, %v2804_v58  ;;  %vm11290_vm8 = vmmov %vm11288_vm5 }
 0xb22   : > { %v7315_v45 = vunpack.i.h.bf16 %v7313_v57  ;;  %v7314_v49 = vunpack.i.l.bf16 %v7313_v57  ;;  %vm11291_vm13 = vmmov %vm11288_vm5  ;;  %vm11292_vm10 = vcmp.lt.s32.totalorder %v8119_v19, 127  ;;  %v6105_v23 = vpack.c.bf16 %v9620_v46, %v9614_v52 }
 0xb23   : > { %6089 = vmatprep.subr.msk.bf16.mxu0 %vm8156_vm6, %v6087_v44 }
 0xb24   : > { %v2807_v2 = vsel %vm11288_vm5, %v7315_v45, %v7320_v29  ;;  %v2811_v37 = vsel %vm11289_vm11, %v7320_v29, %v7315_v45  ;;  %v2806_v28 = vsel %vm11290_vm8, %v7314_v49, %v7319_v54  ;;  %v2810_v63 = vsel %vm11291_vm13, %v7319_v54, %v7314_v49  ;;  %6092 = vmatpush1.bf16.msk.msra.mxu0 %vm8275_vm0, %v6090_v34  ;;  %v7328_v55 = vpop.permute.xlu0 %7327  ;;  %vm11293_vm5 = vmmov %vm11292_vm10 }
 0xb25   : > { %v6096_v51 = vpack.c.bf16 %v2811_v37, %v2810_v63  ;;  %v7323_v59 = vpop.permute.xlu1 %7322  ;;  %v6093_v62 = vpack.c.bf16 %v2807_v2, %v2806_v28  ;;  %v7330_v1 = vunpack.i.h.bf16 %v7328_v55  ;;  %v7329_v9 = vunpack.i.l.bf16 %v7328_v55  ;;  %vm11294_vm11 = vmmov %vm11293_vm5 }
 0xb26   : > { %v7325_v8 = vunpack.i.h.bf16 %v7323_v59  ;;  %v7324_v42 = vunpack.i.l.bf16 %v7323_v59  ;;  %vm11295_vm8 = vmmov %vm11293_vm5 }
 0xb27   : > { %6095 = vmatprep.subr.msk.bf16.mxu0 %vm8156_vm6, %v6093_v62  ;;  %vm11296_vm13 = vmmov %vm11293_vm5 }
 0xb28   : > { %6098 = vmatpush1.bf16.msk.msra.mxu0 %vm8275_vm0, %v6096_v51  ;;  %v7338_v48 = vpop.permute.xlu0 %7337  ;;  %v2841_v11 = vsel %vm11292_vm10, %v7330_v1, %v7325_v8  ;;  %v2840_v12 = vsel %vm11293_vm5, %v7329_v9, %v7324_v42  ;;  %v2837_v5 = vsel %vm11294_vm11, %v7325_v8, %v7330_v1  ;;  %v2836_v13 = vsel %vm11295_vm8, %v7324_v42, %v7329_v9  ;;  %vm11297_vm10 = vmmov %vm11293_vm5 }
 0xb29   : > { %v7333_v60 = vpop.permute.xlu1 %7332  ;;  %6100 = vmatprep.subr.bf16.mxu0 %v6099_v10  ;;  %v7340_v56 = vunpack.i.h.bf16 %v7338_v48  ;;  %v7339_v0 = vunpack.i.l.bf16 %v7338_v48  ;;  %v6107_v39 = vpack.c.bf16 %v2841_v11, %v2840_v12  ;;  %v6110_v57 = vpack.c.bf16 %v2837_v5, %v2836_v13  ;;  %vm11298_vm11 = vmmov %vm11293_vm5 }
 0xb2a   : > { %v7335_v18 = vunpack.i.h.bf16 %v7333_v60  ;;  %v7334_v15 = vunpack.i.l.bf16 %v7333_v60  ;;  %vm11299_vm8 = vcmp.lt.s32.totalorder %v8119_v19, 113 }
 0xb2c   : > { %6102 = vmatpush1.bf16.msra.mxu0 %v6101_v50  ;;  %v7348_v27 = vpop.permute.xlu0 %7347  ;;  %v2843_v58 = vsel %vm11296_vm13, %v7340_v56, %v7335_v18  ;;  %v2842_v25 = vsel %vm11297_vm10, %v7339_v0, %v7334_v15  ;;  %v2839_v29 = vsel %vm11293_vm5, %v7335_v18, %v7340_v56  ;;  %v2838_v54 = vsel %vm11298_vm11, %v7334_v15, %v7339_v0  ;;  %vm11300_vm13 = vmmov %vm11299_vm8 }
 0xb2d   : > { %v7343_v35 = vpop.permute.xlu1 %7342  ;;  %6104 = vmatprep.subr.bf16.mxu0 %v6103_v31  ;;  %v7350_v16 = vunpack.i.h.bf16 %v7348_v27  ;;  %v7349_v30 = vunpack.i.l.bf16 %v7348_v27  ;;  %v6113_v49 = vpack.c.bf16 %v2843_v58, %v2842_v25  ;;  %v6116_v59 = vpack.c.bf16 %v2839_v29, %v2838_v54  ;;  %vm11301_vm10 = vmmov %vm11299_vm8 }
 0xb2e   : > { %v7345_v40 = vunpack.i.h.bf16 %v7343_v35  ;;  %v7344_v33 = vunpack.i.l.bf16 %v7343_v35  ;;  %vm11302_vm5 = vmmov %vm11299_vm8 }
 0xb2f   : > { %vm11303_vm11 = vmmov %vm11302_vm5 }
 0xb30   : > { %6106 = vmatpush1.bf16.msra.mxu0 %v6105_v23  ;;  %v7358_v17 = vpop.permute.xlu0 %7357  ;;  %v2873_v44 = vsel %vm11299_vm8, %v7350_v16, %v7345_v40  ;;  %v2872_v45 = vsel %vm11300_vm13, %v7349_v30, %v7344_v33  ;;  %v2869_v62 = vsel %vm11301_vm10, %v7345_v40, %v7350_v16  ;;  %v2868_v10 = vsel %vm11302_vm5, %v7344_v33, %v7349_v30  ;;  %vm11304_vm8 = vmmov %vm11302_vm5 }
 0xb31   : > { %v7353_v34 = vpop.permute.xlu1 %7352  ;;  %6109 = vmatprep.subr.msk.bf16.mxu0 %vm8229_vm12, %v6107_v39  ;;  %v7360_v28 = vunpack.i.h.bf16 %v7358_v17  ;;  %v7359_v63 = vunpack.i.l.bf16 %v7358_v17  ;;  %v6119_v8 = vpack.c.bf16 %v2873_v44, %v2872_v45  ;;  %v6122_v31 = vpack.c.bf16 %v2869_v62, %v2868_v10  ;;  %vm11305_vm13 = vmmov %vm11302_vm5 }
 0xb32   : > { %v7355_v2 = vunpack.i.h.bf16 %v7353_v34  ;;  %v7354_v37 = vunpack.i.l.bf16 %v7353_v34  ;;  %vm11306_vm10 = vmmov %vm11302_vm5  ;;  %vm11307_vm5 = vcmp.lt.s32.totalorder %v8119_v19, 112 }
 0xb34   : > { %6112 = vmatpush1.bf16.msk.msra.mxu0 %vm8319_vm14, %v6110_v57  ;;  %v7368_v55 = vpop.permute.xlu0 %7367  ;;  %v2875_v60 = vsel %vm11303_vm11, %v7360_v28, %v7355_v2  ;;  %v2874_v50 = vsel %vm11304_vm8, %v7359_v63, %v7354_v37  ;;  %v2871_v18 = vsel %vm11305_vm13, %v7355_v2, %v7360_v28  ;;  %v2870_v15 = vsel %vm11306_vm10, %v7354_v37, %v7359_v63  ;;  %vm11308_vm11 = vmmov %vm11307_vm5 }
 0xb35   : > { %v7363_v51 = vpop.permute.xlu1 %7362  ;;  %6115 = vmatprep.subr.msk.bf16.mxu0 %vm8229_vm12, %v6113_v49  ;;  %v7370_v9 = vunpack.i.h.bf16 %v7368_v55  ;;  %v7369_v48 = vunpack.i.l.bf16 %v7368_v55  ;;  %v6125_v27 = vpack.c.bf16 %v2875_v60, %v2874_v50  ;;  %v6128_v33 = vpack.c.bf16 %v2871_v18, %v2870_v15  ;;  %vm11309_vm8 = vmmov %vm11307_vm5  ;;  %v5319_v50 = vld [vmem:[%s11046_s1 + $0xc0] sm:$0xff] }
 0xb36   : > { %v7365_v42 = vunpack.i.h.bf16 %v7363_v51  ;;  %v7364_v1 = vunpack.i.l.bf16 %v7363_v51  ;;  %vm11310_vm13 = vmmov %vm11307_vm5 }
 0xb37   : > { %vm11311_vm10 = vmmov %vm11307_vm5 }
 0xb38   : > { %6118 = vmatpush1.bf16.msk.msra.mxu0 %vm8319_vm14, %v6116_v59  ;;  %v7378_v11 = vpop.permute.xlu0 %7377  ;;  %v2905_v56 = vsel %vm11307_vm5, %v7370_v9, %v7365_v42  ;;  %v2904_v0 = vsel %vm11308_vm11, %v7369_v48, %v7364_v1  ;;  %v2901_v16 = vsel %vm11309_vm8, %v7365_v42, %v7370_v9  ;;  %v2900_v30 = vsel %vm11310_vm13, %v7364_v1, %v7369_v48  ;;  %vm11312_vm11 = vmmov %vm11307_vm5 }
 0xb39   : > { %v7373_v12 = vpop.permute.xlu1 %7372  ;;  %6121 = vmatprep.subr.msk.bf16.mxu0 %vm8355_vm1, %v6119_v8  ;;  %v7380_v13 = vunpack.i.h.bf16 %v7378_v11  ;;  %v7379_v23 = vunpack.i.l.bf16 %v7378_v11  ;;  %v6131_v58 = vpack.c.bf16 %v2905_v56, %v2904_v0  ;;  %v6134_v2 = vpack.c.bf16 %v2901_v16, %v2900_v30  ;;  %vm11313_vm8 = vmmov %vm11307_vm5  ;;  %v5323_v11 = vld [vmem:[%s11046_s1 + $0xe0] sm:$0xff]  ;;  %v5322_v56 = vld [vmem:[%s11046_s1 + $0xd8] sm:$0xff] }
 0xb3a   : > { %v7375_v35 = vunpack.i.h.bf16 %v7373_v12  ;;  %v7374_v5 = vunpack.i.l.bf16 %v7373_v12  ;;  %vm11314_vm13 = vcmp.lt.s32.totalorder %v8119_v19, 111  ;;  %v5326_v0 = vld [vmem:[%s11046_s1 + $0xf8] sm:$0xff] }
 0xb3c   : > { %6124 = vmatpush1.bf16.msk.msra.mxu0 %vm8275_vm0, %v6122_v31  ;;  %v7388_v39 = vpop.permute.xlu0 %7387  ;;  %v2907_v29 = vsel %vm11311_vm10, %v7380_v13, %v7375_v35  ;;  %v2906_v54 = vsel %vm11307_vm5, %v7379_v23, %v7374_v5  ;;  %v2903_v49 = vsel %vm11312_vm11, %v7375_v35, %v7380_v13  ;;  %v2902_v37 = vsel %vm11313_vm8, %v7374_v5, %v7379_v23  ;;  %vm11315_vm10 = vmmov %vm11314_vm13  ;;  %v5325_v35 = vld [vmem:[%s11046_s1 + $0xf0] sm:$0xff]  ;;  %v5328_v13 = vld [vmem:[%s11046_s1 + $0x108] sm:$0xff] }
 0xb3d   : > { %v7383_v40 = vpop.permute.xlu1 %7382  ;;  %6127 = vmatprep.subr.msk.bf16.mxu0 %vm8355_vm1, %v6125_v27  ;;  %v7390_v34 = vunpack.i.h.bf16 %v7388_v39  ;;  %v7389_v57 = vunpack.i.l.bf16 %v7388_v39  ;;  %v6136_v55 = vpack.c.bf16 %v2907_v29, %v2906_v54  ;;  %v6139_v8 = vpack.c.bf16 %v2903_v49, %v2902_v37  ;;  %vm11316_vm5 = vmmov %vm11315_vm10  ;;  %v5329_v5 = vld [vmem:[%s11046_s1 + $0x110] sm:$0xff]  ;;  %v5324_v39 = vld [vmem:[%s11046_s1 + $0xe8] sm:$0xff] }
 0xb3e   : > { %v7385_v25 = vunpack.i.h.bf16 %v7383_v40  ;;  %v7384_v17 = vunpack.i.l.bf16 %v7383_v40  ;;  %vm11317_vm11 = vmmov %vm11316_vm5  ;;  %v5321_v23 = vld [vmem:[%s11046_s1 + $0xd0] sm:$0xff]  ;;  %v5327_v40 = vld [vmem:[%s11046_s1 + $0x100] sm:$0xff] }
 0xb3f   : > { %vm11318_vm8 = vmmov %vm11316_vm5 }
 0xb40   : > { %6130 = vmatpush1.bf16.msk.msra.mxu0 %vm8275_vm0, %v6128_v33  ;;  %v7398_v45 = vpop.permute.xlu0 %7397  ;;  %v2937_v28 = vsel %vm11314_vm13, %v7390_v34, %v7385_v25  ;;  %v2936_v63 = vsel %vm11315_vm10, %v7389_v57, %v7384_v17  ;;  %v2933_v42 = vsel %vm11316_vm5, %v7385_v25, %v7390_v34  ;;  %v2932_v1 = vsel %vm11317_vm11, %v7384_v17, %v7389_v57  ;;  %vm11319_vm13 = vmmov %vm11316_vm5  ;;  %v5330_v33 = vld [vmem:[%s11046_s1 + $0x118] sm:$0xff] }
 0xb41   : > { %v7393_v44 = vpop.permute.xlu1 %7392  ;;  %6133 = vmatprep.subr.msk.bf16.mxu0 %vm8387_vm4, %v6131_v58  ;;  %v7400_v62 = vunpack.i.h.bf16 %v7398_v45  ;;  %v7399_v10 = vunpack.i.l.bf16 %v7398_v45  ;;  %v6141_v9 = vpack.c.bf16 %v2937_v28, %v2936_v63  ;;  %v6144_v12 = vpack.c.bf16 %v2933_v42, %v2932_v1  ;;  %vm11320_vm10 = vmmov %vm11316_vm5 }
 0xb42   : > { %v7395_v51 = vunpack.i.h.bf16 %v7393_v44  ;;  %v7394_v59 = vunpack.i.l.bf16 %v7393_v44  ;;  %vm11321_vm11 = vcmask 261120  }
 0xb44   : > { %6135 = vmatpush1.bf16.msra.mxu0 %v6134_v2  ;;  %v2939_v48 = vsel %vm11318_vm8, %v7400_v62, %v7395_v51  ;;  %v2938_v60 = vsel %vm11319_vm13, %v7399_v10, %v7394_v59  ;;  %v2935_v31 = vsel %vm11320_vm10, %v7395_v51, %v7400_v62  ;;  %v2934_v18 = vsel %vm11316_vm5, %v7394_v59, %v7399_v10  ;;  %vm11322_vm8 = vmmov %vm11321_vm11 }
 0xb45   : > { %6138 = vmatprep.subr.msk.bf16.mxu0 %vm8387_vm4, %v6136_v55  ;;  %v6147_v15 = vpack.c.bf16 %v2939_v48, %v2938_v60  ;;  %v6150_v27 = vpack.c.bf16 %v2935_v31, %v2934_v18  ;;  %vm11323_vm13 = vmmov %vm11322_vm8 }
 0xb46   : > { %vm11324_vm10 = vmmov %vm11322_vm8 }
 0xb48   : > { %6140 = vmatpush1.bf16.msra.mxu0 %v6139_v8 }
 0xb49   : > { %6143 = vmatprep.subr.msk.bf16.mxu0 %vm8413_vm3, %v6141_v9 }
 0xb4b   : > { %3045 = vmatmul.mubr.f32.vlgmr.msra.gmra.mrb[16].mxu0 %v5319_v50 }
 0xb4c   : > { %6146 = vmatpush1.bf16.msk.msra.mxu0 %vm8319_vm14, %v6144_v12  ;;  %3050 = vmatprep.mubr.f32.mxu0 %v5323_v11 }
 0xb4d   : > { %6149 = vmatprep.subr.msk.bf16.mxu0 %vm8413_vm3, %v6147_v15 }
 0xb4f   : > { %3051 = vmatmul.mubr.f32.gmra.mrb[18].mxu0 %v5322_v56 }
 0xb50   : > { %6152 = vmatpush1.bf16.msk.msra.mxu0 %vm8319_vm14, %v6150_v27  ;;  %3056 = vmatprep.mubr.f32.mxu0 %v5326_v0 }
 0xb51   : > { %v2956_v34 = vpop.permute.xlu0 %2955 }
 0xb52   : > { %v2951_v16 = vpop.permute.xlu1 %2950 }
 0xb53   : > { %3057 = vmatmul.mubr.f32.gmra.mrb[20].mxu0 %v5325_v35 }
 0xb54   : > { %3062 = vmatprep.mubr.f32.mxu0 %v5329_v5 }
 0xb55   : > { %v2966_v60 = vpop.permute.xlu0 %2965 }
 0xb56   : > { %v2961_v37 = vpop.permute.xlu1 %2960 }
 0xb57   : > { %3063 = vmatmul.mubr.f32.gmra.mrb[22].mxu0 %v5328_v13 }
 0xb58   : > { %3133 = vmatprep.mubr.f32.mxu0 %v7970_v36 }
 0xb5b   : > { %5391 = vmatmul.mubr.msk.f32.vlgmr.msra.gmra.mrb[16].mxu0 %vm11321_vm11, %v5321_v23 }
 0xb5c   : > { %3139 = vmatprep.mubr.f32.mxu0 %v7970_v36 }
 0xb5f   : > { %5392 = vmatmul.mubr.msk.f32.gmra.mrb[18].mxu0 %vm11322_vm8, %v5324_v39 }
 0xb60   : > { %3145 = vmatprep.mubr.f32.mxu0 %v7970_v36 }
 0xb63   : > { %5393 = vmatmul.mubr.msk.f32.gmra.mrb[20].mxu0 %vm11323_vm13, %v5327_v40 }
 0xb64   : > { %3151 = vmatprep.mubr.f32.mxu0 %v7970_v36 }
 0xb67   : > { %5394 = vmatmul.mubr.msk.f32.gmra.mrb[22].mxu0 %vm11324_vm10, %v5330_v33 }
 0xc2e   : > { %v3135_v30 = vpop.f32.mrb[16].mxu0 }
 0xc2f   : > { %v6485_v58 = vadd.f32 %v3135_v30, %v2951_v16  ;;  %v3137_v25 = vpop.f32.mrb[17].mxu0  ;;  %v5396_v30 = vld [vmem:[%s11048_s3 + $0xc8] sm:$0xff] }
 0xc30   : > { %v6486_v17 = vadd.f32 %v3137_v25, %v2951_v16  ;;  %3552 = vmatprep.mubr.f32.mxu1 %v5396_v30  ;;  %v5408_v25 = vld [vmem:[%s11049_s4 + $0x48] sm:$0xff] }
 0xc31   : > { %v3166_v29 = vmul.f32 0.1, %v6485_v58  ;;  %vm3158_vm5 = vcmp.gt.f32.partialorder %v6485_v58, 0.0 }
 0xc32   : > { %v3141_v57 = vpop.f32.mrb[18].mxu0  ;;  %v3167_v54 = vmul.f32 0.1, %v6486_v17  ;;  %vm3159_vm11 = vcmp.gt.f32.partialorder %v6486_v17, 0.0 }
 0xc33   : > { %v6487_v44 = vadd.f32 %v3141_v57, %v2956_v34  ;;  %v3143_v45 = vpop.f32.mrb[19].mxu0  ;;  %v9909_v55 = vsel %vm3158_vm5, %v6485_v58, %v3166_v29  ;;  %v5407_v58 = vld [vmem:[%s11049_s4 + $0x40] sm:$0xff] }
 0xc34   : > { %v6488_v49 = vadd.f32 %v3143_v45, %v2956_v34  ;;  %v9911_v51 = vsel %vm3159_vm11, %v6486_v17, %v3167_v54  ;;  %v5409_v17 = vld [vmem:[%s11049_s4 + $0x50] sm:$0xff]  ;;  %v5410_v34 = vld [vmem:[%s11049_s4 + $0x58] sm:$0xff] }
 0xc35   : > { %vm3160_vm8 = vcmp.gt.f32.partialorder %v6487_v44, 0.0  ;;  %v3168_v2 = vmul.f32 0.1, %v6487_v44 }
 0xc36   : > { %vm3161_vm13 = vcmp.gt.f32.partialorder %v6488_v49, 0.0  ;;  %v3169_v28 = vmul.f32 0.1, %v6488_v49  ;;  %v3147_v63 = vpop.f32.mrb[20].mxu0 }
 0xc37   : > { %v9913_v59 = vsel %vm3160_vm8, %v6487_v44, %v3168_v2  ;;  %v6489_v62 = vadd.f32 %v3147_v63, %v2961_v37  ;;  %v3149_v10 = vpop.f32.mrb[21].mxu0 }
 0xc38   : > { %v9915_v8 = vsel %vm3161_vm13, %v6488_v49, %v3169_v28  ;;  %v6490_v42 = vadd.f32 %v3149_v10, %v2961_v37  ;;  %v7401_v1 = vpack.i.bf16 %v9913_v59, %v9909_v55  ;;  %v6201_v40 = vpack.c.bf16 %v9913_v59, %v9909_v55 }
 0xc39   : > { %vm3162_vm10 = vcmp.gt.f32.partialorder %v6489_v62, 0.0  ;;  %v3170_v9 = vmul.f32 0.1, %v6489_v62  ;;  %v7406_v48 = vpack.i.bf16 %v9915_v8, %v9911_v51  ;;  %v6199_v5 = vpack.c.bf16 %v9915_v8, %v9911_v51 }
 0xc3a   : > { %vm3163_vm5 = vcmp.gt.f32.partialorder %v6490_v42, 0.0  ;;  %v3171_v50 = vmul.f32 0.1, %v6490_v42  ;;  %v3153_v11 = vpop.f32.mrb[22].mxu0  ;;  %7402 = vrot.lane.b32.xlu1 %v7401_v1, %s7961_s15  ;;  %vm11325_vm13 = vcmp.lt.s32.totalorder %v8119_v19, 16 }
 0xc3b   : > { %v9922_v12 = vsel %vm3162_vm10, %v6489_v62, %v3170_v9  ;;  %v6491_v31 = vadd.f32 %v3153_v11, %v2966_v60  ;;  %v3155_v18 = vpop.f32.mrb[23].mxu0  ;;  %7407 = vrot.lane.b32.xlu0 %v7406_v48, %s7961_s15  ;;  %vm11326_vm10 = vmmov %vm11325_vm13 }
 0xc3c   : > { %v9925_v15 = vsel %vm3163_vm5, %v6490_v42, %v3171_v50  ;;  %v6492_v56 = vadd.f32 %v3155_v18, %v2966_v60  ;;  %vm11327_vm5 = vmmov %vm11326_vm10 }
 0xc3d   : > { %vm3164_vm11 = vcmp.gt.f32.partialorder %v6491_v31, 0.0  ;;  %v3172_v0 = vmul.f32 0.1, %v6491_v31 }
 0xc3e   : > { %vm3165_vm8 = vcmp.gt.f32.partialorder %v6492_v56, 0.0  ;;  %v3173_v27 = vmul.f32 0.1, %v6492_v56 }
 0xc3f   : > { %v9927_v35 = vsel %vm3164_vm11, %v6491_v31, %v3172_v0  ;;  %vm11328_vm11 = vmmov %vm11327_vm5 }
 0xc40   : > { %v9931_v13 = vsel %vm3165_vm8, %v6492_v56, %v3173_v27  ;;  %v7411_v23 = vpack.i.bf16 %v9927_v35, %v9922_v12  ;;  %v6205_v16 = vpack.c.bf16 %v9927_v35, %v9922_v12  ;;  %vm11329_vm8 = vmmov %vm11327_vm5 }
 0xc41   : > { %v7421_v39 = vpack.i.bf16 %v9931_v13, %v9925_v15  ;;  %v6203_v33 = vpack.c.bf16 %v9931_v13, %v9925_v15 }
 0xc42   : > { %7412 = vrot.lane.b32.xlu1 %v7411_v23, %s7961_s15 }
 0xc43   : > { %7422 = vrot.lane.b32.xlu0 %v7421_v39, %s7961_s15 }
 0xc46   : > { %7417 = vrot.lane.b32.xlu1 %v7401_v1, %s7962_s16 }
 0xc47   : > { %7427 = vrot.lane.b32.xlu0 %v7406_v48, %s7962_s16 }
 0xc4a   : > { %7432 = vrot.lane.b32.xlu1 %v7411_v23, %s7962_s16 }
 0xc4b   : > { %7442 = vrot.lane.b32.xlu0 %v7421_v39, %s7962_s16 }
 0xc4e   : > { %7437 = vrot.lane.b32.xlu1 %v7401_v1, %s7963_s17 }
 0xc4f   : > { %7447 = vrot.lane.b32.xlu0 %v7406_v48, %s7963_s17 }
 0xc52   : > { %7452 = vrot.lane.b32.xlu1 %v7411_v23, %s7963_s17 }
 0xc53   : > { %7462 = vrot.lane.b32.xlu0 %v7421_v39, %s7963_s17 }
 0xc56   : > { %7457 = vrot.lane.b32.xlu1 %v7401_v1, %s7964_s18 }
 0xc57   : > { %7467 = vrot.lane.b32.xlu0 %v7406_v48, %s7964_s18 }
 0xc5a   : > { %7472 = vrot.lane.b32.xlu1 %v7411_v23, %s7964_s18 }
 0xc5b   : > { %7477 = vrot.lane.b32.xlu0 %v7421_v39, %s7964_s18 }
 0xc5e   : > { %7482 = vrot.lane.b32.xlu1 %v7401_v1, %s7965_s19 }
 0xc5f   : > { %7487 = vrot.lane.b32.xlu0 %v7406_v48, %s7965_s19 }
 0xc62   : > { %7492 = vrot.lane.b32.xlu1 %v7411_v23, %s7965_s19 }
 0xc63   : > { %7502 = vrot.lane.b32.xlu0 %v7421_v39, %s7965_s19 }
 0xc66   : > { %7497 = vrot.lane.b32.xlu1 %v7401_v1, %s7966_s20 }
 0xc67   : > { %7507 = vrot.lane.b32.xlu0 %v7406_v48, %s7966_s20 }
 0xc6a   : > { %7512 = vrot.lane.b32.xlu1 %v7411_v23, %s7966_s20 }
 0xc6b   : > { %7522 = vrot.lane.b32.xlu0 %v7421_v39, %s7966_s20 }
 0xc6e   : > { %7517 = vrot.lane.b32.xlu1 %v7401_v1, %s7967_s21 }
 0xc6f   : > { %7527 = vrot.lane.b32.xlu0 %v7406_v48, %s7967_s21 }
 0xc72   : > { %7532 = vrot.lane.b32.xlu1 %v7411_v23, %s7967_s21 }
 0xc73   : > { %7537 = vrot.lane.b32.xlu0 %v7421_v39, %s7967_s21 }
 0xc76   : > { %7542 = vrot.lane.b32.xlu1 %v7401_v1, %s7968_s22 }
 0xc77   : > { %7547 = vrot.lane.b32.xlu0 %v7406_v48, %s7968_s22 }
 0xc7a   : > { %7552 = vrot.lane.b32.xlu1 %v7411_v23, %s7968_s22 }
 0xc7b   : > { %7557 = vrot.lane.b32.xlu0 %v7421_v39, %s7968_s22 }
 0xc7e   : > { %3458 = vperm.xlu1 %6760, %v5407_v58  }
 0xc7f   : > { %3463 = vperm.xlu0 %6759, %v5408_v25  }
 0xc82   : > { %3468 = vperm.xlu1 %6760, %v5409_v17  }
 0xc83   : > { %3473 = vperm.xlu0 %6759, %v5410_v34  }
 0xcac   : > { %v7403_v57 = vpop.permute.xlu1 %7402 }
 0xcad   : > { %v7405_v29 = vunpack.i.h.bf16 %v7403_v57  ;;  %v7404_v54 = vunpack.i.l.bf16 %v7403_v57  ;;  %v7408_v44 = vpop.permute.xlu0 %7407 }
 0xcae   : > { %v7410_v45 = vunpack.i.h.bf16 %v7408_v44  ;;  %v7409_v49 = vunpack.i.l.bf16 %v7408_v44 }
 0xcb0   : > { %v3216_v2 = vsel %vm416_vm2, %v7404_v54, %v7409_v49  ;;  %v3217_v37 = vsel %vm416_vm2, %v7405_v29, %v7410_v45  ;;  %v3220_v28 = vsel %vm416_vm2, %v7409_v49, %v7404_v54  ;;  %v3221_v63 = vsel %vm416_vm2, %v7410_v45, %v7405_v29 }
 0xcb1   : > { %v6156_v62 = vpack.c.bf16 %v3221_v63, %v3220_v28  ;;  %v6153_v10 = vpack.c.bf16 %v3217_v37, %v3216_v2 }
 0xcb3   : > { %6155 = vmatprep.subr.msk.bf16.mxu1 %vm8156_vm6, %v6153_v10 }
 0xcb4   : > { %v7413_v42 = vpop.permute.xlu1 %7412  ;;  %6158 = vmatpush1.bf16.msk.msra.mxu1 %vm8164_vm7, %v6156_v62 }
 0xcb5   : > { %v7415_v1 = vunpack.i.h.bf16 %v7413_v42  ;;  %v7414_v9 = vunpack.i.l.bf16 %v7413_v42  ;;  %v7423_v48 = vpop.permute.xlu0 %7422 }
 0xcb6   : > { %v7425_v60 = vunpack.i.h.bf16 %v7423_v48  ;;  %v7424_v50 = vunpack.i.l.bf16 %v7423_v48 }
 0xcb8   : > { %v3218_v11 = vsel %vm416_vm2, %v7414_v9, %v7424_v50  ;;  %v3219_v31 = vsel %vm416_vm2, %v7415_v1, %v7425_v60  ;;  %v3222_v18 = vsel %vm416_vm2, %v7424_v50, %v7414_v9  ;;  %v3223_v56 = vsel %vm416_vm2, %v7425_v60, %v7415_v1  ;;  %v7418_v0 = vpop.permute.xlu1 %7417 }
 0xcb9   : > { %v6162_v27 = vpack.c.bf16 %v3223_v56, %v3222_v18  ;;  %v7420_v23 = vunpack.i.h.bf16 %v7418_v0  ;;  %v7419_v39 = vunpack.i.l.bf16 %v7418_v0  ;;  %v7428_v30 = vpop.permute.xlu0 %7427  ;;  %v6159_v58 = vpack.c.bf16 %v3219_v31, %v3218_v11 }
 0xcba   : > { %v7430_v25 = vunpack.i.h.bf16 %v7428_v30  ;;  %v7429_v17 = vunpack.i.l.bf16 %v7428_v30 }
 0xcbb   : > { %6161 = vmatprep.subr.msk.bf16.mxu1 %vm8156_vm6, %v6159_v58 }
 0xcbc   : > { %v3252_v34 = vsel %vm11325_vm13, %v7429_v17, %v7419_v39  ;;  %v3253_v57 = vsel %vm11326_vm10, %v7430_v25, %v7420_v23  ;;  %v7433_v29 = vpop.permute.xlu1 %7432  ;;  %6164 = vmatpush1.bf16.msk.msra.mxu1 %vm8164_vm7, %v6162_v27  ;;  %v3248_v54 = vsel %vm11327_vm5, %v7419_v39, %v7429_v17  ;;  %v3249_v44 = vsel %vm11328_vm11, %v7420_v23, %v7430_v25  ;;  %vm11330_vm13 = vmmov %vm11327_vm5 }
 0xcbd   : > { %v6167_v45 = vpack.c.bf16 %v3253_v57, %v3252_v34  ;;  %v7435_v49 = vunpack.i.h.bf16 %v7433_v29  ;;  %v7434_v2 = vunpack.i.l.bf16 %v7433_v29  ;;  %v7443_v37 = vpop.permute.xlu0 %7442  ;;  %v6165_v28 = vpack.c.bf16 %v3249_v44, %v3248_v54  ;;  %vm11331_vm10 = vmmov %vm11327_vm5 }
 0xcbe   : > { %v7445_v63 = vunpack.i.h.bf16 %v7443_v37  ;;  %v7444_v62 = vunpack.i.l.bf16 %v7443_v37  ;;  %vm11332_vm11 = vcmp.lt.s32.totalorder %v8119_v19, 15 }
 0xcbf   : > { %6166 = vmatprep.subr.bf16.mxu1 %v6165_v28 }
 0xcc0   : > { %v3254_v10 = vsel %vm11329_vm8, %v7444_v62, %v7434_v2  ;;  %v3255_v42 = vsel %vm11330_vm13, %v7445_v63, %v7435_v49  ;;  %v7438_v1 = vpop.permute.xlu1 %7437  ;;  %6169 = vmatpush1.bf16.msk.msra.mxu1 %vm8200_vm9, %v6167_v45  ;;  %v3250_v9 = vsel %vm11331_vm10, %v7434_v2, %v7444_v62  ;;  %v3251_v48 = vsel %vm11327_vm5, %v7435_v49, %v7445_v63  ;;  %vm11333_vm8 = vmmov %vm11332_vm11 }
 0xcc1   : > { %v6172_v60 = vpack.c.bf16 %v3255_v42, %v3254_v10  ;;  %v7440_v50 = vunpack.i.h.bf16 %v7438_v1  ;;  %v7439_v11 = vunpack.i.l.bf16 %v7438_v1  ;;  %v7448_v31 = vpop.permute.xlu0 %7447  ;;  %v6170_v18 = vpack.c.bf16 %v3251_v48, %v3250_v9  ;;  %vm11334_vm13 = vmmov %vm11333_vm8 }
 0xcc2   : > { %v7450_v56 = vunpack.i.h.bf16 %v7448_v31  ;;  %v7449_v0 = vunpack.i.l.bf16 %v7448_v31  ;;  %vm11335_vm10 = vmmov %vm11333_vm8 }
 0xcc3   : > { %6171 = vmatprep.subr.bf16.mxu1 %v6170_v18  ;;  %vm11336_vm5 = vmmov %vm11333_vm8 }
 0xcc4   : > { %v3280_v27 = vsel %vm11332_vm11, %v7439_v11, %v7449_v0  ;;  %v3281_v23 = vsel %vm11333_vm8, %v7440_v50, %v7450_v56  ;;  %v3284_v39 = vsel %vm11334_vm13, %v7449_v0, %v7439_v11  ;;  %v3285_v30 = vsel %vm11335_vm10, %v7450_v56, %v7440_v50  ;;  %v7453_v58 = vpop.permute.xlu1 %7452  ;;  %6174 = vmatpush1.bf16.msk.msra.mxu1 %vm8200_vm9, %v6172_v60  ;;  %vm11337_vm11 = vmmov %vm11336_vm5 }
 0xcc5   : > { %v6178_v25 = vpack.c.bf16 %v3285_v30, %v3284_v39  ;;  %v7455_v17 = vunpack.i.h.bf16 %v7453_v58  ;;  %v7454_v34 = vunpack.i.l.bf16 %v7453_v58  ;;  %v7463_v57 = vpop.permute.xlu0 %7462  ;;  %v6175_v29 = vpack.c.bf16 %v3281_v23, %v3280_v27  ;;  %vm11338_vm8 = vmmov %vm11336_vm5 }
 0xcc6   : > { %v7465_v54 = vunpack.i.h.bf16 %v7463_v57  ;;  %v7464_v44 = vunpack.i.l.bf16 %v7463_v57  ;;  %vm11339_vm13 = vmmov %vm11336_vm5  ;;  %vm11340_vm10 = vcmp.lt.s32.totalorder %v8119_v19, 1 }
 0xcc7   : > { %6177 = vmatprep.subr.msk.bf16.mxu1 %vm8229_vm12, %v6175_v29 }
 0xcc8   : > { %v3282_v45 = vsel %vm11336_vm5, %v7454_v34, %v7464_v44  ;;  %v3283_v49 = vsel %vm11337_vm11, %v7455_v17, %v7465_v54  ;;  %v3286_v2 = vsel %vm11338_vm8, %v7464_v44, %v7454_v34  ;;  %v3287_v37 = vsel %vm11339_vm13, %v7465_v54, %v7455_v17  ;;  %v7458_v28 = vpop.permute.xlu1 %7457  ;;  %6180 = vmatpush1.bf16.msk.msra.mxu1 %vm8250_vm15, %v6178_v25  ;;  %vm11341_vm5 = vmmov %vm11340_vm10 }
 0xcc9   : > { %v6184_v63 = vpack.c.bf16 %v3287_v37, %v3286_v2  ;;  %v7460_v62 = vunpack.i.h.bf16 %v7458_v28  ;;  %v7459_v10 = vunpack.i.l.bf16 %v7458_v28  ;;  %v7468_v42 = vpop.permute.xlu0 %7467  ;;  %v6181_v1 = vpack.c.bf16 %v3283_v49, %v3282_v45  ;;  %vm11342_vm11 = vmmov %vm11341_vm5 }
 0xcca   : > { %v7470_v9 = vunpack.i.h.bf16 %v7468_v42  ;;  %v7469_v48 = vunpack.i.l.bf16 %v7468_v42  ;;  %vm11343_vm8 = vmmov %vm11341_vm5 }
 0xccb   : > { %6183 = vmatprep.subr.msk.bf16.mxu1 %vm8229_vm12, %v6181_v1  ;;  %vm11344_vm13 = vmmov %vm11341_vm5 }
 0xccc   : > { %v3312_v60 = vsel %vm11340_vm10, %v7459_v10, %v7469_v48  ;;  %v3313_v50 = vsel %vm11341_vm5, %v7460_v62, %v7470_v9  ;;  %v3316_v11 = vsel %vm11342_vm11, %v7469_v48, %v7459_v10  ;;  %v3317_v31 = vsel %vm11343_vm8, %v7470_v9, %v7460_v62  ;;  %v7473_v18 = vpop.permute.xlu1 %7472  ;;  %6186 = vmatpush1.bf16.msk.msra.mxu1 %vm8250_vm15, %v6184_v63  ;;  %vm11345_vm10 = vmmov %vm11341_vm5 }
 0xccd   : > { %v6190_v56 = vpack.c.bf16 %v3317_v31, %v3316_v11  ;;  %v7475_v0 = vunpack.i.h.bf16 %v7473_v18  ;;  %v7474_v27 = vunpack.i.l.bf16 %v7473_v18  ;;  %v7478_v23 = vpop.permute.xlu0 %7477  ;;  %v6187_v39 = vpack.c.bf16 %v3313_v50, %v3312_v60  ;;  %vm11346_vm11 = vmmov %vm11341_vm5 }
 0xcce   : > { %v7480_v30 = vunpack.i.h.bf16 %v7478_v23  ;;  %v7479_v58 = vunpack.i.l.bf16 %v7478_v23  ;;  %vm11347_vm8 = vcmp.lt.s32.totalorder %v8119_v19, 127 }
 0xccf   : > { %6189 = vmatprep.subr.msk.bf16.mxu1 %vm8156_vm6, %v6187_v39 }
 0xcd0   : > { %v3314_v25 = vsel %vm11344_vm13, %v7474_v27, %v7479_v58  ;;  %v3315_v17 = vsel %vm11345_vm10, %v7475_v0, %v7480_v30  ;;  %v3318_v34 = vsel %vm11341_vm5, %v7479_v58, %v7474_v27  ;;  %v3319_v57 = vsel %vm11346_vm11, %v7480_v30, %v7475_v0  ;;  %v7483_v29 = vpop.permute.xlu1 %7482  ;;  %6192 = vmatpush1.bf16.msk.msra.mxu1 %vm8275_vm0, %v6190_v56  ;;  %vm11348_vm13 = vmmov %vm11347_vm8 }
 0xcd1   : > { %v6196_v54 = vpack.c.bf16 %v3319_v57, %v3318_v34  ;;  %v7488_v44 = vpop.permute.xlu0 %7487  ;;  %v6193_v45 = vpack.c.bf16 %v3315_v17, %v3314_v25  ;;  %v7485_v49 = vunpack.i.h.bf16 %v7483_v29  ;;  %v7484_v2 = vunpack.i.l.bf16 %v7483_v29  ;;  %vm11349_vm10 = vmmov %vm11347_vm8 }
 0xcd2   : > { %v7490_v37 = vunpack.i.h.bf16 %v7488_v44  ;;  %v7489_v28 = vunpack.i.l.bf16 %v7488_v44  ;;  %vm11350_vm5 = vmmov %vm11347_vm8 }
 0xcd3   : > { %6195 = vmatprep.subr.msk.bf16.mxu1 %vm8156_vm6, %v6193_v45  ;;  %vm11351_vm11 = vmmov %vm11350_vm5 }
 0xcd4   : > { %v7493_v63 = vpop.permute.xlu1 %7492  ;;  %6198 = vmatpush1.bf16.msk.msra.mxu1 %vm8275_vm0, %v6196_v54  ;;  %v3348_v10 = vsel %vm11347_vm8, %v7489_v28, %v7484_v2  ;;  %v3349_v42 = vsel %vm11348_vm13, %v7490_v37, %v7485_v49  ;;  %v3344_v51 = vsel %vm11349_vm10, %v7484_v2, %v7489_v28  ;;  %v3345_v8 = vsel %vm11350_vm5, %v7485_v49, %v7490_v37  ;;  %vm11352_vm8 = vmmov %vm11350_vm5 }
 0xcd5   : > { %v7503_v62 = vpop.permute.xlu0 %7502  ;;  %6200 = vmatprep.subr.bf16.mxu1 %v6199_v5  ;;  %v7495_v1 = vunpack.i.h.bf16 %v7493_v63  ;;  %v7494_v9 = vunpack.i.l.bf16 %v7493_v63  ;;  %v6207_v5 = vpack.c.bf16 %v3349_v42, %v3348_v10  ;;  %v6210_v13 = vpack.c.bf16 %v3345_v8, %v3344_v51  ;;  %vm11353_vm13 = vmmov %vm11350_vm5 }
 0xcd6   : > { %v7505_v48 = vunpack.i.h.bf16 %v7503_v62  ;;  %v7504_v60 = vunpack.i.l.bf16 %v7503_v62  ;;  %vm11354_vm10 = vmmov %vm11350_vm5  ;;  %vm11355_vm5 = vcmp.lt.s32.totalorder %v8119_v19, 113 }
 0xcd8   : > { %v7498_v50 = vpop.permute.xlu1 %7497  ;;  %6202 = vmatpush1.bf16.msra.mxu1 %v6201_v40  ;;  %v3350_v55 = vsel %vm11351_vm11, %v7504_v60, %v7494_v9  ;;  %v3351_v59 = vsel %vm11352_vm8, %v7505_v48, %v7495_v1  ;;  %v3347_v27 = vsel %vm11354_vm10, %v7495_v1, %v7505_v48  ;;  %vm11356_vm11 = vmmov %vm11355_vm5 }
 0xcd9   : > { %v7508_v11 = vpop.permute.xlu0 %7507  ;;  %6204 = vmatprep.subr.bf16.mxu1 %v6203_v33  ;;  %v7500_v31 = vunpack.i.h.bf16 %v7498_v50  ;;  %v7499_v18 = vunpack.i.l.bf16 %v7498_v50  ;;  %v3346_v33 = vsel %vm11353_vm13, %v7494_v9, %v7504_v60  ;;  %v6213_v30 = vpack.c.bf16 %v3351_v59, %v3350_v55  ;;  %vm11357_vm8 = vmmov %vm11355_vm5 }
 0xcda   : > { %v7510_v56 = vunpack.i.h.bf16 %v7508_v11  ;;  %v7509_v0 = vunpack.i.l.bf16 %v7508_v11  ;;  %v6216_v34 = vpack.c.bf16 %v3347_v27, %v3346_v33  ;;  %vm11358_vm13 = vmmov %vm11355_vm5 }
 0xcdb   : > { %vm11359_vm10 = vmmov %vm11355_vm5 }
 0xcdc   : > { %v7513_v40 = vpop.permute.xlu1 %7512  ;;  %6206 = vmatpush1.bf16.msra.mxu1 %v6205_v16  ;;  %v3380_v23 = vsel %vm11355_vm5, %v7509_v0, %v7499_v18  ;;  %v3381_v39 = vsel %vm11356_vm11, %v7510_v56, %v7500_v31  ;;  %v3376_v57 = vsel %vm11357_vm8, %v7499_v18, %v7509_v0  ;;  %v3377_v29 = vsel %vm11358_vm13, %v7500_v31, %v7510_v56  ;;  %vm11360_vm11 = vmmov %vm11355_vm5 }
 0xcdd   : > { %v7523_v15 = vpop.permute.xlu0 %7522  ;;  %6209 = vmatprep.subr.msk.bf16.mxu1 %vm8229_vm12, %v6207_v5  ;;  %v7515_v12 = vunpack.i.h.bf16 %v7513_v40  ;;  %v7514_v35 = vunpack.i.l.bf16 %v7513_v40  ;;  %v6219_v54 = vpack.c.bf16 %v3381_v39, %v3380_v23  ;;  %v6222_v10 = vpack.c.bf16 %v3377_v29, %v3376_v57  ;;  %vm11361_vm8 = vmmov %vm11355_vm5 }
 0xcde   : > { %v7525_v16 = vunpack.i.h.bf16 %v7523_v15  ;;  %v7524_v58 = vunpack.i.l.bf16 %v7523_v15  ;;  %vm11362_vm13 = vcmp.lt.s32.totalorder %v8119_v19, 112 }
 0xce0   : > { %v7518_v25 = vpop.permute.xlu1 %7517  ;;  %6212 = vmatpush1.bf16.msk.msra.mxu1 %vm8319_vm14, %v6210_v13  ;;  %v3382_v37 = vsel %vm11359_vm10, %v7524_v58, %v7514_v35  ;;  %v3383_v28 = vsel %vm11355_vm5, %v7525_v16, %v7515_v12  ;;  %v3378_v42 = vsel %vm11360_vm11, %v7514_v35, %v7524_v58  ;;  %v3379_v1 = vsel %vm11361_vm8, %v7515_v12, %v7525_v16  ;;  %vm11363_vm10 = vmmov %vm11362_vm13 }
 0xce1   : > { %v7528_v17 = vpop.permute.xlu0 %7527  ;;  %6215 = vmatprep.subr.msk.bf16.mxu1 %vm8229_vm12, %v6213_v30  ;;  %v7520_v44 = vunpack.i.h.bf16 %v7518_v25  ;;  %v7519_v45 = vunpack.i.l.bf16 %v7518_v25  ;;  %v6225_v60 = vpack.c.bf16 %v3383_v28, %v3382_v37  ;;  %v6228_v18 = vpack.c.bf16 %v3379_v1, %v3378_v42  ;;  %vm11364_vm5 = vmmov %vm11363_vm10  ;;  %v5395_v28 = vld [vmem:[%s11048_s3 + $0xc0] sm:$0xff] }
 0xce2   : > { %v7530_v49 = vunpack.i.h.bf16 %v7528_v17  ;;  %v7529_v2 = vunpack.i.l.bf16 %v7528_v17  ;;  %vm11365_vm11 = vmmov %vm11364_vm5 }
 0xce3   : > { %vm11366_vm8 = vmmov %vm11364_vm5 }
 0xce4   : > { %v7533_v63 = vpop.permute.xlu1 %7532  ;;  %6218 = vmatpush1.bf16.msk.msra.mxu1 %vm8319_vm14, %v6216_v34  ;;  %v3412_v9 = vsel %vm11362_vm13, %v7529_v2, %v7519_v45  ;;  %v3413_v48 = vsel %vm11363_vm10, %v7530_v49, %v7520_v44  ;;  %v3408_v56 = vsel %vm11364_vm5, %v7519_v45, %v7529_v2  ;;  %v3409_v0 = vsel %vm11365_vm11, %v7520_v44, %v7530_v49  ;;  %vm11367_vm13 = vmmov %vm11364_vm5 }
 0xce5   : > { %v7538_v62 = vpop.permute.xlu0 %7537  ;;  %6221 = vmatprep.subr.msk.bf16.mxu1 %vm8355_vm1, %v6219_v54  ;;  %v7535_v50 = vunpack.i.h.bf16 %v7533_v63  ;;  %v7534_v11 = vunpack.i.l.bf16 %v7533_v63  ;;  %v6231_v55 = vpack.c.bf16 %v3413_v48, %v3412_v9  ;;  %vm11368_vm10 = vmmov %vm11364_vm5  ;;  %v6234_v12 = vpack.c.bf16 %v3409_v0, %v3408_v56  ;;  %v5399_v63 = vld [vmem:[%s11048_s3 + $0xe0] sm:$0xff]  ;;  %v5398_v9 = vld [vmem:[%s11048_s3 + $0xd8] sm:$0xff] }
 0xce6   : > { %v7540_v51 = vunpack.i.h.bf16 %v7538_v62  ;;  %v7539_v8 = vunpack.i.l.bf16 %v7538_v62  ;;  %vm11369_vm11 = vcmp.lt.s32.totalorder %v8119_v19, 111  ;;  %v5402_v48 = vld [vmem:[%s11048_s3 + $0xf8] sm:$0xff] }
 0xce8   : > { %v7543_v5 = vpop.permute.xlu1 %7542  ;;  %6224 = vmatpush1.bf16.msk.msra.mxu1 %vm8275_vm0, %v6222_v10  ;;  %v3414_v33 = vsel %vm11366_vm8, %v7539_v8, %v7534_v11  ;;  %v3415_v27 = vsel %vm11367_vm13, %v7540_v51, %v7535_v50  ;;  %v3410_v30 = vsel %vm11368_vm10, %v7534_v11, %v7539_v8  ;;  %v3411_v35 = vsel %vm11364_vm5, %v7535_v50, %v7540_v51  ;;  %vm11370_vm8 = vmmov %vm11369_vm11  ;;  %v5401_v50 = vld [vmem:[%s11048_s3 + $0xf0] sm:$0xff]  ;;  %v5404_v51 = vld [vmem:[%s11048_s3 + $0x108] sm:$0xff] }
 0xce9   : > { %v7548_v31 = vpop.permute.xlu0 %7547  ;;  %6227 = vmatprep.subr.msk.bf16.mxu1 %vm8355_vm1, %v6225_v60  ;;  %v7545_v59 = vunpack.i.h.bf16 %v7543_v5  ;;  %v7544_v40 = vunpack.i.l.bf16 %v7543_v5  ;;  %v6236_v25 = vpack.c.bf16 %v3415_v27, %v3414_v33  ;;  %v6239_v54 = vpack.c.bf16 %v3411_v35, %v3410_v30  ;;  %vm11371_vm13 = vmmov %vm11370_vm8  ;;  %v5405_v11 = vld [vmem:[%s11048_s3 + $0x110] sm:$0xff]  ;;  %v5400_v5 = vld [vmem:[%s11048_s3 + $0xe8] sm:$0xff] }
 0xcea   : > { %v7550_v15 = vunpack.i.h.bf16 %v7548_v31  ;;  %v7549_v13 = vunpack.i.l.bf16 %v7548_v31  ;;  %vm11372_vm10 = vmmov %vm11370_vm8  ;;  %v5397_v8 = vld [vmem:[%s11048_s3 + $0xd0] sm:$0xff]  ;;  %v5403_v31 = vld [vmem:[%s11048_s3 + $0x100] sm:$0xff] }
 0xceb   : > { %vm11373_vm5 = vmmov %vm11370_vm8 }
 0xcec   : > { %6230 = vmatpush1.bf16.msk.msra.mxu1 %vm8275_vm0, %v6228_v18  ;;  %v7553_v23 = vpop.permute.xlu1 %7552  ;;  %v3444_v16 = vsel %vm11369_vm11, %v7549_v13, %v7544_v40  ;;  %v3445_v58 = vsel %vm11370_vm8, %v7550_v15, %v7545_v59  ;;  %v3440_v44 = vsel %vm11371_vm13, %v7544_v40, %v7549_v13  ;;  %v3441_v45 = vsel %vm11372_vm10, %v7545_v59, %v7550_v15  ;;  %vm11374_vm11 = vmmov %vm11373_vm5  ;;  %v5406_v18 = vld [vmem:[%s11048_s3 + $0x118] sm:$0xff] }
 0xced   : > { %v7558_v39 = vpop.permute.xlu0 %7557  ;;  %6233 = vmatprep.subr.msk.bf16.mxu1 %vm8387_vm4, %v6231_v55  ;;  %v7555_v17 = vunpack.i.h.bf16 %v7553_v23  ;;  %v7554_v34 = vunpack.i.l.bf16 %v7553_v23  ;;  %v6241_v49 = vpack.c.bf16 %v3445_v58, %v3444_v16  ;;  %v6244_v62 = vpack.c.bf16 %v3441_v45, %v3440_v44  ;;  %vm11375_vm8 = vmmov %vm11373_vm5 }
 0xcee   : > { %v7560_v57 = vunpack.i.h.bf16 %v7558_v39  ;;  %v7559_v29 = vunpack.i.l.bf16 %v7558_v39  ;;  %vm11376_vm13 = vmmov %vm11373_vm5  ;;  %vm11377_vm10 = vcmask 261120  }
 0xcf0   : > { %6235 = vmatpush1.bf16.msra.mxu1 %v6234_v12  ;;  %v3446_v2 = vsel %vm11373_vm5, %v7559_v29, %v7554_v34  ;;  %v3447_v37 = vsel %vm11374_vm11, %v7560_v57, %v7555_v17  ;;  %v3442_v10 = vsel %vm11375_vm8, %v7554_v34, %v7559_v29  ;;  %v3443_v42 = vsel %vm11376_vm13, %v7555_v17, %v7560_v57  ;;  %vm11378_vm5 = vmmov %vm11377_vm10 }
 0xcf1   : > { %6238 = vmatprep.subr.msk.bf16.mxu1 %vm8387_vm4, %v6236_v25  ;;  %v6247_v1 = vpack.c.bf16 %v3447_v37, %v3446_v2  ;;  %v6250_v60 = vpack.c.bf16 %v3443_v42, %v3442_v10  ;;  %vm11379_vm11 = vmmov %vm11378_vm5  ;;  %vm11381_vm13 = vcmask 15360  }
 0xcf2   : > { %vm11380_vm8 = vmmov %vm11378_vm5 }
 0xcf4   : > { %6240 = vmatpush1.bf16.msra.mxu1 %v6239_v54 }
 0xcf5   : > { %6243 = vmatprep.subr.msk.bf16.mxu1 %vm8413_vm3, %v6241_v49 }
 0xcf7   : > { %3553 = vmatmul.mubr.f32.vlgmr.msra.gmra.mrb[16].mxu1 %v5395_v28 }
 0xcf8   : > { %6246 = vmatpush1.bf16.msk.msra.mxu1 %vm8319_vm14, %v6244_v62  ;;  %3558 = vmatprep.mubr.f32.mxu1 %v5399_v63 }
 0xcf9   : > { %6249 = vmatprep.subr.msk.bf16.mxu1 %vm8413_vm3, %v6247_v1 }
 0xcfb   : > { %3559 = vmatmul.mubr.f32.gmra.mrb[18].mxu1 %v5398_v9 }
 0xcfc   : > { %6252 = vmatpush1.bf16.msk.msra.mxu1 %vm8319_vm14, %v6250_v60  ;;  %3564 = vmatprep.mubr.f32.mxu1 %v5402_v48  ;;  %v5472_v60 = vld [vmem:[%s11050_s5 + $0x48] sm:$0xff] }
 0xcfd   : > { %v3459_v56 = vpop.permute.xlu1 %3458 }
 0xcfe   : > { %v3464_v13 = vpop.permute.xlu0 %3463 }
 0xcff   : > { %3565 = vmatmul.mubr.f32.gmra.mrb[20].mxu1 %v5401_v50 }
 0xd00   : > { %3570 = vmatprep.mubr.f32.mxu1 %v5405_v11  ;;  %v5471_v11 = vld [vmem:[%s11050_s5 + $0x40] sm:$0xff] }
 0xd02   : > { %v3474_v29 = vpop.permute.xlu0 %3473 }
 0xd03   : > { %3571 = vmatmul.mubr.f32.gmra.mrb[22].mxu1 %v5404_v51 }
 0xd04   : > { %3641 = vmatprep.mubr.f32.mxu1 %v7970_v36 }
 0xd07   : > { %5467 = vmatmul.mubr.msk.f32.vlgmr.msra.gmra.mrb[16].mxu1 %vm11377_vm10, %v5397_v8  ;;  %vm11382_vm10 = vmmov %vm11381_vm13 }
 0xd08   : > { %3647 = vmatprep.mubr.f32.mxu1 %v7970_v36 }
 0xd0b   : > { %5468 = vmatmul.mubr.msk.f32.gmra.mrb[18].mxu1 %vm11378_vm5, %v5400_v5  ;;  %vm11383_vm5 = vmmov %vm11382_vm10 }
 0xd0c   : > { %3653 = vmatprep.mubr.f32.mxu1 %v7970_v36 }
 0xd0f   : > { %5469 = vmatmul.mubr.msk.f32.gmra.mrb[20].mxu1 %vm11379_vm11, %v5403_v31  ;;  %vm11384_vm11 = vmmov %vm11383_vm5 }
 0xd10   : > { %3659 = vmatprep.mubr.f32.mxu1 %v7970_v36 }
 0xd13   : > { %5470 = vmatmul.mubr.msk.f32.gmra.mrb[22].mxu1 %vm11380_vm8, %v5406_v18  ;;  %vm11385_vm8 = vmmov %vm11383_vm5 }
 0xdda   : > { %v3643_v0 = vpop.f32.mrb[16].mxu1 }
 0xddb   : > { %v6493_v55 = vadd.f32 %v3643_v0, %v3459_v56  ;;  %v3645_v59 = vpop.f32.mrb[17].mxu1  ;;  %v5473_v0 = vld [vmem:[%s11050_s5 + $0x50] sm:$0xff] }
 0xddc   : > { %v6494_v40 = vadd.f32 %v3645_v59, %v3459_v56  ;;  %v5474_v59 = vld [vmem:[%s11050_s5 + $0x58] sm:$0xff] }
 0xddd   : > { %v10226_v15 = vadd.f32 %v6493_v55, %v9604_v21  ;;  %v3469_v21 = vpop.permute.xlu1 %3468 }
 0xdde   : > { %v10229_v33 = vadd.f32 %v6494_v40, %v9607_v38  ;;  %v3649_v27 = vpop.f32.mrb[18].mxu1 }
 0xddf   : > { %v6495_v23 = vadd.f32 %v3649_v27, %v3464_v13  ;;  %v3651_v39 = vpop.f32.mrb[19].mxu1 }
 0xde0   : > { %v6496_v30 = vadd.f32 %v3651_v39, %v3464_v13  ;;  %v3674_v12 = vadd.f32 %v10229_v33, %v10226_v15  ;;  %v3690_v57 = vmax.f32 %v10226_v15, %v10229_v33 }
 0xde1   : > { %v10234_v35 = vadd.f32 %v6495_v23, %v9598_v20 }
 0xde2   : > { %v10237_v16 = vadd.f32 %v6496_v30, %v9601_v32  ;;  %v3655_v58 = vpop.f32.mrb[20].mxu1  ;;  %3675 = vadd.xlane.f32.xlu1 %v3674_v12 }
 0xde3   : > { %v3657_v25 = vpop.f32.mrb[21].mxu1  ;;  %v6497_v17 = vadd.f32 %v3655_v58, %v3469_v21 }
 0xde4   : > { %v6498_v38 = vadd.f32 %v3657_v25, %v3469_v21  ;;  %v3677_v34 = vadd.f32 %v10237_v16, %v10234_v35  ;;  %v3693_v2 = vmax.f32 %v10234_v35, %v10237_v16 }
 0xde5   : > { %v10244_v32 = vadd.f32 %v6497_v17, %v9614_v52 }
 0xde6   : > { %v3661_v54 = vpop.f32.mrb[22].mxu1  ;;  %3678 = vadd.xlane.f32.xlu0 %v3677_v34  ;;  %3691 = vmax.xlane.f32.xlu1 %v3690_v57  ;;  %v10247_v45 = vadd.f32 %v6498_v38, %v9617_v7 }
 0xde7   : > { %v6499_v20 = vadd.f32 %v3661_v54, %v3474_v29  ;;  %v3663_v44 = vpop.f32.mrb[23].mxu1 }
 0xde8   : > { %v6500_v49 = vadd.f32 %v3663_v44, %v3474_v29  ;;  %v3680_v63 = vadd.f32 %v10247_v45, %v10244_v32  ;;  %v3696_v7 = vmax.f32 %v10244_v32, %v10247_v45  ;;  %v5475_v44 = vld [vmem:[%s11051_s6 + $0x2] sm:$0x1] }
 0xde9   : > { %v10252_v37 = vadd.f32 %v6499_v20, %v9620_v46 }
 0xdea   : > { %v10255_v28 = vadd.f32 %v6500_v49, %v9623_v3  ;;  %3694 = vmax.xlane.f32.xlu0 %v3693_v2 }
 0xdec   : > { %v3683_v52 = vadd.f32 %v10255_v28, %v10252_v37  ;;  %v3699_v62 = vmax.f32 %v10252_v37, %v10255_v28 }
 0xdee   : > { %3681 = vadd.xlane.f32.xlu0 %v3680_v63  ;;  %3684 = vadd.xlane.f32.xlu1 %v3683_v52  ;;  %v5477_v52 = vld [vmem:[%s11052_s7 + $0x48] sm:$0xff] }
 0xdf2   : > { %3697 = vmax.xlane.f32.xlu0 %v3696_v7  ;;  %3700 = vmax.xlane.f32.xlu1 %v3699_v62  ;;  %v5476_v7 = vld [vmem:[%s11052_s7 + $0x40] sm:$0xff] }
 0xe6f   : > { %v3676_v46 = vpop.xlane.xlu1 %3675 }
 0xe70   : > { %v3686_v9 = vmul.f32 0.00390625, %v3676_v46  ;;  %v5479_v46 = vld [vmem:[%s11052_s7 + $0x58] sm:$0xff] }
 0xe73   : > { %v3679_v3 = vpop.xlane.xlu0 %3678  ;;  %v3692_v42 = vpop.xlane.xlu1 %3691 }
 0xe74   : > { %v3687_v10 = vmul.f32 0.00390625, %v3679_v3  ;;  %v3702_v50 = vadd.f32 %v3692_v42, %v3686_v9  ;;  %v5478_v3 = vld [vmem:[%s11052_s7 + $0x50] sm:$0xff] }
 0xe76   : > { %v3711_v31 = vmul.f32 %v5471_v11, %v3702_v50 }
 0xe77   : > { %v3695_v1 = vpop.xlane.xlu0 %3694 }
 0xe78   : > { %v3703_v48 = vadd.f32 %v3695_v1, %v3687_v10  ;;  %v3715_v39 = vsel %vm11382_vm10, %v3711_v31, 0.0  ;;  %vm11387_vm10 = vmmov %vm11383_vm5 }
 0xe7a   : > { %v3712_v5 = vmul.f32 %v5472_v60, %v3703_v48 }
 0xe7b   : > { %v3682_v51 = vpop.xlane.xlu0 %3681  ;;  %v3685_v8 = vpop.xlane.xlu1 %3684 }
 0xe7c   : > { %v3688_v18 = vmul.f32 0.00390625, %v3682_v51  ;;  %v3689_v56 = vmul.f32 0.00390625, %v3685_v8  ;;  %v3716_v13 = vsel %vm11381_vm13, %v3712_v5, 0.0  ;;  %vm11386_vm13 = vmmov %vm11383_vm5  ;;  %v5481_v51 = vld [vmem:[%s11053_s8 + $0x48] sm:$0xff]  ;;  %v5480_v8 = vld [vmem:[%s11053_s8 + $0x40] sm:$0xff] }
 0xe7d   : > { %v3717_v58 = vadd.f32 %v3716_v13, %v3715_v39 }
 0xe7f   : > { %v3698_v55 = vpop.xlane.xlu0 %3697  ;;  %v3701_v40 = vpop.xlane.xlu1 %3700 }
 0xe80   : > { %v3704_v27 = vadd.f32 %v3698_v55, %v3688_v18  ;;  %v3705_v23 = vadd.f32 %v3701_v40, %v3689_v56  ;;  %v5482_v55 = vld [vmem:[%s11053_s8 + $0x50] sm:$0xff] }
 0xe82   : > { %v3713_v30 = vmul.f32 %v5473_v0, %v3704_v27  ;;  %v3714_v12 = vmul.f32 %v5474_v59, %v3705_v23  ;;  %v5483_v0 = vld [vmem:[%s11053_s8 + $0x58] sm:$0xff] }
 0xe84   : > { %v3718_v21 = vsel %vm11383_vm5, %v3713_v30, 0.0  ;;  %v3720_v17 = vsel %vm11384_vm11, %v3714_v12, 0.0  ;;  %vm11388_vm11 = vcmp.lt.s32.totalorder %v8119_v19, 16 }
 0xe85   : > { %v3719_v25 = vadd.f32 %v3718_v21, %v3717_v58 }
 0xe87   : > { %v3721_v38 = vadd.f32 %v3720_v17, %v3719_v25 }
 0xe89   : > { %v3722_v34 = vrot.slane %v3721_v38, 4 }
 0xe8b   : > { %v3723_v57 = vadd.f32 %v3722_v34, %v3721_v38 }
 0xe8d   : > { %v3724_v29 = vrot.slane %v3723_v57, 2 }
 0xe8f   : > { %v3725_v54 = vadd.f32 %v3724_v29, %v3723_v57 }
 0xe91   : > { %v3726_v20 = vrot.slane %v3725_v54, 1 }
 0xe93   : > { %v3727_v49 = vadd.f32 %v3726_v20, %v3725_v54 }
 0xe95   : > { %v3730_v2 = vadd.f32 %v5475_v44, %v3727_v49 }
 0xe97   : > { %v3731_v63 = vmax.f32 %v3730_v2, 0.0 }
 0xe99   : > { %v3740_v62 = vrot.slane %v3731_v63, %v8850_v4 }
 0xe9b   : > { %v3742_v10 = vmul.f32 %v5477_v52, %v3740_v62  ;;  %v3741_v42 = vmul.f32 %v5476_v7, %v3740_v62  ;;  %v3744_v48 = vmul.f32 %v5479_v46, %v3740_v62  ;;  %v3743_v60 = vmul.f32 %v5478_v3, %v3740_v62 }
 0xe9d   : > { %v3748_v1 = vsel %vm11385_vm8, %v3742_v10, 0.0  ;;  %v3745_v9 = vsel %vm11386_vm13, %v3741_v42, 0.0  ;;  %v3754_v50 = vsel %vm11387_vm10, %v3744_v48, 0.0  ;;  %v3751_v11 = vsel %vm11383_vm5, %v3743_v60, 0.0  ;;  %vm11389_vm8 = vmmov %vm11388_vm11 }
 0xe9e   : > { %3749 = vadd.xlane.f32.xlu1 %v3748_v1  ;;  %3746 = vadd.xlane.f32.xlu0 %v3745_v9  ;;  %vm11390_vm13 = vmmov %vm11389_vm8 }
 0xe9f   : > { %vm11391_vm10 = vmmov %vm11389_vm8 }
 0xea0   : > { %vm11392_vm5 = vmmov %vm11389_vm8 }
 0xea2   : > { %3755 = vadd.xlane.f32.xlu1 %v3754_v50  ;;  %3752 = vadd.xlane.f32.xlu0 %v3751_v11 }
 0xf2b   : > { %v3750_v5 = vpop.xlane.xlu1 %3749  ;;  %v3747_v31 = vpop.xlane.xlu0 %3746 }
 0xf2c   : > { %v3763_v18 = vadd.f32 %v5481_v51, %v3750_v5  ;;  %v3762_v56 = vadd.f32 %v5480_v8, %v3747_v31  ;;  %v5499_v51 = vld [vmem:[%s11047_s2 + $0x78] sm:$0xff]  ;;  %v5498_v8 = vld [vmem:[%s11047_s2 + $0x70] sm:$0xff] }
 0xf2e   : > { %v3767_v59 = vsub.f32 0.0, %v3763_v18  ;;  %v3766_v40 = vsub.f32 0.0, %v3762_v56 }
 0xf2f   : > { %v3756_v13 = vpop.xlane.xlu1 %3755  ;;  %v3753_v27 = vpop.xlane.xlu0 %3752 }
 0xf30   : > { %v3772_v23 = vmul.f32 1.442695, %v3767_v59  ;;  %v3770_v39 = vmul.f32 1.442695, %v3766_v40  ;;  %v3765_v30 = vadd.f32 %v5483_v0, %v3756_v13  ;;  %v3764_v12 = vadd.f32 %v5482_v55, %v3753_v27 }
 0xf32   : > { %7913 = vpow2.f32 %v3772_v23  ;;  %v3769_v58 = vsub.f32 0.0, %v3765_v30  ;;  %v3768_v21 = vsub.f32 0.0, %v3764_v12 }
 0xf33   : > { %7915 = vpow2.f32 %v3770_v39 }
 0xf34   : > { %v3776_v25 = vmul.f32 1.442695, %v3769_v58  ;;  %v3774_v17 = vmul.f32 1.442695, %v3768_v21 }
 0xf36   : > { %7917 = vpow2.f32 %v3776_v25 }
 0xf37   : > { %7919 = vpow2.f32 %v3774_v17 }
 0xf3c   : > { %v7914_v38 = vpop.eup %7913 }
 0xf3d   : > { %v7916_v34 = vpop.eup %7915  ;;  %v3779_v57 = vadd.f32 1.0, %v7914_v38 }
 0xf3e   : > { %v3778_v29 = vadd.f32 1.0, %v7916_v34 }
 0xf3f   : > { %7921 = vrcp.f32 %v3779_v57 }
 0xf40   : > { %v7918_v54 = vpop.eup %7917  ;;  %7923 = vrcp.f32 %v3778_v29 }
 0xf41   : > { %v7920_v20 = vpop.eup %7919  ;;  %v3781_v44 = vadd.f32 1.0, %v7918_v54 }
 0xf42   : > { %v3780_v49 = vadd.f32 1.0, %v7920_v20 }
 0xf43   : > { %7925 = vrcp.f32 %v3781_v44 }
 0xf44   : > { %7927 = vrcp.f32 %v3780_v49 }
 0xf49   : > { %v7922_v2 = vpop.eup %7921 }
 0xf4a   : > { %v7924_v63 = vpop.eup %7923  ;;  %3797 = vperm.xlu1 %6760, %v7922_v2  }
 0xf4b   : > { %3792 = vperm.xlu0 %6759, %v7924_v63  }
 0xf4d   : > { %v7926_v52 = vpop.eup %7925 }
 0xf4e   : > { %v7928_v7 = vpop.eup %7927 }
 0xf4f   : > { %3807 = vperm.xlu0 %6759, %v7926_v52   ;;  %3802 = vperm.xlu1 %6760, %v7928_v7  }
 0xfc9   : > { %v3798_v62 = vpop.permute.xlu1 %3797 }
 0xfca   : > { %v10314_v46 = vmul.f32 %v3798_v62, %v10234_v35  ;;  %v10317_v3 = vmul.f32 %v3798_v62, %v10237_v16  ;;  %v3793_v10 = vpop.permute.xlu0 %3792 }
 0xfcb   : > { %v10320_v42 = vmul.f32 %v3793_v10, %v10226_v15  ;;  %v10323_v1 = vmul.f32 %v3793_v10, %v10229_v33 }
 0xfcd   : > { %v7566_v9 = vpack.i.bf16 %v10317_v3, %v10323_v1  ;;  %v7561_v48 = vpack.i.bf16 %v10314_v46, %v10320_v42 }
 0xfce   : > { %v3803_v60 = vpop.permute.xlu1 %3802  ;;  %v3808_v50 = vpop.permute.xlu0 %3807 }
 0xfcf   : > { %v10330_v35 = vmul.f32 %v3803_v60, %v10244_v32  ;;  %v10333_v16 = vmul.f32 %v3803_v60, %v10247_v45  ;;  %v10336_v15 = vmul.f32 %v3808_v50, %v10252_v37  ;;  %v10339_v33 = vmul.f32 %v3808_v50, %v10255_v28  ;;  %7567 = vrot.lane.b32.xlu0 %v7566_v9, %s7961_s15  ;;  %v5485_v45 = vld [vmem:[%s11046_s1 + $0x128] sm:$0xff]  ;;  %v5496_v28 = vld [vmem:[%s11047_s2 + $0x60] sm:$0xff] }
 0xfd0   : > { %7562 = vrot.lane.b32.xlu1 %v7561_v48, %s7961_s15  ;;  %4188 = vmatprep.mubr.f32.mxu0 %v5485_v45  ;;  %v5497_v37 = vld [vmem:[%s11047_s2 + $0x68] sm:$0xff] }
 0xfd1   : > { %v7576_v11 = vpack.i.bf16 %v10339_v33, %v10333_v16  ;;  %v7571_v32 = vpack.i.bf16 %v10336_v15, %v10330_v35 }
 0xfd3   : > { %7577 = vrot.lane.b32.xlu0 %v7576_v11, %s7961_s15 }
 0xfd4   : > { %7572 = vrot.lane.b32.xlu1 %v7571_v32, %s7961_s15 }
 0xfd7   : > { %7587 = vrot.lane.b32.xlu0 %v7566_v9, %s7962_s16 }
 0xfd8   : > { %7582 = vrot.lane.b32.xlu1 %v7561_v48, %s7962_s16 }
 0xfdb   : > { %7597 = vrot.lane.b32.xlu0 %v7576_v11, %s7962_s16 }
 0xfdc   : > { %7592 = vrot.lane.b32.xlu1 %v7571_v32, %s7962_s16 }
 0xfdf   : > { %7607 = vrot.lane.b32.xlu0 %v7566_v9, %s7963_s17 }
 0xfe0   : > { %7602 = vrot.lane.b32.xlu1 %v7561_v48, %s7963_s17 }
 0xfe3   : > { %7617 = vrot.lane.b32.xlu0 %v7576_v11, %s7963_s17 }
 0xfe4   : > { %7612 = vrot.lane.b32.xlu1 %v7571_v32, %s7963_s17 }
 0xfe7   : > { %7627 = vrot.lane.b32.xlu0 %v7566_v9, %s7964_s18 }
 0xfe8   : > { %7622 = vrot.lane.b32.xlu1 %v7561_v48, %s7964_s18 }
 0xfeb   : > { %7637 = vrot.lane.b32.xlu0 %v7576_v11, %s7964_s18 }
 0xfec   : > { %7632 = vrot.lane.b32.xlu1 %v7571_v32, %s7964_s18 }
 0xfef   : > { %7647 = vrot.lane.b32.xlu0 %v7566_v9, %s7965_s19 }
 0xff0   : > { %7642 = vrot.lane.b32.xlu1 %v7561_v48, %s7965_s19 }
 0xff3   : > { %7657 = vrot.lane.b32.xlu0 %v7576_v11, %s7965_s19 }
 0xff4   : > { %7652 = vrot.lane.b32.xlu1 %v7571_v32, %s7965_s19 }
 0xff7   : > { %7667 = vrot.lane.b32.xlu0 %v7566_v9, %s7966_s20 }
 0xff8   : > { %7662 = vrot.lane.b32.xlu1 %v7561_v48, %s7966_s20 }
 0xffb   : > { %7677 = vrot.lane.b32.xlu0 %v7576_v11, %s7966_s20 }
 0xffc   : > { %7672 = vrot.lane.b32.xlu1 %v7571_v32, %s7966_s20 }
 0xfff   : > { %7687 = vrot.lane.b32.xlu0 %v7566_v9, %s7967_s21 }
0x1000   : > { %7682 = vrot.lane.b32.xlu1 %v7561_v48, %s7967_s21 }
0x1003   : > { %7697 = vrot.lane.b32.xlu0 %v7576_v11, %s7967_s21 }
0x1004   : > { %7692 = vrot.lane.b32.xlu1 %v7571_v32, %s7967_s21 }
0x1007   : > { %7707 = vrot.lane.b32.xlu0 %v7566_v9, %s7968_s22 }
0x1008   : > { %7702 = vrot.lane.b32.xlu1 %v7561_v48, %s7968_s22 }
0x100b   : > { %7717 = vrot.lane.b32.xlu0 %v7576_v11, %s7968_s22 }
0x100c   : > { %7712 = vrot.lane.b32.xlu1 %v7571_v32, %s7968_s22 }
0x100f   : > { %4099 = vperm.xlu0 %6759, %v5497_v37  }
0x1010   : > { %4094 = vperm.xlu1 %6760, %v5496_v28  }
0x1013   : > { %4109 = vperm.xlu0 %6759, %v5499_v51  }
0x1014   : > { %4104 = vperm.xlu1 %6760, %v5498_v8  }
0x1041   : > { %v7568_v5 = vpop.permute.xlu0 %7567 }
0x1042   : > { %v7563_v31 = vpop.permute.xlu1 %7562  ;;  %v7570_v18 = vunpack.i.h.bf16 %v7568_v5  ;;  %v7569_v56 = vunpack.i.l.bf16 %v7568_v5 }
0x1043   : > { %v7565_v0 = vunpack.i.h.bf16 %v7563_v31  ;;  %v7564_v55 = vunpack.i.l.bf16 %v7563_v31 }
0x1045   : > { %v3853_v59 = vsel %vm416_vm2, %v7565_v0, %v7570_v18  ;;  %v3857_v40 = vsel %vm416_vm2, %v7570_v18, %v7565_v0  ;;  %v3852_v13 = vsel %vm416_vm2, %v7564_v55, %v7569_v56  ;;  %v3856_v27 = vsel %vm416_vm2, %v7569_v56, %v7564_v55  ;;  %v7578_v23 = vpop.permute.xlu0 %7577 }
0x1046   : > { %v6253_v39 = vpack.c.bf16 %v3853_v59, %v3852_v13  ;;  %v6256_v30 = vpack.c.bf16 %v3857_v40, %v3856_v27  ;;  %v7573_v12 = vpop.permute.xlu1 %7572  ;;  %v7580_v58 = vunpack.i.h.bf16 %v7578_v23  ;;  %v7579_v21 = vunpack.i.l.bf16 %v7578_v23 }
0x1047   : > { %v7575_v25 = vunpack.i.h.bf16 %v7573_v12  ;;  %v7574_v17 = vunpack.i.l.bf16 %v7573_v12 }
0x1048   : > { %6255 = vmatprep.subr.msk.bf16.mxu0 %vm8156_vm6, %v6253_v39 }
0x1049   : > { %v3855_v38 = vsel %vm416_vm2, %v7575_v25, %v7580_v58  ;;  %v3859_v34 = vsel %vm416_vm2, %v7580_v58, %v7575_v25  ;;  %v3854_v57 = vsel %vm416_vm2, %v7574_v17, %v7579_v21  ;;  %v3858_v29 = vsel %vm416_vm2, %v7579_v21, %v7574_v17  ;;  %6258 = vmatpush1.bf16.msk.msra.mxu0 %vm8164_vm7, %v6256_v30  ;;  %v7588_v54 = vpop.permute.xlu0 %7587 }
0x104a   : > { %v6259_v20 = vpack.c.bf16 %v3855_v38, %v3854_v57  ;;  %v6262_v44 = vpack.c.bf16 %v3859_v34, %v3858_v29  ;;  %v7583_v49 = vpop.permute.xlu1 %7582  ;;  %v7590_v2 = vunpack.i.h.bf16 %v7588_v54  ;;  %v7589_v63 = vunpack.i.l.bf16 %v7588_v54 }
0x104b   : > { %v7585_v52 = vunpack.i.h.bf16 %v7583_v49  ;;  %v7584_v7 = vunpack.i.l.bf16 %v7583_v49 }
0x104c   : > { %6261 = vmatprep.subr.msk.bf16.mxu0 %vm8156_vm6, %v6259_v20 }
0x104d   : > { %v3889_v62 = vsel %vm11388_vm11, %v7590_v2, %v7585_v52  ;;  %v3888_v10 = vsel %vm11389_vm8, %v7589_v63, %v7584_v7  ;;  %6264 = vmatpush1.bf16.msk.msra.mxu0 %vm8164_vm7, %v6262_v44  ;;  %v7598_v9 = vpop.permute.xlu0 %7597  ;;  %v3884_v48 = vsel %vm11390_vm13, %v7584_v7, %v7589_v63  ;;  %v3885_v60 = vsel %vm11391_vm10, %v7585_v52, %v7590_v2  ;;  %vm11393_vm11 = vmmov %vm11392_vm5 }
0x104e   : > { %v6267_v50 = vpack.c.bf16 %v3889_v62, %v3888_v10  ;;  %v7593_v11 = vpop.permute.xlu1 %7592  ;;  %v7600_v32 = vunpack.i.h.bf16 %v7598_v9  ;;  %v7599_v45 = vunpack.i.l.bf16 %v7598_v9  ;;  %v6265_v37 = vpack.c.bf16 %v3885_v60, %v3884_v48  ;;  %vm11394_vm8 = vmmov %vm11392_vm5 }
0x104f   : > { %v7595_v28 = vunpack.i.h.bf16 %v7593_v11  ;;  %v7594_v51 = vunpack.i.l.bf16 %v7593_v11  ;;  %vm11395_vm13 = vmmov %vm11392_vm5  ;;  %vm11396_vm10 = vcmp.lt.s32.totalorder %v8119_v19, 15 }
0x1050   : > { %6266 = vmatprep.subr.bf16.mxu0 %v6265_v37 }
0x1051   : > { %v3891_v8 = vsel %vm11392_vm5, %v7600_v32, %v7595_v28  ;;  %v3890_v5 = vsel %vm11393_vm11, %v7599_v45, %v7594_v51  ;;  %6269 = vmatpush1.bf16.msk.msra.mxu0 %vm8200_vm9, %v6267_v50  ;;  %v7608_v31 = vpop.permute.xlu0 %7607  ;;  %v3886_v18 = vsel %vm11394_vm8, %v7594_v51, %v7599_v45  ;;  %v3887_v56 = vsel %vm11395_vm13, %v7595_v28, %v7600_v32  ;;  %vm11397_vm5 = vmmov %vm11396_vm10 }
0x1052   : > { %v6272_v0 = vpack.c.bf16 %v3891_v8, %v3890_v5  ;;  %v7603_v55 = vpop.permute.xlu1 %7602  ;;  %v7610_v59 = vunpack.i.h.bf16 %v7608_v31  ;;  %v7609_v40 = vunpack.i.l.bf16 %v7608_v31  ;;  %v6270_v13 = vpack.c.bf16 %v3887_v56, %v3886_v18  ;;  %vm11398_vm11 = vmmov %vm11397_vm5 }
0x1053   : > { %v7605_v27 = vunpack.i.h.bf16 %v7603_v55  ;;  %v7604_v23 = vunpack.i.l.bf16 %v7603_v55  ;;  %vm11399_vm8 = vmmov %vm11397_vm5 }
0x1054   : > { %6271 = vmatprep.subr.bf16.mxu0 %v6270_v13  ;;  %vm11400_vm13 = vmmov %vm11397_vm5 }
0x1055   : > { %v3917_v39 = vsel %vm11396_vm10, %v7605_v27, %v7610_v59  ;;  %v3921_v30 = vsel %vm11397_vm5, %v7610_v59, %v7605_v27  ;;  %v3916_v12 = vsel %vm11398_vm11, %v7604_v23, %v7609_v40  ;;  %v3920_v58 = vsel %vm11399_vm8, %v7609_v40, %v7604_v23  ;;  %6274 = vmatpush1.bf16.msk.msra.mxu0 %vm8200_vm9, %v6272_v0  ;;  %v7618_v21 = vpop.permute.xlu0 %7617  ;;  %vm11401_vm10 = vmmov %vm11397_vm5 }
0x1056   : > { %v6275_v25 = vpack.c.bf16 %v3917_v39, %v3916_v12  ;;  %v6278_v17 = vpack.c.bf16 %v3921_v30, %v3920_v58  ;;  %v7613_v38 = vpop.permute.xlu1 %7612  ;;  %v7620_v34 = vunpack.i.h.bf16 %v7618_v21  ;;  %v7619_v57 = vunpack.i.l.bf16 %v7618_v21  ;;  %vm11402_vm11 = vmmov %vm11397_vm5 }
0x1057   : > { %v7615_v29 = vunpack.i.h.bf16 %v7613_v38  ;;  %v7614_v54 = vunpack.i.l.bf16 %v7613_v38  ;;  %vm11403_vm8 = vcmp.lt.s32.totalorder %v8119_v19, 1  ;;  %v6299_v30 = vpack.c.bf16 %v10317_v3, %v10323_v1 }
0x1058   : > { %6277 = vmatprep.subr.msk.bf16.mxu0 %vm8229_vm12, %v6275_v25 }
0x1059   : > { %v3919_v20 = vsel %vm11400_vm13, %v7615_v29, %v7620_v34  ;;  %v3923_v44 = vsel %vm11401_vm10, %v7620_v34, %v7615_v29  ;;  %v3918_v49 = vsel %vm11397_vm5, %v7614_v54, %v7619_v57  ;;  %v3922_v2 = vsel %vm11402_vm11, %v7619_v57, %v7614_v54  ;;  %6280 = vmatpush1.bf16.msk.msra.mxu0 %vm8250_vm15, %v6278_v17  ;;  %v7628_v63 = vpop.permute.xlu0 %7627  ;;  %vm11404_vm13 = vmmov %vm11403_vm8 }
0x105a   : > { %v6281_v52 = vpack.c.bf16 %v3919_v20, %v3918_v49  ;;  %v6284_v7 = vpack.c.bf16 %v3923_v44, %v3922_v2  ;;  %v7623_v62 = vpop.permute.xlu1 %7622  ;;  %v7630_v10 = vunpack.i.h.bf16 %v7628_v63  ;;  %v7629_v9 = vunpack.i.l.bf16 %v7628_v63  ;;  %vm11405_vm10 = vmmov %vm11403_vm8 }
0x105b   : > { %v7625_v48 = vunpack.i.h.bf16 %v7623_v62  ;;  %v7624_v60 = vunpack.i.l.bf16 %v7623_v62  ;;  %vm11406_vm5 = vmmov %vm11403_vm8  ;;  %v6301_v34 = vpack.c.bf16 %v10314_v46, %v10320_v42  ;;  %v6303_v54 = vpack.c.bf16 %v10339_v33, %v10333_v16 }
0x105c   : > { %6283 = vmatprep.subr.msk.bf16.mxu0 %vm8229_vm12, %v6281_v52  ;;  %vm11407_vm11 = vmmov %vm11406_vm5 }
0x105d   : > { %v3949_v50 = vsel %vm11403_vm8, %v7625_v48, %v7630_v10  ;;  %v3953_v11 = vsel %vm11404_vm13, %v7630_v10, %v7625_v48  ;;  %v3948_v32 = vsel %vm11405_vm10, %v7624_v60, %v7629_v9  ;;  %v3952_v45 = vsel %vm11406_vm5, %v7629_v9, %v7624_v60  ;;  %6286 = vmatpush1.bf16.msk.msra.mxu0 %vm8250_vm15, %v6284_v7  ;;  %v7638_v37 = vpop.permute.xlu0 %7637  ;;  %vm11408_vm8 = vmmov %vm11406_vm5 }
0x105e   : > { %v6287_v28 = vpack.c.bf16 %v3949_v50, %v3948_v32  ;;  %v6290_v51 = vpack.c.bf16 %v3953_v11, %v3952_v45  ;;  %v7633_v8 = vpop.permute.xlu1 %7632  ;;  %v7640_v5 = vunpack.i.h.bf16 %v7638_v37  ;;  %v7639_v31 = vunpack.i.l.bf16 %v7638_v37  ;;  %vm11409_vm13 = vmmov %vm11406_vm5 }
0x105f   : > { %v7635_v18 = vunpack.i.h.bf16 %v7633_v8  ;;  %v7634_v56 = vunpack.i.l.bf16 %v7633_v8  ;;  %vm11410_vm10 = vmmov %vm11406_vm5  ;;  %vm11411_vm5 = vcmp.lt.s32.totalorder %v8119_v19, 127  ;;  %v6305_v9 = vpack.c.bf16 %v10336_v15, %v10330_v35 }
0x1060   : > { %6289 = vmatprep.subr.msk.bf16.mxu0 %vm8156_vm6, %v6287_v28 }
0x1061   : > { %v3951_v0 = vsel %vm11407_vm11, %v7635_v18, %v7640_v5  ;;  %v3955_v55 = vsel %vm11408_vm8, %v7640_v5, %v7635_v18  ;;  %v3950_v59 = vsel %vm11409_vm13, %v7634_v56, %v7639_v31  ;;  %v3954_v40 = vsel %vm11410_vm10, %v7639_v31, %v7634_v56  ;;  %6292 = vmatpush1.bf16.msk.msra.mxu0 %vm8275_vm0, %v6290_v51  ;;  %v7648_v13 = vpop.permute.xlu0 %7647  ;;  %vm11412_vm11 = vmmov %vm11411_vm5 }
0x1062   : > { %v6293_v27 = vpack.c.bf16 %v3951_v0, %v3950_v59  ;;  %v6296_v23 = vpack.c.bf16 %v3955_v55, %v3954_v40  ;;  %v7643_v39 = vpop.permute.xlu1 %7642  ;;  %v7650_v21 = vunpack.i.h.bf16 %v7648_v13  ;;  %v7649_v25 = vunpack.i.l.bf16 %v7648_v13  ;;  %vm11413_vm8 = vmmov %vm11411_vm5 }
0x1063   : > { %v7645_v12 = vunpack.i.h.bf16 %v7643_v39  ;;  %v7644_v58 = vunpack.i.l.bf16 %v7643_v39  ;;  %vm11414_vm13 = vmmov %vm11411_vm5 }
0x1064   : > { %6295 = vmatprep.subr.msk.bf16.mxu0 %vm8156_vm6, %v6293_v27  ;;  %vm11415_vm10 = vmmov %vm11411_vm5 }
0x1065   : > { %6298 = vmatpush1.bf16.msk.msra.mxu0 %vm8275_vm0, %v6296_v23  ;;  %v7658_v17 = vpop.permute.xlu0 %7657  ;;  %v3985_v57 = vsel %vm11411_vm5, %v7650_v21, %v7645_v12  ;;  %v3984_v29 = vsel %vm11412_vm11, %v7649_v25, %v7644_v58  ;;  %v3981_v7 = vsel %vm11413_vm8, %v7645_v12, %v7650_v21  ;;  %v3980_v62 = vsel %vm11414_vm13, %v7644_v58, %v7649_v25  ;;  %vm11416_vm11 = vmmov %vm11411_vm5 }
0x1066   : > { %v7653_v38 = vpop.permute.xlu1 %7652  ;;  %6300 = vmatprep.subr.bf16.mxu0 %v6299_v30  ;;  %v7660_v49 = vunpack.i.h.bf16 %v7658_v17  ;;  %v7659_v2 = vunpack.i.l.bf16 %v7658_v17  ;;  %v6307_v10 = vpack.c.bf16 %v3985_v57, %v3984_v29  ;;  %v6310_v51 = vpack.c.bf16 %v3981_v7, %v3980_v62  ;;  %vm11417_vm8 = vmmov %vm11411_vm5 }
0x1067   : > { %v7655_v20 = vunpack.i.h.bf16 %v7653_v38  ;;  %v7654_v44 = vunpack.i.l.bf16 %v7653_v38  ;;  %vm11418_vm13 = vcmp.lt.s32.totalorder %v8119_v19, 113 }
0x1069   : > { %6302 = vmatpush1.bf16.msra.mxu0 %v6301_v34  ;;  %v7668_v63 = vpop.permute.xlu0 %7667  ;;  %v3987_v32 = vsel %vm11415_vm10, %v7660_v49, %v7655_v20  ;;  %v3986_v45 = vsel %vm11411_vm5, %v7659_v2, %v7654_v44  ;;  %v3983_v8 = vsel %vm11416_vm11, %v7655_v20, %v7660_v49  ;;  %v3982_v5 = vsel %vm11417_vm8, %v7654_v44, %v7659_v2  ;;  %vm11419_vm10 = vmmov %vm11418_vm13 }
0x106a   : > { %v7663_v52 = vpop.permute.xlu1 %7662  ;;  %6304 = vmatprep.subr.bf16.mxu0 %v6303_v54  ;;  %v7670_v50 = vunpack.i.h.bf16 %v7668_v63  ;;  %v7669_v11 = vunpack.i.l.bf16 %v7668_v63  ;;  %v6313_v31 = vpack.c.bf16 %v3987_v32, %v3986_v45  ;;  %v6316_v23 = vpack.c.bf16 %v3983_v8, %v3982_v5  ;;  %vm11420_vm5 = vmmov %vm11419_vm10 }
0x106b   : > { %v7665_v48 = vunpack.i.h.bf16 %v7663_v52  ;;  %v7664_v60 = vunpack.i.l.bf16 %v7663_v52  ;;  %vm11421_vm11 = vmmov %vm11420_vm5 }
0x106c   : > { %vm11422_vm8 = vmmov %vm11420_vm5 }
0x106d   : > { %6306 = vmatpush1.bf16.msra.mxu0 %v6305_v9  ;;  %v7678_v37 = vpop.permute.xlu0 %7677  ;;  %v4017_v18 = vsel %vm11418_vm13, %v7670_v50, %v7665_v48  ;;  %v4016_v56 = vsel %vm11419_vm10, %v7669_v11, %v7664_v60  ;;  %v4013_v39 = vsel %vm11420_vm5, %v7665_v48, %v7670_v50  ;;  %v4012_v30 = vsel %vm11421_vm11, %v7664_v60, %v7669_v11  ;;  %vm11423_vm13 = vmmov %vm11420_vm5 }
0x106e   : > { %v7673_v28 = vpop.permute.xlu1 %7672  ;;  %6309 = vmatprep.subr.msk.bf16.mxu0 %vm8229_vm12, %v6307_v10  ;;  %v7680_v59 = vunpack.i.h.bf16 %v7678_v37  ;;  %v7679_v40 = vunpack.i.l.bf16 %v7678_v37  ;;  %v6319_v12 = vpack.c.bf16 %v4017_v18, %v4016_v56  ;;  %v6322_v54 = vpack.c.bf16 %v4013_v39, %v4012_v30  ;;  %vm11424_vm10 = vmmov %vm11420_vm5 }
0x106f   : > { %v7675_v0 = vunpack.i.h.bf16 %v7673_v28  ;;  %v7674_v55 = vunpack.i.l.bf16 %v7673_v28  ;;  %vm11425_vm11 = vcmp.lt.s32.totalorder %v8119_v19, 112 }
0x1071   : > { %6312 = vmatpush1.bf16.msk.msra.mxu0 %vm8319_vm14, %v6310_v51  ;;  %v7688_v13 = vpop.permute.xlu0 %7687  ;;  %v4019_v38 = vsel %vm11422_vm8, %v7680_v59, %v7675_v0  ;;  %v4018_v34 = vsel %vm11423_vm13, %v7679_v40, %v7674_v55  ;;  %v4015_v20 = vsel %vm11424_vm10, %v7675_v0, %v7680_v59  ;;  %v4014_v44 = vsel %vm11420_vm5, %v7674_v55, %v7679_v40  ;;  %vm11426_vm8 = vmmov %vm11425_vm11 }
0x1072   : > { %v7683_v27 = vpop.permute.xlu1 %7682  ;;  %6315 = vmatprep.subr.msk.bf16.mxu0 %vm8229_vm12, %v6313_v31  ;;  %v7690_v25 = vunpack.i.h.bf16 %v7688_v13  ;;  %v7689_v17 = vunpack.i.l.bf16 %v7688_v13  ;;  %v6325_v49 = vpack.c.bf16 %v4019_v38, %v4018_v34  ;;  %v6328_v60 = vpack.c.bf16 %v4015_v20, %v4014_v44  ;;  %vm11427_vm13 = vmmov %vm11426_vm8  ;;  %v5484_v34 = vld [vmem:[%s11046_s1 + $0x120] sm:$0xff] }
0x1073   : > { %v7685_v58 = vunpack.i.h.bf16 %v7683_v27  ;;  %v7684_v21 = vunpack.i.l.bf16 %v7683_v27  ;;  %vm11428_vm10 = vmmov %vm11426_vm8 }
0x1074   : > { %vm11429_vm5 = vmmov %vm11426_vm8 }
0x1075   : > { %6318 = vmatpush1.bf16.msk.msra.mxu0 %vm8319_vm14, %v6316_v23  ;;  %v7698_v57 = vpop.permute.xlu0 %7697  ;;  %v4049_v2 = vsel %vm11425_vm11, %v7690_v25, %v7685_v58  ;;  %v4048_v63 = vsel %vm11426_vm8, %v7689_v17, %v7684_v21  ;;  %v4045_v50 = vsel %vm11427_vm13, %v7685_v58, %v7690_v25  ;;  %v4044_v11 = vsel %vm11428_vm10, %v7684_v21, %v7689_v17  ;;  %vm11430_vm11 = vmmov %vm11429_vm5 }
0x1076   : > { %v7693_v29 = vpop.permute.xlu1 %7692  ;;  %6321 = vmatprep.subr.msk.bf16.mxu0 %vm8355_vm1, %v6319_v12  ;;  %v7700_v62 = vunpack.i.h.bf16 %v7698_v57  ;;  %v7699_v10 = vunpack.i.l.bf16 %v7698_v57  ;;  %v6331_v32 = vpack.c.bf16 %v4049_v2, %v4048_v63  ;;  %v6334_v56 = vpack.c.bf16 %v4045_v50, %v4044_v11  ;;  %vm11431_vm8 = vmmov %vm11429_vm5  ;;  %v5488_v57 = vld [vmem:[%s11046_s1 + $0x140] sm:$0xff]  ;;  %v5491_v2 = vld [vmem:[%s11046_s1 + $0x158] sm:$0xff] }
0x1077   : > { %v7695_v52 = vunpack.i.h.bf16 %v7693_v29  ;;  %v7694_v7 = vunpack.i.l.bf16 %v7693_v29  ;;  %vm11432_vm13 = vmmov %vm11429_vm5  ;;  %vm11433_vm10 = vcmp.lt.s32.totalorder %v8119_v19, 111 }
0x1079   : > { %6324 = vmatpush1.bf16.msk.msra.mxu0 %vm8275_vm0, %v6322_v54  ;;  %v7708_v9 = vpop.permute.xlu0 %7707  ;;  %v4051_v8 = vsel %vm11429_vm5, %v7700_v62, %v7695_v52  ;;  %v4050_v5 = vsel %vm11430_vm11, %v7699_v10, %v7694_v7  ;;  %v4047_v0 = vsel %vm11431_vm8, %v7695_v52, %v7700_v62  ;;  %v4046_v55 = vsel %vm11432_vm13, %v7694_v7, %v7699_v10  ;;  %vm11434_vm5 = vmmov %vm11433_vm10  ;;  %v5490_v52 = vld [vmem:[%s11046_s1 + $0x150] sm:$0xff]  ;;  %v5493_v62 = vld [vmem:[%s11046_s1 + $0x168] sm:$0xff] }
0x107a   : > { %v7703_v48 = vpop.permute.xlu1 %7702  ;;  %6327 = vmatprep.subr.msk.bf16.mxu0 %vm8355_vm1, %v6325_v49  ;;  %v7710_v28 = vunpack.i.h.bf16 %v7708_v9  ;;  %v7709_v51 = vunpack.i.l.bf16 %v7708_v9  ;;  %v6336_v59 = vpack.c.bf16 %v4051_v8, %v4050_v5  ;;  %v6339_v12 = vpack.c.bf16 %v4047_v0, %v4046_v55  ;;  %vm11435_vm11 = vmmov %vm11434_vm5  ;;  %v5487_v49 = vld [vmem:[%s11046_s1 + $0x138] sm:$0xff]  ;;  %v5494_v7 = vld [vmem:[%s11046_s1 + $0x170] sm:$0xff] }
0x107b   : > { %v7705_v45 = vunpack.i.h.bf16 %v7703_v48  ;;  %v7704_v37 = vunpack.i.l.bf16 %v7703_v48  ;;  %vm11436_vm8 = vmmov %vm11434_vm5  ;;  %v5486_v10 = vld [vmem:[%s11046_s1 + $0x130] sm:$0xff]  ;;  %v5489_v9 = vld [vmem:[%s11046_s1 + $0x148] sm:$0xff] }
0x107c   : > { %vm11437_vm13 = vmmov %vm11434_vm5  ;;  %v5492_v48 = vld [vmem:[%s11046_s1 + $0x160] sm:$0xff] }
0x107d   : > { %6330 = vmatpush1.bf16.msk.msra.mxu0 %vm8275_vm0, %v6328_v60  ;;  %v7718_v18 = vpop.permute.xlu0 %7717  ;;  %v4081_v40 = vsel %vm11433_vm10, %v7710_v28, %v7705_v45  ;;  %v4080_v13 = vsel %vm11434_vm5, %v7709_v51, %v7704_v37  ;;  %v4077_v58 = vsel %vm11435_vm11, %v7705_v45, %v7710_v28  ;;  %v4076_v21 = vsel %vm11436_vm8, %v7704_v37, %v7709_v51  ;;  %vm11438_vm10 = vmmov %vm11434_vm5  ;;  %v5495_v60 = vld [vmem:[%s11046_s1 + $0x178] sm:$0xff] }
0x107e   : > { %v7713_v31 = vpop.permute.xlu1 %7712  ;;  %6333 = vmatprep.subr.msk.bf16.mxu0 %vm8387_vm4, %v6331_v32  ;;  %v7720_v39 = vunpack.i.h.bf16 %v7718_v18  ;;  %v7719_v30 = vunpack.i.l.bf16 %v7718_v18  ;;  %v6341_v25 = vpack.c.bf16 %v4081_v40, %v4080_v13  ;;  %v6344_v29 = vpack.c.bf16 %v4077_v58, %v4076_v21  ;;  %vm11439_vm11 = vmmov %vm11434_vm5 }
0x107f   : > { %v7715_v27 = vunpack.i.h.bf16 %v7713_v31  ;;  %v7714_v23 = vunpack.i.l.bf16 %v7713_v31  ;;  %vm11440_vm8 = vcmask 261120  }
0x1081   : > { %6335 = vmatpush1.bf16.msra.mxu0 %v6334_v56  ;;  %v4083_v17 = vsel %vm11437_vm13, %v7720_v39, %v7715_v27  ;;  %v4082_v38 = vsel %vm11438_vm10, %v7719_v30, %v7714_v23  ;;  %v4079_v54 = vsel %vm11434_vm5, %v7715_v27, %v7720_v39  ;;  %v4078_v20 = vsel %vm11439_vm11, %v7714_v23, %v7719_v30  ;;  %vm11441_vm13 = vmmov %vm11440_vm8 }
0x1082   : > { %6338 = vmatprep.subr.msk.bf16.mxu0 %vm8387_vm4, %v6336_v59  ;;  %v6347_v44 = vpack.c.bf16 %v4083_v17, %v4082_v38  ;;  %v6350_v63 = vpack.c.bf16 %v4079_v54, %v4078_v20  ;;  %vm11442_vm10 = vmmov %vm11440_vm8 }
0x1083   : > { %vm11443_vm5 = vmmov %vm11440_vm8 }
0x1085   : > { %6340 = vmatpush1.bf16.msra.mxu0 %v6339_v12 }
0x1086   : > { %6343 = vmatprep.subr.msk.bf16.mxu0 %vm8413_vm3, %v6341_v25 }
0x1088   : > { %4189 = vmatmul.mubr.f32.vlgmr.msra.gmra.mrb[24].mxu0 %v5484_v34 }
0x1089   : > { %6346 = vmatpush1.bf16.msk.msra.mxu0 %vm8319_vm14, %v6344_v29  ;;  %4194 = vmatprep.mubr.f32.mxu0 %v5488_v57 }
0x108a   : > { %6349 = vmatprep.subr.msk.bf16.mxu0 %vm8413_vm3, %v6347_v44 }
0x108c   : > { %4195 = vmatmul.mubr.f32.gmra.mrb[26].mxu0 %v5487_v49 }
0x108d   : > { %6352 = vmatpush1.bf16.msk.msra.mxu0 %vm8319_vm14, %v6350_v63  ;;  %4200 = vmatprep.mubr.f32.mxu0 %v5491_v2 }
0x108e   : > { %v4100_v28 = vpop.permute.xlu0 %4099 }
0x108f   : > { %v4095_v50 = vpop.permute.xlu1 %4094 }
0x1090   : > { %4201 = vmatmul.mubr.f32.gmra.mrb[28].mxu0 %v5490_v52 }
0x1091   : > { %4206 = vmatprep.mubr.f32.mxu0 %v5494_v7 }
0x1092   : > { %v4110_v38 = vpop.permute.xlu0 %4109 }
0x1093   : > { %v4105_v55 = vpop.permute.xlu1 %4104 }
0x1094   : > { %4207 = vmatmul.mubr.f32.gmra.mrb[30].mxu0 %v5493_v62 }
0x1095   : > { %4277 = vmatprep.mubr.f32.mxu0 %v7970_v36 }
0x1098   : > { %5556 = vmatmul.mubr.msk.f32.vlgmr.msra.gmra.mrb[24].mxu0 %vm11440_vm8, %v5486_v10 }
0x1099   : > { %4283 = vmatprep.mubr.f32.mxu0 %v7970_v36 }
0x109c   : > { %5557 = vmatmul.mubr.msk.f32.gmra.mrb[26].mxu0 %vm11441_vm13, %v5489_v9 }
0x109d   : > { %4289 = vmatprep.mubr.f32.mxu0 %v7970_v36 }
0x10a0   : > { %5558 = vmatmul.mubr.msk.f32.gmra.mrb[28].mxu0 %vm11442_vm10, %v5492_v48 }
0x10a1   : > { %4295 = vmatprep.mubr.f32.mxu0 %v7970_v36 }
0x10a4   : > { %5559 = vmatmul.mubr.msk.f32.gmra.mrb[30].mxu0 %vm11443_vm5, %v5495_v60 }
0x116b   : > { %v4279_v11 = vpop.f32.mrb[24].mxu0 }
0x116c   : > { %v6501_v32 = vadd.f32 %v4279_v11, %v4095_v50  ;;  %v4281_v45 = vpop.f32.mrb[25].mxu0  ;;  %v5561_v11 = vld [vmem:[%s11048_s3 + $0x128] sm:$0xff] }
0x116d   : > { %v6502_v37 = vadd.f32 %v4281_v45, %v4095_v50  ;;  %4696 = vmatprep.mubr.f32.mxu1 %v5561_v11  ;;  %v5573_v45 = vld [vmem:[%s11049_s4 + $0x68] sm:$0xff] }
0x116e   : > { %v4310_v8 = vmul.f32 0.1, %v6501_v32  ;;  %vm4302_vm11 = vcmp.gt.f32.partialorder %v6501_v32, 0.0 }
0x116f   : > { %v4285_v51 = vpop.f32.mrb[26].mxu0  ;;  %v4311_v5 = vmul.f32 0.1, %v6502_v37  ;;  %vm4303_vm8 = vcmp.gt.f32.partialorder %v6502_v37, 0.0 }
0x1170   : > { %v6503_v31 = vadd.f32 %v4285_v51, %v4100_v28  ;;  %v4287_v18 = vpop.f32.mrb[27].mxu0  ;;  %v10625_v13 = vsel %vm4302_vm11, %v6501_v32, %v4310_v8  ;;  %v5572_v32 = vld [vmem:[%s11049_s4 + $0x60] sm:$0xff] }
0x1171   : > { %v6504_v56 = vadd.f32 %v4287_v18, %v4100_v28  ;;  %v10627_v27 = vsel %vm4303_vm8, %v6502_v37, %v4311_v5  ;;  %v5574_v37 = vld [vmem:[%s11049_s4 + $0x70] sm:$0xff]  ;;  %v5575_v28 = vld [vmem:[%s11049_s4 + $0x78] sm:$0xff] }
0x1172   : > { %vm4304_vm13 = vcmp.gt.f32.partialorder %v6503_v31, 0.0  ;;  %v4312_v0 = vmul.f32 0.1, %v6503_v31 }
0x1173   : > { %vm4305_vm10 = vcmp.gt.f32.partialorder %v6504_v56, 0.0  ;;  %v4313_v59 = vmul.f32 0.1, %v6504_v56  ;;  %v4291_v40 = vpop.f32.mrb[28].mxu0 }
0x1174   : > { %v10629_v23 = vsel %vm4304_vm13, %v6503_v31, %v4312_v0  ;;  %v6505_v39 = vadd.f32 %v4291_v40, %v4105_v55  ;;  %v4293_v30 = vpop.f32.mrb[29].mxu0 }
0x1175   : > { %v10631_v12 = vsel %vm4305_vm10, %v6504_v56, %v4313_v59  ;;  %v6506_v58 = vadd.f32 %v4293_v30, %v4105_v55  ;;  %v7721_v21 = vpack.i.bf16 %v10629_v23, %v10625_v13  ;;  %v6401_v48 = vpack.c.bf16 %v10629_v23, %v10625_v13 }
0x1176   : > { %vm4306_vm5 = vcmp.gt.f32.partialorder %v6505_v39, 0.0  ;;  %v4314_v25 = vmul.f32 0.1, %v6505_v39  ;;  %v7726_v17 = vpack.i.bf16 %v10631_v12, %v10627_v27  ;;  %v6399_v7 = vpack.c.bf16 %v10631_v12, %v10627_v27 }
0x1177   : > { %vm4307_vm11 = vcmp.gt.f32.partialorder %v6506_v58, 0.0  ;;  %v4315_v34 = vmul.f32 0.1, %v6506_v58  ;;  %v4297_v57 = vpop.f32.mrb[30].mxu0  ;;  %7722 = vrot.lane.b32.xlu1 %v7721_v21, %s7961_s15  ;;  %vm11444_vm10 = vcmp.lt.s32.totalorder %v8119_v19, 16 }
0x1178   : > { %v10638_v29 = vsel %vm4306_vm5, %v6505_v39, %v4314_v25  ;;  %v6507_v54 = vadd.f32 %v4297_v57, %v4110_v38  ;;  %v4299_v20 = vpop.f32.mrb[31].mxu0  ;;  %7727 = vrot.lane.b32.xlu0 %v7726_v17, %s7961_s15  ;;  %vm11445_vm5 = vmmov %vm11444_vm10 }
0x1179   : > { %v10641_v44 = vsel %vm4307_vm11, %v6506_v58, %v4315_v34  ;;  %v6508_v49 = vadd.f32 %v4299_v20, %v4110_v38 }
0x117a   : > { %vm4308_vm8 = vcmp.gt.f32.partialorder %v6507_v54, 0.0  ;;  %v4316_v2 = vmul.f32 0.1, %v6507_v54 }
0x117b   : > { %vm4309_vm13 = vcmp.gt.f32.partialorder %v6508_v49, 0.0  ;;  %v4317_v63 = vmul.f32 0.1, %v6508_v49 }
0x117c   : > { %v10643_v52 = vsel %vm4308_vm8, %v6507_v54, %v4316_v2 }
0x117d   : > { %v10647_v62 = vsel %vm4309_vm13, %v6508_v49, %v4317_v63  ;;  %v7731_v10 = vpack.i.bf16 %v10643_v52, %v10638_v29  ;;  %v6405_v50 = vpack.c.bf16 %v10643_v52, %v10638_v29 }
0x117e   : > { %v7741_v9 = vpack.i.bf16 %v10647_v62, %v10641_v44  ;;  %v6403_v60 = vpack.c.bf16 %v10647_v62, %v10641_v44 }
0x117f   : > { %7732 = vrot.lane.b32.xlu1 %v7731_v10, %s7961_s15 }
0x1180   : > { %7742 = vrot.lane.b32.xlu0 %v7741_v9, %s7961_s15 }
0x1183   : > { %7737 = vrot.lane.b32.xlu1 %v7721_v21, %s7962_s16 }
0x1184   : > { %7747 = vrot.lane.b32.xlu0 %v7726_v17, %s7962_s16 }
0x1187   : > { %7752 = vrot.lane.b32.xlu1 %v7731_v10, %s7962_s16 }
0x1188   : > { %7762 = vrot.lane.b32.xlu0 %v7741_v9, %s7962_s16 }
0x118b   : > { %7757 = vrot.lane.b32.xlu1 %v7721_v21, %s7963_s17 }
0x118c   : > { %7767 = vrot.lane.b32.xlu0 %v7726_v17, %s7963_s17 }
0x118f   : > { %7772 = vrot.lane.b32.xlu1 %v7731_v10, %s7963_s17 }
0x1190   : > { %7782 = vrot.lane.b32.xlu0 %v7741_v9, %s7963_s17 }
0x1193   : > { %7777 = vrot.lane.b32.xlu1 %v7721_v21, %s7964_s18 }
0x1194   : > { %7787 = vrot.lane.b32.xlu0 %v7726_v17, %s7964_s18 }
0x1197   : > { %7792 = vrot.lane.b32.xlu1 %v7731_v10, %s7964_s18 }
0x1198   : > { %7797 = vrot.lane.b32.xlu0 %v7741_v9, %s7964_s18 }
0x119b   : > { %7802 = vrot.lane.b32.xlu1 %v7721_v21, %s7965_s19 }
0x119c   : > { %7807 = vrot.lane.b32.xlu0 %v7726_v17, %s7965_s19 }
0x119f   : > { %7812 = vrot.lane.b32.xlu1 %v7731_v10, %s7965_s19 }
0x11a0   : > { %7822 = vrot.lane.b32.xlu0 %v7741_v9, %s7965_s19 }
0x11a3   : > { %7817 = vrot.lane.b32.xlu1 %v7721_v21, %s7966_s20 }
0x11a4   : > { %7827 = vrot.lane.b32.xlu0 %v7726_v17, %s7966_s20 }
0x11a7   : > { %7832 = vrot.lane.b32.xlu1 %v7731_v10, %s7966_s20 }
0x11a8   : > { %7842 = vrot.lane.b32.xlu0 %v7741_v9, %s7966_s20 }
0x11ab   : > { %7837 = vrot.lane.b32.xlu1 %v7721_v21, %s7967_s21 }
0x11ac   : > { %7847 = vrot.lane.b32.xlu0 %v7726_v17, %s7967_s21 }
0x11af   : > { %7852 = vrot.lane.b32.xlu1 %v7731_v10, %s7967_s21 }
0x11b0   : > { %7857 = vrot.lane.b32.xlu0 %v7741_v9, %s7967_s21  ;;  %s332_s21 = scalar_lea.vmem %s11054_s9, %s5651_s11 }
0x11b3   : > { %7862 = vrot.lane.b32.xlu1 %v7721_v21, %s7968_s22 }
0x11b4   : > { %7867 = vrot.lane.b32.xlu0 %v7726_v17, %s7968_s22 }
0x11b7   : > { %7872 = vrot.lane.b32.xlu1 %v7731_v10, %s7968_s22 }
0x11b8   : > { %7877 = vrot.lane.b32.xlu0 %v7741_v9, %s7968_s22 }
0x11bb   : > { %4602 = vperm.xlu1 %6760, %v5572_v32  }
0x11bc   : > { %4607 = vperm.xlu0 %6759, %v5573_v45  }
0x11bf   : > { %4612 = vperm.xlu1 %6760, %v5574_v37  }
0x11c0   : > { %4617 = vperm.xlu0 %6759, %v5575_v28  }
0x11e9   : > { %v7723_v51 = vpop.permute.xlu1 %7722 }
0x11ea   : > { %v7725_v8 = vunpack.i.h.bf16 %v7723_v51  ;;  %v7724_v5 = vunpack.i.l.bf16 %v7723_v51  ;;  %v7728_v31 = vpop.permute.xlu0 %7727 }
0x11eb   : > { %v7730_v18 = vunpack.i.h.bf16 %v7728_v31  ;;  %v7729_v56 = vunpack.i.l.bf16 %v7728_v31 }
0x11ed   : > { %v4360_v0 = vsel %vm416_vm2, %v7724_v5, %v7729_v56  ;;  %v4361_v55 = vsel %vm416_vm2, %v7725_v8, %v7730_v18  ;;  %v4364_v59 = vsel %vm416_vm2, %v7729_v56, %v7724_v5  ;;  %v4365_v40 = vsel %vm416_vm2, %v7730_v18, %v7725_v8 }
0x11ee   : > { %v6353_v39 = vpack.c.bf16 %v4361_v55, %v4360_v0  ;;  %v6356_v30 = vpack.c.bf16 %v4365_v40, %v4364_v59 }
0x11f0   : > { %6355 = vmatprep.subr.msk.bf16.mxu1 %vm8156_vm6, %v6353_v39 }
0x11f1   : > { %v7733_v58 = vpop.permute.xlu1 %7732  ;;  %6358 = vmatpush1.bf16.msk.msra.mxu1 %vm8164_vm7, %v6356_v30 }
0x11f2   : > { %v7735_v21 = vunpack.i.h.bf16 %v7733_v58  ;;  %v7734_v25 = vunpack.i.l.bf16 %v7733_v58  ;;  %v7743_v17 = vpop.permute.xlu0 %7742 }
0x11f3   : > { %v7745_v38 = vunpack.i.h.bf16 %v7743_v17  ;;  %v7744_v34 = vunpack.i.l.bf16 %v7743_v17 }
0x11f5   : > { %v4362_v57 = vsel %vm416_vm2, %v7734_v25, %v7744_v34  ;;  %v4363_v54 = vsel %vm416_vm2, %v7735_v21, %v7745_v38  ;;  %v4366_v20 = vsel %vm416_vm2, %v7744_v34, %v7734_v25  ;;  %v4367_v49 = vsel %vm416_vm2, %v7745_v38, %v7735_v21  ;;  %v7738_v2 = vpop.permute.xlu1 %7737  ;;  %vm11446_vm2 = vmmov %vm11445_vm5 }
0x11f6   : > { %v6359_v63 = vpack.c.bf16 %v4363_v54, %v4362_v57  ;;  %v6362_v10 = vpack.c.bf16 %v4367_v49, %v4366_v20  ;;  %v7740_v9 = vunpack.i.h.bf16 %v7738_v2  ;;  %v7739_v11 = vunpack.i.l.bf16 %v7738_v2  ;;  %v7748_v32 = vpop.permute.xlu0 %7747  ;;  %vm11447_vm11 = vmmov %vm11446_vm2 }
0x11f7   : > { %v7750_v45 = vunpack.i.h.bf16 %v7748_v32  ;;  %v7749_v37 = vunpack.i.l.bf16 %v7748_v32  ;;  %vm11448_vm8 = vmmov %vm11446_vm2 }
0x11f8   : > { %6361 = vmatprep.subr.msk.bf16.mxu1 %vm8156_vm6, %v6359_v63  ;;  %vm11449_vm13 = vmmov %vm11446_vm2 }
0x11f9   : > { %v4396_v28 = vsel %vm11444_vm10, %v7749_v37, %v7739_v11  ;;  %v4397_v51 = vsel %vm11445_vm5, %v7750_v45, %v7740_v9  ;;  %v7753_v8 = vpop.permute.xlu1 %7752  ;;  %6364 = vmatpush1.bf16.msk.msra.mxu1 %vm8164_vm7, %v6362_v10  ;;  %v4392_v5 = vsel %vm11446_vm2, %v7739_v11, %v7749_v37  ;;  %v4393_v31 = vsel %vm11447_vm11, %v7740_v9, %v7750_v45  ;;  %vm11450_vm7 = vmmov %vm11446_vm2 }
0x11fa   : > { %v6367_v18 = vpack.c.bf16 %v4397_v51, %v4396_v28  ;;  %v7755_v56 = vunpack.i.h.bf16 %v7753_v8  ;;  %v7754_v0 = vunpack.i.l.bf16 %v7753_v8  ;;  %v7763_v55 = vpop.permute.xlu0 %7762  ;;  %v6365_v59 = vpack.c.bf16 %v4393_v31, %v4392_v5  ;;  %vm11451_vm10 = vmmov %vm11446_vm2 }
0x11fb   : > { %v7765_v40 = vunpack.i.h.bf16 %v7763_v55  ;;  %v7764_v39 = vunpack.i.l.bf16 %v7763_v55  ;;  %vm11452_vm5 = vcmp.lt.s32.totalorder %v8119_v19, 15 }
0x11fc   : > { %6366 = vmatprep.subr.bf16.mxu1 %v6365_v59  ;;  %vm11453_vm2 = vmmov %vm11452_vm5 }
0x11fd   : > { %v4398_v30 = vsel %vm11448_vm8, %v7764_v39, %v7754_v0  ;;  %v4399_v47 = vsel %vm11449_vm13, %v7765_v40, %v7755_v56  ;;  %v7758_v58 = vpop.permute.xlu1 %7757  ;;  %6369 = vmatpush1.bf16.msk.msra.mxu1 %vm8200_vm9, %v6367_v18  ;;  %v4394_v21 = vsel %vm11450_vm7, %v7754_v0, %v7764_v39  ;;  %v4395_v25 = vsel %vm11451_vm10, %v7755_v56, %v7765_v40  ;;  %vm11454_vm11 = vmmov %vm11453_vm2 }
0x11fe   : > { %v6372_v17 = vpack.c.bf16 %v4399_v47, %v4398_v30  ;;  %v7760_v38 = vunpack.i.h.bf16 %v7758_v58  ;;  %v7759_v34 = vunpack.i.l.bf16 %v7758_v58  ;;  %v7768_v57 = vpop.permute.xlu0 %7767  ;;  %v6370_v54 = vpack.c.bf16 %v4395_v25, %v4394_v21  ;;  %vm11455_vm8 = vmmov %vm11453_vm2 }
0x11ff   : > { %v7770_v20 = vunpack.i.h.bf16 %v7768_v57  ;;  %v7769_v49 = vunpack.i.l.bf16 %v7768_v57  ;;  %vm11456_vm13 = vmmov %vm11453_vm2 }
0x1200   : > { %6371 = vmatprep.subr.bf16.mxu1 %v6370_v54  ;;  %vm11457_vm7 = vmmov %vm11453_vm2 }
0x1201   : > { %v4424_v2 = vsel %vm11452_vm5, %v7759_v34, %v7769_v49  ;;  %v4425_v63 = vsel %vm11453_vm2, %v7760_v38, %v7770_v20  ;;  %v4428_v10 = vsel %vm11454_vm11, %v7769_v49, %v7759_v34  ;;  %v4429_v9 = vsel %vm11455_vm8, %v7770_v20, %v7760_v38  ;;  %v7773_v11 = vpop.permute.xlu1 %7772  ;;  %6374 = vmatpush1.bf16.msk.msra.mxu1 %vm8200_vm9, %v6372_v17  ;;  %vm11458_vm10 = vmmov %vm11453_vm2 }
0x1202   : > { %v6375_v32 = vpack.c.bf16 %v4425_v63, %v4424_v2  ;;  %v6378_v45 = vpack.c.bf16 %v4429_v9, %v4428_v10  ;;  %v7775_v37 = vunpack.i.h.bf16 %v7773_v11  ;;  %v7774_v28 = vunpack.i.l.bf16 %v7773_v11  ;;  %v7783_v51 = vpop.permute.xlu0 %7782  ;;  %vm11459_vm9 = vmmov %vm11453_vm2 }
0x1203   : > { %v7785_v8 = vunpack.i.h.bf16 %v7783_v51  ;;  %v7784_v5 = vunpack.i.l.bf16 %v7783_v51  ;;  %vm11460_vm5 = vcmp.lt.s32.totalorder %v8119_v19, 1 }
0x1204   : > { %6377 = vmatprep.subr.msk.bf16.mxu1 %vm8229_vm12, %v6375_v32  ;;  %vm11461_vm2 = vmmov %vm11460_vm5 }
0x1205   : > { %v4426_v31 = vsel %vm11456_vm13, %v7774_v28, %v7784_v5  ;;  %v4427_v18 = vsel %vm11457_vm7, %v7775_v37, %v7785_v8  ;;  %v4430_v22 = vsel %vm11458_vm10, %v7784_v5, %v7774_v28  ;;  %v4431_v56 = vsel %vm11459_vm9, %v7785_v8, %v7775_v37  ;;  %v7778_v0 = vpop.permute.xlu1 %7777  ;;  %6380 = vmatpush1.bf16.msk.msra.mxu1 %vm8250_vm15, %v6378_v45  ;;  %vm11462_vm11 = vmmov %vm11461_vm2 }
0x1206   : > { %v6381_v55 = vpack.c.bf16 %v4427_v18, %v4426_v31  ;;  %v6384_v59 = vpack.c.bf16 %v4431_v56, %v4430_v22  ;;  %v7780_v40 = vunpack.i.h.bf16 %v7778_v0  ;;  %v7779_v39 = vunpack.i.l.bf16 %v7778_v0  ;;  %v7788_v30 = vpop.permute.xlu0 %7787  ;;  %vm11463_vm8 = vmmov %vm11461_vm2 }
0x1207   : > { %v7790_v47 = vunpack.i.h.bf16 %v7788_v30  ;;  %v7789_v58 = vunpack.i.l.bf16 %v7788_v30  ;;  %vm11464_vm13 = vmmov %vm11461_vm2  ;;  %vm11468_vm9 = vcmp.lt.s32.totalorder %v8119_v19, 127 }
0x1208   : > { %6383 = vmatprep.subr.msk.bf16.mxu1 %vm8229_vm12, %v6381_v55  ;;  %vm11465_vm7 = vmmov %vm11461_vm2 }
0x1209   : > { %v4456_v21 = vsel %vm11460_vm5, %v7779_v39, %v7789_v58  ;;  %v4457_v25 = vsel %vm11461_vm2, %v7780_v40, %v7790_v47  ;;  %v4460_v17 = vsel %vm11462_vm11, %v7789_v58, %v7779_v39  ;;  %v4461_v38 = vsel %vm11463_vm8, %v7790_v47, %v7780_v40  ;;  %v7793_v34 = vpop.permute.xlu1 %7792  ;;  %6386 = vmatpush1.bf16.msk.msra.mxu1 %vm8250_vm15, %v6384_v59  ;;  %vm11466_vm10 = vmmov %vm11461_vm2 }
0x120a   : > { %v6387_v57 = vpack.c.bf16 %v4457_v25, %v4456_v21  ;;  %v6390_v54 = vpack.c.bf16 %v4461_v38, %v4460_v17  ;;  %v7795_v20 = vunpack.i.h.bf16 %v7793_v34  ;;  %v7794_v49 = vunpack.i.l.bf16 %v7793_v34  ;;  %v7798_v2 = vpop.permute.xlu0 %7797  ;;  %vm11467_vm15 = vmmov %vm11461_vm2 }
0x120b   : > { %v7800_v63 = vunpack.i.h.bf16 %v7798_v2  ;;  %v7799_v10 = vunpack.i.l.bf16 %v7798_v2  ;;  %vm11469_vm5 = vmmov %vm11468_vm9 }
0x120c   : > { %6389 = vmatprep.subr.msk.bf16.mxu1 %vm8156_vm6, %v6387_v57  ;;  %vm11471_vm2 = vmmov %vm11469_vm5 }
0x120d   : > { %v4458_v9 = vsel %vm11464_vm13, %v7794_v49, %v7799_v10  ;;  %v4459_v11 = vsel %vm11465_vm7, %v7795_v20, %v7800_v63  ;;  %v4462_v53 = vsel %vm11466_vm10, %v7799_v10, %v7794_v49  ;;  %v4463_v32 = vsel %vm11467_vm15, %v7800_v63, %v7795_v20  ;;  %v7803_v45 = vpop.permute.xlu1 %7802  ;;  %6392 = vmatpush1.bf16.msk.msra.mxu1 %vm8275_vm0, %v6390_v54  ;;  %vm11472_vm11 = vmmov %vm11471_vm2 }
0x120e   : > { %v6393_v37 = vpack.c.bf16 %v4459_v11, %v4458_v9  ;;  %v6396_v28 = vpack.c.bf16 %v4463_v32, %v4462_v53  ;;  %v7808_v51 = vpop.permute.xlu0 %7807  ;;  %v7805_v8 = vunpack.i.h.bf16 %v7803_v45  ;;  %v7804_v5 = vunpack.i.l.bf16 %v7803_v45  ;;  %vm11473_vm8 = vmmov %vm11471_vm2 }
0x120f   : > { %v7810_v31 = vunpack.i.h.bf16 %v7808_v51  ;;  %v7809_v18 = vunpack.i.l.bf16 %v7808_v51  ;;  %vm11474_vm13 = vmmov %vm11471_vm2  ;;  %vm11476_vm10 = vcmp.lt.s32.totalorder %v8119_v19, 113 }
0x1210   : > { %6395 = vmatprep.subr.msk.bf16.mxu1 %vm8156_vm6, %v6393_v37  ;;  %vm11470_vm6 = vmmov %vm11469_vm5 }
0x1211   : > { %v7813_v22 = vpop.permute.xlu1 %7812  ;;  %6398 = vmatpush1.bf16.msk.msra.mxu1 %vm8275_vm0, %v6396_v28  ;;  %v4492_v0 = vsel %vm11468_vm9, %v7809_v18, %v7804_v5  ;;  %v4493_v55 = vsel %vm11469_vm5, %v7810_v31, %v7805_v8  ;;  %v4488_v27 = vsel %vm11470_vm6, %v7804_v5, %v7809_v18  ;;  %v4489_v12 = vsel %vm11471_vm2, %v7805_v8, %v7810_v31  ;;  %vm11475_vm7 = vmmov %vm11471_vm2 }
0x1212   : > { %v7823_v56 = vpop.permute.xlu0 %7822  ;;  %6400 = vmatprep.subr.bf16.mxu1 %v6399_v7  ;;  %v7815_v59 = vunpack.i.h.bf16 %v7813_v22  ;;  %v7814_v40 = vunpack.i.l.bf16 %v7813_v22  ;;  %v6407_v7 = vpack.c.bf16 %v4493_v55, %v4492_v0  ;;  %v6410_v62 = vpack.c.bf16 %v4489_v12, %v4488_v27  ;;  %vm11477_vm15 = vmmov %vm11476_vm10 }
0x1213   : > { %v7825_v39 = vunpack.i.h.bf16 %v7823_v56  ;;  %v7824_v41 = vunpack.i.l.bf16 %v7823_v56  ;;  %vm11478_vm9 = vmmov %vm11476_vm10 }
0x1214   : > { %vm11479_vm5 = vmmov %vm11478_vm9 }
0x1215   : > { %v7818_v30 = vpop.permute.xlu1 %7817  ;;  %6402 = vmatpush1.bf16.msra.mxu1 %v6401_v48  ;;  %v4494_v13 = vsel %vm11472_vm11, %v7824_v41, %v7814_v40  ;;  %v4495_v23 = vsel %vm11473_vm8, %v7825_v39, %v7815_v59  ;;  %v4491_v38 = vsel %vm11475_vm7, %v7815_v59, %v7825_v39  ;;  %vm11480_vm6 = vmmov %vm11479_vm5  ;;  %vm11484_vm8 = vcmp.lt.s32.totalorder %v8119_v19, 112 }
0x1216   : > { %v7828_v47 = vpop.permute.xlu0 %7827  ;;  %6404 = vmatprep.subr.bf16.mxu1 %v6403_v60  ;;  %v7820_v58 = vunpack.i.h.bf16 %v7818_v30  ;;  %v7819_v21 = vunpack.i.l.bf16 %v7818_v30  ;;  %v4490_v60 = vsel %vm11474_vm13, %v7814_v40, %v7824_v41  ;;  %v6413_v34 = vpack.c.bf16 %v4495_v23, %v4494_v13  ;;  %vm11481_vm2 = vmmov %vm11479_vm5 }
0x1217   : > { %v7830_v25 = vunpack.i.h.bf16 %v7828_v47  ;;  %v7829_v17 = vunpack.i.l.bf16 %v7828_v47  ;;  %v6416_v63 = vpack.c.bf16 %v4491_v38, %v4490_v60  ;;  %vm11483_vm11 = vmmov %vm11481_vm2 }
0x1218   : > { %vm11485_vm13 = vmmov %vm11484_vm8 }
0x1219   : > { %v7833_v48 = vpop.permute.xlu1 %7832  ;;  %6406 = vmatpush1.bf16.msra.mxu1 %v6405_v50  ;;  %v4524_v57 = vsel %vm11476_vm10, %v7829_v17, %v7819_v21  ;;  %v4525_v54 = vsel %vm11477_vm15, %v7830_v25, %v7820_v58  ;;  %v4520_v10 = vsel %vm11478_vm9, %v7819_v21, %v7829_v17  ;;  %v4521_v9 = vsel %vm11479_vm5, %v7820_v58, %v7830_v25  ;;  %vm11486_vm7 = vmmov %vm11484_vm8 }
0x121a   : > { %v7843_v44 = vpop.permute.xlu0 %7842  ;;  %6409 = vmatprep.subr.msk.bf16.mxu1 %vm8229_vm12, %v6407_v7  ;;  %v7835_v29 = vunpack.i.h.bf16 %v7833_v48  ;;  %v7834_v52 = vunpack.i.l.bf16 %v7833_v48  ;;  %v6419_v11 = vpack.c.bf16 %v4525_v54, %v4524_v57  ;;  %v6422_v5 = vpack.c.bf16 %v4521_v9, %v4520_v10  ;;  %vm11487_vm10 = vmmov %vm11486_vm7  ;;  %v5564_v9 = vld [vmem:[%s11048_s3 + $0x140] sm:$0xff] }
0x121b   : > { %v7845_v50 = vunpack.i.h.bf16 %v7843_v44  ;;  %v7844_v20 = vunpack.i.l.bf16 %v7843_v44  ;;  %vm11488_vm15 = vmmov %vm11486_vm7 }
0x121c   : > { %vm11489_vm9 = vmmov %vm11486_vm7 }
0x121d   : > { %v7838_v49 = vpop.permute.xlu1 %7837  ;;  %6412 = vmatpush1.bf16.msk.msra.mxu1 %vm8319_vm14, %v6410_v62  ;;  %v4526_v28 = vsel %vm11480_vm6, %v7844_v20, %v7834_v52  ;;  %v4527_v51 = vsel %vm11481_vm2, %v7845_v50, %v7835_v29  ;;  %v4523_v18 = vsel %vm11483_vm11, %v7835_v29, %v7845_v50  ;;  %vm11492_vm6 = vcmp.lt.s32.totalorder %v8119_v19, 111  ;;  %v5566_v19 = vld [vmem:[%s11048_s3 + $0x150] sm:$0xff] }
0x121e   : > { %v7848_v2 = vpop.permute.xlu0 %7847  ;;  %6415 = vmatprep.subr.msk.bf16.mxu1 %vm8229_vm12, %v6413_v34  ;;  %v7840_v53 = vunpack.i.h.bf16 %v7838_v49  ;;  %v7839_v32 = vunpack.i.l.bf16 %v7838_v49  ;;  %vm11482_vm12 = vmmov %vm11481_vm2  ;;  %v6425_v22 = vpack.c.bf16 %v4527_v51, %v4526_v28  ;;  %v5567_v28 = vld [vmem:[%s11048_s3 + $0x158] sm:$0xff] }
0x121f   : > { %v7850_v45 = vunpack.i.h.bf16 %v7848_v2  ;;  %v7849_v37 = vunpack.i.l.bf16 %v7848_v2  ;;  %v4522_v31 = vsel %vm11482_vm12, %v7834_v52, %v7844_v20  ;;  %vm11493_vm2 = vmmov %vm11492_vm6 }
0x1220   : > { %v6428_v47 = vpack.c.bf16 %v4523_v18, %v4522_v31  ;;  %v5571_v31 = vld [vmem:[%s11048_s3 + $0x178] sm:$0xff] }
0x1221   : > { %v7853_v43 = vpop.permute.xlu1 %7852  ;;  %6418 = vmatpush1.bf16.msk.msra.mxu1 %vm8319_vm14, %v6416_v63  ;;  %v4556_v56 = vsel %vm11484_vm8, %v7849_v37, %v7839_v32  ;;  %v4557_v0 = vsel %vm11485_vm13, %v7850_v45, %v7840_v53  ;;  %v4552_v27 = vsel %vm11486_vm7, %v7839_v32, %v7849_v37  ;;  %v4553_v12 = vsel %vm11487_vm10, %v7840_v53, %v7850_v45  ;;  %v5563_v37 = vld [vmem:[%s11048_s3 + $0x138] sm:$0xff] }
0x1222   : > { %v7858_v8 = vpop.permute.xlu0 %7857  ;;  %6421 = vmatprep.subr.msk.bf16.mxu1 %vm8355_vm1, %v6419_v11  ;;  %v7855_v55 = vunpack.i.h.bf16 %v7853_v43  ;;  %v7854_v59 = vunpack.i.l.bf16 %v7853_v43  ;;  %v6431_v7 = vpack.c.bf16 %v4557_v0, %v4556_v56  ;;  %v6434_v44 = vpack.c.bf16 %v4553_v12, %v4552_v27  ;;  %v5570_v43 = vld [vmem:[%s11048_s3 + $0x170] sm:$0xff] }
0x1223   : > { %v7860_v40 = vunpack.i.h.bf16 %v7858_v8  ;;  %v7859_v39 = vunpack.i.l.bf16 %v7858_v8  ;;  %v5565_v8 = vld [vmem:[%s11048_s3 + $0x148] sm:$0xff] }
0x1225   : > { %v7863_v41 = vpop.permute.xlu1 %7862  ;;  %6424 = vmatpush1.bf16.msk.msra.mxu1 %vm8275_vm0, %v6422_v5  ;;  %v4558_v13 = vsel %vm11488_vm15, %v7859_v39, %v7854_v59  ;;  %v4559_v23 = vsel %vm11489_vm9, %v7860_v40, %v7855_v55  ;;  %v5568_v5 = vld [vmem:[%s11048_s3 + $0x160] sm:$0xff]  ;;  %vm11504_vm15 = vcmask 15360  }
0x1226   : > { %v7868_v30 = vpop.permute.xlu0 %7867  ;;  %6427 = vmatprep.subr.msk.bf16.mxu1 %vm8355_vm1, %v6425_v22  ;;  %v7865_v58 = vunpack.i.h.bf16 %v7863_v41  ;;  %v7864_v21 = vunpack.i.l.bf16 %v7863_v41  ;;  %vm11490_vm1 = vmmov %vm11486_vm7  ;;  %v6436_v38 = vpack.c.bf16 %v4559_v23, %v4558_v13 }
0x1227   : > { %v7870_v25 = vunpack.i.h.bf16 %v7868_v30  ;;  %v7869_v17 = vunpack.i.l.bf16 %v7868_v30  ;;  %v4554_v62 = vsel %vm11490_vm1, %v7854_v59, %v7859_v39  ;;  %vm11491_vm5 = vmmov %vm11490_vm1 }
0x1228   : > { %v4555_v60 = vsel %vm11491_vm5, %v7855_v55, %v7860_v40  ;;  %vm11505_vm9 = vmmov %vm11504_vm15 }
0x1229   : > { %6430 = vmatpush1.bf16.msk.msra.mxu1 %vm8275_vm0, %v6428_v47  ;;  %v7873_v24 = vpop.permute.xlu1 %7872  ;;  %v4588_v34 = vsel %vm11492_vm6, %v7869_v17, %v7864_v21  ;;  %v4589_v26 = vsel %vm11493_vm2, %v7870_v25, %v7865_v58  ;;  %v6439_v50 = vpack.c.bf16 %v4555_v60, %v4554_v62  ;;  %vm11494_vm0 = vmmov %vm11493_vm2 }
0x122a   : > { %v7878_v48 = vpop.permute.xlu0 %7877  ;;  %6433 = vmatprep.subr.msk.bf16.mxu1 %vm8387_vm4, %v6431_v7  ;;  %v7875_v57 = vunpack.i.h.bf16 %v7873_v24  ;;  %v7874_v54 = vunpack.i.l.bf16 %v7873_v24  ;;  %v4584_v20 = vsel %vm11494_vm0, %v7864_v21, %v7869_v17  ;;  %vm11495_vm12 = vmmov %vm11494_vm0  ;;  %v6441_v2 = vpack.c.bf16 %v4589_v26, %v4588_v34 }
0x122b   : > { %v7880_v29 = vunpack.i.h.bf16 %v7878_v48  ;;  %v7879_v52 = vunpack.i.l.bf16 %v7878_v48  ;;  %v4585_v49 = vsel %vm11495_vm12, %v7865_v58, %v7870_v25  ;;  %vm11496_vm11 = vmmov %vm11494_vm0 }
0x122c   : > { %vm11497_vm8 = vmmov %vm11494_vm0  ;;  %v6444_v11 = vpack.c.bf16 %v4585_v49, %v4584_v20  ;;  %v5637_v49 = vld [vmem:[%s11050_s5 + $0x68] sm:$0xff] }
0x122d   : > { %6435 = vmatpush1.bf16.msra.mxu1 %v6434_v44  ;;  %v4590_v63 = vsel %vm11496_vm11, %v7879_v52, %v7874_v54  ;;  %v4591_v10 = vsel %vm11497_vm8, %v7880_v29, %v7875_v57  ;;  %vm11499_vm13 = vmmov %vm11494_vm0 }
0x122e   : > { %6438 = vmatprep.subr.msk.bf16.mxu1 %vm8387_vm4, %v6436_v38  ;;  %vm11498_vm4 = vmmov %vm11494_vm0  ;;  %v4587_v32 = vsel %vm11499_vm13, %v7875_v57, %v7880_v29  ;;  %v6447_v45 = vpack.c.bf16 %v4591_v10, %v4590_v63  ;;  %v5636_v63 = vld [vmem:[%s11050_s5 + $0x60] sm:$0xff] }
0x122f   : > { %v4586_v53 = vsel %vm11498_vm4, %v7874_v54, %v7879_v52  ;;  %vm11506_vm1 = vmmov %vm11505_vm9 }
0x1230   : > { %v6450_v51 = vpack.c.bf16 %v4587_v32, %v4586_v53  ;;  %vm11507_vm5 = vmmov %vm11506_vm1 }
0x1231   : > { %6440 = vmatpush1.bf16.msra.mxu1 %v6439_v50  ;;  %vm11508_vm6 = vmmov %vm11506_vm1 }
0x1232   : > { %6443 = vmatprep.subr.msk.bf16.mxu1 %vm8413_vm3, %v6441_v2  ;;  %vm11509_vm2 = vmmov %vm11506_vm1 }
0x1233   : > { %vm11510_vm0 = vmmov %vm11506_vm1 }
0x1234   : > { %4697 = vmatmul.mubr.f32.vlgmr.msra.gmra.mrb[24].mxu1 %v5560_v6  ;;  %vm11511_vm12 = vmmov %vm11510_vm0 }
0x1235   : > { %6446 = vmatpush1.bf16.msk.msra.mxu1 %vm8319_vm14, %v6444_v11  ;;  %4702 = vmatprep.mubr.f32.mxu1 %v5564_v9 }
0x1236   : > { %6449 = vmatprep.subr.msk.bf16.mxu1 %vm8413_vm3, %v6447_v45  ;;  %v5638_v45 = vld [vmem:[%s11050_s5 + $0x70] sm:$0xff] }
0x1238   : > { %4703 = vmatmul.mubr.f32.gmra.mrb[26].mxu1 %v5563_v37 }
0x1239   : > { %6452 = vmatpush1.bf16.msk.msra.mxu1 %vm8319_vm14, %v6450_v51  ;;  %4708 = vmatprep.mubr.f32.mxu1 %v5567_v28  ;;  %vm11500_vm14 = vcmask 261120   ;;  %v5639_v28 = vld [vmem:[%s11050_s5 + $0x78] sm:$0xff] }
0x123a   : > { %vm11501_vm3 = vmmov %vm11500_vm14  ;;  %v4603_v18 = vpop.permute.xlu1 %4602 }
0x123b   : > { %vm11502_vm7 = vmmov %vm11501_vm3  ;;  %v4608_v40 = vpop.permute.xlu0 %4607 }
0x123c   : > { %4709 = vmatmul.mubr.f32.gmra.mrb[28].mxu1 %v5566_v19  ;;  %vm11503_vm10 = vmmov %vm11501_vm3 }
0x123d   : > { %4714 = vmatprep.mubr.f32.mxu1 %v5570_v43 }
0x123f   : > { %v4618_v23 = vpop.permute.xlu0 %4617 }
0x1240   : > { %4715 = vmatmul.mubr.f32.gmra.mrb[30].mxu1 %v5569_v14 }
0x1241   : > { %4785 = vmatprep.mubr.f32.mxu1 %v7970_v36 }
0x1244   : > { %5632 = vmatmul.mubr.msk.f32.vlgmr.msra.gmra.mrb[24].mxu1 %vm11500_vm14, %v5562_v61 }
0x1245   : > { %4791 = vmatprep.mubr.f32.mxu1 %v7970_v36 }
0x1248   : > { %5633 = vmatmul.mubr.msk.f32.gmra.mrb[26].mxu1 %vm11501_vm3, %v5565_v8 }
0x1249   : > { %4797 = vmatprep.mubr.f32.mxu1 %v7970_v36 }
0x124c   : > { %5634 = vmatmul.mubr.msk.f32.gmra.mrb[28].mxu1 %vm11502_vm7, %v5568_v5 }
0x124d   : > { %4803 = vmatprep.mubr.f32.mxu1 %v7970_v36 }
0x1250   : > { %5635 = vmatmul.mubr.msk.f32.gmra.mrb[30].mxu1 %vm11503_vm10, %v5571_v31 }
0x1317   : > { %v4787_v22 = vpop.f32.mrb[24].mxu1 }
0x1318   : > { %v6509_v56 = vadd.f32 %v4787_v22, %v4603_v18  ;;  %v4789_v0 = vpop.f32.mrb[25].mxu1 }
0x1319   : > { %v6510_v55 = vadd.f32 %v4789_v0, %v4603_v18 }
0x131a   : > { %v10942_v59 = vadd.f32 %v6509_v56, %v10320_v42  ;;  %v4613_v42 = vpop.permute.xlu1 %4612 }
0x131b   : > { %v10945_v39 = vadd.f32 %v6510_v55, %v10323_v1  ;;  %v4793_v41 = vpop.f32.mrb[26].mxu1 }
0x131c   : > { %v6511_v36 = vadd.f32 %v4793_v41, %v4608_v40  ;;  %v4795_v30 = vpop.f32.mrb[27].mxu1 }
0x131d   : > { %v6512_v47 = vadd.f32 %v4795_v30, %v4608_v40  ;;  %v4818_v27 = vadd.f32 %v10945_v39, %v10942_v59  ;;  %v4834_v13 = vmax.f32 %v10942_v59, %v10945_v39 }
0x131e   : > { %v10950_v12 = vadd.f32 %v6511_v36, %v10314_v46 }
0x131f   : > { %v10953_v7 = vadd.f32 %v6512_v47, %v10317_v3  ;;  %v4799_v58 = vpop.f32.mrb[28].mxu1  ;;  %4819 = vadd.xlane.f32.xlu1 %v4818_v27  ;;  %v5640_v47 = vld [vmem:[%s11051_s6 + $0x3] sm:$0x1] }
0x1320   : > { %v4801_v21 = vpop.f32.mrb[29].mxu1  ;;  %v6513_v25 = vadd.f32 %v4799_v58, %v4613_v42 }
0x1321   : > { %v6514_v1 = vadd.f32 %v4801_v21, %v4613_v42  ;;  %v4821_v17 = vadd.f32 %v10953_v7, %v10950_v12  ;;  %v4837_v60 = vmax.f32 %v10950_v12, %v10953_v7  ;;  %v5642_v21 = vld [vmem:[%s11052_s7 + $0x68] sm:$0xff] }
0x1322   : > { %v10960_v3 = vadd.f32 %v6513_v25, %v10330_v35  ;;  %v5641_v25 = vld [vmem:[%s11052_s7 + $0x60] sm:$0xff] }
0x1323   : > { %v4805_v24 = vpop.f32.mrb[30].mxu1  ;;  %4822 = vadd.xlane.f32.xlu0 %v4821_v17  ;;  %4835 = vmax.xlane.f32.xlu1 %v4834_v13  ;;  %v10963_v44 = vadd.f32 %v6514_v1, %v10333_v16  ;;  %v5644_v17 = vld [vmem:[%s11052_s7 + $0x78] sm:$0xff]  ;;  %v5643_v13 = vld [vmem:[%s11052_s7 + $0x70] sm:$0xff] }
0x1324   : > { %v6515_v46 = vadd.f32 %v4805_v24, %v4618_v23  ;;  %v4807_v48 = vpop.f32.mrb[31].mxu1 }
0x1325   : > { %v6516_v62 = vadd.f32 %v4807_v48, %v4618_v23  ;;  %v4824_v26 = vadd.f32 %v10963_v44, %v10960_v3  ;;  %v4840_v16 = vmax.f32 %v10960_v3, %v10963_v44 }
0x1326   : > { %v10968_v38 = vadd.f32 %v6515_v46, %v10336_v15 }
0x1327   : > { %v10971_v34 = vadd.f32 %v6516_v62, %v10339_v33  ;;  %4838 = vmax.xlane.f32.xlu0 %v4837_v60 }
0x1329   : > { %v4827_v35 = vadd.f32 %v10971_v34, %v10968_v38  ;;  %v4843_v57 = vmax.f32 %v10968_v38, %v10971_v34 }
0x132b   : > { %4825 = vadd.xlane.f32.xlu0 %v4824_v26  ;;  %4828 = vadd.xlane.f32.xlu1 %v4827_v35  ;;  %v5646_v35 = vld [vmem:[%s11053_s8 + $0x68] sm:$0xff] }
0x132f   : > { %4841 = vmax.xlane.f32.xlu0 %v4840_v16  ;;  %4844 = vmax.xlane.f32.xlu1 %v4843_v57  ;;  %v5645_v16 = vld [vmem:[%s11053_s8 + $0x60] sm:$0xff] }
0x13ac   : > { %v4820_v15 = vpop.xlane.xlu1 %4819 }
0x13ad   : > { %v4830_v50 = vmul.f32 0.00390625, %v4820_v15 }
0x13b0   : > { %v4823_v33 = vpop.xlane.xlu0 %4822  ;;  %v4836_v29 = vpop.xlane.xlu1 %4835 }
0x13b1   : > { %v4831_v54 = vmul.f32 0.00390625, %v4823_v33  ;;  %v4846_v2 = vadd.f32 %v4836_v29, %v4830_v50  ;;  %v5648_v29 = vld [vmem:[%s11053_s8 + $0x78] sm:$0xff] }
0x13b3   : > { %v4855_v11 = vmul.f32 %v5636_v63, %v4846_v2 }
0x13b4   : > { %v4839_v52 = vpop.xlane.xlu0 %4838 }
0x13b5   : > { %v4847_v20 = vadd.f32 %v4839_v52, %v4831_v54  ;;  %v4859_v61 = vsel %vm11505_vm9, %v4855_v11, 0.0  ;;  %v5647_v52 = vld [vmem:[%s11053_s8 + $0x70] sm:$0xff] }
0x13b7   : > { %v4856_v9 = vmul.f32 %v5637_v49, %v4847_v20 }
0x13b8   : > { %v4826_v10 = vpop.xlane.xlu0 %4825  ;;  %v4829_v6 = vpop.xlane.xlu1 %4828 }
0x13b9   : > { %v4832_v53 = vmul.f32 0.00390625, %v4826_v10  ;;  %v4833_v32 = vmul.f32 0.00390625, %v4829_v6  ;;  %v4860_v19 = vsel %vm11504_vm15, %v4856_v9, 0.0 }
0x13ba   : > { %v4861_v31 = vadd.f32 %v4860_v19, %v4859_v61 }
0x13bc   : > { %v4842_v37 = vpop.xlane.xlu0 %4841  ;;  %v4845_v51 = vpop.xlane.xlu1 %4844 }
0x13bd   : > { %v4848_v43 = vadd.f32 %v4842_v37, %v4832_v53  ;;  %v4849_v14 = vadd.f32 %v4845_v51, %v4833_v32 }
0x13bf   : > { %v4857_v8 = vmul.f32 %v5638_v45, %v4848_v43  ;;  %v4858_v5 = vmul.f32 %v5639_v28, %v4849_v14 }
0x13c1   : > { %v4862_v18 = vsel %vm11506_vm1, %v4857_v8, 0.0  ;;  %v4864_v56 = vsel %vm11507_vm5, %v4858_v5, 0.0 }
0x13c2   : > { %v4863_v22 = vadd.f32 %v4862_v18, %v4861_v31 }
0x13c4   : > { %v4865_v0 = vadd.f32 %v4864_v56, %v4863_v22 }
0x13c6   : > { %v4866_v55 = vrot.slane %v4865_v0, 4 }
0x13c8   : > { %v4867_v40 = vadd.f32 %v4866_v55, %v4865_v0 }
0x13ca   : > { %v4868_v41 = vrot.slane %v4867_v40, 2 }
0x13cc   : > { %v4869_v36 = vadd.f32 %v4868_v41, %v4867_v40 }
0x13ce   : > { %v4870_v30 = vrot.slane %v4869_v36, 1 }
0x13d0   : > { %v4871_v27 = vadd.f32 %v4870_v30, %v4869_v36 }
0x13d2   : > { %v4874_v58 = vadd.f32 %v5640_v47, %v4871_v27 }
0x13d4   : > { %v4875_v42 = vmax.f32 %v4874_v58, 0.0 }
0x13d6   : > { %v4884_v1 = vrot.slane %v4875_v42, %v8850_v4 }
0x13d8   : > { %v4886_v23 = vmul.f32 %v5642_v21, %v4884_v1  ;;  %v4885_v24 = vmul.f32 %v5641_v25, %v4884_v1  ;;  %v4888_v62 = vmul.f32 %v5644_v17, %v4884_v1  ;;  %v4887_v60 = vmul.f32 %v5643_v13, %v4884_v1 }
0x13da   : > { %v4892_v46 = vsel %vm11508_vm6, %v4886_v23, 0.0  ;;  %v4889_v48 = vsel %vm11509_vm2, %v4885_v24, 0.0  ;;  %v4898_v4 = vsel %vm11510_vm0, %v4888_v62, 0.0  ;;  %v4895_v26 = vsel %vm11511_vm12, %v4887_v60, 0.0 }
0x13db   : > { %4893 = vadd.xlane.f32.xlu1 %v4892_v46  ;;  %4890 = vadd.xlane.f32.xlu0 %v4889_v48 }
0x13df   : > { %4899 = vadd.xlane.f32.xlu1 %v4898_v4  ;;  %4896 = vadd.xlane.f32.xlu0 %v4895_v26 }
0x1468   : > { %v4894_v57 = vpop.xlane.xlu1 %4893  ;;  %v4891_v15 = vpop.xlane.xlu0 %4890 }
0x1469   : > { %v4907_v33 = vadd.f32 %v5646_v35, %v4894_v57  ;;  %v4906_v54 = vadd.f32 %v5645_v16, %v4891_v15 }
0x146b   : > { %v4911_v50 = vsub.f32 0.0, %v4907_v33  ;;  %v4910_v20 = vsub.f32 0.0, %v4906_v54 }
0x146c   : > { %v4900_v49 = vpop.xlane.xlu1 %4899  ;;  %v4897_v2 = vpop.xlane.xlu0 %4896 }
0x146d   : > { %v4916_v63 = vmul.f32 1.442695, %v4911_v50  ;;  %v4914_v10 = vmul.f32 1.442695, %v4910_v20  ;;  %v4909_v6 = vadd.f32 %v5648_v29, %v4900_v49  ;;  %v4908_v9 = vadd.f32 %v5647_v52, %v4897_v2 }
0x146f   : > { %7929 = vpow2.f32 %v4916_v63  ;;  %v4913_v11 = vsub.f32 0.0, %v4909_v6  ;;  %v4912_v53 = vsub.f32 0.0, %v4908_v9 }
0x1470   : > { %7931 = vpow2.f32 %v4914_v10 }
0x1471   : > { %v4920_v32 = vmul.f32 1.442695, %v4913_v11  ;;  %v4918_v45 = vmul.f32 1.442695, %v4912_v53 }
0x1473   : > { %7933 = vpow2.f32 %v4920_v32 }
0x1474   : > { %7935 = vpow2.f32 %v4918_v45 }
0x1479   : > { %v7930_v37 = vpop.eup %7929 }
0x147a   : > { %v7932_v28 = vpop.eup %7931  ;;  %v4923_v51 = vadd.f32 1.0, %v7930_v37 }
0x147b   : > { %v4922_v19 = vadd.f32 1.0, %v7932_v28 }
0x147c   : > { %7937 = vrcp.f32 %v4923_v51 }
0x147d   : > { %v7934_v43 = vpop.eup %7933  ;;  %7939 = vrcp.f32 %v4922_v19 }
0x147e   : > { %v7936_v14 = vpop.eup %7935  ;;  %v4925_v61 = vadd.f32 1.0, %v7934_v43 }
0x147f   : > { %v4924_v8 = vadd.f32 1.0, %v7936_v14 }
0x1480   : > { %7941 = vrcp.f32 %v4925_v61 }
0x1481   : > { %7943 = vrcp.f32 %v4924_v8 }
0x1486   : > { %v7938_v5 = vpop.eup %7937 }
0x1487   : > { %v7940_v31 = vpop.eup %7939  ;;  %4941 = vperm.xlu1 %6760, %v7938_v5  }
0x1488   : > { %4936 = vperm.xlu0 %6759, %v7940_v31  }
0x148a   : > { %v7942_v18 = vpop.eup %7941 }
0x148b   : > { %v7944_v22 = vpop.eup %7943 }
0x148c   : > { %4951 = vperm.xlu0 %6759, %v7942_v18   ;;  %4946 = vperm.xlu1 %6760, %v7944_v22  }
0x1506   : > { %v4942_v56 = vpop.permute.xlu1 %4941 }
0x1507   : > { %v4956_v0 = vmul.f32 %v4942_v56, %v10950_v12  ;;  %v4957_v55 = vmul.f32 %v4942_v56, %v10953_v7  ;;  %v4937_v40 = vpop.permute.xlu0 %4936 }
0x1508   : > { %v4954_v41 = vmul.f32 %v4937_v40, %v10942_v59  ;;  %v4955_v36 = vmul.f32 %v4937_v40, %v10945_v39 }
0x1509   : > { %4964 = vst [vmem:[%s332_s21 + $0x10] sm:$0xff] %v4956_v0  ;;  %4965 = vst [vmem:[%s332_s21 + $0x18] sm:$0xff] %v4957_v55 }
0x150a   : > { %4962 = vst [vmem:[%s332_s21] sm:$0xff] %v4954_v41  ;;  %4963 = vst [vmem:[%s332_s21 + $0x8] sm:$0xff] %v4955_v36 }
0x150b   : > { %v4947_v30 = vpop.permute.xlu1 %4946  ;;  %v4952_v47 = vpop.permute.xlu0 %4951 }
0x150c   : > { %v4958_v27 = vmul.f32 %v4947_v30, %v10960_v3  ;;  %v4959_v58 = vmul.f32 %v4947_v30, %v10963_v44  ;;  %v4960_v42 = vmul.f32 %v4952_v47, %v10968_v38  ;;  %v4961_v12 = vmul.f32 %v4952_v47, %v10971_v34 }
0x150e   : > { %4966 = vst [vmem:[%s332_s21 + $0x20] sm:$0xff] %v4958_v27  ;;  %4967 = vst [vmem:[%s332_s21 + $0x28] sm:$0xff] %v4959_v58 }
0x150f   : > { %4968 = vst [vmem:[%s332_s21 + $0x30] sm:$0xff] %v4960_v42  ;;  %4969 = vst [vmem:[%s332_s21 + $0x38] sm:$0xff] %v4961_v12 }
0x1510 PF: > { %s19_s30 = sadd.s32 1, %s7959_s30  }
0x1511   : > { %p16_p4 = scmp.ge.s32.totalorder %s19_s30, 10  }
0x1513   :  { %18 = sbr.rel (!%p16_p4) target bundleno = 1 (0x1), region = 110 }

</bundles_post_ra>
